<compile_context>
chip_gen: v6e
topology: v6e:2x2x1
jax: 0.10.0
libtpu: 0.0.40
codegen_flags: <defaults>
</compile_context>

<pallas_src>
import functools

import jax
import jax.numpy as jnp
from jax.experimental import pallas as pl
from jax.experimental.pallas import tpu as pltpu


# ----------------------------------------------------------------------------
# Pallas kernel: tiled bf16 matmul + (1/sigma scale) + bias + activation
# ----------------------------------------------------------------------------
def _conv_matmul_kernel(x_ref, w_ref, b_ref, scale_ref, o_ref, acc_ref, *,
                        act, neg_slope):
    k = pl.program_id(2)

    @pl.when(k == 0)
    def _():
        acc_ref[...] = jnp.zeros_like(acc_ref)

    acc_ref[...] += jnp.dot(x_ref[...], w_ref[...],
                            preferred_element_type=jnp.float32)

    @pl.when(k == pl.num_programs(2) - 1)
    def _():
        # Spectral-norm scale folded into the epilogue; bias is NOT scaled
        # (matches conv(x, W/sigma) + b).
        y = acc_ref[...] * scale_ref[...] + b_ref[...]
        if act == "leaky_relu":
            y = jnp.where(y > 0, y, neg_slope * y)
        elif act == "sigmoid":
            # Numerically stable sigmoid (both exps hit the EUP; where selects).
            pos = 1.0 / (1.0 + jnp.exp(-y))
            e = jnp.exp(y)
            y = jnp.where(y >= 0, pos, e / (1.0 + e))
        o_ref[...] = y.astype(o_ref.dtype)


def _round_up(x, m):
    return ((x + m - 1) // m) * m


def _maybe_pad2d(a, rows, cols):
    r, c = a.shape
    if r == rows and c == cols:
        return a
    return jnp.pad(a, ((0, rows - r), (0, cols - c)))


def matmul_bias_act(x, w, b, scale, act):
    """y = act((x @ w) * scale + b).

    x: (M, K) bf16 patch matrix, w: (K, N) bf16 weight, b: (N,) f32,
    scale: f32 scalar (1/sigma or 1.0).  Returns (M, N) f32.
    """
    M, K = x.shape
    K2, N = w.shape
    assert K == K2

    tm = min(128, _round_up(M, 8))
    if N >= 256:
        tn = 256
    elif N >= 128:
        tn = 128
    else:
        tn = N                 # last layer N == 1: block == full dim, no padding
    if K % 128 == 0:
        tk = min(2048, K)
    else:
        tk = K                 # first layer K == 48: full-dim block, no padding

    Mp, Kp, Np = _round_up(M, tm), _round_up(K, tk), _round_up(N, tn)

    xp = _maybe_pad2d(x, Mp, Kp)
    wp = _maybe_pad2d(w, Kp, Np)
    bp = _maybe_pad2d(b.reshape(1, -1).astype(jnp.float32), 1, Np)
    scale_arr = jnp.asarray(scale, jnp.float32).reshape(1, 1)

    grid = (Mp // tm, Np // tn, Kp // tk)

    out = pl.pallas_call(
        functools.partial(_conv_matmul_kernel, act=act, neg_slope=0.2),
        out_shape=jax.ShapeDtypeStruct((Mp, Np), jnp.float32),
        grid_spec=pltpu.PrefetchScalarGridSpec(
            num_scalar_prefetch=0,
            grid=grid,
            in_specs=[
                pl.BlockSpec((tm, tk), lambda i, j, k: (i, k)),
                pl.BlockSpec((tk, tn), lambda i, j, k: (k, j)),
                pl.BlockSpec((1, tn), lambda i, j, k: (0, j)),
                pl.BlockSpec((1, 1), lambda i, j, k: (0, 0)),
            ],
            out_specs=pl.BlockSpec((tm, tn), lambda i, j, k: (i, j)),
            scratch_shapes=[pltpu.VMEM((tm, tn), jnp.float32)],
        ),
        compiler_params=pltpu.CompilerParams(
            dimension_semantics=("parallel", "parallel", "arbitrary")),
    )(xp, wp, bp, scale_arr)

    if Mp == M and Np == N:
        return out
    return out[:M, :N]


# ----------------------------------------------------------------------------
# Glue: NHWC im2col, spectral norm sigma, conv block
# ----------------------------------------------------------------------------
def im2col_nhwc(x, k, stride, pad):
    """x: NHWC -> (N*Ho*Wo, k*k*C), patch columns ordered (kh, kw, cin)."""
    N, H, W, C = x.shape
    if pad:
        x = jnp.pad(x, ((0, 0), (pad, pad), (pad, pad), (0, 0)))
    Ho = (H + 2 * pad - k) // stride + 1
    Wo = (W + 2 * pad - k) // stride + 1
    cols = []
    for di in range(k):
        for dj in range(k):
            cols.append(x[:, di:di + stride * Ho:stride,
                             dj:dj + stride * Wo:stride, :])
    p = jnp.stack(cols, axis=3)                       # (N, Ho, Wo, k*k, C)
    return p.reshape(N * Ho * Wo, k * k * C), (N, Ho, Wo)


def spectral_inv_sigma(w, u0, n_power_iterations, eps=1e-12):
    """1/sigma per torch.nn.utils.spectral_norm forward power iteration.

    NOTE: PyTorch also updates the `u` buffer in place during training; that
    stateful side effect is not replicated here (per-call numerics identical).
    """
    cout = w.shape[0]
    wm = w.reshape(cout, -1).astype(jnp.float32)      # (Cout, Cin*k*k)

    def l2n(v):
        return v / (jnp.linalg.norm(v) + eps)

    u = u0
    v = None
    for _ in range(max(1, n_power_iterations)):
        v = l2n(wm.T @ u)
        u = l2n(wm @ v)
    sigma = jnp.dot(u, wm @ v)
    return 1.0 / sigma


def conv_block_nhwc(x_nhwc, wm_bf16, b, scale, pad, act):
    """4x4 / stride-2 conv on NHWC activations via im2col + Pallas matmul."""
    patches, (n, ho, wo) = im2col_nhwc(x_nhwc, 4, 2, pad)
    y = matmul_bias_act(patches.astype(jnp.bfloat16), wm_bf16, b, scale, act)
    return y.reshape(n, ho, wo, wm_bf16.shape[1])


# ----------------------------------------------------------------------------
# Discriminator
# ----------------------------------------------------------------------------
CHANNELS = [3, 128, 256, 512, 1024, 1]


def init_params(key):
    params = []
    for i in range(5):
        key, kw, kb, ku = jax.random.split(key, 4)
        cin, cout = CHANNELS[i], CHANNELS[i + 1]
        fan_in = cin * 4 * 4
        w = jax.random.normal(kw, (cout, cin, 4, 4), jnp.float32) / jnp.sqrt(fan_in)
        b = 0.01 * jax.random.normal(kb, (cout,), jnp.float32)
        u = jax.random.normal(ku, (cout,), jnp.float32)
        u = u / (jnp.linalg.norm(u) + 1e-12)
        params.append((w, b, u))
    return params


def prepare_params(params):
    """One-time preprocessing (outside the per-forward hot path):
    reshape weights to (kh*kw*Cin, Cout) matmul layout and cast to bf16."""
    prepped = []
    for w, b, u in params:
        cout = w.shape[0]
        wm = jnp.transpose(w, (2, 3, 1, 0)).reshape(-1, cout).astype(jnp.bfloat16)
        prepped.append(dict(w=w, wm=wm, b=b, u=u))
    return prepped


def discriminator_forward(prepped, x_nchw, n_power_iterations=1):
    x = jnp.transpose(x_nchw, (0, 2, 3, 1))           # NCHW -> NHWC, once
    # Blocks 1-4: spectral-norm conv(k=4, s=2, p=1) + LeakyReLU(0.2)
    for i in range(4):
        p = prepped[i]
        inv_sigma = spectral_inv_sigma(p["w"], p["u"], n_power_iterations)
        x = conv_block_nhwc(x, p["wm"], p["b"], inv_sigma, pad=1,
                            act="leaky_relu")
    # Block 5: conv(k=4, s=2, p=0), no spectral norm, Sigmoid
    p = prepped[4]
    x = conv_block_nhwc(x, p["wm"], p["b"], jnp.float32(1.0), pad=0,
                        act="sigmoid")
    return jnp.transpose(x, (0, 3, 1, 2))             # NHWC -> NCHW, once


# ----------------------------------------------------------------------------
# Reference (pure JAX, same bf16-in / f32-accumulate precision) for checking
# ----------------------------------------------------------------------------
def _ref_conv_bf16(x, w, b, scale, pad):
    y = jax.lax.conv_general_dilated(
        x.astype(jnp.bfloat16), w.astype(jnp.bfloat16),
        window_strides=(2, 2), padding=[(pad, pad), (pad, pad)],
        dimension_numbers=("NCHW", "OIHW", "NCHW"),
        preferred_element_type=jnp.float32)
    return y * scale + b.reshape(1, -1, 1, 1)


def discriminator_forward_ref(params, x, n_power_iterations=1):
    for i in range(4):
        w, b, u = params[i]
        inv_sigma = spectral_inv_sigma(w, u, n_power_iterations)
        x = _ref_conv_bf16(x, w, b, inv_sigma, pad=1)
        x = jnp.where(x > 0, x, 0.2 * x)
    w, b, _ = params[4]
    x = _ref_conv_bf16(x, w, b, jnp.float32(1.0), pad=0)
    return jax.nn.sigmoid(x)


if __name__ == "__main__":
    key = jax.random.PRNGKey(0)
    kp, kx = jax.random.split(key)
    params = init_params(kp)
    prepped = prepare_params(params)

    # DCGAN geometry: 5 stride-2 4x4 convs (last with pad=0) -> 64x64 input is
    # the smallest spatial size consistent with the module; channels are fixed
    # by the spec ([3,128,256,512,1024,1]).  Batch kept small (2).
    x = jax.random.normal(kx, (2, 3, 64, 64), jnp.float32)

    fwd = jax.jit(discriminator_forward)
    out = jax.block_until_ready(fwd(prepped, x))
    assert out.shape == (2, 1, 1, 1), out.shape

    ref = jax.block_until_ready(discriminator_forward_ref(params, x))
    assert jnp.allclose(out, ref, atol=5e-3, rtol=5e-3), (out, ref)

    print("KERNEL_OK")
</pallas_src>

<mosaic_0001>
module attributes {stable_mosaic.version = 11 : i64} {
  func.func @_conv_matmul_kernel(%arg0: i32, %arg1: i32, %arg2: i32, %arg3: memref<128x48xbf16, #tpu.memory_space<vmem>>, %arg4: memref<48x128xbf16, #tpu.memory_space<vmem>>, %arg5: memref<1x128xf32, #tpu.memory_space<vmem>>, %arg6: memref<1x1xf32, #tpu.memory_space<vmem>>, %arg7: memref<128x128xf32, #tpu.memory_space<vmem>>, %arg8: memref<128x128xf32, #tpu.memory_space<vmem>>) attributes {dimension_semantics = [#tpu.dimension_semantics<parallel>, #tpu.dimension_semantics<parallel>, #tpu.dimension_semantics<arbitrary>], iteration_bounds = array<i64: 16, 1, 1>, scalar_prefetch = 0 : i64, scratch_operands = 1 : i64, tpu.core_type = #tpu.core_type<tc>, window_params = [{transform_indices = @transform_0, window_bounds = array<i64: 128, 48>}, {transform_indices = @transform_1, window_bounds = array<i64: 48, 128>}, {transform_indices = @transform_2, window_bounds = array<i64: 1, 128>}, {pipeline_mode = #tpu.pipeline_mode<synchronous>, transform_indices = @transform_3, window_bounds = array<i64: 1, 1>}, {transform_indices = @transform_4, window_bounds = array<i64: 128, 128>}]} {
    %c0_i32 = arith.constant 0 : i32
    %0 = arith.cmpi eq, %arg2, %c0_i32 : i32
    %1 = arith.extui %0 : i1 to i32
    %c0_i32_0 = arith.constant 0 : i32
    %2 = arith.cmpi ne, %1, %c0_i32_0 : i32
    scf.if %2 {
      %cst_10 = arith.constant 0.000000e+00 : f32
      %12 = vector.broadcast %cst_10 : f32 to vector<128x128xf32>
      %c0_11 = arith.constant 0 : index
      %c0_12 = arith.constant 0 : index
      %13 = vector.load %arg8[%c0_11, %c0_12] : memref<128x128xf32, #tpu.memory_space<vmem>>, vector<128x128xf32>
      tpu.vector_store %arg8[%c0_11, %c0_12], %12 {strides = array<i32>} : memref<128x128xf32, #tpu.memory_space<vmem>>, vector<128x128xf32>,
    } else {
    }
    %c0 = arith.constant 0 : index
    %c0_1 = arith.constant 0 : index
    %3 = vector.load %arg8[%c0, %c0_1] : memref<128x128xf32, #tpu.memory_space<vmem>>, vector<128x128xf32>
    %c0_2 = arith.constant 0 : index
    %c0_3 = arith.constant 0 : index
    %4 = vector.load %arg3[%c0_2, %c0_3] : memref<128x48xbf16, #tpu.memory_space<vmem>>, vector<128x48xbf16>
    %c0_4 = arith.constant 0 : index
    %c0_5 = arith.constant 0 : index
    %5 = vector.load %arg4[%c0_4, %c0_5] : memref<48x128xbf16, #tpu.memory_space<vmem>>, vector<48x128xbf16>
    %cst = arith.constant dense<0.000000e+00> : vector<128x128xf32>
    %6 = tpu.matmul %4, %5, %cst {dimension_numbers = #tpu.dot_dimension_numbers<[1], [0], [0], [1], [0, 0, 1, 1], [], []>} : vector<128x48xbf16>, vector<48x128xbf16>, vector<128x128xf32> -> vector<128x128xf32>
    %7 = arith.addf %3, %6 : vector<128x128xf32>
    %c0_6 = arith.constant 0 : index
    %c0_7 = arith.constant 0 : index
    %8 = vector.load %arg8[%c0_6, %c0_7] : memref<128x128xf32, #tpu.memory_space<vmem>>, vector<128x128xf32>
    tpu.vector_store %arg8[%c0_6, %c0_7], %7 {strides = array<i32>} : memref<128x128xf32, #tpu.memory_space<vmem>>, vector<128x128xf32>,
    %c0_i32_8 = arith.constant 0 : i32
    %9 = arith.cmpi eq, %arg2, %c0_i32_8 : i32
    %10 = arith.extui %9 : i1 to i32
    %c0_i32_9 = arith.constant 0 : i32
    %11 = arith.cmpi ne, %10, %c0_i32_9 : i32
    scf.if %11 {
      %c0_10 = arith.constant 0 : index
      %c0_11 = arith.constant 0 : index
      %12 = vector.load %arg8[%c0_10, %c0_11] : memref<128x128xf32, #tpu.memory_space<vmem>>, vector<128x128xf32>
      %c0_12 = arith.constant 0 : index
      %c0_13 = arith.constant 0 : index
      %13 = vector.load %arg6[%c0_12, %c0_13] : memref<1x1xf32, #tpu.memory_space<vmem>>, vector<1x1xf32>
      %14 = vector.broadcast %13 : vector<1x1xf32> to vector<128x128xf32>
      %15 = arith.mulf %12, %14 : vector<128x128xf32>
      %c0_14 = arith.constant 0 : index
      %c0_15 = arith.constant 0 : index
      %16 = vector.load %arg5[%c0_14, %c0_15] : memref<1x128xf32, #tpu.memory_space<vmem>>, vector<1x128xf32>
      %17 = vector.broadcast %16 : vector<1x128xf32> to vector<128x128xf32>
      %18 = arith.addf %15, %17 : vector<128x128xf32>
      %cst_16 = arith.constant 0.000000e+00 : f32
      %19 = vector.broadcast %cst_16 : f32 to vector<128x128xf32>
      %20 = arith.cmpf ogt, %18, %19 : vector<128x128xf32>
      %cst_17 = arith.constant 2.000000e-01 : f32
      %21 = vector.broadcast %cst_17 : f32 to vector<128x128xf32>
      %22 = arith.mulf %21, %18 : vector<128x128xf32>
      %23 = arith.select %20, %18, %22 : vector<128x128xi1>, vector<128x128xf32>
      %c0_18 = arith.constant 0 : index
      %c0_19 = arith.constant 0 : index
      %24 = vector.load %arg7[%c0_18, %c0_19] : memref<128x128xf32, #tpu.memory_space<vmem>>, vector<128x128xf32>
      tpu.vector_store %arg7[%c0_18, %c0_19], %23 {strides = array<i32>} : memref<128x128xf32, #tpu.memory_space<vmem>>, vector<128x128xf32>,
    } else {
    }
    return
  }
  func.func @transform_0(%arg0: i32, %arg1: i32, %arg2: i32) -> (i32, i32) {
    %c0_i32 = arith.constant 0 : i32
    return %arg0, %arg2 : i32, i32
  }
  func.func @transform_1(%arg0: i32, %arg1: i32, %arg2: i32) -> (i32, i32) {
    %c0_i32 = arith.constant 0 : i32
    return %arg2, %arg1 : i32, i32
  }
  func.func @transform_2(%arg0: i32, %arg1: i32, %arg2: i32) -> (i32, i32) {
    %c0_i32 = arith.constant 0 : i32
    %c0_i32_0 = arith.constant 0 : i32
    return %c0_i32, %arg1 : i32, i32
  }
  func.func @transform_3(%arg0: i32, %arg1: i32, %arg2: i32) -> (i32, i32) {
    %c0_i32 = arith.constant 0 : i32
    %c0_i32_0 = arith.constant 0 : i32
    %c0_i32_1 = arith.constant 0 : i32
    return %c0_i32, %c0_i32_0 : i32, i32
  }
  func.func @transform_4(%arg0: i32, %arg1: i32, %arg2: i32) -> (i32, i32) {
    %c0_i32 = arith.constant 0 : i32
    return %arg0, %arg1 : i32, i32
  }
}

module attributes {stable_mosaic.version = 11 : i64} {
  func.func @_conv_matmul_kernel(%arg0: i32, %arg1: i32, %arg2: i32, %arg3: memref<128x2048xbf16, #tpu.memory_space<vmem>>, %arg4: memref<2048x256xbf16, #tpu.memory_space<vmem>>, %arg5: memref<1x256xf32, #tpu.memory_space<vmem>>, %arg6: memref<1x1xf32, #tpu.memory_space<vmem>>, %arg7: memref<128x256xf32, #tpu.memory_space<vmem>>, %arg8: memref<128x256xf32, #tpu.memory_space<vmem>>) attributes {dimension_semantics = [#tpu.dimension_semantics<parallel>, #tpu.dimension_semantics<parallel>, #tpu.dimension_semantics<arbitrary>], iteration_bounds = array<i64: 4, 1, 1>, scalar_prefetch = 0 : i64, scratch_operands = 1 : i64, tpu.core_type = #tpu.core_type<tc>, window_params = [{transform_indices = @transform_0, window_bounds = array<i64: 128, 2048>}, {transform_indices = @transform_1, window_bounds = array<i64: 2048, 256>}, {transform_indices = @transform_2, window_bounds = array<i64: 1, 256>}, {pipeline_mode = #tpu.pipeline_mode<synchronous>, transform_indices = @transform_3, window_bounds = array<i64: 1, 1>}, {transform_indices = @transform_4, window_bounds = array<i64: 128, 256>}]} {
    %c0_i32 = arith.constant 0 : i32
    %0 = arith.cmpi eq, %arg2, %c0_i32 : i32
    %1 = arith.extui %0 : i1 to i32
    %c0_i32_0 = arith.constant 0 : i32
    %2 = arith.cmpi ne, %1, %c0_i32_0 : i32
    scf.if %2 {
      %cst_10 = arith.constant 0.000000e+00 : f32
      %12 = vector.broadcast %cst_10 : f32 to vector<128x256xf32>
      %c0_11 = arith.constant 0 : index
      %c0_12 = arith.constant 0 : index
      %13 = vector.load %arg8[%c0_11, %c0_12] : memref<128x256xf32, #tpu.memory_space<vmem>>, vector<128x256xf32>
      tpu.vector_store %arg8[%c0_11, %c0_12], %12 {strides = array<i32>} : memref<128x256xf32, #tpu.memory_space<vmem>>, vector<128x256xf32>,
    } else {
    }
    %c0 = arith.constant 0 : index
    %c0_1 = arith.constant 0 : index
    %3 = vector.load %arg8[%c0, %c0_1] : memref<128x256xf32, #tpu.memory_space<vmem>>, vector<128x256xf32>
    %c0_2 = arith.constant 0 : index
    %c0_3 = arith.constant 0 : index
    %4 = vector.load %arg3[%c0_2, %c0_3] : memref<128x2048xbf16, #tpu.memory_space<vmem>>, vector<128x2048xbf16>
    %c0_4 = arith.constant 0 : index
    %c0_5 = arith.constant 0 : index
    %5 = vector.load %arg4[%c0_4, %c0_5] : memref<2048x256xbf16, #tpu.memory_space<vmem>>, vector<2048x256xbf16>
    %cst = arith.constant dense<0.000000e+00> : vector<128x256xf32>
    %6 = tpu.matmul %4, %5, %cst {dimension_numbers = #tpu.dot_dimension_numbers<[1], [0], [0], [1], [0, 0, 1, 1], [], []>} : vector<128x2048xbf16>, vector<2048x256xbf16>, vector<128x256xf32> -> vector<128x256xf32>
    %7 = arith.addf %3, %6 : vector<128x256xf32>
    %c0_6 = arith.constant 0 : index
    %c0_7 = arith.constant 0 : index
    %8 = vector.load %arg8[%c0_6, %c0_7] : memref<128x256xf32, #tpu.memory_space<vmem>>, vector<128x256xf32>
    tpu.vector_store %arg8[%c0_6, %c0_7], %7 {strides = array<i32>} : memref<128x256xf32, #tpu.memory_space<vmem>>, vector<128x256xf32>,
    %c0_i32_8 = arith.constant 0 : i32
    %9 = arith.cmpi eq, %arg2, %c0_i32_8 : i32
    %10 = arith.extui %9 : i1 to i32
    %c0_i32_9 = arith.constant 0 : i32
    %11 = arith.cmpi ne, %10, %c0_i32_9 : i32
    scf.if %11 {
      %c0_10 = arith.constant 0 : index
      %c0_11 = arith.constant 0 : index
      %12 = vector.load %arg8[%c0_10, %c0_11] : memref<128x256xf32, #tpu.memory_space<vmem>>, vector<128x256xf32>
      %c0_12 = arith.constant 0 : index
      %c0_13 = arith.constant 0 : index
      %13 = vector.load %arg6[%c0_12, %c0_13] : memref<1x1xf32, #tpu.memory_space<vmem>>, vector<1x1xf32>
      %14 = vector.broadcast %13 : vector<1x1xf32> to vector<128x256xf32>
      %15 = arith.mulf %12, %14 : vector<128x256xf32>
      %c0_14 = arith.constant 0 : index
      %c0_15 = arith.constant 0 : index
      %16 = vector.load %arg5[%c0_14, %c0_15] : memref<1x256xf32, #tpu.memory_space<vmem>>, vector<1x256xf32>
      %17 = vector.broadcast %16 : vector<1x256xf32> to vector<128x256xf32>
      %18 = arith.addf %15, %17 : vector<128x256xf32>
      %cst_16 = arith.constant 0.000000e+00 : f32
      %19 = vector.broadcast %cst_16 : f32 to vector<128x256xf32>
      %20 = arith.cmpf ogt, %18, %19 : vector<128x256xf32>
      %cst_17 = arith.constant 2.000000e-01 : f32
      %21 = vector.broadcast %cst_17 : f32 to vector<128x256xf32>
      %22 = arith.mulf %21, %18 : vector<128x256xf32>
      %23 = arith.select %20, %18, %22 : vector<128x256xi1>, vector<128x256xf32>
      %c0_18 = arith.constant 0 : index
      %c0_19 = arith.constant 0 : index
      %24 = vector.load %arg7[%c0_18, %c0_19] : memref<128x256xf32, #tpu.memory_space<vmem>>, vector<128x256xf32>
      tpu.vector_store %arg7[%c0_18, %c0_19], %23 {strides = array<i32>} : memref<128x256xf32, #tpu.memory_space<vmem>>, vector<128x256xf32>,
    } else {
    }
    return
  }
  func.func @transform_0(%arg0: i32, %arg1: i32, %arg2: i32) -> (i32, i32) {
    %c0_i32 = arith.constant 0 : i32
    return %arg0, %arg2 : i32, i32
  }
  func.func @transform_1(%arg0: i32, %arg1: i32, %arg2: i32) -> (i32, i32) {
    %c0_i32 = arith.constant 0 : i32
    return %arg2, %arg1 : i32, i32
  }
  func.func @transform_2(%arg0: i32, %arg1: i32, %arg2: i32) -> (i32, i32) {
    %c0_i32 = arith.constant 0 : i32
    %c0_i32_0 = arith.constant 0 : i32
    return %c0_i32, %arg1 : i32, i32
  }
  func.func @transform_3(%arg0: i32, %arg1: i32, %arg2: i32) -> (i32, i32) {
    %c0_i32 = arith.constant 0 : i32
    %c0_i32_0 = arith.constant 0 : i32
    %c0_i32_1 = arith.constant 0 : i32
    return %c0_i32, %c0_i32_0 : i32, i32
  }
  func.func @transform_4(%arg0: i32, %arg1: i32, %arg2: i32) -> (i32, i32) {
    %c0_i32 = arith.constant 0 : i32
    return %arg0, %arg1 : i32, i32
  }
}

module attributes {stable_mosaic.version = 11 : i64} {
  func.func @_conv_matmul_kernel(%arg0: i32, %arg1: i32, %arg2: i32, %arg3: memref<128x2048xbf16, #tpu.memory_space<vmem>>, %arg4: memref<2048x256xbf16, #tpu.memory_space<vmem>>, %arg5: memref<1x256xf32, #tpu.memory_space<vmem>>, %arg6: memref<1x1xf32, #tpu.memory_space<vmem>>, %arg7: memref<128x256xf32, #tpu.memory_space<vmem>>, %arg8: memref<128x256xf32, #tpu.memory_space<vmem>>) attributes {dimension_semantics = [#tpu.dimension_semantics<parallel>, #tpu.dimension_semantics<parallel>, #tpu.dimension_semantics<arbitrary>], iteration_bounds = array<i64: 1, 2, 2>, scalar_prefetch = 0 : i64, scratch_operands = 1 : i64, tpu.core_type = #tpu.core_type<tc>, window_params = [{transform_indices = @transform_0, window_bounds = array<i64: 128, 2048>}, {transform_indices = @transform_1, window_bounds = array<i64: 2048, 256>}, {transform_indices = @transform_2, window_bounds = array<i64: 1, 256>}, {pipeline_mode = #tpu.pipeline_mode<synchronous>, transform_indices = @transform_3, window_bounds = array<i64: 1, 1>}, {transform_indices = @transform_4, window_bounds = array<i64: 128, 256>}]} {
    %c0_i32 = arith.constant 0 : i32
    %0 = arith.cmpi eq, %arg2, %c0_i32 : i32
    %1 = arith.extui %0 : i1 to i32
    %c0_i32_0 = arith.constant 0 : i32
    %2 = arith.cmpi ne, %1, %c0_i32_0 : i32
    scf.if %2 {
      %cst_9 = arith.constant 0.000000e+00 : f32
      %12 = vector.broadcast %cst_9 : f32 to vector<128x256xf32>
      %c0_10 = arith.constant 0 : index
      %c0_11 = arith.constant 0 : index
      %13 = vector.load %arg8[%c0_10, %c0_11] : memref<128x256xf32, #tpu.memory_space<vmem>>, vector<128x256xf32>
      tpu.vector_store %arg8[%c0_10, %c0_11], %12 {strides = array<i32>} : memref<128x256xf32, #tpu.memory_space<vmem>>, vector<128x256xf32>,
    } else {
    }
    %c0 = arith.constant 0 : index
    %c0_1 = arith.constant 0 : index
    %3 = vector.load %arg8[%c0, %c0_1] : memref<128x256xf32, #tpu.memory_space<vmem>>, vector<128x256xf32>
    %c0_2 = arith.constant 0 : index
    %c0_3 = arith.constant 0 : index
    %4 = vector.load %arg3[%c0_2, %c0_3] : memref<128x2048xbf16, #tpu.memory_space<vmem>>, vector<128x2048xbf16>
    %c0_4 = arith.constant 0 : index
    %c0_5 = arith.constant 0 : index
    %5 = vector.load %arg4[%c0_4, %c0_5] : memref<2048x256xbf16, #tpu.memory_space<vmem>>, vector<2048x256xbf16>
    %cst = arith.constant dense<0.000000e+00> : vector<128x256xf32>
    %6 = tpu.matmul %4, %5, %cst {dimension_numbers = #tpu.dot_dimension_numbers<[1], [0], [0], [1], [0, 0, 1, 1], [], []>} : vector<128x2048xbf16>, vector<2048x256xbf16>, vector<128x256xf32> -> vector<128x256xf32>
    %7 = arith.addf %3, %6 : vector<128x256xf32>
    %c0_6 = arith.constant 0 : index
    %c0_7 = arith.constant 0 : index
    %8 = vector.load %arg8[%c0_6, %c0_7] : memref<128x256xf32, #tpu.memory_space<vmem>>, vector<128x256xf32>
    tpu.vector_store %arg8[%c0_6, %c0_7], %7 {strides = array<i32>} : memref<128x256xf32, #tpu.memory_space<vmem>>, vector<128x256xf32>,
    %c1_i32 = arith.constant 1 : i32
    %9 = arith.cmpi eq, %arg2, %c1_i32 : i32
    %10 = arith.extui %9 : i1 to i32
    %c0_i32_8 = arith.constant 0 : i32
    %11 = arith.cmpi ne, %10, %c0_i32_8 : i32
    scf.if %11 {
      %c0_9 = arith.constant 0 : index
      %c0_10 = arith.constant 0 : index
      %12 = vector.load %arg8[%c0_9, %c0_10] : memref<128x256xf32, #tpu.memory_space<vmem>>, vector<128x256xf32>
      %c0_11 = arith.constant 0 : index
      %c0_12 = arith.constant 0 : index
      %13 = vector.load %arg6[%c0_11, %c0_12] : memref<1x1xf32, #tpu.memory_space<vmem>>, vector<1x1xf32>
      %14 = vector.broadcast %13 : vector<1x1xf32> to vector<128x256xf32>
      %15 = arith.mulf %12, %14 : vector<128x256xf32>
      %c0_13 = arith.constant 0 : index
      %c0_14 = arith.constant 0 : index
      %16 = vector.load %arg5[%c0_13, %c0_14] : memref<1x256xf32, #tpu.memory_space<vmem>>, vector<1x256xf32>
      %17 = vector.broadcast %16 : vector<1x256xf32> to vector<128x256xf32>
      %18 = arith.addf %15, %17 : vector<128x256xf32>
      %cst_15 = arith.constant 0.000000e+00 : f32
      %19 = vector.broadcast %cst_15 : f32 to vector<128x256xf32>
      %20 = arith.cmpf ogt, %18, %19 : vector<128x256xf32>
      %cst_16 = arith.constant 2.000000e-01 : f32
      %21 = vector.broadcast %cst_16 : f32 to vector<128x256xf32>
      %22 = arith.mulf %21, %18 : vector<128x256xf32>
      %23 = arith.select %20, %18, %22 : vector<128x256xi1>, vector<128x256xf32>
      %c0_17 = arith.constant 0 : index
      %c0_18 = arith.constant 0 : index
      %24 = vector.load %arg7[%c0_17, %c0_18] : memref<128x256xf32, #tpu.memory_space<vmem>>, vector<128x256xf32>
      tpu.vector_store %arg7[%c0_17, %c0_18], %23 {strides = array<i32>} : memref<128x256xf32, #tpu.memory_space<vmem>>, vector<128x256xf32>,
    } else {
    }
    return
  }
  func.func @transform_0(%arg0: i32, %arg1: i32, %arg2: i32) -> (i32, i32) {
    %c0_i32 = arith.constant 0 : i32
    return %arg0, %arg2 : i32, i32
  }
  func.func @transform_1(%arg0: i32, %arg1: i32, %arg2: i32) -> (i32, i32) {
    %c0_i32 = arith.constant 0 : i32
    return %arg2, %arg1 : i32, i32
  }
  func.func @transform_2(%arg0: i32, %arg1: i32, %arg2: i32) -> (i32, i32) {
    %c0_i32 = arith.constant 0 : i32
    %c0_i32_0 = arith.constant 0 : i32
    return %c0_i32, %arg1 : i32, i32
  }
  func.func @transform_3(%arg0: i32, %arg1: i32, %arg2: i32) -> (i32, i32) {
    %c0_i32 = arith.constant 0 : i32
    %c0_i32_0 = arith.constant 0 : i32
    %c0_i32_1 = arith.constant 0 : i32
    return %c0_i32, %c0_i32_0 : i32, i32
  }
  func.func @transform_4(%arg0: i32, %arg1: i32, %arg2: i32) -> (i32, i32) {
    %c0_i32 = arith.constant 0 : i32
    return %arg0, %arg1 : i32, i32
  }
}

module attributes {stable_mosaic.version = 11 : i64} {
  func.func @_conv_matmul_kernel(%arg0: i32, %arg1: i32, %arg2: i32, %arg3: memref<32x2048xbf16, #tpu.memory_space<vmem>>, %arg4: memref<2048x256xbf16, #tpu.memory_space<vmem>>, %arg5: memref<1x256xf32, #tpu.memory_space<vmem>>, %arg6: memref<1x1xf32, #tpu.memory_space<vmem>>, %arg7: memref<32x256xf32, #tpu.memory_space<vmem>>, %arg8: memref<32x256xf32, #tpu.memory_space<vmem>>) attributes {dimension_semantics = [#tpu.dimension_semantics<parallel>, #tpu.dimension_semantics<parallel>, #tpu.dimension_semantics<arbitrary>], iteration_bounds = array<i64: 1, 4, 4>, scalar_prefetch = 0 : i64, scratch_operands = 1 : i64, tpu.core_type = #tpu.core_type<tc>, window_params = [{transform_indices = @transform_0, window_bounds = array<i64: 32, 2048>}, {transform_indices = @transform_1, window_bounds = array<i64: 2048, 256>}, {transform_indices = @transform_2, window_bounds = array<i64: 1, 256>}, {pipeline_mode = #tpu.pipeline_mode<synchronous>, transform_indices = @transform_3, window_bounds = array<i64: 1, 1>}, {transform_indices = @transform_4, window_bounds = array<i64: 32, 256>}]} {
    %c0_i32 = arith.constant 0 : i32
    %0 = arith.cmpi eq, %arg2, %c0_i32 : i32
    %1 = arith.extui %0 : i1 to i32
    %c0_i32_0 = arith.constant 0 : i32
    %2 = arith.cmpi ne, %1, %c0_i32_0 : i32
    scf.if %2 {
      %cst_9 = arith.constant 0.000000e+00 : f32
      %12 = vector.broadcast %cst_9 : f32 to vector<32x256xf32>
      %c0_10 = arith.constant 0 : index
      %c0_11 = arith.constant 0 : index
      %13 = vector.load %arg8[%c0_10, %c0_11] : memref<32x256xf32, #tpu.memory_space<vmem>>, vector<32x256xf32>
      tpu.vector_store %arg8[%c0_10, %c0_11], %12 {strides = array<i32>} : memref<32x256xf32, #tpu.memory_space<vmem>>, vector<32x256xf32>,
    } else {
    }
    %c0 = arith.constant 0 : index
    %c0_1 = arith.constant 0 : index
    %3 = vector.load %arg8[%c0, %c0_1] : memref<32x256xf32, #tpu.memory_space<vmem>>, vector<32x256xf32>
    %c0_2 = arith.constant 0 : index
    %c0_3 = arith.constant 0 : index
    %4 = vector.load %arg3[%c0_2, %c0_3] : memref<32x2048xbf16, #tpu.memory_space<vmem>>, vector<32x2048xbf16>
    %c0_4 = arith.constant 0 : index
    %c0_5 = arith.constant 0 : index
    %5 = vector.load %arg4[%c0_4, %c0_5] : memref<2048x256xbf16, #tpu.memory_space<vmem>>, vector<2048x256xbf16>
    %cst = arith.constant dense<0.000000e+00> : vector<32x256xf32>
    %6 = tpu.matmul %4, %5, %cst {dimension_numbers = #tpu.dot_dimension_numbers<[1], [0], [0], [1], [0, 0, 1, 1], [], []>} : vector<32x2048xbf16>, vector<2048x256xbf16>, vector<32x256xf32> -> vector<32x256xf32>
    %7 = arith.addf %3, %6 : vector<32x256xf32>
    %c0_6 = arith.constant 0 : index
    %c0_7 = arith.constant 0 : index
    %8 = vector.load %arg8[%c0_6, %c0_7] : memref<32x256xf32, #tpu.memory_space<vmem>>, vector<32x256xf32>
    tpu.vector_store %arg8[%c0_6, %c0_7], %7 {strides = array<i32>} : memref<32x256xf32, #tpu.memory_space<vmem>>, vector<32x256xf32>,
    %c3_i32 = arith.constant 3 : i32
    %9 = arith.cmpi eq, %arg2, %c3_i32 : i32
    %10 = arith.extui %9 : i1 to i32
    %c0_i32_8 = arith.constant 0 : i32
    %11 = arith.cmpi ne, %10, %c0_i32_8 : i32
    scf.if %11 {
      %c0_9 = arith.constant 0 : index
      %c0_10 = arith.constant 0 : index
      %12 = vector.load %arg8[%c0_9, %c0_10] : memref<32x256xf32, #tpu.memory_space<vmem>>, vector<32x256xf32>
      %c0_11 = arith.constant 0 : index
      %c0_12 = arith.constant 0 : index
      %13 = vector.load %arg6[%c0_11, %c0_12] : memref<1x1xf32, #tpu.memory_space<vmem>>, vector<1x1xf32>
      %14 = vector.broadcast %13 : vector<1x1xf32> to vector<32x256xf32>
      %15 = arith.mulf %12, %14 : vector<32x256xf32>
      %c0_13 = arith.constant 0 : index
      %c0_14 = arith.constant 0 : index
      %16 = vector.load %arg5[%c0_13, %c0_14] : memref<1x256xf32, #tpu.memory_space<vmem>>, vector<1x256xf32>
      %17 = vector.broadcast %16 : vector<1x256xf32> to vector<32x256xf32>
      %18 = arith.addf %15, %17 : vector<32x256xf32>
      %cst_15 = arith.constant 0.000000e+00 : f32
      %19 = vector.broadcast %cst_15 : f32 to vector<32x256xf32>
      %20 = arith.cmpf ogt, %18, %19 : vector<32x256xf32>
      %cst_16 = arith.constant 2.000000e-01 : f32
      %21 = vector.broadcast %cst_16 : f32 to vector<32x256xf32>
      %22 = arith.mulf %21, %18 : vector<32x256xf32>
      %23 = arith.select %20, %18, %22 : vector<32x256xi1>, vector<32x256xf32>
      %c0_17 = arith.constant 0 : index
      %c0_18 = arith.constant 0 : index
      %24 = vector.load %arg7[%c0_17, %c0_18] : memref<32x256xf32, #tpu.memory_space<vmem>>, vector<32x256xf32>
      tpu.vector_store %arg7[%c0_17, %c0_18], %23 {strides = array<i32>} : memref<32x256xf32, #tpu.memory_space<vmem>>, vector<32x256xf32>,
    } else {
    }
    return
  }
  func.func @transform_0(%arg0: i32, %arg1: i32, %arg2: i32) -> (i32, i32) {
    %c0_i32 = arith.constant 0 : i32
    return %arg0, %arg2 : i32, i32
  }
  func.func @transform_1(%arg0: i32, %arg1: i32, %arg2: i32) -> (i32, i32) {
    %c0_i32 = arith.constant 0 : i32
    return %arg2, %arg1 : i32, i32
  }
  func.func @transform_2(%arg0: i32, %arg1: i32, %arg2: i32) -> (i32, i32) {
    %c0_i32 = arith.constant 0 : i32
    %c0_i32_0 = arith.constant 0 : i32
    return %c0_i32, %arg1 : i32, i32
  }
  func.func @transform_3(%arg0: i32, %arg1: i32, %arg2: i32) -> (i32, i32) {
    %c0_i32 = arith.constant 0 : i32
    %c0_i32_0 = arith.constant 0 : i32
    %c0_i32_1 = arith.constant 0 : i32
    return %c0_i32, %c0_i32_0 : i32, i32
  }
  func.func @transform_4(%arg0: i32, %arg1: i32, %arg2: i32) -> (i32, i32) {
    %c0_i32 = arith.constant 0 : i32
    return %arg0, %arg1 : i32, i32
  }
}

module attributes {stable_mosaic.version = 11 : i64} {
  func.func @_conv_matmul_kernel(%arg0: i32, %arg1: i32, %arg2: i32, %arg3: memref<8x2048xbf16, #tpu.memory_space<vmem>>, %arg4: memref<2048x1xbf16, #tpu.memory_space<vmem>>, %arg5: memref<1x1xf32, #tpu.memory_space<vmem>>, %arg6: memref<1x1xf32, #tpu.memory_space<vmem>>, %arg7: memref<8x1xf32, #tpu.memory_space<vmem>>, %arg8: memref<8x1xf32, #tpu.memory_space<vmem>>) attributes {dimension_semantics = [#tpu.dimension_semantics<parallel>, #tpu.dimension_semantics<parallel>, #tpu.dimension_semantics<arbitrary>], iteration_bounds = array<i64: 1, 1, 8>, scalar_prefetch = 0 : i64, scratch_operands = 1 : i64, tpu.core_type = #tpu.core_type<tc>, window_params = [{transform_indices = @transform_0, window_bounds = array<i64: 8, 2048>}, {transform_indices = @transform_1, window_bounds = array<i64: 2048, 1>}, {transform_indices = @transform_2, window_bounds = array<i64: 1, 1>}, {pipeline_mode = #tpu.pipeline_mode<synchronous>, transform_indices = @transform_3, window_bounds = array<i64: 1, 1>}, {transform_indices = @transform_4, window_bounds = array<i64: 8, 1>}]} {
    %c0_i32 = arith.constant 0 : i32
    %0 = arith.cmpi eq, %arg2, %c0_i32 : i32
    %1 = arith.extui %0 : i1 to i32
    %c0_i32_0 = arith.constant 0 : i32
    %2 = arith.cmpi ne, %1, %c0_i32_0 : i32
    scf.if %2 {
      %cst_9 = arith.constant 0.000000e+00 : f32
      %12 = vector.broadcast %cst_9 : f32 to vector<8x1xf32>
      %c0_10 = arith.constant 0 : index
      %c0_11 = arith.constant 0 : index
      %13 = vector.load %arg8[%c0_10, %c0_11] : memref<8x1xf32, #tpu.memory_space<vmem>>, vector<8x1xf32>
      tpu.vector_store %arg8[%c0_10, %c0_11], %12 {strides = array<i32>} : memref<8x1xf32, #tpu.memory_space<vmem>>, vector<8x1xf32>,
    } else {
    }
    %c0 = arith.constant 0 : index
    %c0_1 = arith.constant 0 : index
    %3 = vector.load %arg8[%c0, %c0_1] : memref<8x1xf32, #tpu.memory_space<vmem>>, vector<8x1xf32>
    %c0_2 = arith.constant 0 : index
    %c0_3 = arith.constant 0 : index
    %4 = vector.load %arg3[%c0_2, %c0_3] : memref<8x2048xbf16, #tpu.memory_space<vmem>>, vector<8x2048xbf16>
    %c0_4 = arith.constant 0 : index
    %c0_5 = arith.constant 0 : index
    %5 = vector.load %arg4[%c0_4, %c0_5] : memref<2048x1xbf16, #tpu.memory_space<vmem>>, vector<2048x1xbf16>
    %cst = arith.constant dense<0.000000e+00> : vector<8x1xf32>
    %6 = tpu.matmul %4, %5, %cst {dimension_numbers = #tpu.dot_dimension_numbers<[1], [0], [0], [1], [0, 0, 1, 1], [], []>} : vector<8x2048xbf16>, vector<2048x1xbf16>, vector<8x1xf32> -> vector<8x1xf32>
    %7 = arith.addf %3, %6 : vector<8x1xf32>
    %c0_6 = arith.constant 0 : index
    %c0_7 = arith.constant 0 : index
    %8 = vector.load %arg8[%c0_6, %c0_7] : memref<8x1xf32, #tpu.memory_space<vmem>>, vector<8x1xf32>
    tpu.vector_store %arg8[%c0_6, %c0_7], %7 {strides = array<i32>} : memref<8x1xf32, #tpu.memory_space<vmem>>, vector<8x1xf32>,
    %c7_i32 = arith.constant 7 : i32
    %9 = arith.cmpi eq, %arg2, %c7_i32 : i32
    %10 = arith.extui %9 : i1 to i32
    %c0_i32_8 = arith.constant 0 : i32
    %11 = arith.cmpi ne, %10, %c0_i32_8 : i32
    scf.if %11 {
      %c0_9 = arith.constant 0 : index
      %c0_10 = arith.constant 0 : index
      %12 = vector.load %arg8[%c0_9, %c0_10] : memref<8x1xf32, #tpu.memory_space<vmem>>, vector<8x1xf32>
      %c0_11 = arith.constant 0 : index
      %c0_12 = arith.constant 0 : index
      %13 = vector.load %arg6[%c0_11, %c0_12] : memref<1x1xf32, #tpu.memory_space<vmem>>, vector<1x1xf32>
      %14 = vector.broadcast %13 : vector<1x1xf32> to vector<8x1xf32>
      %15 = arith.mulf %12, %14 : vector<8x1xf32>
      %c0_13 = arith.constant 0 : index
      %c0_14 = arith.constant 0 : index
      %16 = vector.load %arg5[%c0_13, %c0_14] : memref<1x1xf32, #tpu.memory_space<vmem>>, vector<1x1xf32>
      %17 = vector.broadcast %16 : vector<1x1xf32> to vector<8x1xf32>
      %18 = arith.addf %15, %17 : vector<8x1xf32>
      %cst_15 = arith.constant 0.000000e+00 : f32
      %19 = vector.broadcast %cst_15 : f32 to vector<8x1xf32>
      %20 = arith.subf %19, %18 : vector<8x1xf32>
      %21 = math.exp %20 : vector<8x1xf32>
      %cst_16 = arith.constant 1.000000e+00 : f32
      %22 = vector.broadcast %cst_16 : f32 to vector<8x1xf32>
      %23 = arith.addf %22, %21 : vector<8x1xf32>
      %cst_17 = arith.constant 1.000000e+00 : f32
      %24 = vector.broadcast %cst_17 : f32 to vector<8x1xf32>
      %25 = arith.divf %24, %23 : vector<8x1xf32>
      %26 = math.exp %18 : vector<8x1xf32>
      %cst_18 = arith.constant 0.000000e+00 : f32
      %27 = vector.broadcast %cst_18 : f32 to vector<8x1xf32>
      %28 = arith.cmpf oge, %18, %27 : vector<8x1xf32>
      %cst_19 = arith.constant 1.000000e+00 : f32
      %29 = vector.broadcast %cst_19 : f32 to vector<8x1xf32>
      %30 = arith.addf %29, %26 : vector<8x1xf32>
      %31 = arith.divf %26, %30 : vector<8x1xf32>
      %32 = arith.select %28, %25, %31 : vector<8x1xi1>, vector<8x1xf32>
      %c0_20 = arith.constant 0 : index
      %c0_21 = arith.constant 0 : index
      %33 = vector.load %arg7[%c0_20, %c0_21] : memref<8x1xf32, #tpu.memory_space<vmem>>, vector<8x1xf32>
      tpu.vector_store %arg7[%c0_20, %c0_21], %32 {strides = array<i32>} : memref<8x1xf32, #tpu.memory_space<vmem>>, vector<8x1xf32>,
    } else {
    }
    return
  }
  func.func @transform_0(%arg0: i32, %arg1: i32, %arg2: i32) -> (i32, i32) {
    %c0_i32 = arith.constant 0 : i32
    return %arg0, %arg2 : i32, i32
  }
  func.func @transform_1(%arg0: i32, %arg1: i32, %arg2: i32) -> (i32, i32) {
    %c0_i32 = arith.constant 0 : i32
    return %arg2, %arg1 : i32, i32
  }
  func.func @transform_2(%arg0: i32, %arg1: i32, %arg2: i32) -> (i32, i32) {
    %c0_i32 = arith.constant 0 : i32
    %c0_i32_0 = arith.constant 0 : i32
    return %c0_i32, %arg1 : i32, i32
  }
  func.func @transform_3(%arg0: i32, %arg1: i32, %arg2: i32) -> (i32, i32) {
    %c0_i32 = arith.constant 0 : i32
    %c0_i32_0 = arith.constant 0 : i32
    %c0_i32_1 = arith.constant 0 : i32
    return %c0_i32, %c0_i32_0 : i32, i32
  }
  func.func @transform_4(%arg0: i32, %arg1: i32, %arg2: i32) -> (i32, i32) {
    %c0_i32 = arith.constant 0 : i32
    return %arg0, %arg1 : i32, i32
  }
}

</mosaic_0001>

<bundles_post_ra>
// kernel: discriminator_forward.5
= control target key start
LH: loop header
LB: loop body
LE: loop exit
PB: predicated region body
PF: predicated region fallthrough
CT: control target
= control target key end

     0   :  { %s965_s17 = smov 0   ;;  %s967_s18 = smov 0   ;;  %s1076_s0 = inlined_call_operand.vmem [shape: bf16[2048,48], index: 0, kind: input, shape index: {}]   ;;  %s1077_s1 = inlined_call_operand.vmem [shape: bf16[48,128], index: 1, kind: input, shape index: {}]   ;;  %s1078_s2 = inlined_call_operand.vmem [shape: f32[1,128], index: 2, kind: input, shape index: {}]   ;;  %s1079_s3 = inlined_call_operand.<no memory space> [shape: f32[1,1], index: 3, kind: input, shape index: {}]   ;;  %s1080_s4 = inlined_call_operand.vmem [shape: f32[2048,128], index: 4, kind: output, shape index: {}]  }
   0x1   :  { %v9_v0 = vstv %s1079_s3  ;;  %s969_s19 = smov 0  }
   0x2   :  { %10 = vst [vmem:[#allocation3] sm:$0x1] %v9_v0 }
   0x3 LB: > { %s35_s3 = sadd.s32 1, %s930_s18  ;;  %p808_p0 = scmp.ge.s32.totalorder %s934_s19, 1  ;;  %s934_s19 = sphi %s969_s19, %s16_s19   ;;  %s930_s18 = sphi %s967_s18, %s1082_s18   ;;  %s926_s17 = sphi %s965_s17, %s1081_s17  }
   0x4   : > { %p37_p1 = scmp.ge.s32.totalorder %s35_s3, 16  ;;  %p215_p2 = scmp.lt.s32.totalorder %s934_s19, 17 }
   0x6   : > { %s1084_s3 = smov (%p37_p1, %s35_s3), 0  ;;  %p216_p3 = pnand %p808_p0, %p215_p2 }
   0x7   : > { %s809_s22 = sshll.u32 (!%p216_p3), %s926_s17, 4 }
   0x8   : > { %219 = sbr.rel (%p216_p3) target bundleno = 244 (0xf4), region = 36  ;;  %p259_p4 = scmp.lt.s32.totalorder (!%p216_p3), %s809_s22, 255 }
   0xd   : > { %v901_v1 = vld [vmem:[%s1077_s1 + $0x10] sm:$0xff]   ;;  %v902_v2 = vld [vmem:[%s1077_s1 + $0x8] sm:$0xff]   ;;  %s1086_s22 = smov (!%p259_p4, %s809_s22), 255  ;;  %v832_v3 = vld [vmem:[#allocation3] ss:$0 sm:$0xff]  ;;  %v936_v5 = vmov 0  }
   0xe   : > { %847 = vmatprep.subr.bf16.mxu0 %v901_v1  ;;  %869 = vmatprep.subr.bf16.mxu1 %v901_v1  ;;  %v903_v4 = vld [vmem:[%s1077_s1] sm:$0xff]   ;;  %s810_s27 = sshll.u32 %s1086_s22, 2  ;;  %vm405_vm0 = vcmask 392192   ;;  %s812_s7 = sshll.u32 %s1086_s22, 3 }
   0xf   : > { %848 = vmatpush3.bf16.msra.mxu0 %v901_v1  ;;  %872 = vmatpush3.bf16.msra.mxu1 %v901_v1  ;;  %s265_s30 = scalar_lea.vmem %s1076_s0, %s810_s27  ;;  %v1011_v16 = vld [vmem:[%s1078_s2] ss:$0 sm:$0xff]  ;;  %s1023_s10 = scalar_lea.vmem %s1080_s4, %s812_s7 }
  0x10   : > { %849 = vmatprep.subr.bf16.mxu0 %v902_v2  ;;  %870 = vmatprep.subr.bf16.mxu1 %v902_v2  ;;  %v904_v6 = vld [vmem:[%s265_s30] sm:$0xff]   ;;  %v906_v8 = vld [vmem:[%s265_s30 + $0x8] sm:$0xff]   ;;  %v908_v10 = vld [vmem:[%s265_s30 + $0x10] sm:$0xff]  }
  0x11   : > { %900 = vset.pattern.permute.xlu0 %v936_v5  ;;  %v905_v7 = vld [vmem:[%s265_s30 + $0x20] sm:$0xff]   ;;  %853 = vmatprep.mubr.msk.bf16.mxu0 %vm405_vm0, %v904_v6  ;;  %v907_v9 = vld [vmem:[%s265_s30 + $0x28] sm:$0xff]   ;;  %v909_v11 = vld [vmem:[%s265_s30 + $0x30] sm:$0xff]  }
  0x12   : > { %585 = vperm.xlu0 %900, %v832_v3   ;;  %861 = vmatprep.mubr.msk.bf16.mxu1 %vm405_vm0, %v905_v7  ;;  %v910_v12 = vld [vmem:[%s265_s30 + $0x18] sm:$0xff]  }
  0x13   : > { %850 = vmatpush3.bf16.msra.mxu0 %v902_v2  ;;  %873 = vmatpush3.bf16.msra.mxu1 %v902_v2  ;;  %v911_v13 = vld [vmem:[%s265_s30 + $0x38] sm:$0xff]  }
  0x14   : > { %851 = vmatprep.subr.bf16.mxu0 %v903_v4  ;;  %871 = vmatprep.subr.bf16.mxu1 %v903_v4 }
  0x17   : > { %852 = vmatpush3.bf16.msra.mxu0 %v903_v4  ;;  %874 = vmatpush3.bf16.msra.mxu1 %v903_v4 }
  0x1a   : > { %854 = vmatmul.mubr.msk.bf16.vlgmr.msra.gmra.mxu0 %vm405_vm0, %v906_v8  ;;  %862 = vmatmul.mubr.msk.bf16.vlgmr.msra.gmra.mxu1 %vm405_vm0, %v907_v9 }
  0x1b   : > { %857 = vmatprep.mubr.msk.bf16.mxu0 %vm405_vm0, %v908_v10  ;;  %865 = vmatprep.mubr.msk.bf16.mxu1 %vm405_vm0, %v909_v11 }
  0x22   : > { %858 = vmatmul.mubr.msk.bf16.gmra.mxu0 %vm405_vm0, %v910_v12  ;;  %866 = vmatmul.mubr.msk.bf16.gmra.mxu1 %vm405_vm0, %v911_v13 }
  0x8d   : > { %v1006_v14 = vpop.permute.xlu0 %585 }
  0xda   : > { %v855_v15 = vpop.f32.mrf.mxu0  ;;  %v863_v17 = vpop.f32.mrf.mxu1 }
  0xdb   : > { %v590_v18 = vmul.f32 %v855_v15, %v1006_v14  ;;  %v598_v19 = vmul.f32 %v863_v17, %v1006_v14 }
  0xdc   : > { %v464_v20 = vpop.f32.mrf.mxu0  ;;  %v496_v21 = vpop.f32.mrf.mxu1 }
  0xdd   : > { %v613_v22 = vadd.f32 %v1011_v16, %v590_v18  ;;  %v621_v23 = vadd.f32 %v1011_v16, %v598_v19  ;;  %v588_v24 = vmul.f32 %v1006_v14, %v464_v20  ;;  %v596_v25 = vmul.f32 %v1006_v14, %v496_v21 }
  0xde   : > { %v856_v26 = vpop.f32.mrf.mxu0  ;;  %v864_v27 = vpop.f32.mrf.mxu1 }
  0xdf   : > { %vm629_vm1 = vcmp.gt.f32.partialorder %v613_v22, 0.0  ;;  %v645_v28 = vmul.f32 0.2, %v613_v22  ;;  %vm637_vm2 = vcmp.gt.f32.partialorder %v621_v23, 0.0  ;;  %v653_v29 = vmul.f32 0.2, %v621_v23 }
  0xe0   : > { %v611_v30 = vadd.f32 %v1011_v16, %v588_v24  ;;  %v619_v31 = vadd.f32 %v1011_v16, %v596_v25  ;;  %v591_v32 = vmul.f32 %v856_v26, %v1006_v14  ;;  %v599_v33 = vmul.f32 %v864_v27, %v1006_v14  ;;  %v467_v34 = vpop.f32.mrf.mxu0  ;;  %v499_v35 = vpop.f32.mrf.mxu1 }
  0xe1   : > { %v661_v36 = vsel %vm629_vm1, %v613_v22, %v645_v28  ;;  %v669_v37 = vsel %vm637_vm2, %v621_v23, %v653_v29  ;;  %v589_v38 = vmul.f32 %v1006_v14, %v467_v34  ;;  %v597_v39 = vmul.f32 %v1006_v14, %v499_v35 }
  0xe2   : > { %677 = vst [vmem:[%s1023_s10 + $0x10] sm:$0xff] %v661_v36  ;;  %685 = vst [vmem:[%s1023_s10 + $0x50] sm:$0xff] %v669_v37  ;;  %vm627_vm3 = vcmp.gt.f32.partialorder %v611_v30, 0.0  ;;  %v643_v40 = vmul.f32 0.2, %v611_v30  ;;  %vm635_vm4 = vcmp.gt.f32.partialorder %v619_v31, 0.0  ;;  %v859_v42 = vpop.f32.mrf.mxu0  ;;  %v867_v43 = vpop.f32.mrf.mxu1  ;;  %v614_v44 = vadd.f32 %v1011_v16, %v591_v32 }
  0xe3   : > { %v651_v41 = vmul.f32 0.2, %v619_v31  ;;  %v622_v45 = vadd.f32 %v1011_v16, %v599_v33  ;;  %v612_v46 = vadd.f32 %v1011_v16, %v589_v38  ;;  %v620_v47 = vadd.f32 %v1011_v16, %v597_v39 }
  0xe4   : > { %v659_v48 = vsel %vm627_vm3, %v611_v30, %v643_v40  ;;  %v594_v50 = vmul.f32 %v859_v42, %v1006_v14  ;;  %v602_v51 = vmul.f32 %v867_v43, %v1006_v14  ;;  %v480_v52 = vpop.f32.mrf.mxu0  ;;  %v512_v53 = vpop.f32.mrf.mxu1  ;;  %vm630_vm5 = vcmp.gt.f32.partialorder %v614_v44, 0.0 }
  0xe5   : > { %v667_v49 = vsel %vm635_vm4, %v619_v31, %v651_v41  ;;  %675 = vst [vmem:[%s1023_s10] sm:$0xff] %v659_v48  ;;  %v646_v54 = vmul.f32 0.2, %v614_v44  ;;  %vm638_vm6 = vcmp.gt.f32.partialorder %v622_v45, 0.0  ;;  %v654_v55 = vmul.f32 0.2, %v622_v45 }
  0xe6   : > { %683 = vst [vmem:[%s1023_s10 + $0x40] sm:$0xff] %v667_v49  ;;  %vm628_vm7 = vcmp.gt.f32.partialorder %v612_v46, 0.0  ;;  %v644_v56 = vmul.f32 0.2, %v612_v46  ;;  %vm636_vm8 = vcmp.gt.f32.partialorder %v620_v47, 0.0  ;;  %v860_v58 = vpop.f32.mrf.mxu0  ;;  %v868_v59 = vpop.f32.mrf.mxu1  ;;  %v617_v62 = vadd.f32 %v1011_v16, %v594_v50 }
  0xe7   : > { %v652_v57 = vmul.f32 0.2, %v620_v47  ;;  %v662_v60 = vsel %vm630_vm5, %v614_v44, %v646_v54  ;;  %v670_v61 = vsel %vm638_vm6, %v622_v45, %v654_v55  ;;  %v625_v63 = vadd.f32 %v1011_v16, %v602_v51 }
  0xe8   : > { %678 = vst [vmem:[%s1023_s10 + $0x18] sm:$0xff] %v662_v60  ;;  %686 = vst [vmem:[%s1023_s10 + $0x58] sm:$0xff] %v670_v61  ;;  %v660_v0 = vsel %vm628_vm7, %v612_v46, %v644_v56  ;;  %v592_v2 = vmul.f32 %v1006_v14, %v480_v52  ;;  %v600_v3 = vmul.f32 %v1006_v14, %v512_v53  ;;  %v483_v4 = vpop.f32.mrf.mxu0  ;;  %v515_v5 = vpop.f32.mrf.mxu1  ;;  %vm633_vm9 = vcmp.gt.f32.partialorder %v617_v62, 0.0 }
  0xe9   : > { %v668_v1 = vsel %vm636_vm8, %v620_v47, %v652_v57  ;;  %676 = vst [vmem:[%s1023_s10 + $0x8] sm:$0xff] %v660_v0  ;;  %v649_v6 = vmul.f32 0.2, %v617_v62  ;;  %vm641_vm10 = vcmp.gt.f32.partialorder %v625_v63, 0.0  ;;  %v657_v7 = vmul.f32 0.2, %v625_v63 }
  0xea   : > { %684 = vst [vmem:[%s1023_s10 + $0x48] sm:$0xff] %v668_v1  ;;  %v615_v8 = vadd.f32 %v1011_v16, %v592_v2  ;;  %v623_v9 = vadd.f32 %v1011_v16, %v600_v3  ;;  %v595_v10 = vmul.f32 %v860_v58, %v1006_v14  ;;  %v603_v11 = vmul.f32 %v868_v59, %v1006_v14 }
  0xeb   : > { %v665_v12 = vsel %vm633_vm9, %v617_v62, %v649_v6  ;;  %v673_v13 = vsel %vm641_vm10, %v625_v63, %v657_v7  ;;  %v593_v15 = vmul.f32 %v1006_v14, %v483_v4  ;;  %v601_v17 = vmul.f32 %v1006_v14, %v515_v5 }
  0xec   : > { %681 = vst [vmem:[%s1023_s10 + $0x30] sm:$0xff] %v665_v12  ;;  %689 = vst [vmem:[%s1023_s10 + $0x70] sm:$0xff] %v673_v13  ;;  %vm631_vm11 = vcmp.gt.f32.partialorder %v615_v8, 0.0  ;;  %v647_v18 = vmul.f32 0.2, %v615_v8  ;;  %vm639_vm12 = vcmp.gt.f32.partialorder %v623_v9, 0.0  ;;  %v618_v20 = vadd.f32 %v1011_v16, %v595_v10 }
  0xed   : > { %v655_v19 = vmul.f32 0.2, %v623_v9  ;;  %v626_v21 = vadd.f32 %v1011_v16, %v603_v11  ;;  %v616_v22 = vadd.f32 %v1011_v16, %v593_v15  ;;  %v624_v23 = vadd.f32 %v1011_v16, %v601_v17 }
  0xee   : > { %v663_v24 = vsel %vm631_vm11, %v615_v8, %v647_v18  ;;  %vm634_vm13 = vcmp.gt.f32.partialorder %v618_v20, 0.0  ;;  %v650_v14 = vmul.f32 0.2, %v618_v20 }
  0xef   : > { %v671_v25 = vsel %vm639_vm12, %v623_v9, %v655_v19  ;;  %679 = vst [vmem:[%s1023_s10 + $0x20] sm:$0xff] %v663_v24  ;;  %vm642_vm14 = vcmp.gt.f32.partialorder %v626_v21, 0.0  ;;  %v658_v26 = vmul.f32 0.2, %v626_v21  ;;  %vm632_vm15 = vcmp.gt.f32.partialorder %v616_v22, 0.0 }
  0xf0   : > { %687 = vst [vmem:[%s1023_s10 + $0x60] sm:$0xff] %v671_v25  ;;  %v648_v27 = vmul.f32 0.2, %v616_v22  ;;  %vm640_vm0 = vcmp.gt.f32.partialorder %v624_v23, 0.0  ;;  %v656_v28 = vmul.f32 0.2, %v624_v23  ;;  %v666_v29 = vsel %vm634_vm13, %v618_v20, %v650_v14 }
  0xf1   : > { %v674_v30 = vsel %vm642_vm14, %v626_v21, %v658_v26  ;;  %682 = vst [vmem:[%s1023_s10 + $0x38] sm:$0xff] %v666_v29 }
  0xf2   : > { %690 = vst [vmem:[%s1023_s10 + $0x78] sm:$0xff] %v674_v30  ;;  %v664_v16 = vsel %vm632_vm15, %v616_v22, %v648_v27  ;;  %v672_v31 = vsel %vm640_vm0, %v624_v23, %v656_v28 }
  0xf3   : > { %680 = vst [vmem:[%s1023_s10 + $0x28] sm:$0xff] %v664_v16  ;;  %688 = vst [vmem:[%s1023_s10 + $0x68] sm:$0xff] %v672_v31 }
  0xf4 PF: > { %s16_s19 = sadd.s32 1, %s934_s19   ;;  %s1081_s17 = smov %s930_s18 }
  0xf5   : > { %p13_p5 = scmp.ge.s32.totalorder %s16_s19, 18   ;;  %s1082_s18 = smov %s1084_s3 }
  0xf7   :  { %15 = sbr.rel (!%p13_p5) target bundleno = 3 (0x3), region = 80 }

// kernel: discriminator_forward.6
= control target key start
LH: loop header
LB: loop body
LE: loop exit
PB: predicated region body
PF: predicated region fallthrough
CT: control target
= control target key end

     0   :  { %s4894_s17 = smov 0   ;;  %s4896_s18 = smov 0   ;;  %s6371_s0 = inlined_call_operand.vmem [shape: bf16[512,2048], index: 0, kind: input, shape index: {}]   ;;  %s6372_s1 = inlined_call_operand.vmem [shape: bf16[2048,256], index: 1, kind: input, shape index: {}]   ;;  %s6373_s2 = inlined_call_operand.vmem [shape: f32[1,256], index: 2, kind: input, shape index: {}]   ;;  %s6374_s3 = inlined_call_operand.<no memory space> [shape: f32[1,1], index: 3, kind: input, shape index: {}]   ;;  %s6375_s4 = inlined_call_operand.vmem [shape: f32[512,256], index: 4, kind: output, shape index: {}]  }
   0x1   :  { %v9_v0 = vstv %s6374_s3  ;;  %s4898_s19 = smov 0  }
   0x2   :  { %10 = vst [vmem:[#allocation3] sm:$0x1] %v9_v0 }
   0x3 LB: > { %s35_s3 = sadd.s32 1, %s4859_s18  ;;  %p4035_p0 = scmp.ge.s32.totalorder %s4863_s19, 1  ;;  %s4863_s19 = sphi %s4898_s19, %s16_s19   ;;  %s4859_s18 = sphi %s4896_s18, %s6457_s18   ;;  %s4855_s17 = sphi %s4894_s17, %s6456_s17  }
   0x4   : > { %p37_p1 = scmp.ge.s32.totalorder %s35_s3, 4  ;;  %p223_p2 = scmp.lt.s32.totalorder %s4863_s19, 5 }
   0x6   : > { %s6459_s3 = smov (%p37_p1, %s35_s3), 0  ;;  %p224_p3 = pnand %p4035_p0, %p223_p2 }
   0x8   : > { %227 = sbr.rel (%p224_p3) target bundleno = 538 (0x21a), region = 36 }
   0xd   : > { %v4457_v1 = vld [vmem:[%s6372_s1 + $0x74] ss:$8 sps:$4 sm:$0xff]   ;;  %v4461_v3 = vld [vmem:[%s6372_s1 + $0x70] ss:$8 sps:$4 sm:$0xff]   ;;  %v4463_v5 = vld [vmem:[%s6372_s1 + $0x64] ss:$8 sps:$4 sm:$0xff]  }
   0xe   : > { %v4459_v2 = vld [vmem:[%s6372_s1 + $0x174] ss:$8 sps:$4 sm:$0xff]   ;;  %2686 = vmatprep.subr.bf16.mxu0 %v4457_v1  ;;  %v4462_v4 = vld [vmem:[%s6372_s1 + $0x170] ss:$8 sps:$4 sm:$0xff]   ;;  %v4465_v6 = vld [vmem:[%s6372_s1 + $0x164] ss:$8 sps:$4 sm:$0xff]  }
   0xf   : > { %2799 = vmatprep.subr.bf16.mxu1 %v4459_v2  ;;  %2687 = vmatpush1.bf16.msra.mxu0 %v4461_v3  ;;  %v4467_v7 = vld [vmem:[%s6372_s1 + $0x60] ss:$8 sps:$4 sm:$0xff]   ;;  %v4469_v9 = vld [vmem:[%s6372_s1 + $0x54] ss:$8 sps:$4 sm:$0xff]   ;;  %v4473_v11 = vld [vmem:[%s6372_s1 + $0x50] ss:$8 sps:$4 sm:$0xff]  }
  0x10   : > { %2800 = vmatpush1.bf16.msra.mxu1 %v4462_v4  ;;  %2688 = vmatprep.subr.bf16.mxu0 %v4463_v5  ;;  %v4468_v8 = vld [vmem:[%s6372_s1 + $0x160] ss:$8 sps:$4 sm:$0xff]   ;;  %v4471_v10 = vld [vmem:[%s6372_s1 + $0x154] ss:$8 sps:$4 sm:$0xff]   ;;  %v4474_v12 = vld [vmem:[%s6372_s1 + $0x150] ss:$8 sps:$4 sm:$0xff]  }
  0x11   : > { %2801 = vmatprep.subr.bf16.mxu1 %v4465_v6  ;;  %v4475_v13 = vld [vmem:[%s6372_s1 + $0x44] ss:$8 sps:$4 sm:$0xff]   ;;  %v4479_v15 = vld [vmem:[%s6372_s1 + $0x40] ss:$8 sps:$4 sm:$0xff]   ;;  %v4481_v17 = vld [vmem:[%s6372_s1 + $0x34] ss:$8 sps:$4 sm:$0xff]  }
  0x12   : > { %v4477_v14 = vld [vmem:[%s6372_s1 + $0x144] ss:$8 sps:$4 sm:$0xff]   ;;  %v4480_v16 = vld [vmem:[%s6372_s1 + $0x140] ss:$8 sps:$4 sm:$0xff]   ;;  %v4483_v18 = vld [vmem:[%s6372_s1 + $0x134] ss:$8 sps:$4 sm:$0xff]  }
  0x13   : > { %2689 = vmatpush1.bf16.msra.mxu0 %v4467_v7  ;;  %v4485_v19 = vld [vmem:[%s6372_s1 + $0x30] ss:$8 sps:$4 sm:$0xff]   ;;  %v4487_v21 = vld [vmem:[%s6372_s1 + $0x24] ss:$8 sps:$4 sm:$0xff]   ;;  %v4491_v23 = vld [vmem:[%s6372_s1 + $0x20] ss:$8 sps:$4 sm:$0xff]  }
  0x14   : > { %2802 = vmatpush1.bf16.msra.mxu1 %v4468_v8  ;;  %2690 = vmatprep.subr.bf16.mxu0 %v4469_v9  ;;  %v4486_v20 = vld [vmem:[%s6372_s1 + $0x130] ss:$8 sps:$4 sm:$0xff]   ;;  %v4489_v22 = vld [vmem:[%s6372_s1 + $0x124] ss:$8 sps:$4 sm:$0xff]   ;;  %v4492_v24 = vld [vmem:[%s6372_s1 + $0x120] ss:$8 sps:$4 sm:$0xff]  }
  0x15   : > { %2803 = vmatprep.subr.bf16.mxu1 %v4471_v10  ;;  %v4493_v25 = vld [vmem:[%s6372_s1 + $0x14] ss:$8 sps:$4 sm:$0xff]   ;;  %v4497_v27 = vld [vmem:[%s6372_s1 + $0x10] ss:$8 sps:$4 sm:$0xff]   ;;  %v4499_v29 = vld [vmem:[%s6372_s1 + $0x4] ss:$8 sps:$4 sm:$0xff]  }
  0x16   : > { %v4495_v26 = vld [vmem:[%s6372_s1 + $0x114] ss:$8 sps:$4 sm:$0xff]   ;;  %v4498_v28 = vld [vmem:[%s6372_s1 + $0x110] ss:$8 sps:$4 sm:$0xff]   ;;  %v4501_v30 = vld [vmem:[%s6372_s1 + $0x104] ss:$8 sps:$4 sm:$0xff]  }
  0x17   : > { %2691 = vmatpush1.bf16.msra.mxu0 %v4473_v11  ;;  %s4036_s8 = sshll.u32 %s4855_s17, 4  ;;  %v4503_v31 = vld [vmem:[%s6372_s1] ss:$8 sps:$4 sm:$0xff]   ;;  %v4505_v33 = vld [vmem:[%s6372_s1 + $0xf4] ss:$8 sps:$4 sm:$0xff]  }
  0x18   : > { %2804 = vmatpush1.bf16.msra.mxu1 %v4474_v12  ;;  %2692 = vmatprep.subr.bf16.mxu0 %v4475_v13  ;;  %v4504_v32 = vld [vmem:[%s6372_s1 + $0x100] ss:$8 sps:$4 sm:$0xff]   ;;  %p275_p4 = scmp.lt.s32.totalorder %s4036_s8, 63  ;;  %v4507_v34 = vld [vmem:[%s6372_s1 + $0x1f4] ss:$8 sps:$4 sm:$0xff]  }
  0x19   : > { %2805 = vmatprep.subr.bf16.mxu1 %v4477_v14  ;;  %v4509_v35 = vld [vmem:[%s6372_s1 + $0xf0] ss:$8 sps:$4 sm:$0xff]   ;;  %v4511_v37 = vld [vmem:[%s6372_s1 + $0xe4] ss:$8 sps:$4 sm:$0xff]   ;;  %v4515_v39 = vld [vmem:[%s6372_s1 + $0xe0] ss:$8 sps:$4 sm:$0xff]  }
  0x1a   : > { %v4510_v36 = vld [vmem:[%s6372_s1 + $0x1f0] ss:$8 sps:$4 sm:$0xff]   ;;  %s6461_s8 = smov (!%p275_p4, %s4036_s8), 63  ;;  %v4513_v38 = vld [vmem:[%s6372_s1 + $0x1e4] ss:$8 sps:$4 sm:$0xff]  }
  0x1b   : > { %2693 = vmatpush1.bf16.msra.mxu0 %v4479_v15  ;;  %v4516_v40 = vld [vmem:[%s6372_s1 + $0x1e0] ss:$8 sps:$4 sm:$0xff]   ;;  %v4517_v41 = vld [vmem:[%s6372_s1 + $0xd4] ss:$8 sps:$4 sm:$0xff]   ;;  %s4429_s7 = sshll.u32 %s6461_s8, 6  ;;  %s4430_s27 = sshll.u32 %s6461_s8, 4 }
  0x1c   : > { %2806 = vmatpush1.bf16.msra.mxu1 %v4480_v16  ;;  %2694 = vmatprep.subr.bf16.mxu0 %v4481_v17  ;;  %v4519_v42 = vld [vmem:[%s6372_s1 + $0x1d4] ss:$8 sps:$4 sm:$0xff]   ;;  %v4521_v43 = vld [vmem:[%s6372_s1 + $0xd0] ss:$8 sps:$4 sm:$0xff]   ;;  %s5053_s17 = scalar_lea.vmem %s6371_s0, %s4429_s7  ;;  %v4523_v45 = vld [vmem:[%s6372_s1 + $0xc4] ss:$8 sps:$4 sm:$0xff]   ;;  %s6191_s29 = scalar_lea.vmem %s6375_s4, %s4430_s27 }
  0x1d   : > { %2807 = vmatprep.subr.bf16.mxu1 %v4483_v18  ;;  %v4522_v44 = vld [vmem:[%s6372_s1 + $0x1d0] ss:$8 sps:$4 sm:$0xff]   ;;  %v4525_v46 = vld [vmem:[%s6372_s1 + $0x1c4] ss:$8 sps:$4 sm:$0xff]   ;;  %v4527_v47 = vld [vmem:[%s6372_s1 + $0xc0] ss:$8 sps:$4 sm:$0xff]  }
  0x1e   : > { %v4528_v48 = vld [vmem:[%s6372_s1 + $0x1c0] ss:$8 sps:$4 sm:$0xff]   ;;  %v4529_v53 = vld [vmem:[%s6372_s1 + $0xb4] ss:$8 sps:$4 sm:$0xff]   ;;  %v4533_v57 = vld [vmem:[%s6372_s1 + $0xb0] ss:$8 sps:$4 sm:$0xff]  }
  0x1f   : > { %2695 = vmatpush1.bf16.msra.mxu0 %v4485_v19  ;;  %v382_v49 = vld [vmem:[%s5053_s17] sm:$0xff]  ;;  %v383_v51 = vld [vmem:[%s5053_s17 + $0x8] sm:$0xff]  ;;  %v4531_v55 = vld [vmem:[%s6372_s1 + $0x1b4] ss:$8 sps:$4 sm:$0xff]  }
  0x20   : > { %2808 = vmatpush1.bf16.msra.mxu1 %v4486_v20  ;;  %2696 = vmatprep.subr.bf16.mxu0 %v4487_v21  ;;  %v390_v50 = vld [vmem:[%s5053_s17 + $0x40] sm:$0xff]  ;;  %v391_v52 = vld [vmem:[%s5053_s17 + $0x48] sm:$0xff]  ;;  %v4534_v58 = vld [vmem:[%s6372_s1 + $0x1b0] ss:$8 sps:$4 sm:$0xff]  }
  0x21   : > { %2809 = vmatprep.subr.bf16.mxu1 %v4489_v22  ;;  %v4043_v54 = vcombine.high %v382_v49, %v390_v50  ;;  %v4045_v56 = vcombine.high %v383_v51, %v391_v52  ;;  %v4535_v59 = vld [vmem:[%s6372_s1 + $0xa4] ss:$8 sps:$4 sm:$0xff]   ;;  %v4539_v61 = vld [vmem:[%s6372_s1 + $0xa0] ss:$8 sps:$4 sm:$0xff]   ;;  %v4541_v63 = vld [vmem:[%s6372_s1 + $0x94] ss:$8 sps:$4 sm:$0xff]   ;;  %v4042_v12 = vcombine.low %v382_v49, %v390_v50  ;;  %v4044_v13 = vcombine.low %v383_v51, %v391_v52 }
  0x22   : > { %v4537_v60 = vld [vmem:[%s6372_s1 + $0x1a4] ss:$8 sps:$4 sm:$0xff]   ;;  %v4540_v62 = vld [vmem:[%s6372_s1 + $0x1a0] ss:$8 sps:$4 sm:$0xff]   ;;  %v4543_v0 = vld [vmem:[%s6372_s1 + $0x194] ss:$8 sps:$4 sm:$0xff]  }
  0x23   : > { %2697 = vmatpush1.bf16.msra.mxu0 %v4491_v23  ;;  %2718 = vmatprep.mubr.bf16.mxu0 %v4043_v54  ;;  %v4545_v1 = vld [vmem:[%s6372_s1 + $0x90] ss:$8 sps:$4 sm:$0xff]   ;;  %v4547_v3 = vld [vmem:[%s6372_s1 + $0x84] ss:$8 sps:$4 sm:$0xff]   ;;  %v4551_v5 = vld [vmem:[%s6372_s1 + $0x80] ss:$8 sps:$4 sm:$0xff]  }
  0x24   : > { %2810 = vmatpush1.bf16.msra.mxu1 %v4492_v24  ;;  %2698 = vmatprep.subr.bf16.mxu0 %v4493_v25  ;;  %v4546_v2 = vld [vmem:[%s6372_s1 + $0x190] ss:$8 sps:$4 sm:$0xff]   ;;  %v4549_v4 = vld [vmem:[%s6372_s1 + $0x184] ss:$8 sps:$4 sm:$0xff]   ;;  %v4552_v6 = vld [vmem:[%s6372_s1 + $0x180] ss:$8 sps:$4 sm:$0xff]  }
  0x25   : > { %2811 = vmatprep.subr.bf16.mxu1 %v4495_v26  ;;  %2831 = vmatprep.mubr.bf16.mxu1 %v4045_v56  ;;  %v4555_v7 = vld [vmem:[%s6372_s1 + $0x274] ss:$8 sps:$4 sm:$0xff]   ;;  %v4553_v9 = vld [vmem:[%s6372_s1 + $0x270] ss:$8 sps:$4 sm:$0xff]   ;;  %v398_v11 = vld [vmem:[%s5053_s17 + $0x80] sm:$0xff] }
  0x26   : > { %v4558_v8 = vld [vmem:[%s6372_s1 + $0x374] ss:$8 sps:$4 sm:$0xff]   ;;  %v4556_v10 = vld [vmem:[%s6372_s1 + $0x370] ss:$8 sps:$4 sm:$0xff]   ;;  %v406_v14 = vld [vmem:[%s5053_s17 + $0xc0] sm:$0xff] }
  0x27   : > { %2699 = vmatpush1.bf16.msra.mxu0 %v4497_v27  ;;  %v399_v15 = vld [vmem:[%s5053_s17 + $0x88] sm:$0xff]  ;;  %v4059_v19 = vcombine.high %v398_v11, %v406_v14  ;;  %v4567_v23 = vld [vmem:[%s6372_s1 + $0x254] ss:$8 sps:$4 sm:$0xff]   ;;  %v4565_v25 = vld [vmem:[%s6372_s1 + $0x250] ss:$8 sps:$4 sm:$0xff]  }
  0x28   : > { %2812 = vmatpush1.bf16.msra.mxu1 %v4498_v28  ;;  %2700 = vmatprep.subr.bf16.mxu0 %v4499_v29  ;;  %v407_v16 = vld [vmem:[%s5053_s17 + $0xc8] sm:$0xff]  ;;  %v4570_v24 = vld [vmem:[%s6372_s1 + $0x354] ss:$8 sps:$4 sm:$0xff]   ;;  %v4568_v26 = vld [vmem:[%s6372_s1 + $0x350] ss:$8 sps:$4 sm:$0xff]   ;;  %v4058_v29 = vcombine.low %v398_v11, %v406_v14 }
  0x29   : > { %2813 = vmatprep.subr.bf16.mxu1 %v4501_v30  ;;  %v4561_v17 = vld [vmem:[%s6372_s1 + $0x264] ss:$8 sps:$4 sm:$0xff]   ;;  %v4061_v20 = vcombine.high %v399_v15, %v407_v16  ;;  %v4559_v21 = vld [vmem:[%s6372_s1 + $0x260] ss:$8 sps:$4 sm:$0xff]   ;;  %v4060_v30 = vcombine.low %v399_v15, %v407_v16  ;;  %v4594_v56 = vld [vmem:[%s6372_s1 + $0x314] ss:$8 sps:$4 sm:$0xff]  }
  0x2a   : > { %v4564_v18 = vld [vmem:[%s6372_s1 + $0x364] ss:$8 sps:$4 sm:$0xff]   ;;  %v4562_v22 = vld [vmem:[%s6372_s1 + $0x360] ss:$8 sps:$4 sm:$0xff]   ;;  %v4601_v15 = vld [vmem:[%s6372_s1 + $0x2f0] ss:$8 sps:$4 sm:$0xff]  }
  0x2b   : > { %2701 = vmatpush1.bf16.msra.mxu0 %v4503_v31  ;;  %v414_v27 = vld [vmem:[%s5053_s17 + $0x100] sm:$0xff]  ;;  %v415_v31 = vld [vmem:[%s5053_s17 + $0x108] sm:$0xff]  ;;  %v4604_v16 = vld [vmem:[%s6372_s1 + $0x3f0] ss:$8 sps:$4 sm:$0xff]  }
  0x2c   : > { %2814 = vmatpush1.bf16.msra.mxu1 %v4504_v32  ;;  %2702 = vmatprep.subr.bf16.mxu0 %v4505_v33  ;;  %v422_v28 = vld [vmem:[%s5053_s17 + $0x140] sm:$0xff]  ;;  %v423_v32 = vld [vmem:[%s5053_s17 + $0x148] sm:$0xff] }
  0x2d   : > { %2815 = vmatprep.subr.bf16.mxu1 %v4507_v34  ;;  %v4573_v33 = vld [vmem:[%s6372_s1 + $0x244] ss:$8 sps:$4 sm:$0xff]   ;;  %v4586_v54 = vld [vmem:[%s6372_s1 + $0x320] ss:$8 sps:$4 sm:$0xff]  }
  0x2e   : > { %v4576_v34 = vld [vmem:[%s6372_s1 + $0x344] ss:$8 sps:$4 sm:$0xff]  }
  0x2f   : > { %2703 = vmatpush2.bf16.msra.mxu0 %v4509_v35  ;;  %v4075_v35 = vcombine.high %v414_v27, %v422_v28  ;;  %v4585_v49 = vld [vmem:[%s6372_s1 + $0x224] ss:$8 sps:$4 sm:$0xff]  }
  0x30   : > { %2816 = vmatpush2.bf16.msra.mxu1 %v4510_v36  ;;  %2704 = vmatprep.subr.bf16.mxu0 %v4511_v37  ;;  %v4077_v36 = vcombine.high %v415_v31, %v423_v32  ;;  %v4571_v37 = vld [vmem:[%s6372_s1 + $0x240] ss:$8 sps:$4 sm:$0xff]   ;;  %v4588_v50 = vld [vmem:[%s6372_s1 + $0x324] ss:$8 sps:$4 sm:$0xff]  }
  0x31   : > { %2817 = vmatprep.subr.bf16.mxu1 %v4513_v38  ;;  %v4574_v38 = vld [vmem:[%s6372_s1 + $0x340] ss:$8 sps:$4 sm:$0xff]  }
  0x32   : > { %v471_v14 = vld [vmem:[%s5053_s17 + $0x2c8] sm:$0xff] }
  0x33   : > { %2705 = vmatpush2.bf16.msra.mxu0 %v4515_v39  ;;  %v4579_v39 = vld [vmem:[%s6372_s1 + $0x234] ss:$8 sps:$4 sm:$0xff]  }
  0x34   : > { %2818 = vmatpush2.bf16.msra.mxu1 %v4516_v40  ;;  %2706 = vmatprep.subr.bf16.mxu0 %v4517_v41  ;;  %v4582_v40 = vld [vmem:[%s6372_s1 + $0x334] ss:$8 sps:$4 sm:$0xff]   ;;  %v4577_v41 = vld [vmem:[%s6372_s1 + $0x230] ss:$8 sps:$4 sm:$0xff]  }
  0x35   : > { %2819 = vmatprep.subr.bf16.mxu1 %v4519_v42  ;;  %v4580_v42 = vld [vmem:[%s6372_s1 + $0x330] ss:$8 sps:$4 sm:$0xff]  }
  0x37   : > { %2707 = vmatpush2.bf16.msra.mxu0 %v4521_v43  ;;  %v430_v43 = vld [vmem:[%s5053_s17 + $0x180] sm:$0xff] }
  0x38   : > { %2820 = vmatpush2.bf16.msra.mxu1 %v4522_v44  ;;  %2708 = vmatprep.subr.bf16.mxu0 %v4523_v45  ;;  %v438_v44 = vld [vmem:[%s5053_s17 + $0x1c0] sm:$0xff]  ;;  %v4074_v45 = vcombine.low %v414_v27, %v422_v28 }
  0x39   : > { %2821 = vmatprep.subr.bf16.mxu1 %v4525_v46  ;;  %v4076_v46 = vcombine.low %v415_v31, %v423_v32  ;;  %v4091_v51 = vcombine.high %v430_v43, %v438_v44  ;;  %v478_v27 = vld [vmem:[%s5053_s17 + $0x300] sm:$0xff]  ;;  %v479_v31 = vld [vmem:[%s5053_s17 + $0x308] sm:$0xff] }
  0x3a   : > { %v487_v32 = vld [vmem:[%s5053_s17 + $0x348] sm:$0xff] }
  0x3b   : > { %2709 = vmatpush2.bf16.msra.mxu0 %v4527_v47  ;;  %v431_v47 = vld [vmem:[%s5053_s17 + $0x188] sm:$0xff] }
  0x3c   : > { %2822 = vmatpush2.bf16.msra.mxu1 %v4528_v48  ;;  %2710 = vmatprep.subr.bf16.mxu0 %v4529_v53  ;;  %v439_v48 = vld [vmem:[%s5053_s17 + $0x1c8] sm:$0xff] }
  0x3d   : > { %2823 = vmatprep.subr.bf16.mxu1 %v4531_v55  ;;  %v4093_v52 = vcombine.high %v431_v47, %v439_v48  ;;  %v4583_v53 = vld [vmem:[%s6372_s1 + $0x220] ss:$8 sps:$4 sm:$0xff]   ;;  %v4591_v55 = vld [vmem:[%s6372_s1 + $0x214] ss:$8 sps:$4 sm:$0xff]  }
  0x3f   : > { %2711 = vmatpush2.bf16.msra.mxu0 %v4533_v57  ;;  %v4589_v57 = vld [vmem:[%s6372_s1 + $0x210] ss:$8 sps:$4 sm:$0xff]  }
  0x40   : > { %2824 = vmatpush2.bf16.msra.mxu1 %v4534_v58  ;;  %2712 = vmatprep.subr.bf16.mxu0 %v4535_v59  ;;  %v446_v58 = vld [vmem:[%s5053_s17 + $0x200] sm:$0xff] }
  0x41   : > { %2825 = vmatprep.subr.bf16.mxu1 %v4537_v60  ;;  %v454_v59 = vld [vmem:[%s5053_s17 + $0x240] sm:$0xff]  ;;  %v4090_v60 = vcombine.low %v430_v43, %v438_v44 }
  0x42   : > { %v4106_v11 = vcombine.low %v446_v58, %v454_v59  ;;  %v494_v43 = vld [vmem:[%s5053_s17 + $0x380] sm:$0xff] }
  0x43   : > { %2713 = vmatpush2.bf16.msra.mxu0 %v4539_v61  ;;  %v4092_v61 = vcombine.low %v431_v47, %v439_v48  ;;  %v502_v44 = vld [vmem:[%s5053_s17 + $0x3c0] sm:$0xff]  ;;  %v495_v47 = vld [vmem:[%s5053_s17 + $0x388] sm:$0xff] }
  0x44   : > { %2826 = vmatpush2.bf16.msra.mxu1 %v4540_v62  ;;  %2714 = vmatprep.subr.bf16.mxu0 %v4541_v63  ;;  %v447_v62 = vld [vmem:[%s5053_s17 + $0x208] sm:$0xff] }
  0x45   : > { %2827 = vmatprep.subr.bf16.mxu1 %v4543_v0  ;;  %v455_v63 = vld [vmem:[%s5053_s17 + $0x248] sm:$0xff]  ;;  %v4592_v0 = vld [vmem:[%s6372_s1 + $0x310] ss:$8 sps:$4 sm:$0xff]  }
  0x46   : > { %v503_v48 = vld [vmem:[%s5053_s17 + $0x3c8] sm:$0xff] }
  0x47   : > { %2715 = vmatpush2.bf16.msra.mxu0 %v4545_v1  ;;  %v4597_v1 = vld [vmem:[%s6372_s1 + $0x204] ss:$8 sps:$4 sm:$0xff]  }
  0x48   : > { %2828 = vmatpush2.bf16.msra.mxu1 %v4546_v2  ;;  %2716 = vmatprep.subr.bf16.mxu0 %v4547_v3  ;;  %v4600_v2 = vld [vmem:[%s6372_s1 + $0x304] ss:$8 sps:$4 sm:$0xff]   ;;  %v4107_v3 = vcombine.high %v446_v58, %v454_v59  ;;  %v4640_v58 = vld [vmem:[%s6372_s1 + $0x390] ss:$8 sps:$4 sm:$0xff]  }
  0x49   : > { %2829 = vmatprep.subr.bf16.mxu1 %v4549_v4  ;;  %v4109_v4 = vcombine.high %v447_v62, %v455_v63  ;;  %v384_v59 = vld [vmem:[%s5053_s17 + $0x10] sm:$0xff] }
  0x4b   : > { %2717 = vmatpush2.bf16.msra.mxu0 %v4551_v5  ;;  %v4595_v5 = vld [vmem:[%s6372_s1 + $0x200] ss:$8 sps:$4 sm:$0xff]  }
  0x4c   : > { %2830 = vmatpush2.bf16.msra.mxu1 %v4552_v6  ;;  %2912 = vmatprep.subr.bf16.mxu0 %v4555_v7  ;;  %v4598_v6 = vld [vmem:[%s6372_s1 + $0x300] ss:$8 sps:$4 sm:$0xff]   ;;  %v4603_v7 = vld [vmem:[%s6372_s1 + $0x2f4] ss:$8 sps:$4 sm:$0xff]  }
  0x4d   : > { %3025 = vmatprep.subr.bf16.mxu1 %v4558_v8  ;;  %v4606_v8 = vld [vmem:[%s6372_s1 + $0x3f4] ss:$8 sps:$4 sm:$0xff]  }
  0x4e   : > { %2719 = vmatmul.mubr.bf16.vlgmr.msra.gmra.mxu0 %v4042_v12  ;;  %v4108_v12 = vcombine.low %v447_v62, %v455_v63  ;;  %v4156_v62 = vcombine.low %v495_v47, %v503_v48  ;;  %v385_v63 = vld [vmem:[%s5053_s17 + $0x18] sm:$0xff] }
  0x4f   : > { %2832 = vmatmul.mubr.bf16.vlgmr.msra.gmra.mxu1 %v4044_v13  ;;  %2913 = vmatpush1.bf16.msra.mxu0 %v4553_v9  ;;  %v462_v9 = vld [vmem:[%s5053_s17 + $0x280] sm:$0xff]  ;;  %v463_v13 = vld [vmem:[%s5053_s17 + $0x288] sm:$0xff] }
  0x50   : > { %3026 = vmatpush1.bf16.msra.mxu1 %v4556_v10  ;;  %2914 = vmatprep.subr.bf16.mxu0 %v4561_v17  ;;  %v470_v10 = vld [vmem:[%s5053_s17 + $0x2c0] sm:$0xff] }
  0x51   : > { %3027 = vmatprep.subr.bf16.mxu1 %v4564_v18  ;;  %2728 = vmatprep.mubr.bf16.mxu0 %v4059_v19  ;;  %v4609_v17 = vld [vmem:[%s6372_s1 + $0x2e4] ss:$8 sps:$4 sm:$0xff]   ;;  %v4123_v19 = vcombine.high %v462_v9, %v470_v10  ;;  %v4122_v28 = vcombine.low %v462_v9, %v470_v10  ;;  %v4649_v9 = vld [vmem:[%s6372_s1 + $0x470] ss:$8 sps:$4 sm:$0xff]  }
  0x52   : > { %2841 = vmatprep.mubr.bf16.mxu1 %v4061_v20  ;;  %v4612_v18 = vld [vmem:[%s6372_s1 + $0x3e4] ss:$8 sps:$4 sm:$0xff]   ;;  %v4125_v20 = vcombine.high %v463_v13, %v471_v14  ;;  %v400_v10 = vld [vmem:[%s5053_s17 + $0x90] sm:$0xff] }
  0x53   : > { %2915 = vmatpush1.bf16.msra.mxu0 %v4559_v21  ;;  %v4607_v21 = vld [vmem:[%s6372_s1 + $0x2e0] ss:$8 sps:$4 sm:$0xff]  }
  0x54   : > { %3028 = vmatpush1.bf16.msra.mxu1 %v4562_v22  ;;  %2916 = vmatprep.subr.bf16.mxu0 %v4567_v23  ;;  %v4610_v22 = vld [vmem:[%s6372_s1 + $0x3e0] ss:$8 sps:$4 sm:$0xff]   ;;  %v4615_v23 = vld [vmem:[%s6372_s1 + $0x2d4] ss:$8 sps:$4 sm:$0xff]  }
  0x55   : > { %3029 = vmatprep.subr.bf16.mxu1 %v4570_v24  ;;  %v4618_v24 = vld [vmem:[%s6372_s1 + $0x3d4] ss:$8 sps:$4 sm:$0xff]  }
  0x56   : > { %2729 = vmatmul.mubr.bf16.gmra.mxu0 %v4058_v29  ;;  %v4124_v29 = vcombine.low %v463_v13, %v471_v14  ;;  %v401_v14 = vld [vmem:[%s5053_s17 + $0x98] sm:$0xff] }
  0x57   : > { %2842 = vmatmul.mubr.bf16.gmra.mxu1 %v4060_v30  ;;  %2917 = vmatpush1.bf16.msra.mxu0 %v4565_v25  ;;  %v4613_v25 = vld [vmem:[%s6372_s1 + $0x2d0] ss:$8 sps:$4 sm:$0xff]   ;;  %v486_v30 = vld [vmem:[%s5053_s17 + $0x340] sm:$0xff] }
  0x58   : > { %3030 = vmatpush1.bf16.msra.mxu1 %v4568_v26  ;;  %2918 = vmatprep.subr.bf16.mxu0 %v4573_v33  ;;  %v4616_v26 = vld [vmem:[%s6372_s1 + $0x3d0] ss:$8 sps:$4 sm:$0xff]   ;;  %v4621_v33 = vld [vmem:[%s6372_s1 + $0x2c4] ss:$8 sps:$4 sm:$0xff]  }
  0x59   : > { %3031 = vmatprep.subr.bf16.mxu1 %v4576_v34  ;;  %2738 = vmatprep.mubr.bf16.mxu0 %v4075_v35  ;;  %v4624_v34 = vld [vmem:[%s6372_s1 + $0x3c4] ss:$8 sps:$4 sm:$0xff]   ;;  %v4139_v35 = vcombine.high %v478_v27, %v486_v30 }
  0x5a   : > { %2851 = vmatprep.mubr.bf16.mxu1 %v4077_v36  ;;  %v4141_v36 = vcombine.high %v479_v31, %v487_v32 }
  0x5b   : > { %2919 = vmatpush1.bf16.msra.mxu0 %v4571_v37  ;;  %v4619_v37 = vld [vmem:[%s6372_s1 + $0x2c0] ss:$8 sps:$4 sm:$0xff]  }
  0x5c   : > { %3032 = vmatpush1.bf16.msra.mxu1 %v4574_v38  ;;  %2920 = vmatprep.subr.bf16.mxu0 %v4579_v39  ;;  %v4622_v38 = vld [vmem:[%s6372_s1 + $0x3c0] ss:$8 sps:$4 sm:$0xff]   ;;  %v4627_v39 = vld [vmem:[%s6372_s1 + $0x2b4] ss:$8 sps:$4 sm:$0xff]  }
  0x5d   : > { %3033 = vmatprep.subr.bf16.mxu1 %v4582_v40  ;;  %v4630_v40 = vld [vmem:[%s6372_s1 + $0x3b4] ss:$8 sps:$4 sm:$0xff]  }
  0x5e   : > { %2739 = vmatmul.mubr.bf16.gmra.mxu0 %v4074_v45  ;;  %v4138_v45 = vcombine.low %v478_v27, %v486_v30  ;;  %v425_v30 = vld [vmem:[%s5053_s17 + $0x158] sm:$0xff] }
  0x5f   : > { %2852 = vmatmul.mubr.bf16.gmra.mxu1 %v4076_v46  ;;  %2921 = vmatpush1.bf16.msra.mxu0 %v4577_v41  ;;  %v4625_v41 = vld [vmem:[%s6372_s1 + $0x2b0] ss:$8 sps:$4 sm:$0xff]   ;;  %v4140_v46 = vcombine.low %v479_v31, %v487_v32 }
  0x60   : > { %3034 = vmatpush1.bf16.msra.mxu1 %v4580_v42  ;;  %2922 = vmatprep.subr.bf16.mxu0 %v4585_v49  ;;  %v4628_v42 = vld [vmem:[%s6372_s1 + $0x3b0] ss:$8 sps:$4 sm:$0xff]   ;;  %v4633_v49 = vld [vmem:[%s6372_s1 + $0x2a4] ss:$8 sps:$4 sm:$0xff]  }
  0x61   : > { %3035 = vmatprep.subr.bf16.mxu1 %v4588_v50  ;;  %2748 = vmatprep.mubr.bf16.mxu0 %v4091_v51  ;;  %v4636_v50 = vld [vmem:[%s6372_s1 + $0x3a4] ss:$8 sps:$4 sm:$0xff]   ;;  %v4155_v51 = vcombine.high %v494_v43, %v502_v44  ;;  %v4661_v31 = vld [vmem:[%s6372_s1 + $0x450] ss:$8 sps:$4 sm:$0xff]  }
  0x62   : > { %2861 = vmatprep.mubr.bf16.mxu1 %v4093_v52  ;;  %v4157_v52 = vcombine.high %v495_v47, %v503_v48  ;;  %v4664_v32 = vld [vmem:[%s6372_s1 + $0x550] ss:$8 sps:$4 sm:$0xff]  }
  0x63   : > { %2923 = vmatpush1.bf16.msra.mxu0 %v4583_v53  ;;  %v4631_v53 = vld [vmem:[%s6372_s1 + $0x2a0] ss:$8 sps:$4 sm:$0xff]   ;;  %v433_v47 = vld [vmem:[%s5053_s17 + $0x198] sm:$0xff] }
  0x64   : > { %3036 = vmatpush1.bf16.msra.mxu1 %v4586_v54  ;;  %2924 = vmatprep.subr.bf16.mxu0 %v4591_v55  ;;  %v4634_v54 = vld [vmem:[%s6372_s1 + $0x3a0] ss:$8 sps:$4 sm:$0xff]   ;;  %v4639_v55 = vld [vmem:[%s6372_s1 + $0x294] ss:$8 sps:$4 sm:$0xff]  }
  0x65   : > { %3037 = vmatprep.subr.bf16.mxu1 %v4594_v56  ;;  %v4642_v56 = vld [vmem:[%s6372_s1 + $0x394] ss:$8 sps:$4 sm:$0xff]  }
  0x66   : > { %2749 = vmatmul.mubr.bf16.gmra.mxu0 %v4090_v60  ;;  %v392_v60 = vld [vmem:[%s5053_s17 + $0x50] sm:$0xff]  ;;  %v441_v48 = vld [vmem:[%s5053_s17 + $0x1d8] sm:$0xff] }
  0x67   : > { %2862 = vmatmul.mubr.bf16.gmra.mxu1 %v4092_v61  ;;  %2925 = vmatpush1.bf16.msra.mxu0 %v4589_v57  ;;  %v4637_v57 = vld [vmem:[%s6372_s1 + $0x290] ss:$8 sps:$4 sm:$0xff]   ;;  %v4154_v61 = vcombine.low %v494_v43, %v502_v44 }
  0x68   : > { %3038 = vmatpush1.bf16.msra.mxu1 %v4592_v0  ;;  %2926 = vmatprep.subr.bf16.mxu0 %v4597_v1  ;;  %v393_v0 = vld [vmem:[%s5053_s17 + $0x58] sm:$0xff]  ;;  %v4645_v1 = vld [vmem:[%s6372_s1 + $0x284] ss:$8 sps:$4 sm:$0xff]   ;;  %v432_v43 = vld [vmem:[%s5053_s17 + $0x190] sm:$0xff] }
  0x69   : > { %3039 = vmatprep.subr.bf16.mxu1 %v4600_v2  ;;  %2758 = vmatprep.mubr.bf16.mxu0 %v4107_v3  ;;  %v4648_v2 = vld [vmem:[%s6372_s1 + $0x384] ss:$8 sps:$4 sm:$0xff]   ;;  %v4047_v3 = vcombine.high %v384_v59, %v392_v60  ;;  %v4048_v13 = vcombine.low %v385_v63, %v393_v0 }
  0x6a   : > { %2871 = vmatprep.mubr.bf16.mxu1 %v4109_v4  ;;  %v4049_v4 = vcombine.high %v385_v63, %v393_v0  ;;  %v449_v63 = vld [vmem:[%s5053_s17 + $0x218] sm:$0xff] }
  0x6b   : > { %2927 = vmatpush1.bf16.msra.mxu0 %v4595_v5  ;;  %v4643_v5 = vld [vmem:[%s6372_s1 + $0x280] ss:$8 sps:$4 sm:$0xff]   ;;  %v457_v0 = vld [vmem:[%s5053_s17 + $0x258] sm:$0xff] }
  0x6c   : > { %3040 = vmatpush1.bf16.msra.mxu1 %v4598_v6  ;;  %2928 = vmatprep.subr.bf16.mxu0 %v4603_v7  ;;  %v4646_v6 = vld [vmem:[%s6372_s1 + $0x380] ss:$8 sps:$4 sm:$0xff]   ;;  %v4651_v7 = vld [vmem:[%s6372_s1 + $0x474] ss:$8 sps:$4 sm:$0xff]  }
  0x6d   : > { %3041 = vmatprep.subr.bf16.mxu1 %v4606_v8  ;;  %v4654_v8 = vld [vmem:[%s6372_s1 + $0x574] ss:$8 sps:$4 sm:$0xff]  }
  0x6e   : > { %2759 = vmatmul.mubr.bf16.gmra.mxu0 %v4106_v11  ;;  %v408_v11 = vld [vmem:[%s5053_s17 + $0xd0] sm:$0xff] }
  0x6f   : > { %2872 = vmatmul.mubr.bf16.gmra.mxu1 %v4108_v12  ;;  %2929 = vmatpush2.bf16.msra.mxu0 %v4601_v15  ;;  %v4046_v12 = vcombine.low %v384_v59, %v392_v60  ;;  %v409_v15 = vld [vmem:[%s5053_s17 + $0xd8] sm:$0xff]  ;;  %v4062_v27 = vcombine.low %v400_v10, %v408_v11  ;;  %v448_v59 = vld [vmem:[%s5053_s17 + $0x210] sm:$0xff] }
  0x70   : > { %3042 = vmatpush2.bf16.msra.mxu1 %v4604_v16  ;;  %2930 = vmatprep.subr.bf16.mxu0 %v4609_v17  ;;  %v4652_v16 = vld [vmem:[%s6372_s1 + $0x570] ss:$8 sps:$4 sm:$0xff]   ;;  %v4657_v17 = vld [vmem:[%s6372_s1 + $0x464] ss:$8 sps:$4 sm:$0xff]  }
  0x71   : > { %3043 = vmatprep.subr.bf16.mxu1 %v4612_v18  ;;  %2768 = vmatprep.mubr.bf16.mxu0 %v4123_v19  ;;  %v4660_v18 = vld [vmem:[%s6372_s1 + $0x564] ss:$8 sps:$4 sm:$0xff]   ;;  %v4063_v19 = vcombine.high %v400_v10, %v408_v11  ;;  %v456_v60 = vld [vmem:[%s5053_s17 + $0x250] sm:$0xff] }
  0x72   : > { %2881 = vmatprep.mubr.bf16.mxu1 %v4125_v20  ;;  %v4065_v20 = vcombine.high %v401_v14, %v409_v15  ;;  %v4700_v10 = vld [vmem:[%s6372_s1 + $0x5f0] ss:$8 sps:$4 sm:$0xff]  }
  0x73   : > { %2931 = vmatpush2.bf16.msra.mxu0 %v4607_v21  ;;  %v4655_v21 = vld [vmem:[%s6372_s1 + $0x460] ss:$8 sps:$4 sm:$0xff]   ;;  %v464_v11 = vld [vmem:[%s5053_s17 + $0x290] sm:$0xff] }
  0x74   : > { %3044 = vmatpush2.bf16.msra.mxu1 %v4610_v22  ;;  %2932 = vmatprep.subr.bf16.mxu0 %v4615_v23  ;;  %v4658_v22 = vld [vmem:[%s6372_s1 + $0x560] ss:$8 sps:$4 sm:$0xff]   ;;  %v4663_v23 = vld [vmem:[%s6372_s1 + $0x454] ss:$8 sps:$4 sm:$0xff]  }
  0x75   : > { %3045 = vmatprep.subr.bf16.mxu1 %v4618_v24  ;;  %v4666_v24 = vld [vmem:[%s6372_s1 + $0x554] ss:$8 sps:$4 sm:$0xff]  }
  0x76   : > { %2769 = vmatmul.mubr.bf16.gmra.mxu0 %v4122_v28  ;;  %v4064_v28 = vcombine.low %v401_v14, %v409_v15  ;;  %v4112_v14 = vcombine.low %v449_v63, %v457_v0  ;;  %v465_v15 = vld [vmem:[%s5053_s17 + $0x298] sm:$0xff] }
  0x77   : > { %2882 = vmatmul.mubr.bf16.gmra.mxu1 %v4124_v29  ;;  %2933 = vmatpush2.bf16.msra.mxu0 %v4613_v25  ;;  %v416_v25 = vld [vmem:[%s5053_s17 + $0x110] sm:$0xff]  ;;  %v417_v29 = vld [vmem:[%s5053_s17 + $0x118] sm:$0xff] }
  0x78   : > { %3046 = vmatpush2.bf16.msra.mxu1 %v4616_v26  ;;  %2934 = vmatprep.subr.bf16.mxu0 %v4621_v33  ;;  %v424_v26 = vld [vmem:[%s5053_s17 + $0x150] sm:$0xff]  ;;  %v4669_v33 = vld [vmem:[%s6372_s1 + $0x444] ss:$8 sps:$4 sm:$0xff]  }
  0x79   : > { %3047 = vmatprep.subr.bf16.mxu1 %v4624_v34  ;;  %2778 = vmatprep.mubr.bf16.mxu0 %v4139_v35  ;;  %v4672_v34 = vld [vmem:[%s6372_s1 + $0x544] ss:$8 sps:$4 sm:$0xff]   ;;  %v4079_v35 = vcombine.high %v416_v25, %v424_v26  ;;  %v4078_v44 = vcombine.low %v416_v25, %v424_v26  ;;  %v4709_v25 = vld [vmem:[%s6372_s1 + $0x4d0] ss:$8 sps:$4 sm:$0xff]  }
  0x7a   : > { %2891 = vmatprep.mubr.bf16.mxu1 %v4141_v36  ;;  %v4081_v36 = vcombine.high %v417_v29, %v425_v30  ;;  %v480_v26 = vld [vmem:[%s5053_s17 + $0x310] sm:$0xff] }
  0x7b   : > { %2935 = vmatpush2.bf16.msra.mxu0 %v4619_v37  ;;  %v4667_v37 = vld [vmem:[%s6372_s1 + $0x440] ss:$8 sps:$4 sm:$0xff]  }
  0x7c   : > { %3048 = vmatpush2.bf16.msra.mxu1 %v4622_v38  ;;  %2936 = vmatprep.subr.bf16.mxu0 %v4627_v39  ;;  %v4670_v38 = vld [vmem:[%s6372_s1 + $0x540] ss:$8 sps:$4 sm:$0xff]   ;;  %v4675_v39 = vld [vmem:[%s6372_s1 + $0x434] ss:$8 sps:$4 sm:$0xff]  }
  0x7d   : > { %3049 = vmatprep.subr.bf16.mxu1 %v4630_v40  ;;  %v4678_v40 = vld [vmem:[%s6372_s1 + $0x534] ss:$8 sps:$4 sm:$0xff]  }
  0x7e   : > { %2779 = vmatmul.mubr.bf16.gmra.mxu0 %v4138_v45  ;;  %v4080_v45 = vcombine.low %v417_v29, %v425_v30  ;;  %v481_v30 = vld [vmem:[%s5053_s17 + $0x318] sm:$0xff] }
  0x7f   : > { %2892 = vmatmul.mubr.bf16.gmra.mxu1 %v4140_v46  ;;  %2937 = vmatpush2.bf16.msra.mxu0 %v4625_v41  ;;  %v4673_v41 = vld [vmem:[%s6372_s1 + $0x430] ss:$8 sps:$4 sm:$0xff]  }
  0x80   : > { %3050 = vmatpush2.bf16.msra.mxu1 %v4628_v42  ;;  %2938 = vmatprep.subr.bf16.mxu0 %v4633_v49  ;;  %v4676_v42 = vld [vmem:[%s6372_s1 + $0x530] ss:$8 sps:$4 sm:$0xff]   ;;  %v4681_v49 = vld [vmem:[%s6372_s1 + $0x424] ss:$8 sps:$4 sm:$0xff]  }
  0x81   : > { %3051 = vmatprep.subr.bf16.mxu1 %v4636_v50  ;;  %2788 = vmatprep.mubr.bf16.mxu0 %v4155_v51  ;;  %v440_v46 = vld [vmem:[%s5053_s17 + $0x1d0] sm:$0xff]  ;;  %v4684_v50 = vld [vmem:[%s6372_s1 + $0x524] ss:$8 sps:$4 sm:$0xff]  }
  0x82   : > { %2901 = vmatprep.mubr.bf16.mxu1 %v4157_v52  ;;  %v4095_v51 = vcombine.high %v432_v43, %v440_v46  ;;  %v4097_v52 = vcombine.high %v433_v47, %v441_v48 }
  0x83   : > { %2939 = vmatpush2.bf16.msra.mxu0 %v4631_v53  ;;  %v4679_v53 = vld [vmem:[%s6372_s1 + $0x420] ss:$8 sps:$4 sm:$0xff]  }
  0x84   : > { %3052 = vmatpush2.bf16.msra.mxu1 %v4634_v54  ;;  %2940 = vmatprep.subr.bf16.mxu0 %v4639_v55  ;;  %v4682_v54 = vld [vmem:[%s6372_s1 + $0x520] ss:$8 sps:$4 sm:$0xff]   ;;  %v4687_v55 = vld [vmem:[%s6372_s1 + $0x414] ss:$8 sps:$4 sm:$0xff]  }
  0x85   : > { %3053 = vmatprep.subr.bf16.mxu1 %v4642_v56  ;;  %v4690_v56 = vld [vmem:[%s6372_s1 + $0x514] ss:$8 sps:$4 sm:$0xff]  }
  0x86   : > { %2789 = vmatmul.mubr.bf16.gmra.mxu0 %v4154_v61  ;;  %v4094_v61 = vcombine.low %v432_v43, %v440_v46  ;;  %v505_v46 = vld [vmem:[%s5053_s17 + $0x3d8] sm:$0xff] }
  0x87   : > { %2902 = vmatmul.mubr.bf16.gmra.mxu1 %v4156_v62  ;;  %2941 = vmatpush2.bf16.msra.mxu0 %v4637_v57  ;;  %v4685_v57 = vld [vmem:[%s6372_s1 + $0x410] ss:$8 sps:$4 sm:$0xff]   ;;  %v4096_v62 = vcombine.low %v433_v47, %v441_v48 }
  0x88   : > { %3054 = vmatpush2.bf16.msra.mxu1 %v4640_v58  ;;  %2942 = vmatprep.subr.bf16.mxu0 %v4645_v1  ;;  %v4688_v58 = vld [vmem:[%s6372_s1 + $0x510] ss:$8 sps:$4 sm:$0xff]   ;;  %v4693_v1 = vld [vmem:[%s6372_s1 + $0x404] ss:$8 sps:$4 sm:$0xff]  }
  0x89   : > { %3055 = vmatprep.subr.bf16.mxu1 %v4648_v2  ;;  %2944 = vmatprep.mubr.bf16.mxu0 %v4047_v3  ;;  %v4696_v2 = vld [vmem:[%s6372_s1 + $0x504] ss:$8 sps:$4 sm:$0xff]   ;;  %v4111_v3 = vcombine.high %v448_v59, %v456_v60  ;;  %v4721_v47 = vld [vmem:[%s6372_s1 + $0x4b0] ss:$8 sps:$4 sm:$0xff]  }
  0x8a   : > { %3057 = vmatprep.mubr.bf16.mxu1 %v4049_v4  ;;  %v4113_v4 = vcombine.high %v449_v63, %v457_v0  ;;  %v4724_v48 = vld [vmem:[%s6372_s1 + $0x5b0] ss:$8 sps:$4 sm:$0xff]   ;;  %v387_v63 = vld [vmem:[%s5053_s17 + $0x28] sm:$0xff] }
  0x8b   : > { %2943 = vmatpush2.bf16.msra.mxu0 %v4643_v5  ;;  %v4691_v5 = vld [vmem:[%s6372_s1 + $0x400] ss:$8 sps:$4 sm:$0xff]  }
  0x8c   : > { %3056 = vmatpush2.bf16.msra.mxu1 %v4646_v6  ;;  %3138 = vmatprep.subr.bf16.mxu0 %v4651_v7  ;;  %v4694_v6 = vld [vmem:[%s6372_s1 + $0x500] ss:$8 sps:$4 sm:$0xff]   ;;  %v4699_v7 = vld [vmem:[%s6372_s1 + $0x4f4] ss:$8 sps:$4 sm:$0xff]  }
  0x8d   : > { %3251 = vmatprep.subr.bf16.mxu1 %v4654_v8  ;;  %v4702_v8 = vld [vmem:[%s6372_s1 + $0x5f4] ss:$8 sps:$4 sm:$0xff]   ;;  %v395_v0 = vld [vmem:[%s5053_s17 + $0x68] sm:$0xff] }
  0x8e   : > { %2945 = vmatmul.mubr.bf16.vlgmr.msra.gmra.mxu0 %v4046_v12  ;;  %v472_v12 = vld [vmem:[%s5053_s17 + $0x2d0] sm:$0xff] }
  0x8f   : > { %3058 = vmatmul.mubr.bf16.vlgmr.msra.gmra.mxu1 %v4048_v13  ;;  %3139 = vmatpush1.bf16.msra.mxu0 %v4649_v9  ;;  %v4697_v9 = vld [vmem:[%s6372_s1 + $0x4f0] ss:$8 sps:$4 sm:$0xff]   ;;  %v4110_v13 = vcombine.low %v448_v59, %v456_v60  ;;  %v386_v59 = vld [vmem:[%s5053_s17 + $0x20] sm:$0xff] }
  0x90   : > { %3252 = vmatpush1.bf16.msra.mxu1 %v4652_v16  ;;  %3140 = vmatprep.subr.bf16.mxu0 %v4657_v17  ;;  %v473_v16 = vld [vmem:[%s5053_s17 + $0x2d8] sm:$0xff]  ;;  %v4705_v17 = vld [vmem:[%s6372_s1 + $0x4e4] ss:$8 sps:$4 sm:$0xff]  }
  0x91   : > { %3253 = vmatprep.subr.bf16.mxu1 %v4660_v18  ;;  %2954 = vmatprep.mubr.bf16.mxu0 %v4063_v19  ;;  %v4708_v18 = vld [vmem:[%s6372_s1 + $0x5e4] ss:$8 sps:$4 sm:$0xff]   ;;  %v4127_v19 = vcombine.high %v464_v11, %v472_v12  ;;  %v4128_v29 = vcombine.low %v465_v15, %v473_v16 }
  0x92   : > { %3067 = vmatprep.mubr.bf16.mxu1 %v4065_v20  ;;  %v4129_v20 = vcombine.high %v465_v15, %v473_v16  ;;  %v403_v15 = vld [vmem:[%s5053_s17 + $0xa8] sm:$0xff] }
  0x93   : > { %3141 = vmatpush1.bf16.msra.mxu0 %v4655_v21  ;;  %v4703_v21 = vld [vmem:[%s6372_s1 + $0x4e0] ss:$8 sps:$4 sm:$0xff]  }
  0x94   : > { %3254 = vmatpush1.bf16.msra.mxu1 %v4658_v22  ;;  %3142 = vmatprep.subr.bf16.mxu0 %v4663_v23  ;;  %v4706_v22 = vld [vmem:[%s6372_s1 + $0x5e0] ss:$8 sps:$4 sm:$0xff]   ;;  %v4711_v23 = vld [vmem:[%s6372_s1 + $0x4d4] ss:$8 sps:$4 sm:$0xff]  }
  0x95   : > { %3255 = vmatprep.subr.bf16.mxu1 %v4666_v24  ;;  %v4714_v24 = vld [vmem:[%s6372_s1 + $0x5d4] ss:$8 sps:$4 sm:$0xff]   ;;  %v411_v16 = vld [vmem:[%s5053_s17 + $0xe8] sm:$0xff] }
  0x96   : > { %2955 = vmatmul.mubr.bf16.gmra.mxu0 %v4062_v27  ;;  %v488_v27 = vld [vmem:[%s5053_s17 + $0x350] sm:$0xff] }
  0x97   : > { %3068 = vmatmul.mubr.bf16.gmra.mxu1 %v4064_v28  ;;  %3143 = vmatpush1.bf16.msra.mxu0 %v4661_v31  ;;  %v4126_v28 = vcombine.low %v464_v11, %v472_v12  ;;  %v489_v31 = vld [vmem:[%s5053_s17 + $0x358] sm:$0xff]  ;;  %v4142_v43 = vcombine.low %v480_v26, %v488_v27  ;;  %v402_v11 = vld [vmem:[%s5053_s17 + $0xa0] sm:$0xff] }
  0x98   : > { %3256 = vmatpush1.bf16.msra.mxu1 %v4664_v32  ;;  %3144 = vmatprep.subr.bf16.mxu0 %v4669_v33  ;;  %v4712_v32 = vld [vmem:[%s6372_s1 + $0x5d0] ss:$8 sps:$4 sm:$0xff]   ;;  %v4717_v33 = vld [vmem:[%s6372_s1 + $0x4c4] ss:$8 sps:$4 sm:$0xff]  }
  0x99   : > { %3257 = vmatprep.subr.bf16.mxu1 %v4672_v34  ;;  %2964 = vmatprep.mubr.bf16.mxu0 %v4079_v35  ;;  %v4720_v34 = vld [vmem:[%s6372_s1 + $0x5c4] ss:$8 sps:$4 sm:$0xff]   ;;  %v4143_v35 = vcombine.high %v480_v26, %v488_v27  ;;  %v4760_v26 = vld [vmem:[%s6372_s1 + $0x750] ss:$8 sps:$4 sm:$0xff]  }
  0x9a   : > { %3077 = vmatprep.mubr.bf16.mxu1 %v4081_v36  ;;  %v4145_v36 = vcombine.high %v481_v30, %v489_v31  ;;  %v410_v12 = vld [vmem:[%s5053_s17 + $0xe0] sm:$0xff] }
  0x9b   : > { %3145 = vmatpush1.bf16.msra.mxu0 %v4667_v37  ;;  %v4715_v37 = vld [vmem:[%s6372_s1 + $0x4c0] ss:$8 sps:$4 sm:$0xff]  }
  0x9c   : > { %3258 = vmatpush1.bf16.msra.mxu1 %v4670_v38  ;;  %3146 = vmatprep.subr.bf16.mxu0 %v4675_v39  ;;  %v4718_v38 = vld [vmem:[%s6372_s1 + $0x5c0] ss:$8 sps:$4 sm:$0xff]   ;;  %v4723_v39 = vld [vmem:[%s6372_s1 + $0x4b4] ss:$8 sps:$4 sm:$0xff]  }
  0x9d   : > { %3259 = vmatprep.subr.bf16.mxu1 %v4678_v40  ;;  %v4726_v40 = vld [vmem:[%s6372_s1 + $0x5b4] ss:$8 sps:$4 sm:$0xff]   ;;  %v418_v27 = vld [vmem:[%s5053_s17 + $0x120] sm:$0xff] }
  0x9e   : > { %2965 = vmatmul.mubr.bf16.gmra.mxu0 %v4078_v44  ;;  %v4144_v44 = vcombine.low %v481_v30, %v489_v31  ;;  %v4068_v30 = vcombine.low %v403_v15, %v411_v16  ;;  %v419_v31 = vld [vmem:[%s5053_s17 + $0x128] sm:$0xff] }
  0x9f   : > { %3078 = vmatmul.mubr.bf16.gmra.mxu1 %v4080_v45  ;;  %3147 = vmatpush1.bf16.msra.mxu0 %v4673_v41  ;;  %v496_v41 = vld [vmem:[%s5053_s17 + $0x390] sm:$0xff]  ;;  %v497_v45 = vld [vmem:[%s5053_s17 + $0x398] sm:$0xff] }
  0xa0   : > { %3260 = vmatpush1.bf16.msra.mxu1 %v4676_v42  ;;  %3148 = vmatprep.subr.bf16.mxu0 %v4681_v49  ;;  %v504_v42 = vld [vmem:[%s5053_s17 + $0x3d0] sm:$0xff]  ;;  %v4729_v49 = vld [vmem:[%s6372_s1 + $0x4a4] ss:$8 sps:$4 sm:$0xff]  }
  0xa1   : > { %3261 = vmatprep.subr.bf16.mxu1 %v4684_v50  ;;  %2974 = vmatprep.mubr.bf16.mxu0 %v4095_v51  ;;  %v4732_v50 = vld [vmem:[%s6372_s1 + $0x5a4] ss:$8 sps:$4 sm:$0xff]   ;;  %v4159_v51 = vcombine.high %v496_v41, %v504_v42  ;;  %v4158_v60 = vcombine.low %v496_v41, %v504_v42 }
  0xa2   : > { %3087 = vmatprep.mubr.bf16.mxu1 %v4097_v52  ;;  %v4161_v52 = vcombine.high %v497_v45, %v505_v46  ;;  %v434_v41 = vld [vmem:[%s5053_s17 + $0x1a0] sm:$0xff] }
  0xa3   : > { %3149 = vmatpush1.bf16.msra.mxu0 %v4679_v53  ;;  %v4727_v53 = vld [vmem:[%s6372_s1 + $0x4a0] ss:$8 sps:$4 sm:$0xff]  }
  0xa4   : > { %3262 = vmatpush1.bf16.msra.mxu1 %v4682_v54  ;;  %3150 = vmatprep.subr.bf16.mxu0 %v4687_v55  ;;  %v4730_v54 = vld [vmem:[%s6372_s1 + $0x5a0] ss:$8 sps:$4 sm:$0xff]   ;;  %v4735_v55 = vld [vmem:[%s6372_s1 + $0x494] ss:$8 sps:$4 sm:$0xff]  }
  0xa5   : > { %3263 = vmatprep.subr.bf16.mxu1 %v4690_v56  ;;  %v4738_v56 = vld [vmem:[%s6372_s1 + $0x594] ss:$8 sps:$4 sm:$0xff]  }
  0xa6   : > { %2975 = vmatmul.mubr.bf16.gmra.mxu0 %v4094_v61  ;;  %v4160_v61 = vcombine.low %v497_v45, %v505_v46  ;;  %v435_v45 = vld [vmem:[%s5053_s17 + $0x1a8] sm:$0xff] }
  0xa7   : > { %3088 = vmatmul.mubr.bf16.gmra.mxu1 %v4096_v62  ;;  %3151 = vmatpush1.bf16.msra.mxu0 %v4685_v57  ;;  %v4733_v57 = vld [vmem:[%s6372_s1 + $0x490] ss:$8 sps:$4 sm:$0xff]   ;;  %v394_v62 = vld [vmem:[%s5053_s17 + $0x60] sm:$0xff]  ;;  %v443_v46 = vld [vmem:[%s5053_s17 + $0x1e8] sm:$0xff] }
  0xa8   : > { %3264 = vmatpush1.bf16.msra.mxu1 %v4688_v58  ;;  %3152 = vmatprep.subr.bf16.mxu0 %v4693_v1  ;;  %v4736_v58 = vld [vmem:[%s6372_s1 + $0x590] ss:$8 sps:$4 sm:$0xff]   ;;  %v4741_v1 = vld [vmem:[%s6372_s1 + $0x484] ss:$8 sps:$4 sm:$0xff]  }
  0xa9   : > { %3265 = vmatprep.subr.bf16.mxu1 %v4696_v2  ;;  %2984 = vmatprep.mubr.bf16.mxu0 %v4111_v3  ;;  %v4744_v2 = vld [vmem:[%s6372_s1 + $0x584] ss:$8 sps:$4 sm:$0xff]   ;;  %v4051_v3 = vcombine.high %v386_v59, %v394_v62 }
  0xaa   : > { %3097 = vmatprep.mubr.bf16.mxu1 %v4113_v4  ;;  %v4053_v4 = vcombine.high %v387_v63, %v395_v0 }
  0xab   : > { %3153 = vmatpush1.bf16.msra.mxu0 %v4691_v5  ;;  %v4739_v5 = vld [vmem:[%s6372_s1 + $0x480] ss:$8 sps:$4 sm:$0xff]  }
  0xac   : > { %3266 = vmatpush1.bf16.msra.mxu1 %v4694_v6  ;;  %3154 = vmatprep.subr.bf16.mxu0 %v4699_v7  ;;  %v4742_v6 = vld [vmem:[%s6372_s1 + $0x580] ss:$8 sps:$4 sm:$0xff]   ;;  %v4747_v7 = vld [vmem:[%s6372_s1 + $0x674] ss:$8 sps:$4 sm:$0xff]  }
  0xad   : > { %3267 = vmatprep.subr.bf16.mxu1 %v4702_v8  ;;  %v4750_v8 = vld [vmem:[%s6372_s1 + $0x774] ss:$8 sps:$4 sm:$0xff]  }
  0xae   : > { %2985 = vmatmul.mubr.bf16.gmra.mxu0 %v4110_v13  ;;  %v4050_v13 = vcombine.low %v386_v59, %v394_v62  ;;  %v450_v59 = vld [vmem:[%s5053_s17 + $0x220] sm:$0xff] }
  0xaf   : > { %3098 = vmatmul.mubr.bf16.gmra.mxu1 %v4112_v14  ;;  %3155 = vmatpush2.bf16.msra.mxu0 %v4697_v9  ;;  %v4745_v9 = vld [vmem:[%s6372_s1 + $0x670] ss:$8 sps:$4 sm:$0xff]   ;;  %v4052_v14 = vcombine.low %v387_v63, %v395_v0  ;;  %v458_v62 = vld [vmem:[%s5053_s17 + $0x260] sm:$0xff]  ;;  %v451_v63 = vld [vmem:[%s5053_s17 + $0x228] sm:$0xff] }
  0xb0   : > { %3268 = vmatpush2.bf16.msra.mxu1 %v4700_v10  ;;  %3156 = vmatprep.subr.bf16.mxu0 %v4705_v17  ;;  %v4748_v10 = vld [vmem:[%s6372_s1 + $0x770] ss:$8 sps:$4 sm:$0xff]   ;;  %v4753_v17 = vld [vmem:[%s6372_s1 + $0x664] ss:$8 sps:$4 sm:$0xff]  }
  0xb1   : > { %3269 = vmatprep.subr.bf16.mxu1 %v4708_v18  ;;  %2994 = vmatprep.mubr.bf16.mxu0 %v4127_v19  ;;  %v4756_v18 = vld [vmem:[%s6372_s1 + $0x764] ss:$8 sps:$4 sm:$0xff]   ;;  %v4067_v19 = vcombine.high %v402_v11, %v410_v12 }
  0xb2   : > { %3107 = vmatprep.mubr.bf16.mxu1 %v4129_v20  ;;  %v4069_v20 = vcombine.high %v403_v15, %v411_v16  ;;  %v459_v0 = vld [vmem:[%s5053_s17 + $0x268] sm:$0xff] }
  0xb3   : > { %3157 = vmatpush2.bf16.msra.mxu0 %v4703_v21  ;;  %v4751_v21 = vld [vmem:[%s6372_s1 + $0x660] ss:$8 sps:$4 sm:$0xff]  }
  0xb4   : > { %3270 = vmatpush2.bf16.msra.mxu1 %v4706_v22  ;;  %3158 = vmatprep.subr.bf16.mxu0 %v4711_v23  ;;  %v4754_v22 = vld [vmem:[%s6372_s1 + $0x760] ss:$8 sps:$4 sm:$0xff]   ;;  %v4759_v23 = vld [vmem:[%s6372_s1 + $0x654] ss:$8 sps:$4 sm:$0xff]  }
  0xb5   : > { %3271 = vmatprep.subr.bf16.mxu1 %v4714_v24  ;;  %v4762_v24 = vld [vmem:[%s6372_s1 + $0x754] ss:$8 sps:$4 sm:$0xff]   ;;  %v467_v15 = vld [vmem:[%s5053_s17 + $0x2a8] sm:$0xff] }
  0xb6   : > { %2995 = vmatmul.mubr.bf16.gmra.mxu0 %v4126_v28  ;;  %v426_v28 = vld [vmem:[%s5053_s17 + $0x160] sm:$0xff]  ;;  %v475_v16 = vld [vmem:[%s5053_s17 + $0x2e8] sm:$0xff] }
  0xb7   : > { %3108 = vmatmul.mubr.bf16.gmra.mxu1 %v4128_v29  ;;  %3159 = vmatpush2.bf16.msra.mxu0 %v4709_v25  ;;  %v4757_v25 = vld [vmem:[%s6372_s1 + $0x650] ss:$8 sps:$4 sm:$0xff]   ;;  %v4066_v29 = vcombine.low %v402_v11, %v410_v12  ;;  %v4082_v42 = vcombine.low %v418_v27, %v426_v28  ;;  %v466_v11 = vld [vmem:[%s5053_s17 + $0x2a0] sm:$0xff]  ;;  %v4114_v12 = vcombine.low %v450_v59, %v458_v62 }
  0xb8   : > { %3272 = vmatpush2.bf16.msra.mxu1 %v4712_v32  ;;  %3160 = vmatprep.subr.bf16.mxu0 %v4717_v33  ;;  %v427_v32 = vld [vmem:[%s5053_s17 + $0x168] sm:$0xff] }
  0xb9   : > { %3273 = vmatprep.subr.bf16.mxu1 %v4720_v34  ;;  %3004 = vmatprep.mubr.bf16.mxu0 %v4143_v35  ;;  %v4765_v33 = vld [vmem:[%s6372_s1 + $0x644] ss:$8 sps:$4 sm:$0xff]   ;;  %v4083_v35 = vcombine.high %v418_v27, %v426_v28 }
  0xba   : > { %3117 = vmatprep.mubr.bf16.mxu1 %v4145_v36  ;;  %v4768_v34 = vld [vmem:[%s6372_s1 + $0x744] ss:$8 sps:$4 sm:$0xff]   ;;  %v4085_v36 = vcombine.high %v419_v31, %v427_v32 }
  0xbb   : > { %3161 = vmatpush2.bf16.msra.mxu0 %v4715_v37  ;;  %v4763_v37 = vld [vmem:[%s6372_s1 + $0x640] ss:$8 sps:$4 sm:$0xff]  }
  0xbc   : > { %3274 = vmatpush2.bf16.msra.mxu1 %v4718_v38  ;;  %3162 = vmatprep.subr.bf16.mxu0 %v4723_v39  ;;  %v4766_v38 = vld [vmem:[%s6372_s1 + $0x740] ss:$8 sps:$4 sm:$0xff]   ;;  %v4771_v39 = vld [vmem:[%s6372_s1 + $0x634] ss:$8 sps:$4 sm:$0xff]  }
  0xbd   : > { %3275 = vmatprep.subr.bf16.mxu1 %v4726_v40  ;;  %v4774_v40 = vld [vmem:[%s6372_s1 + $0x734] ss:$8 sps:$4 sm:$0xff]   ;;  %v482_v27 = vld [vmem:[%s5053_s17 + $0x320] sm:$0xff] }
  0xbe   : > { %3005 = vmatmul.mubr.bf16.gmra.mxu0 %v4142_v43  ;;  %v4084_v43 = vcombine.low %v419_v31, %v427_v32  ;;  %v483_v31 = vld [vmem:[%s5053_s17 + $0x328] sm:$0xff] }
  0xbf   : > { %3118 = vmatmul.mubr.bf16.gmra.mxu1 %v4144_v44  ;;  %3163 = vmatpush2.bf16.msra.mxu0 %v4721_v47  ;;  %v442_v44 = vld [vmem:[%s5053_s17 + $0x1e0] sm:$0xff]  ;;  %v4865_v47 = vmov 0   ;;  %v491_v32 = vld [vmem:[%s5053_s17 + $0x368] sm:$0xff] }
  0xc0   : > { %3276 = vmatpush2.bf16.msra.mxu1 %v4724_v48  ;;  %3164 = vmatprep.subr.bf16.mxu0 %v4729_v49  ;;  %v4769_v48 = vld [vmem:[%s6372_s1 + $0x630] ss:$8 sps:$4 sm:$0xff]  }
  0xc1   : > { %3277 = vmatprep.subr.bf16.mxu1 %v4732_v50  ;;  %3014 = vmatprep.mubr.bf16.mxu0 %v4159_v51  ;;  %v4772_v49 = vld [vmem:[%s6372_s1 + $0x730] ss:$8 sps:$4 sm:$0xff]   ;;  %v4777_v50 = vld [vmem:[%s6372_s1 + $0x624] ss:$8 sps:$4 sm:$0xff]  }
  0xc2   : > { %3127 = vmatprep.mubr.bf16.mxu1 %v4161_v52  ;;  %4456 = vset.pattern.permute.xlu0 %v4865_v47  ;;  %v4780_v51 = vld [vmem:[%s6372_s1 + $0x724] ss:$8 sps:$4 sm:$0xff]   ;;  %v4099_v52 = vcombine.high %v434_v41, %v442_v44 }
  0xc3   : > { %3165 = vmatpush2.bf16.msra.mxu0 %v4727_v53  ;;  %v4101_v53 = vcombine.high %v435_v45, %v443_v46  ;;  %v499_v47 = vld [vmem:[%s5053_s17 + $0x3a8] sm:$0xff] }
  0xc4   : > { %3278 = vmatpush2.bf16.msra.mxu1 %v4730_v54  ;;  %3166 = vmatprep.subr.bf16.mxu0 %v4735_v55  ;;  %v4775_v54 = vld [vmem:[%s6372_s1 + $0x620] ss:$8 sps:$4 sm:$0xff]  }
  0xc5   : > { %3279 = vmatprep.subr.bf16.mxu1 %v4738_v56  ;;  %v4778_v55 = vld [vmem:[%s6372_s1 + $0x720] ss:$8 sps:$4 sm:$0xff]   ;;  %v4783_v56 = vld [vmem:[%s6372_s1 + $0x614] ss:$8 sps:$4 sm:$0xff]  }
  0xc6   : > { %3015 = vmatmul.mubr.bf16.gmra.mxu0 %v4158_v60  ;;  %v4098_v60 = vcombine.low %v434_v41, %v442_v44  ;;  %v4819_v41 = vld [vmem:[%s6372_s1 + $0x6b4] ss:$8 sps:$4 sm:$0xff]  }
  0xc7   : > { %3128 = vmatmul.mubr.bf16.gmra.mxu1 %v4160_v61  ;;  %3167 = vmatpush2.bf16.msra.mxu0 %v4733_v57  ;;  %v4786_v57 = vld [vmem:[%s6372_s1 + $0x714] ss:$8 sps:$4 sm:$0xff]   ;;  %v4100_v61 = vcombine.low %v435_v45, %v443_v46  ;;  %v4148_v45 = vcombine.low %v483_v31, %v491_v32  ;;  %v506_v46 = vld [vmem:[%s5053_s17 + $0x3e0] sm:$0xff] }
  0xc8   : > { %3280 = vmatpush2.bf16.msra.mxu1 %v4736_v58  ;;  %3168 = vmatprep.subr.bf16.mxu0 %v4741_v1  ;;  %v4426_v58 = vld [vmem:[#allocation3] ss:$0 sm:$0xff]  ;;  %v4781_v1 = vld [vmem:[%s6372_s1 + $0x610] ss:$8 sps:$4 sm:$0xff]  }
  0xc9   : > { %3281 = vmatprep.subr.bf16.mxu1 %v4744_v2  ;;  %3170 = vmatprep.mubr.bf16.mxu0 %v4051_v3  ;;  %v4784_v2 = vld [vmem:[%s6372_s1 + $0x710] ss:$8 sps:$4 sm:$0xff]   ;;  %v4789_v3 = vld [vmem:[%s6372_s1 + $0x604] ss:$8 sps:$4 sm:$0xff]  }
  0xca   : > { %3283 = vmatprep.mubr.bf16.mxu1 %v4053_v4  ;;  %3696 = vperm.xlu0 %4456, %v4426_v58   ;;  %v4792_v4 = vld [vmem:[%s6372_s1 + $0x704] ss:$8 sps:$4 sm:$0xff]   ;;  %v4834_v58 = vld [vmem:[%s6372_s1 + $0x794] ss:$8 sps:$4 sm:$0xff]  }
  0xcb   : > { %3169 = vmatpush2.bf16.msra.mxu0 %v4739_v5  ;;  %v4115_v5 = vcombine.high %v450_v59, %v458_v62  ;;  %v388_v59 = vld [vmem:[%s5053_s17 + $0x30] sm:$0xff] }
  0xcc   : > { %3282 = vmatpush2.bf16.msra.mxu1 %v4742_v6  ;;  %3364 = vmatprep.subr.bf16.mxu0 %v4747_v7  ;;  %v4117_v6 = vcombine.high %v451_v63, %v459_v0  ;;  %v4787_v7 = vld [vmem:[%s6372_s1 + $0x600] ss:$8 sps:$4 sm:$0xff]   ;;  %v396_v62 = vld [vmem:[%s5053_s17 + $0x70] sm:$0xff] }
  0xcd   : > { %3477 = vmatprep.subr.bf16.mxu1 %v4750_v8  ;;  %v4790_v8 = vld [vmem:[%s6372_s1 + $0x700] ss:$8 sps:$4 sm:$0xff]  }
  0xce   : > { %3171 = vmatmul.mubr.bf16.vlgmr.msra.gmra.mxu0 %v4050_v13  ;;  %v4116_v13 = vcombine.low %v451_v63, %v459_v0  ;;  %v389_v63 = vld [vmem:[%s5053_s17 + $0x38] sm:$0xff] }
  0xcf   : > { %3284 = vmatmul.mubr.bf16.vlgmr.msra.gmra.mxu1 %v4052_v14  ;;  %3365 = vmatpush1.bf16.msra.mxu0 %v4745_v9  ;;  %v4795_v9 = vld [vmem:[%s6372_s1 + $0x6f4] ss:$8 sps:$4 sm:$0xff]   ;;  %v474_v14 = vld [vmem:[%s5053_s17 + $0x2e0] sm:$0xff] }
  0xd0   : > { %3478 = vmatpush1.bf16.msra.mxu1 %v4748_v10  ;;  %3366 = vmatprep.subr.bf16.mxu0 %v4753_v17  ;;  %v4798_v10 = vld [vmem:[%s6372_s1 + $0x7f4] ss:$8 sps:$4 sm:$0xff]   ;;  %v4793_v17 = vld [vmem:[%s6372_s1 + $0x6f0] ss:$8 sps:$4 sm:$0xff]   ;;  %v4130_v28 = vcombine.low %v466_v11, %v474_v14 }
  0xd1   : > { %3479 = vmatprep.subr.bf16.mxu1 %v4756_v18  ;;  %3180 = vmatprep.mubr.bf16.mxu0 %v4067_v19  ;;  %v4796_v18 = vld [vmem:[%s6372_s1 + $0x7f0] ss:$8 sps:$4 sm:$0xff]   ;;  %v4801_v19 = vld [vmem:[%s6372_s1 + $0x6e4] ss:$8 sps:$4 sm:$0xff]  }
  0xd2   : > { %3293 = vmatprep.mubr.bf16.mxu1 %v4069_v20  ;;  %v4804_v20 = vld [vmem:[%s6372_s1 + $0x7e4] ss:$8 sps:$4 sm:$0xff]   ;;  %v397_v0 = vld [vmem:[%s5053_s17 + $0x78] sm:$0xff] }
  0xd3   : > { %3367 = vmatpush1.bf16.msra.mxu0 %v4751_v21  ;;  %v4131_v21 = vcombine.high %v466_v11, %v474_v14  ;;  %v405_v11 = vld [vmem:[%s5053_s17 + $0xb8] sm:$0xff]  ;;  %v4056_v14 = vcombine.low %v389_v63, %v397_v0 }
  0xd4   : > { %3480 = vmatpush1.bf16.msra.mxu1 %v4754_v22  ;;  %3368 = vmatprep.subr.bf16.mxu0 %v4759_v23  ;;  %v4133_v22 = vcombine.high %v467_v15, %v475_v16  ;;  %v4799_v23 = vld [vmem:[%s6372_s1 + $0x6e0] ss:$8 sps:$4 sm:$0xff]  }
  0xd5   : > { %3481 = vmatprep.subr.bf16.mxu1 %v4762_v24  ;;  %v4802_v24 = vld [vmem:[%s6372_s1 + $0x7e0] ss:$8 sps:$4 sm:$0xff]  }
  0xd6   : > { %3181 = vmatmul.mubr.bf16.gmra.mxu0 %v4066_v29  ;;  %v4132_v29 = vcombine.low %v467_v15, %v475_v16 }
  0xd7   : > { %3294 = vmatmul.mubr.bf16.gmra.mxu1 %v4068_v30  ;;  %3369 = vmatpush1.bf16.msra.mxu0 %v4757_v25  ;;  %v4807_v25 = vld [vmem:[%s6372_s1 + $0x6d4] ss:$8 sps:$4 sm:$0xff]   ;;  %v490_v30 = vld [vmem:[%s5053_s17 + $0x360] sm:$0xff] }
  0xd8   : > { %3482 = vmatpush1.bf16.msra.mxu1 %v4760_v26  ;;  %3370 = vmatprep.subr.bf16.mxu0 %v4765_v33  ;;  %v4810_v26 = vld [vmem:[%s6372_s1 + $0x7d4] ss:$8 sps:$4 sm:$0xff]   ;;  %v4805_v33 = vld [vmem:[%s6372_s1 + $0x6d0] ss:$8 sps:$4 sm:$0xff]   ;;  %v4146_v44 = vcombine.low %v482_v27, %v490_v30 }
  0xd9   : > { %3483 = vmatprep.subr.bf16.mxu1 %v4768_v34  ;;  %3190 = vmatprep.mubr.bf16.mxu0 %v4083_v35  ;;  %v4808_v34 = vld [vmem:[%s6372_s1 + $0x7d0] ss:$8 sps:$4 sm:$0xff]   ;;  %v4813_v35 = vld [vmem:[%s6372_s1 + $0x6c4] ss:$8 sps:$4 sm:$0xff]  }
  0xda   : > { %3303 = vmatprep.mubr.bf16.mxu1 %v4085_v36  ;;  %v4816_v36 = vld [vmem:[%s6372_s1 + $0x7c4] ss:$8 sps:$4 sm:$0xff]  }
  0xdb   : > { %3371 = vmatpush1.bf16.msra.mxu0 %v4763_v37  ;;  %v4147_v37 = vcombine.high %v482_v27, %v490_v30 }
  0xdc   : > { %3484 = vmatpush1.bf16.msra.mxu1 %v4766_v38  ;;  %3372 = vmatprep.subr.bf16.mxu0 %v4771_v39  ;;  %v4149_v38 = vcombine.high %v483_v31, %v491_v32  ;;  %v4811_v39 = vld [vmem:[%s6372_s1 + $0x6c0] ss:$8 sps:$4 sm:$0xff]  }
  0xdd   : > { %3485 = vmatprep.subr.bf16.mxu1 %v4774_v40  ;;  %v4814_v40 = vld [vmem:[%s6372_s1 + $0x7c0] ss:$8 sps:$4 sm:$0xff]  }
  0xde   : > { %3191 = vmatmul.mubr.bf16.gmra.mxu0 %v4082_v42  ;;  %v4822_v42 = vld [vmem:[%s6372_s1 + $0x7b4] ss:$8 sps:$4 sm:$0xff]  }
  0xdf   : > { %3304 = vmatmul.mubr.bf16.gmra.mxu1 %v4084_v43  ;;  %3373 = vmatpush1.bf16.msra.mxu0 %v4769_v48  ;;  %v498_v43 = vld [vmem:[%s5053_s17 + $0x3a0] sm:$0xff]  ;;  %v507_v48 = vld [vmem:[%s5053_s17 + $0x3e8] sm:$0xff] }
  0xe0   : > { %3486 = vmatpush1.bf16.msra.mxu1 %v4772_v49  ;;  %3374 = vmatprep.subr.bf16.mxu0 %v4777_v50  ;;  %v4817_v49 = vld [vmem:[%s6372_s1 + $0x6b0] ss:$8 sps:$4 sm:$0xff]  }
  0xe1   : > { %3487 = vmatprep.subr.bf16.mxu1 %v4780_v51  ;;  %3200 = vmatprep.mubr.bf16.mxu0 %v4099_v52  ;;  %v4820_v50 = vld [vmem:[%s6372_s1 + $0x7b0] ss:$8 sps:$4 sm:$0xff]   ;;  %v4825_v51 = vld [vmem:[%s6372_s1 + $0x6a4] ss:$8 sps:$4 sm:$0xff]  }
  0xe2   : > { %3313 = vmatprep.mubr.bf16.mxu1 %v4101_v53  ;;  %v4828_v52 = vld [vmem:[%s6372_s1 + $0x7a4] ss:$8 sps:$4 sm:$0xff]   ;;  %v4163_v53 = vcombine.high %v498_v43, %v506_v46 }
  0xe3   : > { %3375 = vmatpush1.bf16.msra.mxu0 %v4775_v54  ;;  %v4165_v54 = vcombine.high %v499_v47, %v507_v48 }
  0xe4   : > { %3488 = vmatpush1.bf16.msra.mxu1 %v4778_v55  ;;  %3376 = vmatprep.subr.bf16.mxu0 %v4783_v56  ;;  %v4823_v55 = vld [vmem:[%s6372_s1 + $0x6a0] ss:$8 sps:$4 sm:$0xff]  }
  0xe5   : > { %3489 = vmatprep.subr.bf16.mxu1 %v4786_v57  ;;  %v4826_v56 = vld [vmem:[%s6372_s1 + $0x7a0] ss:$8 sps:$4 sm:$0xff]   ;;  %v4831_v57 = vld [vmem:[%s6372_s1 + $0x694] ss:$8 sps:$4 sm:$0xff]  }
  0xe6   : > { %3201 = vmatmul.mubr.bf16.gmra.mxu0 %v4098_v60  ;;  %v4162_v60 = vcombine.low %v498_v43, %v506_v46  ;;  %v444_v43 = vld [vmem:[%s5053_s17 + $0x1f0] sm:$0xff] }
  0xe7   : > { %3314 = vmatmul.mubr.bf16.gmra.mxu1 %v4100_v61  ;;  %3377 = vmatpush1.bf16.msra.mxu0 %v4781_v1  ;;  %v4164_v61 = vcombine.low %v499_v47, %v507_v48  ;;  %v4829_v1 = vld [vmem:[%s6372_s1 + $0x690] ss:$8 sps:$4 sm:$0xff]  }
  0xe8   : > { %3490 = vmatpush1.bf16.msra.mxu1 %v4784_v2  ;;  %3378 = vmatprep.subr.bf16.mxu0 %v4789_v3  ;;  %v4832_v2 = vld [vmem:[%s6372_s1 + $0x790] ss:$8 sps:$4 sm:$0xff]   ;;  %v4837_v3 = vld [vmem:[%s6372_s1 + $0x684] ss:$8 sps:$4 sm:$0xff]  }
  0xe9   : > { %3491 = vmatprep.subr.bf16.mxu1 %v4792_v4  ;;  %3210 = vmatprep.mubr.bf16.mxu0 %v4115_v5  ;;  %v4840_v4 = vld [vmem:[%s6372_s1 + $0x784] ss:$8 sps:$4 sm:$0xff]   ;;  %v4055_v5 = vcombine.high %v388_v59, %v396_v62 }
  0xea   : > { %3323 = vmatprep.mubr.bf16.mxu1 %v4117_v6  ;;  %v4057_v6 = vcombine.high %v389_v63, %v397_v0  ;;  %v460_v63 = vld [vmem:[%s5053_s17 + $0x270] sm:$0xff]  ;;  %v453_v0 = vld [vmem:[%s5053_s17 + $0x238] sm:$0xff] }
  0xeb   : > { %3379 = vmatpush1.bf16.msra.mxu0 %v4787_v7  ;;  %v4835_v7 = vld [vmem:[%s6372_s1 + $0x680] ss:$8 sps:$4 sm:$0xff]  }
  0xec   : > { %3492 = vmatpush1.bf16.msra.mxu1 %v4790_v8  ;;  %3380 = vmatprep.subr.bf16.mxu0 %v4795_v9  ;;  %v4838_v8 = vld [vmem:[%s6372_s1 + $0x780] ss:$8 sps:$4 sm:$0xff]   ;;  %v404_v9 = vld [vmem:[%s5053_s17 + $0xb0] sm:$0xff] }
  0xed   : > { %3493 = vmatprep.subr.bf16.mxu1 %v4798_v10  ;;  %v412_v10 = vld [vmem:[%s5053_s17 + $0xf0] sm:$0xff] }
  0xee   : > { %3211 = vmatmul.mubr.bf16.gmra.mxu0 %v4114_v12  ;;  %v413_v12 = vld [vmem:[%s5053_s17 + $0xf8] sm:$0xff]  ;;  %v4071_v15 = vcombine.high %v404_v9, %v412_v10 }
  0xef   : > { %3324 = vmatmul.mubr.bf16.gmra.mxu1 %v4116_v13  ;;  %3381 = vmatpush2.bf16.msra.mxu0 %v4793_v17  ;;  %v4054_v13 = vcombine.low %v388_v59, %v396_v62  ;;  %v4073_v16 = vcombine.high %v405_v11, %v413_v12  ;;  %v4072_v30 = vcombine.low %v405_v11, %v413_v12 }
  0xf0   : > { %3494 = vmatpush2.bf16.msra.mxu1 %v4796_v18  ;;  %3382 = vmatprep.subr.bf16.mxu0 %v4801_v19 }
  0xf1   : > { %3495 = vmatprep.subr.bf16.mxu1 %v4804_v20  ;;  %3220 = vmatprep.mubr.bf16.mxu0 %v4131_v21  ;;  %v420_v20 = vld [vmem:[%s5053_s17 + $0x130] sm:$0xff] }
  0xf2   : > { %3333 = vmatprep.mubr.bf16.mxu1 %v4133_v22 }
  0xf3   : > { %3383 = vmatpush2.bf16.msra.mxu0 %v4799_v23  ;;  %v428_v23 = vld [vmem:[%s5053_s17 + $0x170] sm:$0xff] }
  0xf4   : > { %3496 = vmatpush2.bf16.msra.mxu1 %v4802_v24  ;;  %3384 = vmatprep.subr.bf16.mxu0 %v4807_v25  ;;  %v421_v24 = vld [vmem:[%s5053_s17 + $0x138] sm:$0xff]  ;;  %v4087_v32 = vcombine.high %v420_v20, %v428_v23 }
  0xf5   : > { %3497 = vmatprep.subr.bf16.mxu1 %v4810_v26  ;;  %v429_v25 = vld [vmem:[%s5053_s17 + $0x178] sm:$0xff] }
  0xf6   : > { %3221 = vmatmul.mubr.bf16.gmra.mxu0 %v4130_v28 }
  0xf7   : > { %3334 = vmatmul.mubr.bf16.gmra.mxu1 %v4132_v29  ;;  %3385 = vmatpush2.bf16.msra.mxu0 %v4805_v33  ;;  %v4070_v29 = vcombine.low %v404_v9, %v412_v10  ;;  %v4089_v33 = vcombine.high %v421_v24, %v429_v25 }
  0xf8   : > { %3498 = vmatpush2.bf16.msra.mxu1 %v4808_v34  ;;  %3386 = vmatprep.subr.bf16.mxu0 %v4813_v35 }
  0xf9   : > { %3499 = vmatprep.subr.bf16.mxu1 %v4816_v36  ;;  %3230 = vmatprep.mubr.bf16.mxu0 %v4147_v37 }
  0xfa   : > { %3343 = vmatprep.mubr.bf16.mxu1 %v4149_v38 }
  0xfb   : > { %3387 = vmatpush2.bf16.msra.mxu0 %v4811_v39 }
  0xfc   : > { %3500 = vmatpush2.bf16.msra.mxu1 %v4814_v40  ;;  %3388 = vmatprep.subr.bf16.mxu0 %v4819_v41  ;;  %v436_v40 = vld [vmem:[%s5053_s17 + $0x1b0] sm:$0xff] }
  0xfd   : > { %3501 = vmatprep.subr.bf16.mxu1 %v4822_v42 }
  0xfe   : > { %3231 = vmatmul.mubr.bf16.gmra.mxu0 %v4146_v44  ;;  %v437_v44 = vld [vmem:[%s5053_s17 + $0x1b8] sm:$0xff] }
  0xff   : > { %3344 = vmatmul.mubr.bf16.gmra.mxu1 %v4148_v45  ;;  %3389 = vmatpush2.bf16.msra.mxu0 %v4817_v49  ;;  %v445_v45 = vld [vmem:[%s5053_s17 + $0x1f8] sm:$0xff]  ;;  %v4086_v49 = vcombine.low %v420_v20, %v428_v23  ;;  %v476_v20 = vld [vmem:[%s5053_s17 + $0x2f0] sm:$0xff] }
 0x100   : > { %3502 = vmatpush2.bf16.msra.mxu1 %v4820_v50  ;;  %3390 = vmatprep.subr.bf16.mxu0 %v4825_v51  ;;  %v4088_v50 = vcombine.low %v421_v24, %v429_v25 }
 0x101   : > { %3503 = vmatprep.subr.bf16.mxu1 %v4828_v52  ;;  %3240 = vmatprep.mubr.bf16.mxu0 %v4163_v53  ;;  %v4103_v52 = vcombine.high %v436_v40, %v444_v43  ;;  %v4105_v53 = vcombine.high %v437_v44, %v445_v45 }
 0x102   : > { %3353 = vmatprep.mubr.bf16.mxu1 %v4165_v54 }
 0x103   : > { %3391 = vmatpush2.bf16.msra.mxu0 %v4823_v55 }
 0x104   : > { %3504 = vmatpush2.bf16.msra.mxu1 %v4826_v56  ;;  %3392 = vmatprep.subr.bf16.mxu0 %v4831_v57 }
 0x105   : > { %3505 = vmatprep.subr.bf16.mxu1 %v4834_v58 }
 0x106   : > { %3241 = vmatmul.mubr.bf16.gmra.mxu0 %v4162_v60  ;;  %v452_v60 = vld [vmem:[%s5053_s17 + $0x230] sm:$0xff] }
 0x107   : > { %3354 = vmatmul.mubr.bf16.gmra.mxu1 %v4164_v61  ;;  %3393 = vmatpush2.bf16.msra.mxu0 %v4829_v1  ;;  %v461_v1 = vld [vmem:[%s5053_s17 + $0x278] sm:$0xff] }
 0x108   : > { %3506 = vmatpush2.bf16.msra.mxu1 %v4832_v2  ;;  %3394 = vmatprep.subr.bf16.mxu0 %v4837_v3  ;;  %v4121_v9 = vcombine.high %v453_v0, %v461_v1 }
 0x109   : > { %3507 = vmatprep.subr.bf16.mxu1 %v4840_v4  ;;  %3396 = vmatprep.mubr.bf16.mxu0 %v4055_v5  ;;  %v4102_v5 = vcombine.low %v436_v40, %v444_v43 }
 0x10a   : > { %3509 = vmatprep.mubr.bf16.mxu1 %v4057_v6  ;;  %v4104_v6 = vcombine.low %v437_v44, %v445_v45  ;;  %v492_v44 = vld [vmem:[%s5053_s17 + $0x370] sm:$0xff]  ;;  %v485_v45 = vld [vmem:[%s5053_s17 + $0x338] sm:$0xff] }
 0x10b   : > { %3395 = vmatpush2.bf16.msra.mxu0 %v4835_v7 }
 0x10c   : > { %3508 = vmatpush2.bf16.msra.mxu1 %v4838_v8  ;;  %v4119_v8 = vcombine.high %v452_v60, %v460_v63 }
 0x10e   : > { %v2720_v17 = vpop.f32.mrf.mxu0  ;;  %3397 = vmatmul.mubr.bf16.vlgmr.msra.gmra.mxu0 %v4054_v13 }
 0x10f   : > { %v2833_v18 = vpop.f32.mrf.mxu1  ;;  %3510 = vmatmul.mubr.bf16.vlgmr.msra.gmra.mxu1 %v4056_v14  ;;  %3406 = vmatprep.mubr.bf16.mxu0 %v4071_v15 }
 0x110   : > { %v5795_v19 = vadd.f32 %v2833_v18, %v2720_v17  ;;  %3519 = vmatprep.mubr.bf16.mxu1 %v4073_v16  ;;  %v2722_v21 = vpop.f32.mrf.mxu0  ;;  %v468_v16 = vld [vmem:[%s5053_s17 + $0x2b0] sm:$0xff] }
 0x111   : > { %v2835_v22 = vpop.f32.mrf.mxu1 }
 0x112   : > { %v5801_v26 = vadd.f32 %v2835_v22, %v2722_v21  ;;  %v2724_v27 = vpop.f32.mrf.mxu0  ;;  %v469_v21 = vld [vmem:[%s5053_s17 + $0x2b8] sm:$0xff] }
 0x113   : > { %v2837_v28 = vpop.f32.mrf.mxu1  ;;  %v477_v22 = vld [vmem:[%s5053_s17 + $0x2f8] sm:$0xff] }
 0x114   : > { %v5803_v31 = vadd.f32 %v2837_v28, %v2724_v27  ;;  %v2726_v34 = vpop.f32.mrf.mxu0  ;;  %v4118_v27 = vcombine.low %v452_v60, %v460_v63  ;;  %v4120_v28 = vcombine.low %v453_v0, %v461_v1  ;;  %v500_v1 = vld [vmem:[%s5053_s17 + $0x3b0] sm:$0xff] }
 0x115   : > { %v2839_v35 = vpop.f32.mrf.mxu1 }
 0x116   : > { %v5805_v36 = vadd.f32 %v2839_v35, %v2726_v34  ;;  %v2730_v37 = vpop.f32.mrf.mxu0  ;;  %3407 = vmatmul.mubr.bf16.gmra.mxu0 %v4070_v29 }
 0x117   : > { %v2843_v38 = vpop.f32.mrf.mxu1  ;;  %3520 = vmatmul.mubr.bf16.gmra.mxu1 %v4072_v30  ;;  %3416 = vmatprep.mubr.bf16.mxu0 %v4087_v32  ;;  %v4135_v30 = vcombine.high %v468_v16, %v476_v20  ;;  %v4137_v32 = vcombine.high %v469_v21, %v477_v22 }
 0x118   : > { %v5807_v39 = vadd.f32 %v2843_v38, %v2730_v37  ;;  %3529 = vmatprep.mubr.bf16.mxu1 %v4089_v33  ;;  %v2732_v41 = vpop.f32.mrf.mxu0 }
 0x119   : > { %v2845_v42 = vpop.f32.mrf.mxu1 }
 0x11a   : > { %v5813_v46 = vadd.f32 %v2845_v42, %v2732_v41  ;;  %v2734_v47 = vpop.f32.mrf.mxu0  ;;  %v484_v41 = vld [vmem:[%s5053_s17 + $0x330] sm:$0xff] }
 0x11b   : > { %v2847_v48 = vpop.f32.mrf.mxu1 }
 0x11c   : > { %v5815_v51 = vadd.f32 %v2847_v48, %v2734_v47  ;;  %v2736_v54 = vpop.f32.mrf.mxu0  ;;  %v493_v47 = vld [vmem:[%s5053_s17 + $0x378] sm:$0xff] }
 0x11d   : > { %v2849_v55 = vpop.f32.mrf.mxu1 }
 0x11e   : > { %v5817_v56 = vadd.f32 %v2849_v55, %v2736_v54  ;;  %v2740_v57 = vpop.f32.mrf.mxu0  ;;  %3417 = vmatmul.mubr.bf16.gmra.mxu0 %v4086_v49  ;;  %v4151_v55 = vcombine.high %v484_v41, %v492_v44 }
 0x11f   : > { %v2853_v58 = vpop.f32.mrf.mxu1  ;;  %3530 = vmatmul.mubr.bf16.gmra.mxu1 %v4088_v50  ;;  %3426 = vmatprep.mubr.bf16.mxu0 %v4103_v52  ;;  %v4134_v52 = vcombine.low %v468_v16, %v476_v20 }
 0x120   : > { %v5819_v59 = vadd.f32 %v2853_v58, %v2740_v57  ;;  %3539 = vmatprep.mubr.bf16.mxu1 %v4105_v53  ;;  %v2742_v61 = vpop.f32.mrf.mxu0  ;;  %v4136_v53 = vcombine.low %v469_v21, %v477_v22  ;;  %v4153_v57 = vcombine.high %v485_v45, %v493_v47 }
 0x121   : > { %v2855_v62 = vpop.f32.mrf.mxu1 }
 0x122   : > { %v5825_v2 = vadd.f32 %v2855_v62, %v2742_v61  ;;  %v2744_v3 = vpop.f32.mrf.mxu0 }
 0x123   : > { %v2857_v4 = vpop.f32.mrf.mxu1 }
 0x124   : > { %v5827_v7 = vadd.f32 %v2857_v4, %v2744_v3  ;;  %v2746_v10 = vpop.f32.mrf.mxu0 }
 0x125   : > { %v2859_v11 = vpop.f32.mrf.mxu1 }
 0x126   : > { %v5829_v12 = vadd.f32 %v2859_v11, %v2746_v10  ;;  %v2750_v13 = vpop.f32.mrf.mxu0  ;;  %3427 = vmatmul.mubr.bf16.gmra.mxu0 %v4102_v5  ;;  %v508_v5 = vld [vmem:[%s5053_s17 + $0x3f0] sm:$0xff] }
 0x127   : > { %v2863_v14 = vpop.f32.mrf.mxu1  ;;  %3540 = vmatmul.mubr.bf16.gmra.mxu1 %v4104_v6  ;;  %3436 = vmatprep.mubr.bf16.mxu0 %v4119_v8  ;;  %v501_v6 = vld [vmem:[%s5053_s17 + $0x3b8] sm:$0xff] }
 0x128   : > { %v5831_v15 = vadd.f32 %v2863_v14, %v2750_v13  ;;  %3549 = vmatprep.mubr.bf16.mxu1 %v4121_v9  ;;  %v2752_v17 = vpop.f32.mrf.mxu0  ;;  %v509_v8 = vld [vmem:[%s5053_s17 + $0x3f8] sm:$0xff]  ;;  %v4150_v13 = vcombine.low %v484_v41, %v492_v44  ;;  %v4152_v14 = vcombine.low %v485_v45, %v493_v47 }
 0x129   : > { %v2865_v18 = vpop.f32.mrf.mxu1 }
 0x12a   : > { %v5837_v23 = vadd.f32 %v2865_v18, %v2752_v17  ;;  %v2754_v24 = vpop.f32.mrf.mxu0  ;;  %v4167_v17 = vcombine.high %v500_v1, %v508_v5  ;;  %v4169_v18 = vcombine.high %v501_v6, %v509_v8 }
 0x12b   : > { %v2867_v25 = vpop.f32.mrf.mxu1 }
 0x12c   : > { %v5839_v29 = vadd.f32 %v2867_v25, %v2754_v24  ;;  %v2756_v33 = vpop.f32.mrf.mxu0 }
 0x12d   : > { %v2869_v34 = vpop.f32.mrf.mxu1 }
 0x12e   : > { %v5841_v35 = vadd.f32 %v2869_v34, %v2756_v33  ;;  %v2760_v37 = vpop.f32.mrf.mxu0  ;;  %3437 = vmatmul.mubr.bf16.gmra.mxu0 %v4118_v27 }
 0x12f   : > { %v2873_v38 = vpop.f32.mrf.mxu1  ;;  %3550 = vmatmul.mubr.bf16.gmra.mxu1 %v4120_v28  ;;  %3446 = vmatprep.mubr.bf16.mxu0 %v4135_v30 }
 0x130   : > { %v5843_v40 = vadd.f32 %v2873_v38, %v2760_v37  ;;  %3559 = vmatprep.mubr.bf16.mxu1 %v4137_v32  ;;  %v2762_v42 = vpop.f32.mrf.mxu0  ;;  %v4166_v37 = vcombine.low %v500_v1, %v508_v5  ;;  %v4168_v38 = vcombine.low %v501_v6, %v509_v8 }
 0x131   : > { %v2875_v43 = vpop.f32.mrf.mxu1 }
 0x132   : > { %v5849_v48 = vadd.f32 %v2875_v43, %v2762_v42  ;;  %v2764_v49 = vpop.f32.mrf.mxu0 }
 0x133   : > { %v2877_v50 = vpop.f32.mrf.mxu1 }
 0x134   : > { %v5851_v54 = vadd.f32 %v2877_v50, %v2764_v49  ;;  %v2766_v58 = vpop.f32.mrf.mxu0 }
 0x135   : > { %v2879_v60 = vpop.f32.mrf.mxu1 }
 0x136   : > { %v5853_v61 = vadd.f32 %v2879_v60, %v2766_v58  ;;  %v2770_v62 = vpop.f32.mrf.mxu0  ;;  %3447 = vmatmul.mubr.bf16.gmra.mxu0 %v4134_v52 }
 0x137   : > { %v2883_v63 = vpop.f32.mrf.mxu1  ;;  %3560 = vmatmul.mubr.bf16.gmra.mxu1 %v4136_v53  ;;  %3456 = vmatprep.mubr.bf16.mxu0 %v4151_v55 }
 0x138   : > { %v5855_v0 = vadd.f32 %v2883_v63, %v2770_v62  ;;  %3569 = vmatprep.mubr.bf16.mxu1 %v4153_v57  ;;  %v2772_v3 = vpop.f32.mrf.mxu0 }
 0x139   : > { %v2885_v4 = vpop.f32.mrf.mxu1 }
 0x13a   : > { %v5861_v9 = vadd.f32 %v2885_v4, %v2772_v3  ;;  %v2774_v10 = vpop.f32.mrf.mxu0 }
 0x13b   : > { %v2887_v11 = vpop.f32.mrf.mxu1 }
 0x13c   : > { %v5863_v16 = vadd.f32 %v2887_v11, %v2774_v10  ;;  %v2776_v20 = vpop.f32.mrf.mxu0 }
 0x13d   : > { %v2889_v21 = vpop.f32.mrf.mxu1 }
 0x13e   : > { %v5865_v22 = vadd.f32 %v2889_v21, %v2776_v20  ;;  %v2780_v24 = vpop.f32.mrf.mxu0  ;;  %3457 = vmatmul.mubr.bf16.gmra.mxu0 %v4150_v13 }
 0x13f   : > { %v2893_v25 = vpop.f32.mrf.mxu1  ;;  %3570 = vmatmul.mubr.bf16.gmra.mxu1 %v4152_v14  ;;  %3466 = vmatprep.mubr.bf16.mxu0 %v4167_v17 }
 0x140   : > { %v5867_v27 = vadd.f32 %v2893_v25, %v2780_v24  ;;  %3579 = vmatprep.mubr.bf16.mxu1 %v4169_v18  ;;  %v2782_v28 = vpop.f32.mrf.mxu0 }
 0x141   : > { %v2895_v30 = vpop.f32.mrf.mxu1 }
 0x142   : > { %v5869_v32 = vadd.f32 %v2895_v30, %v2782_v28  ;;  %v2784_v33 = vpop.f32.mrf.mxu0 }
 0x143   : > { %v2897_v34 = vpop.f32.mrf.mxu1 }
 0x144   : > { %v5871_v41 = vadd.f32 %v2897_v34, %v2784_v33  ;;  %v2786_v42 = vpop.f32.mrf.mxu0 }
 0x145   : > { %v2899_v43 = vpop.f32.mrf.mxu1 }
 0x146   : > { %v5873_v44 = vadd.f32 %v2899_v43, %v2786_v42  ;;  %v2790_v45 = vpop.f32.mrf.mxu0  ;;  %3467 = vmatmul.mubr.bf16.gmra.mxu0 %v4166_v37 }
 0x147   : > { %v2903_v47 = vpop.f32.mrf.mxu1  ;;  %3580 = vmatmul.mubr.bf16.gmra.mxu1 %v4168_v38 }
 0x148   : > { %v5875_v49 = vadd.f32 %v2903_v47, %v2790_v45  ;;  %v2792_v50 = vpop.f32.mrf.mxu0 }
 0x149   : > { %v2905_v52 = vpop.f32.mrf.mxu1 }
 0x14a   : > { %v5877_v53 = vadd.f32 %v2905_v52, %v2792_v50  ;;  %v2794_v55 = vpop.f32.mrf.mxu0 }
 0x14b   : > { %v2907_v57 = vpop.f32.mrf.mxu1 }
 0x14c   : > { %v5879_v58 = vadd.f32 %v2907_v57, %v2794_v55  ;;  %v2796_v60 = vpop.f32.mrf.mxu0 }
 0x14d   : > { %v2909_v62 = vpop.f32.mrf.mxu1 }
 0x14e   : > { %v5881_v63 = vadd.f32 %v2909_v62, %v2796_v60  ;;  %v2946_v1 = vpop.f32.mrf.mxu0 }
 0x14f   : > { %v3059_v3 = vpop.f32.mrf.mxu1  ;;  %v2947_v4 = vadd.f32 %v2946_v1, %v5795_v19 }
 0x150   : > { %v2948_v5 = vpop.f32.mrf.mxu0 }
 0x151   : > { %v3061_v6 = vpop.f32.mrf.mxu1  ;;  %v5884_v8 = vadd.f32 %v3059_v3, %v2947_v4  ;;  %v2949_v10 = vadd.f32 %v2948_v5, %v5801_v26 }
 0x152   : > { %v2950_v11 = vpop.f32.mrf.mxu0 }
 0x153   : > { %v3063_v13 = vpop.f32.mrf.mxu1  ;;  %v5887_v14 = vadd.f32 %v3061_v6, %v2949_v10  ;;  %v2951_v17 = vadd.f32 %v2950_v11, %v5803_v31 }
 0x154   : > { %v2952_v18 = vpop.f32.mrf.mxu0 }
 0x155   : > { %v3065_v20 = vpop.f32.mrf.mxu1  ;;  %v5890_v21 = vadd.f32 %v3063_v13, %v2951_v17  ;;  %v2953_v24 = vadd.f32 %v2952_v18, %v5805_v36 }
 0x156   : > { %v2956_v25 = vpop.f32.mrf.mxu0 }
 0x157   : > { %v3069_v19 = vpop.f32.mrf.mxu1  ;;  %v5893_v28 = vadd.f32 %v3065_v20, %v2953_v24  ;;  %v2957_v30 = vadd.f32 %v2956_v25, %v5807_v39 }
 0x158   : > { %v2958_v33 = vpop.f32.mrf.mxu0 }
 0x159   : > { %v3071_v26 = vpop.f32.mrf.mxu1  ;;  %v5896_v34 = vadd.f32 %v3069_v19, %v2957_v30  ;;  %v2959_v37 = vadd.f32 %v2958_v33, %v5813_v46 }
 0x15a   : > { %v2960_v38 = vpop.f32.mrf.mxu0 }
 0x15b   : > { %v3073_v31 = vpop.f32.mrf.mxu1  ;;  %v5899_v42 = vadd.f32 %v3071_v26, %v2959_v37  ;;  %v2961_v43 = vadd.f32 %v2960_v38, %v5815_v51 }
 0x15c   : > { %v2962_v45 = vpop.f32.mrf.mxu0 }
 0x15d   : > { %v3075_v36 = vpop.f32.mrf.mxu1  ;;  %v5902_v47 = vadd.f32 %v3073_v31, %v2961_v43  ;;  %v2963_v50 = vadd.f32 %v2962_v45, %v5817_v56 }
 0x15e   : > { %v2966_v52 = vpop.f32.mrf.mxu0 }
 0x15f   : > { %v3079_v39 = vpop.f32.mrf.mxu1  ;;  %v5905_v55 = vadd.f32 %v3075_v36, %v2963_v50  ;;  %v2967_v57 = vadd.f32 %v2966_v52, %v5819_v59 }
 0x160   : > { %v2968_v60 = vpop.f32.mrf.mxu0 }
 0x161   : > { %v3081_v46 = vpop.f32.mrf.mxu1  ;;  %v5908_v62 = vadd.f32 %v3079_v39, %v2967_v57  ;;  %v2969_v1 = vadd.f32 %v2968_v60, %v5825_v2 }
 0x162   : > { %v2970_v3 = vpop.f32.mrf.mxu0 }
 0x163   : > { %v3083_v51 = vpop.f32.mrf.mxu1  ;;  %v5911_v4 = vadd.f32 %v3081_v46, %v2969_v1  ;;  %v2971_v5 = vadd.f32 %v2970_v3, %v5827_v7 }
 0x164   : > { %v2972_v6 = vpop.f32.mrf.mxu0 }
 0x165   : > { %v3085_v56 = vpop.f32.mrf.mxu1  ;;  %v5914_v10 = vadd.f32 %v3083_v51, %v2971_v5  ;;  %v2973_v11 = vadd.f32 %v2972_v6, %v5829_v12 }
 0x166   : > { %v2976_v13 = vpop.f32.mrf.mxu0 }
 0x167   : > { %v3089_v59 = vpop.f32.mrf.mxu1  ;;  %v5917_v17 = vadd.f32 %v3085_v56, %v2973_v11  ;;  %v2977_v18 = vadd.f32 %v2976_v13, %v5831_v15 }
 0x168   : > { %v2978_v20 = vpop.f32.mrf.mxu0 }
 0x169   : > { %v3091_v2 = vpop.f32.mrf.mxu1  ;;  %v5920_v24 = vadd.f32 %v3089_v59, %v2977_v18  ;;  %v2979_v25 = vadd.f32 %v2978_v20, %v5837_v23 }
 0x16a   : > { %v2980_v19 = vpop.f32.mrf.mxu0 }
 0x16b   : > { %v3093_v7 = vpop.f32.mrf.mxu1  ;;  %v5923_v30 = vadd.f32 %v3091_v2, %v2979_v25  ;;  %v2981_v33 = vadd.f32 %v2980_v19, %v5839_v29 }
 0x16c   : > { %v2982_v26 = vpop.f32.mrf.mxu0 }
 0x16d   : > { %v3095_v12 = vpop.f32.mrf.mxu1  ;;  %v5926_v37 = vadd.f32 %v3093_v7, %v2981_v33  ;;  %v2983_v38 = vadd.f32 %v2982_v26, %v5841_v35 }
 0x16e   : > { %v2986_v31 = vpop.f32.mrf.mxu0 }
 0x16f   : > { %v3099_v15 = vpop.f32.mrf.mxu1  ;;  %v5929_v43 = vadd.f32 %v3095_v12, %v2983_v38  ;;  %v2987_v45 = vadd.f32 %v2986_v31, %v5843_v40 }
 0x170   : > { %v2988_v36 = vpop.f32.mrf.mxu0 }
 0x171   : > { %v3101_v23 = vpop.f32.mrf.mxu1  ;;  %v5932_v50 = vadd.f32 %v3099_v15, %v2987_v45  ;;  %v2989_v52 = vadd.f32 %v2988_v36, %v5849_v48 }
 0x172   : > { %v2990_v39 = vpop.f32.mrf.mxu0 }
 0x173   : > { %v3103_v29 = vpop.f32.mrf.mxu1  ;;  %v5935_v57 = vadd.f32 %v3101_v23, %v2989_v52  ;;  %v2991_v60 = vadd.f32 %v2990_v39, %v5851_v54 }
 0x174   : > { %v2992_v46 = vpop.f32.mrf.mxu0 }
 0x175   : > { %v3105_v35 = vpop.f32.mrf.mxu1  ;;  %v5938_v1 = vadd.f32 %v3103_v29, %v2991_v60  ;;  %v2993_v3 = vadd.f32 %v2992_v46, %v5853_v61 }
 0x176   : > { %v2996_v51 = vpop.f32.mrf.mxu0 }
 0x177   : > { %6376 = vst [vmem:[#allocation4_spill] sm:$0xff] %v5938_v1  ;;  %v3109_v40 = vpop.f32.mrf.mxu1  ;;  %v5941_v5 = vadd.f32 %v3105_v35, %v2993_v3  ;;  %v2997_v6 = vadd.f32 %v2996_v51, %v5855_v0 }
 0x178   : > { %v2998_v56 = vpop.f32.mrf.mxu0 }
 0x179   : > { %6377 = vst [vmem:[#allocation5_spill] sm:$0xff] %v5941_v5  ;;  %v3111_v48 = vpop.f32.mrf.mxu1  ;;  %v5944_v11 = vadd.f32 %v3109_v40, %v2997_v6  ;;  %v2999_v13 = vadd.f32 %v2998_v56, %v5861_v9 }
 0x17a   : > { %v3000_v59 = vpop.f32.mrf.mxu0 }
 0x17b   : > { %6378 = vst [vmem:[#allocation6_spill] sm:$0xff] %v5944_v11  ;;  %v3113_v54 = vpop.f32.mrf.mxu1  ;;  %v5947_v18 = vadd.f32 %v3111_v48, %v2999_v13  ;;  %v3001_v20 = vadd.f32 %v3000_v59, %v5863_v16 }
 0x17c   : > { %v3002_v2 = vpop.f32.mrf.mxu0 }
 0x17d   : > { %6379 = vst [vmem:[#allocation7_spill] sm:$0xff] %v5947_v18  ;;  %v3115_v61 = vpop.f32.mrf.mxu1  ;;  %v5950_v25 = vadd.f32 %v3113_v54, %v3001_v20  ;;  %v3003_v19 = vadd.f32 %v3002_v2, %v5865_v22 }
 0x17e   : > { %v3006_v7 = vpop.f32.mrf.mxu0 }
 0x17f   : > { %6380 = vst [vmem:[#allocation8_spill] sm:$0xff] %v5950_v25  ;;  %v3119_v0 = vpop.f32.mrf.mxu1  ;;  %v5953_v33 = vadd.f32 %v3115_v61, %v3003_v19  ;;  %v3007_v26 = vadd.f32 %v3006_v7, %v5867_v27 }
 0x180   : > { %v3008_v12 = vpop.f32.mrf.mxu0 }
 0x181   : > { %6381 = vst [vmem:[#allocation9_spill] sm:$0xff] %v5953_v33  ;;  %v3121_v9 = vpop.f32.mrf.mxu1  ;;  %v5956_v38 = vadd.f32 %v3119_v0, %v3007_v26  ;;  %v3009_v31 = vadd.f32 %v3008_v12, %v5869_v32 }
 0x182   : > { %v3010_v15 = vpop.f32.mrf.mxu0 }
 0x183   : > { %6382 = vst [vmem:[#allocation10_spill] sm:$0xff] %v5956_v38  ;;  %v3123_v16 = vpop.f32.mrf.mxu1  ;;  %v5959_v45 = vadd.f32 %v3121_v9, %v3009_v31  ;;  %v3011_v36 = vadd.f32 %v3010_v15, %v5871_v41 }
 0x184   : > { %v3012_v23 = vpop.f32.mrf.mxu0 }
 0x185   : > { %6383 = vst [vmem:[#allocation11_spill] sm:$0xff] %v5959_v45  ;;  %v3125_v22 = vpop.f32.mrf.mxu1  ;;  %v5962_v52 = vadd.f32 %v3123_v16, %v3011_v36  ;;  %v3013_v39 = vadd.f32 %v3012_v23, %v5873_v44 }
 0x186   : > { %v3016_v29 = vpop.f32.mrf.mxu0 }
 0x187   : > { %6384 = vst [vmem:[#allocation12_spill] sm:$0xff] %v5962_v52  ;;  %v3129_v27 = vpop.f32.mrf.mxu1  ;;  %v5965_v60 = vadd.f32 %v3125_v22, %v3013_v39  ;;  %v3017_v46 = vadd.f32 %v3016_v29, %v5875_v49 }
 0x188   : > { %v3018_v35 = vpop.f32.mrf.mxu0 }
 0x189   : > { %6385 = vst [vmem:[#allocation13_spill] sm:$0xff] %v5965_v60  ;;  %v3131_v32 = vpop.f32.mrf.mxu1  ;;  %v5968_v3 = vadd.f32 %v3129_v27, %v3017_v46  ;;  %v3019_v51 = vadd.f32 %v3018_v35, %v5877_v53 }
 0x18a   : > { %v3020_v40 = vpop.f32.mrf.mxu0 }
 0x18b   : > { %6386 = vst [vmem:[#allocation14_spill] sm:$0xff] %v5968_v3  ;;  %v3133_v41 = vpop.f32.mrf.mxu1  ;;  %v5971_v6 = vadd.f32 %v3131_v32, %v3019_v51  ;;  %v3021_v56 = vadd.f32 %v3020_v40, %v5879_v58 }
 0x18c   : > { %v3022_v48 = vpop.f32.mrf.mxu0 }
 0x18d   : > { %6387 = vst [vmem:[#allocation15_spill] sm:$0xff] %v5971_v6  ;;  %v3135_v44 = vpop.f32.mrf.mxu1  ;;  %v5974_v13 = vadd.f32 %v3133_v41, %v3021_v56  ;;  %v3023_v59 = vadd.f32 %v3022_v48, %v5881_v63 }
 0x18e   : > { %v5977_v54 = vpop.f32.mrf.mxu0 }
 0x18f   : > { %6388 = vst [vmem:[#allocation16_spill] sm:$0xff] %v5974_v13  ;;  %v5979_v49 = vpop.f32.mrf.mxu1  ;;  %v5981_v20 = vadd.f32 %v3135_v44, %v3023_v59 }
 0x190   : > { %v5983_v2 = vpop.f32.mrf.mxu0 }
 0x191   : > { %6389 = vst [vmem:[#allocation17_spill] sm:$0xff] %v5981_v20  ;;  %v5985_v53 = vpop.f32.mrf.mxu1 }
 0x192   : > { %v5987_v61 = vpop.f32.mrf.mxu0 }
 0x193   : > { %v5989_v19 = vpop.f32.mrf.mxu1 }
 0x194   : > { %v3178_v58 = vpop.f32.mrf.mxu0 }
 0x195   : > { %v5991_v7 = vpop.f32.mrf.mxu1 }
 0x196   : > { %v5993_v0 = vpop.f32.mrf.mxu0 }
 0x197   : > { %v5995_v63 = vpop.f32.mrf.mxu1 }
 0x198   : > { %v3184_v26 = vpop.f32.mrf.mxu0 }
 0x199   : > { %v5997_v12 = vpop.f32.mrf.mxu1 }
 0x19a   : > { %v3186_v9 = vpop.f32.mrf.mxu0 }
 0x19b   : > { %v5999_v31 = vpop.f32.mrf.mxu1 }
 0x19c   : > { %v6001_v15 = vpop.f32.mrf.mxu0 }
 0x19d   : > { %v6003_v16 = vpop.f32.mrf.mxu1 }
 0x19e   : > { %v6005_v36 = vpop.f32.mrf.mxu0 }
 0x19f   : > { %v6007_v23 = vpop.f32.mrf.mxu1 }
 0x1a0   : > { %v6009_v22 = vpop.f32.mrf.mxu0 }
 0x1a1   : > { %v6011_v39 = vpop.f32.mrf.mxu1 }
 0x1a2   : > { %v6013_v29 = vpop.f32.mrf.mxu0 }
 0x1a3   : > { %v6015_v27 = vpop.f32.mrf.mxu1 }
 0x1a4   : > { %v6017_v46 = vpop.f32.mrf.mxu0 }
 0x1a5   : > { %v6019_v35 = vpop.f32.mrf.mxu1 }
 0x1a6   : > { %v6021_v32 = vpop.f32.mrf.mxu0 }
 0x1a7   : > { %v6023_v51 = vpop.f32.mrf.mxu1 }
 0x1a8   : > { %v6025_v40 = vpop.f32.mrf.mxu0 }
 0x1a9   : > { %v6027_v41 = vpop.f32.mrf.mxu1 }
 0x1aa   : > { %v6029_v56 = vpop.f32.mrf.mxu0 }
 0x1ab   : > { %v6031_v48 = vpop.f32.mrf.mxu1 }
 0x1ac   : > { %v6033_v44 = vpop.f32.mrf.mxu0 }
 0x1ad   : > { %v6035_v59 = vpop.f32.mrf.mxu1 }
 0x1ae   : > { %v6037_v20 = vpop.f32.mrf.mxu0 }
 0x1af   : > { %v6039_v13 = vpop.f32.mrf.mxu1 }
 0x1b0   : > { %6390 = vst [vmem:[#allocation18_spill] sm:$0xff] %v6039_v13  ;;  %v6041_v6 = vpop.f32.mrf.mxu0 }
 0x1b1   : > { %v6043_v3 = vpop.f32.mrf.mxu1 }
 0x1b2   : > { %6391 = vst [vmem:[#allocation19_spill] sm:$0xff] %v6043_v3  ;;  %v6045_v60 = vpop.f32.mrf.mxu0 }
 0x1b3   : > { %6392 = vst [vmem:[#allocation20_spill] sm:$0xff] %v6045_v60  ;;  %v6047_v52 = vpop.f32.mrf.mxu1 }
 0x1b4   : > { %6393 = vst [vmem:[#allocation21_spill] sm:$0xff] %v6047_v52  ;;  %v6049_v45 = vpop.f32.mrf.mxu0 }
 0x1b5   : > { %6394 = vst [vmem:[#allocation22_spill] sm:$0xff] %v6049_v45  ;;  %v6051_v38 = vpop.f32.mrf.mxu1 }
 0x1b6   : > { %6395 = vst [vmem:[#allocation23_spill] sm:$0xff] %v6051_v38  ;;  %v6053_v33 = vpop.f32.mrf.mxu0 }
 0x1b7   : > { %6396 = vst [vmem:[#allocation24_spill] sm:$0xff] %v6053_v33  ;;  %v6055_v25 = vpop.f32.mrf.mxu1 }
 0x1b8   : > { %6397 = vst [vmem:[#allocation25_spill] sm:$0xff] %v6055_v25  ;;  %v6057_v18 = vpop.f32.mrf.mxu0  ;;  %v3733_v25 = vlaneseq }
 0x1b9   : > { %6398 = vst [vmem:[#allocation26_spill] sm:$0xff] %v6057_v18  ;;  %v6059_v11 = vpop.f32.mrf.mxu1 }
 0x1ba   : > { %6399 = vst [vmem:[#allocation27_spill] sm:$0xff] %v6059_v11  ;;  %v6061_v5 = vpop.f32.mrf.mxu0 }
 0x1bb   : > { %6400 = vst [vmem:[#allocation28_spill] sm:$0xff] %v6061_v5  ;;  %v6063_v1 = vpop.f32.mrf.mxu1 }
 0x1bc   : > { %6401 = vst [vmem:[#allocation29_spill] sm:$0xff] %v6063_v1  ;;  %v6065_v3 = vpop.f32.mrf.mxu0 }
 0x1bd   : > { %6402 = vst [vmem:[#allocation30_spill] sm:$0xff] %v6065_v3  ;;  %v6067_v60 = vpop.f32.mrf.mxu1  ;;  %v3734_v3 = vshrl.u32 %v3733_v25, 7  ;;  %v3175_v25 = vadd.f32 %v5983_v2, %v5887_v14  ;;  %v3193_v2 = vadd.f32 %v6005_v36, %v5908_v62  ;;  %v3197_v62 = vadd.f32 %v6013_v29, %v5914_v10 }
 0x1be   : > { %6403 = vst [vmem:[#allocation31_spill] sm:$0xff] %v6067_v60  ;;  %v6069_v52 = vpop.f32.mrf.mxu0 }
 0x1bf   : > { %6404 = vst [vmem:[#allocation32_spill] sm:$0xff] %v6069_v52  ;;  %v6071_v45 = vpop.f32.mrf.mxu1  ;;  %v6148_v10 = vadd.f32 %v6007_v23, %v3193_v2 }
 0x1c0   : > { %6405 = vst [vmem:[#allocation33_spill] sm:$0xff] %v6071_v45  ;;  %v6073_v38 = vpop.f32.mrf.mxu0 }
 0x1c1   : > { %6406 = vst [vmem:[#allocation34_spill] sm:$0xff] %v6073_v38  ;;  %v6075_v33 = vpop.f32.mrf.mxu1  ;;  %v3735_v38 = vsub.s32 0, %v3734_v3 }
 0x1c2   : > { %6407 = vst [vmem:[#allocation35_spill] sm:$0xff] %v6075_v33  ;;  %v6077_v18 = vpop.f32.mrf.mxu0  ;;  %v3173_v33 = vadd.f32 %v5977_v54, %v5884_v8  ;;  %v3183_v8 = vadd.f32 %v5993_v0, %v5896_v34  ;;  %v3185_v54 = vadd.f32 %v3184_v26, %v5899_v42  ;;  %v3288_v34 = vadd.f32 %v5985_v53, %v3175_v25 }
 0x1c3   : > { %6408 = vst [vmem:[#allocation36_spill] sm:$0xff] %v6077_v18  ;;  %v6079_v11 = vpop.f32.mrf.mxu1 }
 0x1c4   : > { %6409 = vst [vmem:[#allocation37_spill] sm:$0xff] %v6079_v11  ;;  %v6081_v5 = vpop.f32.mrf.mxu0  ;;  %v3731_v11 = vld [vmem:[%s6373_s2] sm:$0x3] }
 0x1c5   : > { %6410 = vst [vmem:[#allocation38_spill] sm:$0xff] %v6081_v5  ;;  %v6083_v1 = vpop.f32.mrf.mxu1  ;;  %v3739_v5 = vsub.s32 1, %v3734_v3  ;;  %v6115_v14 = vrot.slane %v3731_v11, %v3735_v38  ;;  %v3195_v38 = vadd.f32 %v6009_v22, %v5911_v4  ;;  %v3203_v4 = vadd.f32 %v6021_v32, %v5920_v24 }
 0x1c6   : > { %6411 = vst [vmem:[#allocation39_spill] sm:$0xff] %v6083_v1  ;;  %v6085_v13 = vpop.f32.mrf.mxu0  ;;  %v3187_v1 = vadd.f32 %v3186_v9, %v5902_v47  ;;  %v3209_v24 = vadd.f32 %v6033_v44, %v5929_v43 }
 0x1c7   : > { %6412 = vst [vmem:[#allocation40_spill] sm:$0xff] %v6085_v13  ;;  %v6087_v60 = vpop.f32.mrf.mxu1  ;;  %v3177_v13 = vadd.f32 %v5987_v61, %v5890_v21  ;;  %v3286_v21 = vadd.f32 %v5979_v49, %v3173_v33  ;;  %v6122_v61 = vrot.slane %v3731_v11, %v3739_v5  ;;  %v3296_v33 = vadd.f32 %v5995_v63, %v3183_v8  ;;  %v6133_v11 = vpop.permute.xlu0 %3696  ;;  %v6419_v8 = vld [vmem:[#allocation19_spill] sm:$0xff] }
 0x1c8   : > { %6413 = vst [vmem:[#allocation41_spill] sm:$0xff] %v6087_v60  ;;  %v6089_v52 = vpop.f32.mrf.mxu0  ;;  %v3179_v60 = vadd.f32 %v3178_v58, %v5893_v28  ;;  %v3189_v28 = vadd.f32 %v6001_v15, %v5905_v55  ;;  %v3298_v55 = vadd.f32 %v5997_v12, %v3185_v54  ;;  %v6136_v49 = vadd.f32 %v5999_v31, %v3187_v1 }
 0x1c9   : > { %6414 = vst [vmem:[#allocation42_spill] sm:$0xff] %v6089_v52  ;;  %v6091_v45 = vpop.f32.mrf.mxu1  ;;  %v3290_v42 = vadd.f32 %v5989_v19, %v3177_v13  ;;  %v3205_v13 = vadd.f32 %v6025_v40, %v5923_v30  ;;  %v6151_v26 = vadd.f32 %v6011_v39, %v3195_v38  ;;  %v3213_v30 = vadd.f32 %v6037_v20, %v5932_v50 }
 0x1ca   : > { %6415 = vst [vmem:[#allocation43_spill] sm:$0xff] %v6091_v45  ;;  %v6103_v52 = vpop.f32.mrf.mxu0  ;;  %v3292_v47 = vadd.f32 %v5991_v7, %v3179_v60  ;;  %v3199_v60 = vadd.f32 %v6017_v46, %v5917_v17  ;;  %v6145_v7 = vadd.f32 %v6003_v16, %v3189_v28  ;;  %v3207_v17 = vadd.f32 %v6029_v56, %v5926_v37  ;;  %v6421_v28 = vld [vmem:[#allocation22_spill] sm:$0xff] }
 0x1cb   : > { %v6105_v45 = vpop.f32.mrf.mxu1  ;;  %v6160_v31 = vadd.f32 %v6015_v27, %v3197_v62  ;;  %v6167_v37 = vadd.f32 %v6023_v51, %v3203_v4  ;;  %v6170_v43 = vadd.f32 %v6027_v41, %v3205_v13  ;;  %v3215_v50 = vadd.f32 %v6041_v6, %v5935_v57  ;;  %v6416_v51 = vld [vmem:[#allocation18_spill] sm:$0xff]  ;;  %v6417_v41 = vld [vmem:[#allocation4_spill] sm:$0xff] }
 0x1cc   : > { %v6111_v3 = vpop.f32.mrf.mxu0  ;;  %v6164_v23 = vadd.f32 %v6019_v35, %v3199_v60  ;;  %v6178_v35 = vadd.f32 %v6031_v48, %v3207_v17  ;;  %v6181_v32 = vadd.f32 %v6035_v59, %v3209_v24  ;;  %v6184_v40 = vadd.f32 %v6416_v51, %v3213_v30  ;;  %v6418_v57 = vld [vmem:[#allocation20_spill] sm:$0xff]  ;;  %v6422_v60 = vld [vmem:[#allocation21_spill] sm:$0xff]  ;;  %v6423_v24 = vld [vmem:[#allocation23_spill] sm:$0xff] }
 0x1cd   : > { %v6113_v18 = vpop.f32.mrf.mxu1  ;;  %v3217_v6 = vadd.f32 %v6418_v57, %v6417_v41  ;;  %v6195_v54 = vadd.f32 %v6419_v8, %v3215_v50  ;;  %v6426_v57 = vld [vmem:[#allocation7_spill] sm:$0xff] }
 0x1ce   : > { %v3398_v58 = vpop.f32.mrf.mxu0 }
 0x1cf   : > { %v3511_v0 = vpop.f32.mrf.mxu1  ;;  %v3399_v5 = vadd.f32 %v3398_v58, %v3286_v21  ;;  %v6420_v21 = vld [vmem:[#allocation5_spill] sm:$0xff]  ;;  %v6203_v4 = vadd.f32 %v6422_v60, %v3217_v6  ;;  %v6427_v6 = vld [vmem:[#allocation26_spill] sm:$0xff] }
 0x1d0   : > { %v3400_v53 = vpop.f32.mrf.mxu0  ;;  %v3219_v2 = vadd.f32 %v6421_v28, %v6420_v21 }
 0x1d1   : > { %v3513_v19 = vpop.f32.mrf.mxu1  ;;  %v3512_v63 = vadd.f32 %v3511_v0, %v3399_v5  ;;  %v3401_v1 = vadd.f32 %v3400_v53, %v3288_v34 }
 0x1d2   : > { %v3402_v12 = vpop.f32.mrf.mxu0  ;;  %v6208_v30 = vadd.f32 %v6423_v24, %v3219_v2 }
 0x1d3   : > { %v3515_v9 = vpop.f32.mrf.mxu1  ;;  %v3514_v15 = vadd.f32 %v3513_v19, %v3401_v1  ;;  %v3699_v16 = vmul.f32 %v6133_v11, %v3512_v63  ;;  %v3403_v36 = vadd.f32 %v3402_v12, %v3290_v42 }
 0x1d4   : > { %v3404_v20 = vpop.f32.mrf.mxu0 }
 0x1d5   : > { %v3517_v22 = vpop.f32.mrf.mxu1  ;;  %v3700_v39 = vmul.f32 %v6133_v11, %v3514_v15  ;;  %v3516_v29 = vadd.f32 %v3515_v9, %v3403_v36  ;;  %v3743_v27 = vadd.f32 %v6115_v14, %v3699_v16  ;;  %v3405_v46 = vadd.f32 %v3404_v20, %v3292_v47 }
 0x1d6   : > { %v3408_v56 = vpop.f32.mrf.mxu0 }
 0x1d7   : > { %v3521_v44 = vpop.f32.mrf.mxu1  ;;  %v3701_v48 = vmul.f32 %v6133_v11, %v3516_v29  ;;  %vm3775_vm0 = vcmp.gt.f32.partialorder %v3743_v27, 0.0  ;;  %v3807_v25 = vmul.f32 0.2, %v3743_v27  ;;  %v3518_v59 = vadd.f32 %v3517_v22, %v3405_v46  ;;  %v6424_v22 = vld [vmem:[#allocation6_spill] sm:$0xff] }
 0x1d8   : > { %v3744_v34 = vadd.f32 %v6122_v61, %v3700_v39  ;;  %v3409_v42 = vadd.f32 %v3408_v56, %v3296_v33  ;;  %v3410_v47 = vpop.f32.mrf.mxu0  ;;  %v6425_v39 = vld [vmem:[#allocation24_spill] sm:$0xff]  ;;  %v3225_v56 = vadd.f32 %v6427_v6, %v6426_v57 }
 0x1d9   : > { %v3523_v38 = vpop.f32.mrf.mxu1  ;;  %v3745_v58 = vadd.f32 %v6115_v14, %v3701_v48  ;;  %v3839_v0 = vsel %vm3775_vm0, %v3743_v27, %v3807_v25  ;;  %v3702_v62 = vmul.f32 %v6133_v11, %v3518_v59  ;;  %v3411_v5 = vadd.f32 %v3410_v47, %v3298_v55  ;;  %v6428_v47 = vld [vmem:[#allocation25_spill] sm:$0xff] }
 0x1da   : > { %3871 = vst [vmem:[%s6191_s29] sm:$0xff] %v3839_v0  ;;  %vm3776_vm1 = vcmp.gt.f32.partialorder %v3744_v34, 0.0  ;;  %v3808_v13 = vmul.f32 0.2, %v3744_v34  ;;  %v3522_v53 = vadd.f32 %v3521_v44, %v3409_v42  ;;  %v3412_v19 = vpop.f32.mrf.mxu0  ;;  %v3223_v29 = vadd.f32 %v6425_v39, %v6424_v22 }
 0x1db   : > { %v3525_v63 = vpop.f32.mrf.mxu1  ;;  %vm3777_vm2 = vcmp.gt.f32.partialorder %v3745_v58, 0.0  ;;  %v3809_v33 = vmul.f32 0.2, %v3745_v58  ;;  %v3746_v1 = vadd.f32 %v6122_v61, %v3702_v62  ;;  %v3524_v17 = vadd.f32 %v3523_v38, %v3411_v5 }
 0x1dc   : > { %v3840_v55 = vsel %vm3776_vm1, %v3744_v34, %v3808_v13  ;;  %v3703_v12 = vmul.f32 %v6133_v11, %v3522_v53  ;;  %v3413_v9 = vadd.f32 %v3412_v19, %v6136_v49  ;;  %v3414_v15 = vpop.f32.mrf.mxu0  ;;  %v6227_v38 = vadd.f32 %v6428_v47, %v3223_v29 }
 0x1dd   : > { %v3527_v16 = vpop.f32.mrf.mxu1  ;;  %v3841_v36 = vsel %vm3777_vm2, %v3745_v58, %v3809_v33  ;;  %vm3778_vm3 = vcmp.gt.f32.partialorder %v3746_v1, 0.0  ;;  %v3810_v50 = vmul.f32 0.2, %v3746_v1  ;;  %3872 = vst [vmem:[%s6191_s29 + $0x8] sm:$0xff] %v3840_v55  ;;  %v3704_v20 = vmul.f32 %v6133_v11, %v3524_v17 }
 0x1de   : > { %3873 = vst [vmem:[%s6191_s29 + $0x10] sm:$0xff] %v3841_v36  ;;  %v3747_v27 = vadd.f32 %v6115_v14, %v3703_v12  ;;  %v3526_v46 = vadd.f32 %v3525_v63, %v3413_v9  ;;  %v3415_v51 = vadd.f32 %v3414_v15, %v6145_v7  ;;  %v3418_v41 = vpop.f32.mrf.mxu0  ;;  %v6429_v63 = vld [vmem:[#allocation27_spill] sm:$0xff] }
 0x1df   : > { %v3531_v49 = vpop.f32.mrf.mxu1  ;;  %v3842_v44 = vsel %vm3778_vm3, %v3746_v1, %v3810_v50  ;;  %v3748_v48 = vadd.f32 %v6122_v61, %v3704_v20  ;;  %v3419_v25 = vadd.f32 %v3418_v41, %v6148_v10  ;;  %v6235_v33 = vadd.f32 %v6429_v63, %v3225_v56  ;;  %v6433_v41 = vld [vmem:[#allocation30_spill] sm:$0xff] }
 0x1e0   : > { %3874 = vst [vmem:[%s6191_s29 + $0x18] sm:$0xff] %v3842_v44  ;;  %vm3779_vm4 = vcmp.gt.f32.partialorder %v3747_v27, 0.0  ;;  %v3811_v59 = vmul.f32 0.2, %v3747_v27  ;;  %v3705_v8 = vmul.f32 %v6133_v11, %v3526_v46  ;;  %v3528_v21 = vadd.f32 %v3527_v16, %v3415_v51  ;;  %v3420_v28 = vpop.f32.mrf.mxu0  ;;  %v6430_v16 = vld [vmem:[#allocation8_spill] sm:$0xff]  ;;  %v6432_v51 = vld [vmem:[#allocation9_spill] sm:$0xff] }
 0x1e1   : > { %v3533_v2 = vpop.f32.mrf.mxu1  ;;  %vm3780_vm5 = vcmp.gt.f32.partialorder %v3748_v48, 0.0  ;;  %v3812_v7 = vmul.f32 0.2, %v3748_v48  ;;  %v3532_v34 = vadd.f32 %v3531_v49, %v3419_v25  ;;  %v3421_v42 = vadd.f32 %v3420_v28, %v6151_v26 }
 0x1e2   : > { %v3843_v58 = vsel %vm3779_vm4, %v3747_v27, %v3811_v59  ;;  %v3749_v10 = vadd.f32 %v6115_v14, %v3705_v8  ;;  %v3706_v0 = vmul.f32 %v6133_v11, %v3528_v21  ;;  %v3422_v62 = vpop.f32.mrf.mxu0  ;;  %v6434_v8 = vld [vmem:[#allocation10_spill] sm:$0xff]  ;;  %v6435_v21 = vld [vmem:[#allocation32_spill] sm:$0xff] }
 0x1e3   : > { %v3535_v5 = vpop.f32.mrf.mxu1  ;;  %3875 = vst [vmem:[%s6191_s29 + $0x20] sm:$0xff] %v3843_v58  ;;  %v3844_v60 = vsel %vm3780_vm5, %v3748_v48, %v3812_v7  ;;  %v3707_v13 = vmul.f32 %v6133_v11, %v3532_v34  ;;  %v3534_v53 = vadd.f32 %v3533_v2, %v3421_v42  ;;  %v3423_v19 = vadd.f32 %v3422_v62, %v6160_v31  ;;  %v6431_v31 = vld [vmem:[#allocation28_spill] sm:$0xff] }
 0x1e4   : > { %3876 = vst [vmem:[%s6191_s29 + $0x28] sm:$0xff] %v3844_v60  ;;  %vm3781_vm6 = vcmp.gt.f32.partialorder %v3749_v10, 0.0  ;;  %v3813_v26 = vmul.f32 0.2, %v3749_v10  ;;  %v3750_v1 = vadd.f32 %v6122_v61, %v3706_v0  ;;  %v3424_v17 = vpop.f32.mrf.mxu0  ;;  %v3227_v36 = vadd.f32 %v6431_v31, %v6430_v16  ;;  %v6436_v0 = vld [vmem:[#allocation29_spill] sm:$0xff] }
 0x1e5   : > { %v3537_v24 = vpop.f32.mrf.mxu1  ;;  %v3751_v55 = vadd.f32 %v6115_v14, %v3707_v13  ;;  %v3708_v12 = vmul.f32 %v6133_v11, %v3534_v53  ;;  %v3536_v9 = vadd.f32 %v3535_v5, %v3423_v19  ;;  %v3425_v15 = vadd.f32 %v3424_v17, %v6164_v23 }
 0x1e6   : > { %v3845_v50 = vsel %vm3781_vm6, %v3749_v10, %v3813_v26  ;;  %vm3782_vm7 = vcmp.gt.f32.partialorder %v3750_v1, 0.0  ;;  %v3814_v20 = vmul.f32 0.2, %v3750_v1  ;;  %v3428_v22 = vpop.f32.mrf.mxu0  ;;  %v3229_v23 = vadd.f32 %v6433_v41, %v6432_v51 }
 0x1e7   : > { %v3541_v39 = vpop.f32.mrf.mxu1  ;;  %3877 = vst [vmem:[%s6191_s29 + $0x30] sm:$0xff] %v3845_v50  ;;  %vm3783_vm8 = vcmp.gt.f32.partialorder %v3751_v55, 0.0  ;;  %v3815_v29 = vmul.f32 0.2, %v3751_v55  ;;  %v3752_v27 = vadd.f32 %v6122_v61, %v3708_v12  ;;  %v3709_v46 = vmul.f32 %v6133_v11, %v3536_v9 }
 0x1e8   : > { %v3846_v49 = vsel %vm3782_vm7, %v3750_v1, %v3814_v20  ;;  %v3538_v57 = vadd.f32 %v3537_v24, %v3425_v15  ;;  %v3429_v6 = vadd.f32 %v3428_v22, %v6167_v37  ;;  %v3430_v56 = vpop.f32.mrf.mxu0  ;;  %v3233_v28 = vadd.f32 %v6435_v21, %v6434_v8  ;;  %v6438_v15 = vld [vmem:[#allocation33_spill] sm:$0xff]  ;;  %v6441_v8 = vld [vmem:[#allocation12_spill] sm:$0xff] }
 0x1e9   : > { %v3543_v44 = vpop.f32.mrf.mxu1  ;;  %3878 = vst [vmem:[%s6191_s29 + $0x38] sm:$0xff] %v3846_v49  ;;  %v3847_v48 = vsel %vm3783_vm8, %v3751_v55, %v3815_v29  ;;  %vm3784_vm9 = vcmp.gt.f32.partialorder %v3752_v27, 0.0  ;;  %v3816_v25 = vmul.f32 0.2, %v3752_v27  ;;  %v3753_v59 = vadd.f32 %v6115_v14, %v3709_v46  ;;  %v6440_v49 = vld [vmem:[#allocation34_spill] sm:$0xff]  ;;  %v6442_v21 = vld [vmem:[#allocation36_spill] sm:$0xff] }
 0x1ea   : > { %3879 = vst [vmem:[%s6191_s29 + $0x40] sm:$0xff] %v3847_v48  ;;  %v3710_v2 = vmul.f32 %v6133_v11, %v3538_v57  ;;  %v3542_v7 = vadd.f32 %v3541_v39, %v3429_v6  ;;  %v3431_v34 = vadd.f32 %v3430_v56, %v6170_v43  ;;  %v3432_v42 = vpop.f32.mrf.mxu0  ;;  %v6259_v62 = vadd.f32 %v6436_v0, %v3227_v36  ;;  %v6437_v43 = vld [vmem:[#allocation31_spill] sm:$0xff]  ;;  %v6444_v0 = vld [vmem:[#allocation38_spill] sm:$0xff] }
 0x1eb   : > { %v3545_v37 = vpop.f32.mrf.mxu1  ;;  %v3848_v47 = vsel %vm3784_vm9, %v3752_v27, %v3816_v25  ;;  %vm3785_vm10 = vcmp.gt.f32.partialorder %v3753_v59, 0.0  ;;  %v3817_v58 = vmul.f32 0.2, %v3753_v59  ;;  %v3433_v10 = vadd.f32 %v3432_v42, %v6178_v35 }
 0x1ec   : > { %3880 = vst [vmem:[%s6191_s29 + $0x48] sm:$0xff] %v3848_v47  ;;  %v3754_v5 = vadd.f32 %v6122_v61, %v3710_v2  ;;  %v3711_v60 = vmul.f32 %v6133_v11, %v3542_v7  ;;  %v3544_v13 = vadd.f32 %v3543_v44, %v3431_v34  ;;  %v3434_v53 = vpop.f32.mrf.mxu0  ;;  %v6265_v63 = vadd.f32 %v6437_v43, %v3229_v23  ;;  %v6439_v23 = vld [vmem:[#allocation11_spill] sm:$0xff] }
 0x1ed   : > { %v3547_v19 = vpop.f32.mrf.mxu1  ;;  %v3849_v26 = vsel %vm3785_vm10, %v3753_v59, %v3817_v58  ;;  %v3546_v1 = vadd.f32 %v3545_v37, %v3433_v10  ;;  %v3435_v17 = vadd.f32 %v3434_v53, %v6181_v32  ;;  %v6272_v16 = vadd.f32 %v6438_v15, %v3233_v28  ;;  %v6443_v10 = vld [vmem:[#allocation13_spill] sm:$0xff] }
 0x1ee   : > { %3881 = vst [vmem:[%s6191_s29 + $0x50] sm:$0xff] %v3849_v26  ;;  %vm3786_vm11 = vcmp.gt.f32.partialorder %v3754_v5, 0.0  ;;  %v3818_v35 = vmul.f32 0.2, %v3754_v5  ;;  %v3755_v24 = vadd.f32 %v6115_v14, %v3711_v60  ;;  %v3712_v55 = vmul.f32 %v6133_v11, %v3544_v13  ;;  %v3438_v12 = vpop.f32.mrf.mxu0 }
 0x1ef   : > { %v3551_v9 = vpop.f32.mrf.mxu1  ;;  %v3713_v31 = vmul.f32 %v6133_v11, %v3546_v1  ;;  %v3548_v36 = vadd.f32 %v3547_v19, %v3435_v17  ;;  %v3439_v50 = vadd.f32 %v3438_v12, %v6184_v40  ;;  %v3235_v57 = vadd.f32 %v6440_v49, %v6439_v23  ;;  %v6445_v17 = vld [vmem:[#allocation35_spill] sm:$0xff] }
 0x1f0   : > { %v3850_v20 = vsel %vm3786_vm11, %v3754_v5, %v3818_v35  ;;  %vm3787_vm12 = vcmp.gt.f32.partialorder %v3755_v24, 0.0  ;;  %v3819_v32 = vmul.f32 0.2, %v3755_v24  ;;  %v3756_v22 = vadd.f32 %v6122_v61, %v3712_v55  ;;  %v3440_v39 = vpop.f32.mrf.mxu0 }
 0x1f1   : > { %v3553_v29 = vpop.f32.mrf.mxu1  ;;  %3882 = vst [vmem:[%s6191_s29 + $0x58] sm:$0xff] %v3850_v20  ;;  %v3757_v27 = vadd.f32 %v6115_v14, %v3713_v31  ;;  %v3714_v46 = vmul.f32 %v6133_v11, %v3548_v36  ;;  %v3552_v51 = vadd.f32 %v3551_v9, %v3439_v50  ;;  %v3441_v41 = vadd.f32 %v3440_v39, %v6195_v54  ;;  %v6446_v31 = vld [vmem:[#allocation37_spill] sm:$0xff] }
 0x1f2   : > { %v3851_v40 = vsel %vm3787_vm12, %v3755_v24, %v3819_v32  ;;  %vm3788_vm13 = vcmp.gt.f32.partialorder %v3756_v22, 0.0  ;;  %v3820_v6 = vmul.f32 0.2, %v3756_v22  ;;  %v3442_v56 = vpop.f32.mrf.mxu0  ;;  %v3237_v54 = vadd.f32 %v6442_v21, %v6441_v8  ;;  %v6449_v8 = vld [vmem:[#allocation40_spill] sm:$0xff] }
 0x1f3   : > { %v3555_v44 = vpop.f32.mrf.mxu1  ;;  %3883 = vst [vmem:[%s6191_s29 + $0x60] sm:$0xff] %v3851_v40  ;;  %vm3789_vm14 = vcmp.gt.f32.partialorder %v3757_v27, 0.0  ;;  %v3821_v48 = vmul.f32 0.2, %v3757_v27  ;;  %v3758_v25 = vadd.f32 %v6122_v61, %v3714_v46  ;;  %v3715_v59 = vmul.f32 %v6133_v11, %v3552_v51 }
 0x1f4   : > { %v3852_v28 = vsel %vm3788_vm13, %v3756_v22, %v3820_v6  ;;  %v3554_v2 = vadd.f32 %v3553_v29, %v3441_v41  ;;  %v3443_v7 = vadd.f32 %v3442_v56, %v6203_v4  ;;  %v3444_v34 = vpop.f32.mrf.mxu0  ;;  %v3239_v5 = vadd.f32 %v6444_v0, %v6443_v10 }
 0x1f5   : > { %v3557_v42 = vpop.f32.mrf.mxu1  ;;  %3884 = vst [vmem:[%s6191_s29 + $0x68] sm:$0xff] %v3852_v28  ;;  %v3853_v37 = vsel %vm3789_vm14, %v3757_v27, %v3821_v48  ;;  %vm3790_vm15 = vcmp.gt.f32.partialorder %v3758_v25, 0.0  ;;  %v3822_v47 = vmul.f32 0.2, %v3758_v25  ;;  %v3759_v58 = vadd.f32 %v6115_v14, %v3715_v59  ;;  %v6447_v27 = vld [vmem:[#allocation39_spill] sm:$0xff]  ;;  %v6448_v59 = vld [vmem:[#allocation14_spill] sm:$0xff] }
 0x1f6   : > { %3885 = vst [vmem:[%s6191_s29 + $0x70] sm:$0xff] %v3853_v37  ;;  %v3716_v60 = vmul.f32 %v6133_v11, %v3554_v2  ;;  %v3556_v13 = vadd.f32 %v3555_v44, %v3443_v7  ;;  %v3445_v53 = vadd.f32 %v3444_v34, %v6208_v30  ;;  %v3448_v19 = vpop.f32.mrf.mxu0  ;;  %v3348_v35 = vadd.f32 %v6445_v17, %v3235_v57  ;;  %v6450_v37 = vld [vmem:[#allocation15_spill] sm:$0xff] }
 0x1f7   : > { %v3561_v4 = vpop.f32.mrf.mxu1  ;;  %v3854_v43 = vsel %vm3790_vm15, %v3758_v25, %v3822_v47  ;;  %vm3791_vm0 = vcmp.gt.f32.partialorder %v3759_v58, 0.0  ;;  %v3823_v26 = vmul.f32 0.2, %v3759_v58  ;;  %v3449_v1 = vadd.f32 %v3448_v19, %v6227_v38  ;;  %v6451_v47 = vld [vmem:[#allocation42_spill] sm:$0xff] }
 0x1f8   : > { %3886 = vst [vmem:[%s6191_s29 + $0x78] sm:$0xff] %v3854_v43  ;;  %v3760_v24 = vadd.f32 %v6122_v61, %v3716_v60  ;;  %v3717_v55 = vmul.f32 %v6133_v11, %v3556_v13  ;;  %v3558_v12 = vadd.f32 %v3557_v42, %v3445_v53  ;;  %v3450_v9 = vpop.f32.mrf.mxu0  ;;  %v3350_v30 = vadd.f32 %v6446_v31, %v3237_v54 }
 0x1f9   : > { %v3563_v15 = vpop.f32.mrf.mxu1  ;;  %v3855_v36 = vsel %vm3791_vm0, %v3759_v58, %v3823_v26  ;;  %v3562_v50 = vadd.f32 %v3561_v4, %v3449_v1  ;;  %v3451_v20 = vadd.f32 %v3450_v9, %v6235_v33  ;;  %v3352_v46 = vadd.f32 %v6447_v27, %v3239_v5  ;;  %v6452_v4 = vld [vmem:[#allocation41_spill] sm:$0xff] }
 0x1fa   : > { %3887 = vst [vmem:[%s6191_s29 + $0x80] sm:$0xff] %v3855_v36  ;;  %vm3792_vm1 = vcmp.gt.f32.partialorder %v3760_v24, 0.0  ;;  %v3824_v38 = vmul.f32 0.2, %v3760_v24  ;;  %v3761_v32 = vadd.f32 %v6115_v14, %v3717_v55  ;;  %v3718_v22 = vmul.f32 %v6133_v11, %v3558_v12  ;;  %v3452_v39 = vpop.f32.mrf.mxu0 }
 0x1fb   : > { %v3565_v29 = vpop.f32.mrf.mxu1  ;;  %v3719_v51 = vmul.f32 %v6133_v11, %v3562_v50  ;;  %v3564_v41 = vadd.f32 %v3563_v15, %v3451_v20  ;;  %v3453_v23 = vadd.f32 %v3452_v39, %v6259_v62  ;;  %v3243_v21 = vadd.f32 %v6449_v8, %v6448_v59  ;;  %v6453_v15 = vld [vmem:[#allocation43_spill] sm:$0xff] }
 0x1fc   : > { %v3856_v49 = vsel %vm3792_vm1, %v3760_v24, %v3824_v38  ;;  %vm3793_vm2 = vcmp.gt.f32.partialorder %v3761_v32, 0.0  ;;  %v3825_v33 = vmul.f32 0.2, %v3761_v32  ;;  %v3762_v57 = vadd.f32 %v6122_v61, %v3718_v22  ;;  %v3454_v40 = vpop.f32.mrf.mxu0  ;;  %v6454_v22 = vld [vmem:[#allocation16_spill] sm:$0xff] }
 0x1fd   : > { %v3567_v6 = vpop.f32.mrf.mxu1  ;;  %3888 = vst [vmem:[%s6191_s29 + $0x88] sm:$0xff] %v3856_v49  ;;  %v3763_v56 = vadd.f32 %v6115_v14, %v3719_v51  ;;  %v3720_v44 = vmul.f32 %v6133_v11, %v3564_v41  ;;  %v3566_v48 = vadd.f32 %v3565_v29, %v3453_v23  ;;  %v3455_v25 = vadd.f32 %v3454_v40, %v6265_v63 }
 0x1fe   : > { %v3857_v62 = vsel %vm3793_vm2, %v3761_v32, %v3825_v33  ;;  %vm3794_vm3 = vcmp.gt.f32.partialorder %v3762_v57, 0.0  ;;  %v3826_v54 = vmul.f32 0.2, %v3762_v57  ;;  %v3458_v28 = vpop.f32.mrf.mxu0  ;;  %v3245_v63 = vadd.f32 %v6451_v47, %v6450_v37  ;;  %v6455_v33 = vld [vmem:[#allocation17_spill] sm:$0xff] }
 0x1ff   : > { %v3571_v2 = vpop.f32.mrf.mxu1  ;;  %3889 = vst [vmem:[%s6191_s29 + $0x90] sm:$0xff] %v3857_v62  ;;  %vm3795_vm4 = vcmp.gt.f32.partialorder %v3763_v56, 0.0  ;;  %v3827_v7 = vmul.f32 0.2, %v3763_v56  ;;  %v3764_v34 = vadd.f32 %v6122_v61, %v3720_v44  ;;  %v3721_v42 = vmul.f32 %v6133_v11, %v3566_v48 }
 0x200   : > { %v3858_v58 = vsel %vm3794_vm3, %v3762_v57, %v3826_v54  ;;  %v3568_v10 = vadd.f32 %v3567_v6, %v3455_v25  ;;  %v3459_v0 = vadd.f32 %v3458_v28, %v6272_v16  ;;  %v3460_v5 = vpop.f32.mrf.mxu0  ;;  %v3356_v43 = vadd.f32 %v6452_v4, %v3243_v21 }
 0x201   : > { %v3573_v60 = vpop.f32.mrf.mxu1  ;;  %3890 = vst [vmem:[%s6191_s29 + $0x98] sm:$0xff] %v3858_v58  ;;  %v3859_v13 = vsel %vm3795_vm4, %v3763_v56, %v3827_v7  ;;  %vm3796_vm5 = vcmp.gt.f32.partialorder %v3764_v34, 0.0  ;;  %v3828_v53 = vmul.f32 0.2, %v3764_v34  ;;  %v3765_v19 = vadd.f32 %v6115_v14, %v3721_v42 }
 0x202   : > { %3891 = vst [vmem:[%s6191_s29 + $0xa0] sm:$0xff] %v3859_v13  ;;  %v3722_v26 = vmul.f32 %v6133_v11, %v3568_v10  ;;  %v3572_v1 = vadd.f32 %v3571_v2, %v3459_v0  ;;  %v3461_v17 = vadd.f32 %v3460_v5, %v3348_v35  ;;  %v3462_v24 = vpop.f32.mrf.mxu0  ;;  %v3358_v31 = vadd.f32 %v6453_v15, %v3245_v63 }
 0x203   : > { %v3575_v55 = vpop.f32.mrf.mxu1  ;;  %v3860_v16 = vsel %vm3796_vm5, %v3764_v34, %v3828_v53  ;;  %vm3797_vm6 = vcmp.gt.f32.partialorder %v3765_v19, 0.0  ;;  %v3829_v12 = vmul.f32 0.2, %v3765_v19  ;;  %v3463_v9 = vadd.f32 %v3462_v24, %v3350_v30 }
 0x204   : > { %3892 = vst [vmem:[%s6191_s29 + $0xa8] sm:$0xff] %v3860_v16  ;;  %v3766_v36 = vadd.f32 %v6122_v61, %v3722_v26  ;;  %v3723_v50 = vmul.f32 %v6133_v11, %v3572_v1  ;;  %v3574_v20 = vadd.f32 %v3573_v60, %v3461_v17  ;;  %v3464_v38 = vpop.f32.mrf.mxu0  ;;  %v3247_v35 = vadd.f32 %v6103_v52, %v6454_v22 }
 0x205   : > { %v3577_v32 = vpop.f32.mrf.mxu1  ;;  %v3861_v39 = vsel %vm3797_vm6, %v3765_v19, %v3829_v12  ;;  %v3576_v29 = vadd.f32 %v3575_v55, %v3463_v9  ;;  %v3465_v27 = vadd.f32 %v3464_v38, %v3352_v46  ;;  %v3249_v57 = vadd.f32 %v6111_v3, %v6455_v33 }
 0x206   : > { %3893 = vst [vmem:[%s6191_s29 + $0xb0] sm:$0xff] %v3861_v39  ;;  %vm3798_vm7 = vcmp.gt.f32.partialorder %v3766_v36, 0.0  ;;  %v3830_v30 = vmul.f32 0.2, %v3766_v36  ;;  %v3767_v51 = vadd.f32 %v6115_v14, %v3723_v50  ;;  %v3724_v41 = vmul.f32 %v6133_v11, %v3574_v20  ;;  %v3468_v23 = vpop.f32.mrf.mxu0 }
 0x207   : > { %v3581_v49 = vpop.f32.mrf.mxu1  ;;  %v3725_v40 = vmul.f32 %v6133_v11, %v3576_v29  ;;  %v3578_v6 = vadd.f32 %v3577_v32, %v3465_v27  ;;  %v3469_v52 = vadd.f32 %v3468_v23, %v3356_v43  ;;  %v3360_v3 = vadd.f32 %v6105_v45, %v3247_v35 }
 0x208   : > { %v3862_v56 = vsel %vm3798_vm7, %v3766_v36, %v3830_v30  ;;  %vm3799_vm8 = vcmp.gt.f32.partialorder %v3767_v51, 0.0  ;;  %v3831_v46 = vmul.f32 0.2, %v3767_v51  ;;  %v3768_v44 = vadd.f32 %v6122_v61, %v3724_v41  ;;  %v3470_v48 = vpop.f32.mrf.mxu0 }
 0x209   : > { %v3583_v25 = vpop.f32.mrf.mxu1  ;;  %3894 = vst [vmem:[%s6191_s29 + $0xb8] sm:$0xff] %v3862_v56  ;;  %v3769_v59 = vadd.f32 %v6115_v14, %v3725_v40  ;;  %v3726_v8 = vmul.f32 %v6133_v11, %v3578_v6  ;;  %v3582_v21 = vadd.f32 %v3581_v49, %v3469_v52  ;;  %v3471_v62 = vadd.f32 %v3470_v48, %v3358_v31 }
 0x20a   : > { %v3863_v54 = vsel %vm3799_vm8, %v3767_v51, %v3831_v46  ;;  %vm3800_vm9 = vcmp.gt.f32.partialorder %v3768_v44, 0.0  ;;  %v3832_v28 = vmul.f32 0.2, %v3768_v44  ;;  %v3472_v2 = vpop.f32.mrf.mxu0  ;;  %v3362_v47 = vadd.f32 %v6113_v18, %v3249_v57 }
 0x20b   : > { %3895 = vst [vmem:[%s6191_s29 + $0xc0] sm:$0xff] %v3863_v54  ;;  %vm3801_vm10 = vcmp.gt.f32.partialorder %v3769_v59, 0.0  ;;  %v3833_v7 = vmul.f32 0.2, %v3769_v59  ;;  %v3770_v34 = vadd.f32 %v6122_v61, %v3726_v8  ;;  %v3727_v42 = vmul.f32 %v6133_v11, %v3582_v21  ;;  %v3585_v37 = vpop.f32.mrf.mxu1 }
 0x20c   : > { %v3864_v63 = vsel %vm3800_vm9, %v3768_v44, %v3832_v28  ;;  %v3584_v58 = vadd.f32 %v3583_v25, %v3471_v62  ;;  %v3473_v45 = vadd.f32 %v3472_v2, %v3360_v3  ;;  %v3474_v10 = vpop.f32.mrf.mxu0 }
 0x20d   : > { %3896 = vst [vmem:[%s6191_s29 + $0xc8] sm:$0xff] %v3864_v63  ;;  %v3865_v0 = vsel %vm3801_vm10, %v3769_v59, %v3833_v7  ;;  %vm3802_vm11 = vcmp.gt.f32.partialorder %v3770_v34, 0.0  ;;  %v3834_v5 = vmul.f32 0.2, %v3770_v34  ;;  %v3771_v60 = vadd.f32 %v6115_v14, %v3727_v42  ;;  %v3587_v43 = vpop.f32.mrf.mxu1 }
 0x20e   : > { %3897 = vst [vmem:[%s6191_s29 + $0xd0] sm:$0xff] %v3865_v0  ;;  %v3728_v13 = vmul.f32 %v6133_v11, %v3584_v58  ;;  %v3586_v53 = vadd.f32 %v3585_v37, %v3473_v45  ;;  %v3475_v19 = vadd.f32 %v3474_v10, %v3362_v47 }
 0x20f   : > { %v3866_v4 = vsel %vm3802_vm11, %v3770_v34, %v3834_v5  ;;  %vm3803_vm12 = vcmp.gt.f32.partialorder %v3771_v60, 0.0  ;;  %v3835_v18 = vmul.f32 0.2, %v3771_v60 }
 0x210   : > { %3898 = vst [vmem:[%s6191_s29 + $0xd8] sm:$0xff] %v3866_v4  ;;  %v3772_v26 = vadd.f32 %v6122_v61, %v3728_v13  ;;  %v3729_v1 = vmul.f32 %v6133_v11, %v3586_v53  ;;  %v3588_v17 = vadd.f32 %v3587_v43, %v3475_v19 }
 0x211   : > { %v3867_v24 = vsel %vm3803_vm12, %v3771_v60, %v3835_v18 }
 0x212   : > { %3899 = vst [vmem:[%s6191_s29 + $0xe0] sm:$0xff] %v3867_v24  ;;  %vm3804_vm13 = vcmp.gt.f32.partialorder %v3772_v26, 0.0  ;;  %v3836_v55 = vmul.f32 0.2, %v3772_v26  ;;  %v3773_v16 = vadd.f32 %v6115_v14, %v3729_v1  ;;  %v3730_v12 = vmul.f32 %v6133_v11, %v3588_v17 }
 0x214   : > { %v3868_v9 = vsel %vm3804_vm13, %v3772_v26, %v3836_v55  ;;  %vm3805_vm14 = vcmp.gt.f32.partialorder %v3773_v16, 0.0  ;;  %v3837_v15 = vmul.f32 0.2, %v3773_v16  ;;  %v3774_v31 = vadd.f32 %v6122_v61, %v3730_v12 }
 0x215   : > { %3900 = vst [vmem:[%s6191_s29 + $0xe8] sm:$0xff] %v3868_v9 }
 0x216   : > { %v3869_v36 = vsel %vm3805_vm14, %v3773_v16, %v3837_v15  ;;  %vm3806_vm15 = vcmp.gt.f32.partialorder %v3774_v31, 0.0  ;;  %v3838_v50 = vmul.f32 0.2, %v3774_v31 }
 0x217   : > { %3901 = vst [vmem:[%s6191_s29 + $0xf0] sm:$0xff] %v3869_v36 }
 0x218   : > { %v3870_v20 = vsel %vm3806_vm15, %v3774_v31, %v3838_v50 }
 0x219   : > { %3902 = vst [vmem:[%s6191_s29 + $0xf8] sm:$0xff] %v3870_v20 }
 0x21a PF: > { %s16_s19 = sadd.s32 1, %s4863_s19   ;;  %s6456_s17 = smov %s4859_s18 }
 0x21b   : > { %p13_p5 = scmp.ge.s32.totalorder %s16_s19, 6   ;;  %s6457_s18 = smov %s6459_s3 }
 0x21d   :  { %15 = sbr.rel (!%p13_p5) target bundleno = 3 (0x3), region = 80 }

// kernel: discriminator_forward.7
= control target key start
LH: loop header
LB: loop body
LE: loop exit
PB: predicated region body
PF: predicated region fallthrough
CT: control target
= control target key end

     0   :  { %s8468_s0 = inlined_call_operand.vmem [shape: bf16[128,4096], index: 0, kind: input, shape index: {}]   ;;  %s8469_s1 = inlined_call_operand.vmem [shape: bf16[4096,512], index: 1, kind: input, shape index: {}]   ;;  %s8470_s2 = inlined_call_operand.vmem [shape: f32[1,512], index: 2, kind: input, shape index: {}]   ;;  %s8471_s3 = inlined_call_operand.<no memory space> [shape: f32[1,1], index: 3, kind: input, shape index: {}]   ;;  %s8472_s4 = inlined_call_operand.vmem [shape: f32[128,512], index: 4, kind: output, shape index: {}]  }
   0x1   :  { %8474 = sst [smem:[#allocation52_spill]] %s8468_s0  ;;  %v9_v0 = vstv %s8471_s3 }
   0x2   :  { %8475 = sst [smem:[#allocation53_spill]] %s8469_s1  ;;  %10 = vst [vmem:[#allocation3] sm:$0x1] %v9_v0 }
   0x3   :  { %s6394_s17 = smov 0   ;;  %s6396_s18 = smov 0  }
   0x4   :  { %s6398_s19 = smov 0   ;;  %s6400_s20 = smov 0  }
   0x5   :  { %s6402_s21 = smov 0   ;;  %s6404_s22 = smov 0  }
   0x6   :  { %s6406_s23 = smov 0   ;;  %s6408_s24 = smov 0  }
   0x7   :  { %s6410_s25 = smov 0   ;;  %s6412_s3 = smov 0  }
   0x8   :  { %s6414_s26 = smov 0  }
   0x9 LB: > { %s5389_s27 = sadd.s32 4294967295, %s6362_s26   ;;  %s28_s28 = sadd.s32 1, %s6354_s25  ;;  %s6362_s26 = sphi %s6414_s26, %s16_s26   ;;  %s6358_s3 = sphi %s6412_s3, %s8594_s3   ;;  %s6354_s25 = sphi %s6410_s25, %s8593_s25   ;;  %s6350_s24 = sphi %s6408_s24, %s8592_s24   ;;  %s6346_s23 = sphi %s6406_s23, %s8591_s23   ;;  %s6342_s22 = sphi %s6404_s22, %s8590_s22   ;;  %s6338_s21 = sphi %s6402_s21, %s8589_s21   ;;  %s6334_s20 = sphi %s6400_s20, %s8588_s20   ;;  %s6330_s19 = sphi %s6398_s19, %s8587_s19   ;;  %s6326_s18 = sphi %s6396_s18, %s8586_s18   ;;  %s6322_s17 = sphi %s6394_s17, %s8585_s17  }
   0xa   : > { %p29_p0 = scmp.ge.s32.totalorder %s28_s28, 2  ;;  %s31_s29 = sadd.s32 1, %s6358_s3 }
   0xb   : > { %s44_s30 = sadd.s32 1, %s6342_s22  ;;  %p51_p1 = scmp.ne.s32.totalorder %s6342_s22, %s6338_s21 }
   0xc   : > { %s8596_s28 = smov (%p29_p0, %s28_s28), 0  ;;  %s8598_s29 = smov (!%p29_p0, %s31_s29), %s6358_s3 }
   0xd   : > { %s40_s5 = ssub.s32 %s6354_s25, %s8596_s28  ;;  %p52_p2 = scmp.eq.s32.totalorder %s6362_s26, 0 }
   0xe   : > { %p33_p3 = scmp.ge.s32.totalorder %s8598_s29, 2  ;;  %p42_p4 = scmp.eq.s32.totalorder %s40_s5, 0 }
   0xf   : > { %p6461_p5 = por %p52_p2, %p51_p1  ;;  %s72_s7 = sadd.s32 1, %s6334_s20 }
  0x10   : > { %s8600_s29 = smov (%p33_p3, %s8598_s29), 0  ;;  %p79_p6 = scmp.ne.s32.totalorder %s6334_s20, %s6330_s19 }
  0x11   : > { %8477 = sst [smem:[#allocation7_spill]] %s8600_s29  ;;  %s68_s9 = ssub.s32 %s6358_s3, %s8600_s29 }
  0x12   : > { %s6469_s8 = scalar_select %p42_p4, %s6342_s22, %s44_s30  }
  0x13   : > { %s69_s10 = sor.u32 %s68_s9, %s40_s5  ;;  %p145_p7 = scmp.eq.s32.totalorder %s68_s9, 0 }
  0x14   : > { %p70_p8 = scmp.eq.s32.totalorder %s69_s10, 0  ;;  %p6475_p9 = por %p79_p6, %p52_p2 }
  0x15   : > { %s147_s12 = sadd.s32 1, %s6326_s18  ;;  %p157_p10 = scmp.ne.s32.totalorder %s6326_s18, %s6322_s17 }
  0x16   : > { %s6483_s13 = scalar_select %p70_p8, %s6334_s20, %s72_s7  }
  0x17   : > { %s6486_s14 = scalar_select %p145_p7, %s6326_s18, %s147_s12  }
  0x18   : > { %p158_p11 = scmp.eq.s32.totalorder %s5389_s27, 3  ;;  %p5392_p13 = scmp.ge.s32.totalorder %s6362_s26, 4 }
  0x1a   : > { %p6488_p12 = por %p158_p11, %p157_p10  ;;  %183 = sbr.rel (%p5392_p13) target bundleno = 243 (0xf3), region = 20 }
  0x1f   : > { %186 = sbr.rel (!%p6461_p5) target bundleno = 105 (0x69), region = 24  ;;  %s188_s16 = sand.u32 (%p6461_p5), 1, %s6342_s22  }
  0x20   : > { %s5798_s30 = sshll.u32 (%p6461_p5), %s6354_s25, 6  ;;  %s5393_s5 = sshll.u32 (%p6461_p5), %s188_s16, 10 }
  0x21   : > { %s8480_s0 = sld [smem:[#allocation52_spill]] (%p6461_p5)  ;;  %s6505_s27 = scalar_lea.vmem (%p6461_p5), [#allocation4], %s5393_s5 }
  0x27   : > { %s6500_s10 = scalar_lea.vmem %s8480_s0, %s5798_s30 }
  0x28   : > { %v209_v1 = vld [vmem:[%s6500_s10] sm:$0xff]  ;;  %v211_v2 = vld [vmem:[%s6500_s10 + $0x8] sm:$0xff]  ;;  %v213_v3 = vld [vmem:[%s6500_s10 + $0x10] sm:$0xff] }
  0x29   : > { %210 = vst [vmem:[%s6505_s27] sm:$0xff] %v209_v1  ;;  %212 = vst [vmem:[%s6505_s27 + $0x8] sm:$0xff] %v211_v2  ;;  %v215_v4 = vld [vmem:[%s6500_s10 + $0x18] sm:$0xff]  ;;  %v217_v5 = vld [vmem:[%s6500_s10 + $0x20] sm:$0xff] }
  0x2a   : > { %214 = vst [vmem:[%s6505_s27 + $0x10] sm:$0xff] %v213_v3  ;;  %v219_v6 = vld [vmem:[%s6500_s10 + $0x28] sm:$0xff]  ;;  %216 = vst [vmem:[%s6505_s27 + $0x18] sm:$0xff] %v215_v4  ;;  %v221_v7 = vld [vmem:[%s6500_s10 + $0x30] sm:$0xff] }
  0x2b   : > { %218 = vst [vmem:[%s6505_s27 + $0x20] sm:$0xff] %v217_v5  ;;  %220 = vst [vmem:[%s6505_s27 + $0x28] sm:$0xff] %v219_v6  ;;  %v223_v8 = vld [vmem:[%s6500_s10 + $0x38] sm:$0xff]  ;;  %v225_v9 = vld [vmem:[%s6500_s10 + $0x80] sm:$0xff] }
  0x2c   : > { %222 = vst [vmem:[%s6505_s27 + $0x30] sm:$0xff] %v221_v7  ;;  %224 = vst [vmem:[%s6505_s27 + $0x38] sm:$0xff] %v223_v8  ;;  %v227_v10 = vld [vmem:[%s6500_s10 + $0x88] sm:$0xff]  ;;  %v229_v11 = vld [vmem:[%s6500_s10 + $0x90] sm:$0xff] }
  0x2d   : > { %226 = vst [vmem:[%s6505_s27 + $0x40] sm:$0xff] %v225_v9  ;;  %v231_v12 = vld [vmem:[%s6500_s10 + $0x98] sm:$0xff]  ;;  %228 = vst [vmem:[%s6505_s27 + $0x48] sm:$0xff] %v227_v10  ;;  %v233_v13 = vld [vmem:[%s6500_s10 + $0xa0] sm:$0xff] }
  0x2e   : > { %230 = vst [vmem:[%s6505_s27 + $0x50] sm:$0xff] %v229_v11  ;;  %232 = vst [vmem:[%s6505_s27 + $0x58] sm:$0xff] %v231_v12  ;;  %v235_v14 = vld [vmem:[%s6500_s10 + $0xa8] sm:$0xff]  ;;  %v237_v15 = vld [vmem:[%s6500_s10 + $0xb0] sm:$0xff] }
  0x2f   : > { %234 = vst [vmem:[%s6505_s27 + $0x60] sm:$0xff] %v233_v13  ;;  %236 = vst [vmem:[%s6505_s27 + $0x68] sm:$0xff] %v235_v14  ;;  %v239_v16 = vld [vmem:[%s6500_s10 + $0xb8] sm:$0xff]  ;;  %v241_v17 = vld [vmem:[%s6500_s10 + $0x100] sm:$0xff] }
  0x30   : > { %238 = vst [vmem:[%s6505_s27 + $0x70] sm:$0xff] %v237_v15  ;;  %v243_v18 = vld [vmem:[%s6500_s10 + $0x108] sm:$0xff]  ;;  %240 = vst [vmem:[%s6505_s27 + $0x78] sm:$0xff] %v239_v16  ;;  %v245_v19 = vld [vmem:[%s6500_s10 + $0x110] sm:$0xff] }
  0x31   : > { %242 = vst [vmem:[%s6505_s27 + $0x80] sm:$0xff] %v241_v17  ;;  %244 = vst [vmem:[%s6505_s27 + $0x88] sm:$0xff] %v243_v18  ;;  %v247_v20 = vld [vmem:[%s6500_s10 + $0x118] sm:$0xff]  ;;  %v249_v21 = vld [vmem:[%s6500_s10 + $0x120] sm:$0xff] }
  0x32   : > { %246 = vst [vmem:[%s6505_s27 + $0x90] sm:$0xff] %v245_v19  ;;  %248 = vst [vmem:[%s6505_s27 + $0x98] sm:$0xff] %v247_v20  ;;  %v251_v22 = vld [vmem:[%s6500_s10 + $0x128] sm:$0xff]  ;;  %v253_v23 = vld [vmem:[%s6500_s10 + $0x130] sm:$0xff] }
  0x33   : > { %250 = vst [vmem:[%s6505_s27 + $0xa0] sm:$0xff] %v249_v21  ;;  %v255_v24 = vld [vmem:[%s6500_s10 + $0x138] sm:$0xff]  ;;  %252 = vst [vmem:[%s6505_s27 + $0xa8] sm:$0xff] %v251_v22  ;;  %v257_v25 = vld [vmem:[%s6500_s10 + $0x180] sm:$0xff] }
  0x34   : > { %254 = vst [vmem:[%s6505_s27 + $0xb0] sm:$0xff] %v253_v23  ;;  %256 = vst [vmem:[%s6505_s27 + $0xb8] sm:$0xff] %v255_v24  ;;  %v259_v26 = vld [vmem:[%s6500_s10 + $0x188] sm:$0xff]  ;;  %v261_v27 = vld [vmem:[%s6500_s10 + $0x190] sm:$0xff] }
  0x35   : > { %258 = vst [vmem:[%s6505_s27 + $0xc0] sm:$0xff] %v257_v25  ;;  %260 = vst [vmem:[%s6505_s27 + $0xc8] sm:$0xff] %v259_v26  ;;  %v263_v28 = vld [vmem:[%s6500_s10 + $0x198] sm:$0xff]  ;;  %v265_v29 = vld [vmem:[%s6500_s10 + $0x1a0] sm:$0xff] }
  0x36   : > { %262 = vst [vmem:[%s6505_s27 + $0xd0] sm:$0xff] %v261_v27  ;;  %v267_v30 = vld [vmem:[%s6500_s10 + $0x1a8] sm:$0xff]  ;;  %264 = vst [vmem:[%s6505_s27 + $0xd8] sm:$0xff] %v263_v28  ;;  %v269_v31 = vld [vmem:[%s6500_s10 + $0x1b0] sm:$0xff] }
  0x37   : > { %266 = vst [vmem:[%s6505_s27 + $0xe0] sm:$0xff] %v265_v29  ;;  %268 = vst [vmem:[%s6505_s27 + $0xe8] sm:$0xff] %v267_v30  ;;  %v271_v32 = vld [vmem:[%s6500_s10 + $0x1b8] sm:$0xff]  ;;  %v273_v33 = vld [vmem:[%s6500_s10 + $0x200] sm:$0xff] }
  0x38   : > { %270 = vst [vmem:[%s6505_s27 + $0xf0] sm:$0xff] %v269_v31  ;;  %272 = vst [vmem:[%s6505_s27 + $0xf8] sm:$0xff] %v271_v32  ;;  %v275_v34 = vld [vmem:[%s6500_s10 + $0x208] sm:$0xff]  ;;  %v277_v35 = vld [vmem:[%s6500_s10 + $0x210] sm:$0xff] }
  0x39   : > { %274 = vst [vmem:[%s6505_s27 + $0x100] sm:$0xff] %v273_v33  ;;  %v279_v36 = vld [vmem:[%s6500_s10 + $0x218] sm:$0xff]  ;;  %276 = vst [vmem:[%s6505_s27 + $0x108] sm:$0xff] %v275_v34  ;;  %v281_v37 = vld [vmem:[%s6500_s10 + $0x220] sm:$0xff] }
  0x3a   : > { %278 = vst [vmem:[%s6505_s27 + $0x110] sm:$0xff] %v277_v35  ;;  %280 = vst [vmem:[%s6505_s27 + $0x118] sm:$0xff] %v279_v36  ;;  %v283_v38 = vld [vmem:[%s6500_s10 + $0x228] sm:$0xff]  ;;  %v285_v39 = vld [vmem:[%s6500_s10 + $0x230] sm:$0xff] }
  0x3b   : > { %282 = vst [vmem:[%s6505_s27 + $0x120] sm:$0xff] %v281_v37  ;;  %284 = vst [vmem:[%s6505_s27 + $0x128] sm:$0xff] %v283_v38  ;;  %v287_v40 = vld [vmem:[%s6500_s10 + $0x238] sm:$0xff]  ;;  %v289_v41 = vld [vmem:[%s6500_s10 + $0x280] sm:$0xff] }
  0x3c   : > { %286 = vst [vmem:[%s6505_s27 + $0x130] sm:$0xff] %v285_v39  ;;  %v291_v42 = vld [vmem:[%s6500_s10 + $0x288] sm:$0xff]  ;;  %288 = vst [vmem:[%s6505_s27 + $0x138] sm:$0xff] %v287_v40  ;;  %v293_v43 = vld [vmem:[%s6500_s10 + $0x290] sm:$0xff] }
  0x3d   : > { %290 = vst [vmem:[%s6505_s27 + $0x140] sm:$0xff] %v289_v41  ;;  %292 = vst [vmem:[%s6505_s27 + $0x148] sm:$0xff] %v291_v42  ;;  %v295_v44 = vld [vmem:[%s6500_s10 + $0x298] sm:$0xff]  ;;  %v297_v45 = vld [vmem:[%s6500_s10 + $0x2a0] sm:$0xff] }
  0x3e   : > { %294 = vst [vmem:[%s6505_s27 + $0x150] sm:$0xff] %v293_v43  ;;  %296 = vst [vmem:[%s6505_s27 + $0x158] sm:$0xff] %v295_v44  ;;  %v299_v46 = vld [vmem:[%s6500_s10 + $0x2a8] sm:$0xff]  ;;  %v301_v47 = vld [vmem:[%s6500_s10 + $0x2b0] sm:$0xff] }
  0x3f   : > { %298 = vst [vmem:[%s6505_s27 + $0x160] sm:$0xff] %v297_v45  ;;  %v303_v48 = vld [vmem:[%s6500_s10 + $0x2b8] sm:$0xff]  ;;  %300 = vst [vmem:[%s6505_s27 + $0x168] sm:$0xff] %v299_v46  ;;  %v305_v49 = vld [vmem:[%s6500_s10 + $0x300] sm:$0xff] }
  0x40   : > { %302 = vst [vmem:[%s6505_s27 + $0x170] sm:$0xff] %v301_v47  ;;  %304 = vst [vmem:[%s6505_s27 + $0x178] sm:$0xff] %v303_v48  ;;  %v307_v50 = vld [vmem:[%s6500_s10 + $0x308] sm:$0xff]  ;;  %v309_v51 = vld [vmem:[%s6500_s10 + $0x310] sm:$0xff] }
  0x41   : > { %306 = vst [vmem:[%s6505_s27 + $0x180] sm:$0xff] %v305_v49  ;;  %308 = vst [vmem:[%s6505_s27 + $0x188] sm:$0xff] %v307_v50  ;;  %v311_v52 = vld [vmem:[%s6500_s10 + $0x318] sm:$0xff]  ;;  %v313_v53 = vld [vmem:[%s6500_s10 + $0x320] sm:$0xff] }
  0x42   : > { %310 = vst [vmem:[%s6505_s27 + $0x190] sm:$0xff] %v309_v51  ;;  %v315_v54 = vld [vmem:[%s6500_s10 + $0x328] sm:$0xff]  ;;  %312 = vst [vmem:[%s6505_s27 + $0x198] sm:$0xff] %v311_v52  ;;  %v317_v55 = vld [vmem:[%s6500_s10 + $0x330] sm:$0xff] }
  0x43   : > { %314 = vst [vmem:[%s6505_s27 + $0x1a0] sm:$0xff] %v313_v53  ;;  %316 = vst [vmem:[%s6505_s27 + $0x1a8] sm:$0xff] %v315_v54  ;;  %v319_v56 = vld [vmem:[%s6500_s10 + $0x338] sm:$0xff]  ;;  %v321_v57 = vld [vmem:[%s6500_s10 + $0x380] sm:$0xff] }
  0x44   : > { %318 = vst [vmem:[%s6505_s27 + $0x1b0] sm:$0xff] %v317_v55  ;;  %320 = vst [vmem:[%s6505_s27 + $0x1b8] sm:$0xff] %v319_v56  ;;  %v323_v58 = vld [vmem:[%s6500_s10 + $0x388] sm:$0xff]  ;;  %v325_v59 = vld [vmem:[%s6500_s10 + $0x390] sm:$0xff] }
  0x45   : > { %322 = vst [vmem:[%s6505_s27 + $0x1c0] sm:$0xff] %v321_v57  ;;  %v327_v60 = vld [vmem:[%s6500_s10 + $0x398] sm:$0xff]  ;;  %324 = vst [vmem:[%s6505_s27 + $0x1c8] sm:$0xff] %v323_v58  ;;  %v329_v61 = vld [vmem:[%s6500_s10 + $0x3a0] sm:$0xff] }
  0x46   : > { %326 = vst [vmem:[%s6505_s27 + $0x1d0] sm:$0xff] %v325_v59  ;;  %328 = vst [vmem:[%s6505_s27 + $0x1d8] sm:$0xff] %v327_v60  ;;  %v331_v62 = vld [vmem:[%s6500_s10 + $0x3a8] sm:$0xff]  ;;  %v333_v63 = vld [vmem:[%s6500_s10 + $0x3b0] sm:$0xff] }
  0x47   : > { %330 = vst [vmem:[%s6505_s27 + $0x1e0] sm:$0xff] %v329_v61  ;;  %332 = vst [vmem:[%s6505_s27 + $0x1e8] sm:$0xff] %v331_v62  ;;  %v335_v0 = vld [vmem:[%s6500_s10 + $0x3b8] sm:$0xff]  ;;  %v337_v1 = vld [vmem:[%s6500_s10 + $0x400] sm:$0xff] }
  0x48   : > { %334 = vst [vmem:[%s6505_s27 + $0x1f0] sm:$0xff] %v333_v63  ;;  %v339_v2 = vld [vmem:[%s6500_s10 + $0x408] sm:$0xff]  ;;  %336 = vst [vmem:[%s6505_s27 + $0x1f8] sm:$0xff] %v335_v0  ;;  %v341_v3 = vld [vmem:[%s6500_s10 + $0x410] sm:$0xff] }
  0x49   : > { %338 = vst [vmem:[%s6505_s27 + $0x200] sm:$0xff] %v337_v1  ;;  %340 = vst [vmem:[%s6505_s27 + $0x208] sm:$0xff] %v339_v2  ;;  %v343_v4 = vld [vmem:[%s6500_s10 + $0x418] sm:$0xff]  ;;  %v345_v5 = vld [vmem:[%s6500_s10 + $0x420] sm:$0xff] }
  0x4a   : > { %342 = vst [vmem:[%s6505_s27 + $0x210] sm:$0xff] %v341_v3  ;;  %344 = vst [vmem:[%s6505_s27 + $0x218] sm:$0xff] %v343_v4  ;;  %v347_v6 = vld [vmem:[%s6500_s10 + $0x428] sm:$0xff]  ;;  %v349_v7 = vld [vmem:[%s6500_s10 + $0x430] sm:$0xff] }
  0x4b   : > { %346 = vst [vmem:[%s6505_s27 + $0x220] sm:$0xff] %v345_v5  ;;  %v351_v8 = vld [vmem:[%s6500_s10 + $0x438] sm:$0xff]  ;;  %348 = vst [vmem:[%s6505_s27 + $0x228] sm:$0xff] %v347_v6  ;;  %v353_v9 = vld [vmem:[%s6500_s10 + $0x480] sm:$0xff] }
  0x4c   : > { %350 = vst [vmem:[%s6505_s27 + $0x230] sm:$0xff] %v349_v7  ;;  %352 = vst [vmem:[%s6505_s27 + $0x238] sm:$0xff] %v351_v8  ;;  %v355_v10 = vld [vmem:[%s6500_s10 + $0x488] sm:$0xff]  ;;  %v357_v11 = vld [vmem:[%s6500_s10 + $0x490] sm:$0xff] }
  0x4d   : > { %354 = vst [vmem:[%s6505_s27 + $0x240] sm:$0xff] %v353_v9  ;;  %356 = vst [vmem:[%s6505_s27 + $0x248] sm:$0xff] %v355_v10  ;;  %v359_v12 = vld [vmem:[%s6500_s10 + $0x498] sm:$0xff]  ;;  %v361_v13 = vld [vmem:[%s6500_s10 + $0x4a0] sm:$0xff] }
  0x4e   : > { %358 = vst [vmem:[%s6505_s27 + $0x250] sm:$0xff] %v357_v11  ;;  %v363_v14 = vld [vmem:[%s6500_s10 + $0x4a8] sm:$0xff]  ;;  %360 = vst [vmem:[%s6505_s27 + $0x258] sm:$0xff] %v359_v12  ;;  %v365_v15 = vld [vmem:[%s6500_s10 + $0x4b0] sm:$0xff] }
  0x4f   : > { %362 = vst [vmem:[%s6505_s27 + $0x260] sm:$0xff] %v361_v13  ;;  %364 = vst [vmem:[%s6505_s27 + $0x268] sm:$0xff] %v363_v14  ;;  %v367_v16 = vld [vmem:[%s6500_s10 + $0x4b8] sm:$0xff]  ;;  %v369_v17 = vld [vmem:[%s6500_s10 + $0x500] sm:$0xff] }
  0x50   : > { %366 = vst [vmem:[%s6505_s27 + $0x270] sm:$0xff] %v365_v15  ;;  %368 = vst [vmem:[%s6505_s27 + $0x278] sm:$0xff] %v367_v16  ;;  %v371_v18 = vld [vmem:[%s6500_s10 + $0x508] sm:$0xff]  ;;  %v373_v19 = vld [vmem:[%s6500_s10 + $0x510] sm:$0xff] }
  0x51   : > { %370 = vst [vmem:[%s6505_s27 + $0x280] sm:$0xff] %v369_v17  ;;  %v375_v20 = vld [vmem:[%s6500_s10 + $0x518] sm:$0xff]  ;;  %372 = vst [vmem:[%s6505_s27 + $0x288] sm:$0xff] %v371_v18  ;;  %v377_v21 = vld [vmem:[%s6500_s10 + $0x520] sm:$0xff] }
  0x52   : > { %374 = vst [vmem:[%s6505_s27 + $0x290] sm:$0xff] %v373_v19  ;;  %376 = vst [vmem:[%s6505_s27 + $0x298] sm:$0xff] %v375_v20  ;;  %v379_v22 = vld [vmem:[%s6500_s10 + $0x528] sm:$0xff]  ;;  %v381_v23 = vld [vmem:[%s6500_s10 + $0x530] sm:$0xff] }
  0x53   : > { %378 = vst [vmem:[%s6505_s27 + $0x2a0] sm:$0xff] %v377_v21  ;;  %380 = vst [vmem:[%s6505_s27 + $0x2a8] sm:$0xff] %v379_v22  ;;  %v383_v24 = vld [vmem:[%s6500_s10 + $0x538] sm:$0xff]  ;;  %v385_v25 = vld [vmem:[%s6500_s10 + $0x580] sm:$0xff] }
  0x54   : > { %382 = vst [vmem:[%s6505_s27 + $0x2b0] sm:$0xff] %v381_v23  ;;  %v387_v26 = vld [vmem:[%s6500_s10 + $0x588] sm:$0xff]  ;;  %384 = vst [vmem:[%s6505_s27 + $0x2b8] sm:$0xff] %v383_v24  ;;  %v389_v27 = vld [vmem:[%s6500_s10 + $0x590] sm:$0xff] }
  0x55   : > { %386 = vst [vmem:[%s6505_s27 + $0x2c0] sm:$0xff] %v385_v25  ;;  %388 = vst [vmem:[%s6505_s27 + $0x2c8] sm:$0xff] %v387_v26  ;;  %v391_v28 = vld [vmem:[%s6500_s10 + $0x598] sm:$0xff]  ;;  %v393_v29 = vld [vmem:[%s6500_s10 + $0x5a0] sm:$0xff] }
  0x56   : > { %390 = vst [vmem:[%s6505_s27 + $0x2d0] sm:$0xff] %v389_v27  ;;  %392 = vst [vmem:[%s6505_s27 + $0x2d8] sm:$0xff] %v391_v28  ;;  %v395_v30 = vld [vmem:[%s6500_s10 + $0x5a8] sm:$0xff]  ;;  %v397_v31 = vld [vmem:[%s6500_s10 + $0x5b0] sm:$0xff] }
  0x57   : > { %394 = vst [vmem:[%s6505_s27 + $0x2e0] sm:$0xff] %v393_v29  ;;  %v399_v32 = vld [vmem:[%s6500_s10 + $0x5b8] sm:$0xff]  ;;  %396 = vst [vmem:[%s6505_s27 + $0x2e8] sm:$0xff] %v395_v30  ;;  %v401_v33 = vld [vmem:[%s6500_s10 + $0x600] sm:$0xff] }
  0x58   : > { %398 = vst [vmem:[%s6505_s27 + $0x2f0] sm:$0xff] %v397_v31  ;;  %400 = vst [vmem:[%s6505_s27 + $0x2f8] sm:$0xff] %v399_v32  ;;  %v403_v34 = vld [vmem:[%s6500_s10 + $0x608] sm:$0xff]  ;;  %v405_v35 = vld [vmem:[%s6500_s10 + $0x610] sm:$0xff] }
  0x59   : > { %402 = vst [vmem:[%s6505_s27 + $0x300] sm:$0xff] %v401_v33  ;;  %404 = vst [vmem:[%s6505_s27 + $0x308] sm:$0xff] %v403_v34  ;;  %v407_v36 = vld [vmem:[%s6500_s10 + $0x618] sm:$0xff]  ;;  %v409_v37 = vld [vmem:[%s6500_s10 + $0x620] sm:$0xff] }
  0x5a   : > { %406 = vst [vmem:[%s6505_s27 + $0x310] sm:$0xff] %v405_v35  ;;  %v411_v38 = vld [vmem:[%s6500_s10 + $0x628] sm:$0xff]  ;;  %408 = vst [vmem:[%s6505_s27 + $0x318] sm:$0xff] %v407_v36  ;;  %v413_v39 = vld [vmem:[%s6500_s10 + $0x630] sm:$0xff] }
  0x5b   : > { %410 = vst [vmem:[%s6505_s27 + $0x320] sm:$0xff] %v409_v37  ;;  %412 = vst [vmem:[%s6505_s27 + $0x328] sm:$0xff] %v411_v38  ;;  %v415_v40 = vld [vmem:[%s6500_s10 + $0x638] sm:$0xff]  ;;  %v417_v41 = vld [vmem:[%s6500_s10 + $0x680] sm:$0xff] }
  0x5c   : > { %414 = vst [vmem:[%s6505_s27 + $0x330] sm:$0xff] %v413_v39  ;;  %416 = vst [vmem:[%s6505_s27 + $0x338] sm:$0xff] %v415_v40  ;;  %v419_v42 = vld [vmem:[%s6500_s10 + $0x688] sm:$0xff]  ;;  %v421_v43 = vld [vmem:[%s6500_s10 + $0x690] sm:$0xff] }
  0x5d   : > { %418 = vst [vmem:[%s6505_s27 + $0x340] sm:$0xff] %v417_v41  ;;  %v423_v44 = vld [vmem:[%s6500_s10 + $0x698] sm:$0xff]  ;;  %420 = vst [vmem:[%s6505_s27 + $0x348] sm:$0xff] %v419_v42  ;;  %v425_v45 = vld [vmem:[%s6500_s10 + $0x6a0] sm:$0xff] }
  0x5e   : > { %422 = vst [vmem:[%s6505_s27 + $0x350] sm:$0xff] %v421_v43  ;;  %424 = vst [vmem:[%s6505_s27 + $0x358] sm:$0xff] %v423_v44  ;;  %v427_v46 = vld [vmem:[%s6500_s10 + $0x6a8] sm:$0xff]  ;;  %v429_v47 = vld [vmem:[%s6500_s10 + $0x6b0] sm:$0xff] }
  0x5f   : > { %426 = vst [vmem:[%s6505_s27 + $0x360] sm:$0xff] %v425_v45  ;;  %428 = vst [vmem:[%s6505_s27 + $0x368] sm:$0xff] %v427_v46  ;;  %v431_v48 = vld [vmem:[%s6500_s10 + $0x6b8] sm:$0xff]  ;;  %v433_v49 = vld [vmem:[%s6500_s10 + $0x700] sm:$0xff] }
  0x60   : > { %430 = vst [vmem:[%s6505_s27 + $0x370] sm:$0xff] %v429_v47  ;;  %v435_v50 = vld [vmem:[%s6500_s10 + $0x708] sm:$0xff]  ;;  %432 = vst [vmem:[%s6505_s27 + $0x378] sm:$0xff] %v431_v48  ;;  %v437_v51 = vld [vmem:[%s6500_s10 + $0x710] sm:$0xff] }
  0x61   : > { %434 = vst [vmem:[%s6505_s27 + $0x380] sm:$0xff] %v433_v49  ;;  %436 = vst [vmem:[%s6505_s27 + $0x388] sm:$0xff] %v435_v50  ;;  %v439_v52 = vld [vmem:[%s6500_s10 + $0x718] sm:$0xff]  ;;  %v441_v53 = vld [vmem:[%s6500_s10 + $0x720] sm:$0xff] }
  0x62   : > { %438 = vst [vmem:[%s6505_s27 + $0x390] sm:$0xff] %v437_v51  ;;  %440 = vst [vmem:[%s6505_s27 + $0x398] sm:$0xff] %v439_v52  ;;  %v443_v54 = vld [vmem:[%s6500_s10 + $0x728] sm:$0xff]  ;;  %v445_v55 = vld [vmem:[%s6500_s10 + $0x730] sm:$0xff] }
  0x63   : > { %442 = vst [vmem:[%s6505_s27 + $0x3a0] sm:$0xff] %v441_v53  ;;  %v447_v56 = vld [vmem:[%s6500_s10 + $0x738] sm:$0xff]  ;;  %444 = vst [vmem:[%s6505_s27 + $0x3a8] sm:$0xff] %v443_v54  ;;  %v449_v57 = vld [vmem:[%s6500_s10 + $0x780] sm:$0xff] }
  0x64   : > { %446 = vst [vmem:[%s6505_s27 + $0x3b0] sm:$0xff] %v445_v55  ;;  %448 = vst [vmem:[%s6505_s27 + $0x3b8] sm:$0xff] %v447_v56  ;;  %v451_v58 = vld [vmem:[%s6500_s10 + $0x788] sm:$0xff]  ;;  %v453_v59 = vld [vmem:[%s6500_s10 + $0x790] sm:$0xff] }
  0x65   : > { %450 = vst [vmem:[%s6505_s27 + $0x3c0] sm:$0xff] %v449_v57  ;;  %452 = vst [vmem:[%s6505_s27 + $0x3c8] sm:$0xff] %v451_v58  ;;  %v455_v60 = vld [vmem:[%s6500_s10 + $0x798] sm:$0xff]  ;;  %v457_v61 = vld [vmem:[%s6500_s10 + $0x7a0] sm:$0xff] }
  0x66   : > { %454 = vst [vmem:[%s6505_s27 + $0x3d0] sm:$0xff] %v453_v59  ;;  %v459_v62 = vld [vmem:[%s6500_s10 + $0x7a8] sm:$0xff]  ;;  %456 = vst [vmem:[%s6505_s27 + $0x3d8] sm:$0xff] %v455_v60  ;;  %v461_v63 = vld [vmem:[%s6500_s10 + $0x7b0] sm:$0xff] }
  0x67   : > { %458 = vst [vmem:[%s6505_s27 + $0x3e0] sm:$0xff] %v457_v61  ;;  %460 = vst [vmem:[%s6505_s27 + $0x3e8] sm:$0xff] %v459_v62  ;;  %v463_v0 = vld [vmem:[%s6500_s10 + $0x7b8] sm:$0xff] }
  0x68   : > { %462 = vst [vmem:[%s6505_s27 + $0x3f0] sm:$0xff] %v461_v63  ;;  %464 = vst [vmem:[%s6505_s27 + $0x3f8] sm:$0xff] %v463_v0 }
  0x69 PF: > { %470 = sbr.rel (!%p6475_p9) target bundleno = 243 (0xf3), region = 47  ;;  %s472_s6 = sand.u32 (%p6475_p9), 1, %s6334_s20  }
  0x6a   : > { %s5398_s12 = sshll.u32 (%p6475_p9), %s6358_s3, 1  ;;  %s5396_s16 = sshll.u32 (%p6475_p9), %s472_s6, 11 }
  0x6b   : > { %s5799_s30 = sshll.u32 (%p6475_p9), %s6354_s25, 10  ;;  %s8481_s1 = sld [smem:[#allocation53_spill]] (%p6475_p9) }
  0x6c   : > { %s478_s5 = sadd.s32 (%p6475_p9), %s5799_s30, %s5398_s12  ;;  %s6773_s11 = scalar_lea.vmem (%p6475_p9), [#allocation5], %s5396_s16 }
  0x6d   : > { %s5400_s7 = sshll.u32 (%p6475_p9), %s478_s5, 2 }
  0x71   : > { %s6768_s29 = scalar_lea.vmem %s8481_s1, %s5400_s7 }
  0x72   : > { %v1019_v1 = vld [vmem:[%s6768_s29] sm:$0xff]  ;;  %v1021_v2 = vld [vmem:[%s6768_s29 + $0x10] sm:$0xff] }
  0x73   : > { %v1023_v3 = vld [vmem:[%s6768_s29 + $0x20] sm:$0xff]  ;;  %1020 = vst [vmem:[%s6773_s11] sm:$0xff] %v1019_v1  ;;  %1022 = vst [vmem:[%s6773_s11 + $0x8] sm:$0xff] %v1021_v2  ;;  %v1025_v4 = vld [vmem:[%s6768_s29 + $0x30] sm:$0xff] }
  0x74   : > { %1024 = vst [vmem:[%s6773_s11 + $0x10] sm:$0xff] %v1023_v3  ;;  %v1027_v5 = vld [vmem:[%s6768_s29 + $0x40] sm:$0xff]  ;;  %v1029_v6 = vld [vmem:[%s6768_s29 + $0x50] sm:$0xff]  ;;  %1026 = vst [vmem:[%s6773_s11 + $0x18] sm:$0xff] %v1025_v4 }
  0x75   : > { %1028 = vst [vmem:[%s6773_s11 + $0x20] sm:$0xff] %v1027_v5  ;;  %1030 = vst [vmem:[%s6773_s11 + $0x28] sm:$0xff] %v1029_v6  ;;  %v1031_v7 = vld [vmem:[%s6768_s29 + $0x60] sm:$0xff]  ;;  %v1033_v8 = vld [vmem:[%s6768_s29 + $0x70] sm:$0xff] }
  0x76   : > { %v1035_v9 = vld [vmem:[%s6768_s29 + $0x80] sm:$0xff]  ;;  %1032 = vst [vmem:[%s6773_s11 + $0x30] sm:$0xff] %v1031_v7  ;;  %1034 = vst [vmem:[%s6773_s11 + $0x38] sm:$0xff] %v1033_v8  ;;  %v1037_v10 = vld [vmem:[%s6768_s29 + $0x90] sm:$0xff] }
  0x77   : > { %1036 = vst [vmem:[%s6773_s11 + $0x40] sm:$0xff] %v1035_v9  ;;  %v1039_v11 = vld [vmem:[%s6768_s29 + $0xa0] sm:$0xff]  ;;  %v1041_v12 = vld [vmem:[%s6768_s29 + $0xb0] sm:$0xff]  ;;  %1038 = vst [vmem:[%s6773_s11 + $0x48] sm:$0xff] %v1037_v10 }
  0x78   : > { %1040 = vst [vmem:[%s6773_s11 + $0x50] sm:$0xff] %v1039_v11  ;;  %1042 = vst [vmem:[%s6773_s11 + $0x58] sm:$0xff] %v1041_v12  ;;  %v1043_v13 = vld [vmem:[%s6768_s29 + $0xc0] sm:$0xff]  ;;  %v1045_v14 = vld [vmem:[%s6768_s29 + $0xd0] sm:$0xff] }
  0x79   : > { %v1047_v15 = vld [vmem:[%s6768_s29 + $0xe0] sm:$0xff]  ;;  %1044 = vst [vmem:[%s6773_s11 + $0x60] sm:$0xff] %v1043_v13  ;;  %1046 = vst [vmem:[%s6773_s11 + $0x68] sm:$0xff] %v1045_v14  ;;  %v1049_v16 = vld [vmem:[%s6768_s29 + $0xf0] sm:$0xff] }
  0x7a   : > { %1048 = vst [vmem:[%s6773_s11 + $0x70] sm:$0xff] %v1047_v15  ;;  %v1051_v17 = vld [vmem:[%s6768_s29 + $0x100] sm:$0xff]  ;;  %v1053_v18 = vld [vmem:[%s6768_s29 + $0x110] sm:$0xff]  ;;  %1050 = vst [vmem:[%s6773_s11 + $0x78] sm:$0xff] %v1049_v16 }
  0x7b   : > { %1052 = vst [vmem:[%s6773_s11 + $0x80] sm:$0xff] %v1051_v17  ;;  %1054 = vst [vmem:[%s6773_s11 + $0x88] sm:$0xff] %v1053_v18  ;;  %v1055_v19 = vld [vmem:[%s6768_s29 + $0x120] sm:$0xff]  ;;  %v1057_v20 = vld [vmem:[%s6768_s29 + $0x130] sm:$0xff] }
  0x7c   : > { %v1059_v21 = vld [vmem:[%s6768_s29 + $0x140] sm:$0xff]  ;;  %1056 = vst [vmem:[%s6773_s11 + $0x90] sm:$0xff] %v1055_v19  ;;  %1058 = vst [vmem:[%s6773_s11 + $0x98] sm:$0xff] %v1057_v20  ;;  %v1061_v22 = vld [vmem:[%s6768_s29 + $0x150] sm:$0xff] }
  0x7d   : > { %1060 = vst [vmem:[%s6773_s11 + $0xa0] sm:$0xff] %v1059_v21  ;;  %v1063_v23 = vld [vmem:[%s6768_s29 + $0x160] sm:$0xff]  ;;  %v1065_v24 = vld [vmem:[%s6768_s29 + $0x170] sm:$0xff]  ;;  %1062 = vst [vmem:[%s6773_s11 + $0xa8] sm:$0xff] %v1061_v22 }
  0x7e   : > { %1064 = vst [vmem:[%s6773_s11 + $0xb0] sm:$0xff] %v1063_v23  ;;  %1066 = vst [vmem:[%s6773_s11 + $0xb8] sm:$0xff] %v1065_v24  ;;  %v1067_v25 = vld [vmem:[%s6768_s29 + $0x180] sm:$0xff]  ;;  %v1069_v26 = vld [vmem:[%s6768_s29 + $0x190] sm:$0xff] }
  0x7f   : > { %v1071_v27 = vld [vmem:[%s6768_s29 + $0x1a0] sm:$0xff]  ;;  %1068 = vst [vmem:[%s6773_s11 + $0xc0] sm:$0xff] %v1067_v25  ;;  %1070 = vst [vmem:[%s6773_s11 + $0xc8] sm:$0xff] %v1069_v26  ;;  %v1073_v28 = vld [vmem:[%s6768_s29 + $0x1b0] sm:$0xff] }
  0x80   : > { %1072 = vst [vmem:[%s6773_s11 + $0xd0] sm:$0xff] %v1071_v27  ;;  %v1075_v29 = vld [vmem:[%s6768_s29 + $0x1c0] sm:$0xff]  ;;  %v1077_v30 = vld [vmem:[%s6768_s29 + $0x1d0] sm:$0xff]  ;;  %1074 = vst [vmem:[%s6773_s11 + $0xd8] sm:$0xff] %v1073_v28 }
  0x81   : > { %1076 = vst [vmem:[%s6773_s11 + $0xe0] sm:$0xff] %v1075_v29  ;;  %1078 = vst [vmem:[%s6773_s11 + $0xe8] sm:$0xff] %v1077_v30  ;;  %v1079_v31 = vld [vmem:[%s6768_s29 + $0x1e0] sm:$0xff]  ;;  %v1081_v32 = vld [vmem:[%s6768_s29 + $0x1f0] sm:$0xff] }
  0x82   : > { %v1083_v33 = vld [vmem:[%s6768_s29 + $0x200] sm:$0xff]  ;;  %1080 = vst [vmem:[%s6773_s11 + $0xf0] sm:$0xff] %v1079_v31  ;;  %1082 = vst [vmem:[%s6773_s11 + $0xf8] sm:$0xff] %v1081_v32  ;;  %v1085_v34 = vld [vmem:[%s6768_s29 + $0x210] sm:$0xff] }
  0x83   : > { %1084 = vst [vmem:[%s6773_s11 + $0x100] sm:$0xff] %v1083_v33  ;;  %v1087_v35 = vld [vmem:[%s6768_s29 + $0x220] sm:$0xff]  ;;  %v1089_v36 = vld [vmem:[%s6768_s29 + $0x230] sm:$0xff]  ;;  %1086 = vst [vmem:[%s6773_s11 + $0x108] sm:$0xff] %v1085_v34 }
  0x84   : > { %1088 = vst [vmem:[%s6773_s11 + $0x110] sm:$0xff] %v1087_v35  ;;  %1090 = vst [vmem:[%s6773_s11 + $0x118] sm:$0xff] %v1089_v36  ;;  %v1091_v37 = vld [vmem:[%s6768_s29 + $0x240] sm:$0xff]  ;;  %v1093_v38 = vld [vmem:[%s6768_s29 + $0x250] sm:$0xff] }
  0x85   : > { %v1095_v39 = vld [vmem:[%s6768_s29 + $0x260] sm:$0xff]  ;;  %1092 = vst [vmem:[%s6773_s11 + $0x120] sm:$0xff] %v1091_v37  ;;  %1094 = vst [vmem:[%s6773_s11 + $0x128] sm:$0xff] %v1093_v38  ;;  %v1097_v40 = vld [vmem:[%s6768_s29 + $0x270] sm:$0xff] }
  0x86   : > { %1096 = vst [vmem:[%s6773_s11 + $0x130] sm:$0xff] %v1095_v39  ;;  %v1099_v41 = vld [vmem:[%s6768_s29 + $0x280] sm:$0xff]  ;;  %v1101_v42 = vld [vmem:[%s6768_s29 + $0x290] sm:$0xff]  ;;  %1098 = vst [vmem:[%s6773_s11 + $0x138] sm:$0xff] %v1097_v40 }
  0x87   : > { %1100 = vst [vmem:[%s6773_s11 + $0x140] sm:$0xff] %v1099_v41  ;;  %1102 = vst [vmem:[%s6773_s11 + $0x148] sm:$0xff] %v1101_v42  ;;  %v1103_v43 = vld [vmem:[%s6768_s29 + $0x2a0] sm:$0xff]  ;;  %v1105_v44 = vld [vmem:[%s6768_s29 + $0x2b0] sm:$0xff] }
  0x88   : > { %v1107_v45 = vld [vmem:[%s6768_s29 + $0x2c0] sm:$0xff]  ;;  %1104 = vst [vmem:[%s6773_s11 + $0x150] sm:$0xff] %v1103_v43  ;;  %1106 = vst [vmem:[%s6773_s11 + $0x158] sm:$0xff] %v1105_v44  ;;  %v1109_v46 = vld [vmem:[%s6768_s29 + $0x2d0] sm:$0xff] }
  0x89   : > { %1108 = vst [vmem:[%s6773_s11 + $0x160] sm:$0xff] %v1107_v45  ;;  %v1111_v47 = vld [vmem:[%s6768_s29 + $0x2e0] sm:$0xff]  ;;  %v1113_v48 = vld [vmem:[%s6768_s29 + $0x2f0] sm:$0xff]  ;;  %1110 = vst [vmem:[%s6773_s11 + $0x168] sm:$0xff] %v1109_v46 }
  0x8a   : > { %1112 = vst [vmem:[%s6773_s11 + $0x170] sm:$0xff] %v1111_v47  ;;  %1114 = vst [vmem:[%s6773_s11 + $0x178] sm:$0xff] %v1113_v48  ;;  %v1115_v49 = vld [vmem:[%s6768_s29 + $0x300] sm:$0xff]  ;;  %v1117_v50 = vld [vmem:[%s6768_s29 + $0x310] sm:$0xff] }
  0x8b   : > { %v1119_v51 = vld [vmem:[%s6768_s29 + $0x320] sm:$0xff]  ;;  %1116 = vst [vmem:[%s6773_s11 + $0x180] sm:$0xff] %v1115_v49  ;;  %1118 = vst [vmem:[%s6773_s11 + $0x188] sm:$0xff] %v1117_v50  ;;  %v1121_v52 = vld [vmem:[%s6768_s29 + $0x330] sm:$0xff] }
  0x8c   : > { %1120 = vst [vmem:[%s6773_s11 + $0x190] sm:$0xff] %v1119_v51  ;;  %v1123_v53 = vld [vmem:[%s6768_s29 + $0x340] sm:$0xff]  ;;  %v1125_v54 = vld [vmem:[%s6768_s29 + $0x350] sm:$0xff]  ;;  %1122 = vst [vmem:[%s6773_s11 + $0x198] sm:$0xff] %v1121_v52 }
  0x8d   : > { %1124 = vst [vmem:[%s6773_s11 + $0x1a0] sm:$0xff] %v1123_v53  ;;  %1126 = vst [vmem:[%s6773_s11 + $0x1a8] sm:$0xff] %v1125_v54  ;;  %v1127_v55 = vld [vmem:[%s6768_s29 + $0x360] sm:$0xff]  ;;  %v1129_v56 = vld [vmem:[%s6768_s29 + $0x370] sm:$0xff] }
  0x8e   : > { %v1131_v57 = vld [vmem:[%s6768_s29 + $0x380] sm:$0xff]  ;;  %1128 = vst [vmem:[%s6773_s11 + $0x1b0] sm:$0xff] %v1127_v55  ;;  %1130 = vst [vmem:[%s6773_s11 + $0x1b8] sm:$0xff] %v1129_v56  ;;  %v1133_v58 = vld [vmem:[%s6768_s29 + $0x390] sm:$0xff] }
  0x8f   : > { %1132 = vst [vmem:[%s6773_s11 + $0x1c0] sm:$0xff] %v1131_v57  ;;  %v1135_v59 = vld [vmem:[%s6768_s29 + $0x3a0] sm:$0xff]  ;;  %v1137_v60 = vld [vmem:[%s6768_s29 + $0x3b0] sm:$0xff]  ;;  %1134 = vst [vmem:[%s6773_s11 + $0x1c8] sm:$0xff] %v1133_v58 }
  0x90   : > { %1136 = vst [vmem:[%s6773_s11 + $0x1d0] sm:$0xff] %v1135_v59  ;;  %1138 = vst [vmem:[%s6773_s11 + $0x1d8] sm:$0xff] %v1137_v60  ;;  %v1139_v61 = vld [vmem:[%s6768_s29 + $0x3c0] sm:$0xff]  ;;  %v1141_v62 = vld [vmem:[%s6768_s29 + $0x3d0] sm:$0xff] }
  0x91   : > { %v1143_v63 = vld [vmem:[%s6768_s29 + $0x3e0] sm:$0xff]  ;;  %1140 = vst [vmem:[%s6773_s11 + $0x1e0] sm:$0xff] %v1139_v61  ;;  %1142 = vst [vmem:[%s6773_s11 + $0x1e8] sm:$0xff] %v1141_v62  ;;  %v1145_v0 = vld [vmem:[%s6768_s29 + $0x3f0] sm:$0xff] }
  0x92   : > { %1144 = vst [vmem:[%s6773_s11 + $0x1f0] sm:$0xff] %v1143_v63  ;;  %v1147_v1 = vld [vmem:[%s6768_s29 + $0x400] sm:$0xff]  ;;  %v1149_v2 = vld [vmem:[%s6768_s29 + $0x410] sm:$0xff]  ;;  %1146 = vst [vmem:[%s6773_s11 + $0x1f8] sm:$0xff] %v1145_v0 }
  0x93   : > { %1148 = vst [vmem:[%s6773_s11 + $0x200] sm:$0xff] %v1147_v1  ;;  %1150 = vst [vmem:[%s6773_s11 + $0x208] sm:$0xff] %v1149_v2  ;;  %v1151_v3 = vld [vmem:[%s6768_s29 + $0x420] sm:$0xff]  ;;  %v1153_v4 = vld [vmem:[%s6768_s29 + $0x430] sm:$0xff] }
  0x94   : > { %v1155_v5 = vld [vmem:[%s6768_s29 + $0x440] sm:$0xff]  ;;  %1152 = vst [vmem:[%s6773_s11 + $0x210] sm:$0xff] %v1151_v3  ;;  %1154 = vst [vmem:[%s6773_s11 + $0x218] sm:$0xff] %v1153_v4  ;;  %v1157_v6 = vld [vmem:[%s6768_s29 + $0x450] sm:$0xff] }
  0x95   : > { %1156 = vst [vmem:[%s6773_s11 + $0x220] sm:$0xff] %v1155_v5  ;;  %v1159_v7 = vld [vmem:[%s6768_s29 + $0x460] sm:$0xff]  ;;  %v1161_v8 = vld [vmem:[%s6768_s29 + $0x470] sm:$0xff]  ;;  %1158 = vst [vmem:[%s6773_s11 + $0x228] sm:$0xff] %v1157_v6 }
  0x96   : > { %1160 = vst [vmem:[%s6773_s11 + $0x230] sm:$0xff] %v1159_v7  ;;  %1162 = vst [vmem:[%s6773_s11 + $0x238] sm:$0xff] %v1161_v8  ;;  %v1163_v9 = vld [vmem:[%s6768_s29 + $0x480] sm:$0xff]  ;;  %v1165_v10 = vld [vmem:[%s6768_s29 + $0x490] sm:$0xff] }
  0x97   : > { %v1167_v11 = vld [vmem:[%s6768_s29 + $0x4a0] sm:$0xff]  ;;  %1164 = vst [vmem:[%s6773_s11 + $0x240] sm:$0xff] %v1163_v9  ;;  %1166 = vst [vmem:[%s6773_s11 + $0x248] sm:$0xff] %v1165_v10  ;;  %v1169_v12 = vld [vmem:[%s6768_s29 + $0x4b0] sm:$0xff] }
  0x98   : > { %1168 = vst [vmem:[%s6773_s11 + $0x250] sm:$0xff] %v1167_v11  ;;  %v1171_v13 = vld [vmem:[%s6768_s29 + $0x4c0] sm:$0xff]  ;;  %v1173_v14 = vld [vmem:[%s6768_s29 + $0x4d0] sm:$0xff]  ;;  %1170 = vst [vmem:[%s6773_s11 + $0x258] sm:$0xff] %v1169_v12 }
  0x99   : > { %1172 = vst [vmem:[%s6773_s11 + $0x260] sm:$0xff] %v1171_v13  ;;  %1174 = vst [vmem:[%s6773_s11 + $0x268] sm:$0xff] %v1173_v14  ;;  %v1175_v15 = vld [vmem:[%s6768_s29 + $0x4e0] sm:$0xff]  ;;  %v1177_v16 = vld [vmem:[%s6768_s29 + $0x4f0] sm:$0xff] }
  0x9a   : > { %v1179_v17 = vld [vmem:[%s6768_s29 + $0x500] sm:$0xff]  ;;  %1176 = vst [vmem:[%s6773_s11 + $0x270] sm:$0xff] %v1175_v15  ;;  %1178 = vst [vmem:[%s6773_s11 + $0x278] sm:$0xff] %v1177_v16  ;;  %v1181_v18 = vld [vmem:[%s6768_s29 + $0x510] sm:$0xff] }
  0x9b   : > { %1180 = vst [vmem:[%s6773_s11 + $0x280] sm:$0xff] %v1179_v17  ;;  %v1183_v19 = vld [vmem:[%s6768_s29 + $0x520] sm:$0xff]  ;;  %v1185_v20 = vld [vmem:[%s6768_s29 + $0x530] sm:$0xff]  ;;  %1182 = vst [vmem:[%s6773_s11 + $0x288] sm:$0xff] %v1181_v18 }
  0x9c   : > { %1184 = vst [vmem:[%s6773_s11 + $0x290] sm:$0xff] %v1183_v19  ;;  %1186 = vst [vmem:[%s6773_s11 + $0x298] sm:$0xff] %v1185_v20  ;;  %v1187_v21 = vld [vmem:[%s6768_s29 + $0x540] sm:$0xff]  ;;  %v1189_v22 = vld [vmem:[%s6768_s29 + $0x550] sm:$0xff] }
  0x9d   : > { %v1191_v23 = vld [vmem:[%s6768_s29 + $0x560] sm:$0xff]  ;;  %1188 = vst [vmem:[%s6773_s11 + $0x2a0] sm:$0xff] %v1187_v21  ;;  %1190 = vst [vmem:[%s6773_s11 + $0x2a8] sm:$0xff] %v1189_v22  ;;  %v1193_v24 = vld [vmem:[%s6768_s29 + $0x570] sm:$0xff] }
  0x9e   : > { %1192 = vst [vmem:[%s6773_s11 + $0x2b0] sm:$0xff] %v1191_v23  ;;  %v1195_v25 = vld [vmem:[%s6768_s29 + $0x580] sm:$0xff]  ;;  %v1197_v26 = vld [vmem:[%s6768_s29 + $0x590] sm:$0xff]  ;;  %1194 = vst [vmem:[%s6773_s11 + $0x2b8] sm:$0xff] %v1193_v24 }
  0x9f   : > { %1196 = vst [vmem:[%s6773_s11 + $0x2c0] sm:$0xff] %v1195_v25  ;;  %1198 = vst [vmem:[%s6773_s11 + $0x2c8] sm:$0xff] %v1197_v26  ;;  %v1199_v27 = vld [vmem:[%s6768_s29 + $0x5a0] sm:$0xff]  ;;  %v1201_v28 = vld [vmem:[%s6768_s29 + $0x5b0] sm:$0xff] }
  0xa0   : > { %v1203_v29 = vld [vmem:[%s6768_s29 + $0x5c0] sm:$0xff]  ;;  %1200 = vst [vmem:[%s6773_s11 + $0x2d0] sm:$0xff] %v1199_v27  ;;  %1202 = vst [vmem:[%s6773_s11 + $0x2d8] sm:$0xff] %v1201_v28  ;;  %v1205_v30 = vld [vmem:[%s6768_s29 + $0x5d0] sm:$0xff] }
  0xa1   : > { %1204 = vst [vmem:[%s6773_s11 + $0x2e0] sm:$0xff] %v1203_v29  ;;  %v1207_v31 = vld [vmem:[%s6768_s29 + $0x5e0] sm:$0xff]  ;;  %v1209_v32 = vld [vmem:[%s6768_s29 + $0x5f0] sm:$0xff]  ;;  %1206 = vst [vmem:[%s6773_s11 + $0x2e8] sm:$0xff] %v1205_v30 }
  0xa2   : > { %1208 = vst [vmem:[%s6773_s11 + $0x2f0] sm:$0xff] %v1207_v31  ;;  %1210 = vst [vmem:[%s6773_s11 + $0x2f8] sm:$0xff] %v1209_v32  ;;  %v1211_v33 = vld [vmem:[%s6768_s29 + $0x600] sm:$0xff]  ;;  %v1213_v34 = vld [vmem:[%s6768_s29 + $0x610] sm:$0xff] }
  0xa3   : > { %v1215_v35 = vld [vmem:[%s6768_s29 + $0x620] sm:$0xff]  ;;  %1212 = vst [vmem:[%s6773_s11 + $0x300] sm:$0xff] %v1211_v33  ;;  %1214 = vst [vmem:[%s6773_s11 + $0x308] sm:$0xff] %v1213_v34  ;;  %v1217_v36 = vld [vmem:[%s6768_s29 + $0x630] sm:$0xff] }
  0xa4   : > { %1216 = vst [vmem:[%s6773_s11 + $0x310] sm:$0xff] %v1215_v35  ;;  %v1219_v37 = vld [vmem:[%s6768_s29 + $0x640] sm:$0xff]  ;;  %v1221_v38 = vld [vmem:[%s6768_s29 + $0x650] sm:$0xff]  ;;  %1218 = vst [vmem:[%s6773_s11 + $0x318] sm:$0xff] %v1217_v36 }
  0xa5   : > { %1220 = vst [vmem:[%s6773_s11 + $0x320] sm:$0xff] %v1219_v37  ;;  %1222 = vst [vmem:[%s6773_s11 + $0x328] sm:$0xff] %v1221_v38  ;;  %v1223_v39 = vld [vmem:[%s6768_s29 + $0x660] sm:$0xff]  ;;  %v1225_v40 = vld [vmem:[%s6768_s29 + $0x670] sm:$0xff] }
  0xa6   : > { %v1227_v41 = vld [vmem:[%s6768_s29 + $0x680] sm:$0xff]  ;;  %1224 = vst [vmem:[%s6773_s11 + $0x330] sm:$0xff] %v1223_v39  ;;  %1226 = vst [vmem:[%s6773_s11 + $0x338] sm:$0xff] %v1225_v40  ;;  %v1229_v42 = vld [vmem:[%s6768_s29 + $0x690] sm:$0xff] }
  0xa7   : > { %1228 = vst [vmem:[%s6773_s11 + $0x340] sm:$0xff] %v1227_v41  ;;  %v1231_v43 = vld [vmem:[%s6768_s29 + $0x6a0] sm:$0xff]  ;;  %v1233_v44 = vld [vmem:[%s6768_s29 + $0x6b0] sm:$0xff]  ;;  %1230 = vst [vmem:[%s6773_s11 + $0x348] sm:$0xff] %v1229_v42 }
  0xa8   : > { %1232 = vst [vmem:[%s6773_s11 + $0x350] sm:$0xff] %v1231_v43  ;;  %1234 = vst [vmem:[%s6773_s11 + $0x358] sm:$0xff] %v1233_v44  ;;  %v1235_v45 = vld [vmem:[%s6768_s29 + $0x6c0] sm:$0xff]  ;;  %v1237_v46 = vld [vmem:[%s6768_s29 + $0x6d0] sm:$0xff] }
  0xa9   : > { %v1239_v47 = vld [vmem:[%s6768_s29 + $0x6e0] sm:$0xff]  ;;  %1236 = vst [vmem:[%s6773_s11 + $0x360] sm:$0xff] %v1235_v45  ;;  %1238 = vst [vmem:[%s6773_s11 + $0x368] sm:$0xff] %v1237_v46  ;;  %v1241_v48 = vld [vmem:[%s6768_s29 + $0x6f0] sm:$0xff] }
  0xaa   : > { %1240 = vst [vmem:[%s6773_s11 + $0x370] sm:$0xff] %v1239_v47  ;;  %v1243_v49 = vld [vmem:[%s6768_s29 + $0x700] sm:$0xff]  ;;  %v1245_v50 = vld [vmem:[%s6768_s29 + $0x710] sm:$0xff]  ;;  %1242 = vst [vmem:[%s6773_s11 + $0x378] sm:$0xff] %v1241_v48 }
  0xab   : > { %1244 = vst [vmem:[%s6773_s11 + $0x380] sm:$0xff] %v1243_v49  ;;  %1246 = vst [vmem:[%s6773_s11 + $0x388] sm:$0xff] %v1245_v50  ;;  %v1247_v51 = vld [vmem:[%s6768_s29 + $0x720] sm:$0xff]  ;;  %v1249_v52 = vld [vmem:[%s6768_s29 + $0x730] sm:$0xff] }
  0xac   : > { %v1251_v53 = vld [vmem:[%s6768_s29 + $0x740] sm:$0xff]  ;;  %1248 = vst [vmem:[%s6773_s11 + $0x390] sm:$0xff] %v1247_v51  ;;  %1250 = vst [vmem:[%s6773_s11 + $0x398] sm:$0xff] %v1249_v52  ;;  %v1253_v54 = vld [vmem:[%s6768_s29 + $0x750] sm:$0xff] }
  0xad   : > { %1252 = vst [vmem:[%s6773_s11 + $0x3a0] sm:$0xff] %v1251_v53  ;;  %v1255_v55 = vld [vmem:[%s6768_s29 + $0x760] sm:$0xff]  ;;  %v1257_v56 = vld [vmem:[%s6768_s29 + $0x770] sm:$0xff]  ;;  %1254 = vst [vmem:[%s6773_s11 + $0x3a8] sm:$0xff] %v1253_v54 }
  0xae   : > { %1256 = vst [vmem:[%s6773_s11 + $0x3b0] sm:$0xff] %v1255_v55  ;;  %1258 = vst [vmem:[%s6773_s11 + $0x3b8] sm:$0xff] %v1257_v56  ;;  %v1259_v57 = vld [vmem:[%s6768_s29 + $0x780] sm:$0xff]  ;;  %v1261_v58 = vld [vmem:[%s6768_s29 + $0x790] sm:$0xff] }
  0xaf   : > { %v1263_v59 = vld [vmem:[%s6768_s29 + $0x7a0] sm:$0xff]  ;;  %1260 = vst [vmem:[%s6773_s11 + $0x3c0] sm:$0xff] %v1259_v57  ;;  %1262 = vst [vmem:[%s6773_s11 + $0x3c8] sm:$0xff] %v1261_v58  ;;  %v1265_v60 = vld [vmem:[%s6768_s29 + $0x7b0] sm:$0xff] }
  0xb0   : > { %1264 = vst [vmem:[%s6773_s11 + $0x3d0] sm:$0xff] %v1263_v59  ;;  %v1267_v61 = vld [vmem:[%s6768_s29 + $0x7c0] sm:$0xff]  ;;  %v1269_v62 = vld [vmem:[%s6768_s29 + $0x7d0] sm:$0xff]  ;;  %1266 = vst [vmem:[%s6773_s11 + $0x3d8] sm:$0xff] %v1265_v60 }
  0xb1   : > { %1268 = vst [vmem:[%s6773_s11 + $0x3e0] sm:$0xff] %v1267_v61  ;;  %1270 = vst [vmem:[%s6773_s11 + $0x3e8] sm:$0xff] %v1269_v62  ;;  %v1271_v63 = vld [vmem:[%s6768_s29 + $0x7e0] sm:$0xff]  ;;  %v1273_v0 = vld [vmem:[%s6768_s29 + $0x7f0] sm:$0xff] }
  0xb2   : > { %v1275_v1 = vld [vmem:[%s6768_s29 + $0x800] sm:$0xff]  ;;  %1272 = vst [vmem:[%s6773_s11 + $0x3f0] sm:$0xff] %v1271_v63  ;;  %1274 = vst [vmem:[%s6773_s11 + $0x3f8] sm:$0xff] %v1273_v0  ;;  %v1277_v2 = vld [vmem:[%s6768_s29 + $0x810] sm:$0xff] }
  0xb3   : > { %1276 = vst [vmem:[%s6773_s11 + $0x400] sm:$0xff] %v1275_v1  ;;  %v1279_v3 = vld [vmem:[%s6768_s29 + $0x820] sm:$0xff]  ;;  %v1281_v4 = vld [vmem:[%s6768_s29 + $0x830] sm:$0xff]  ;;  %1278 = vst [vmem:[%s6773_s11 + $0x408] sm:$0xff] %v1277_v2 }
  0xb4   : > { %1280 = vst [vmem:[%s6773_s11 + $0x410] sm:$0xff] %v1279_v3  ;;  %1282 = vst [vmem:[%s6773_s11 + $0x418] sm:$0xff] %v1281_v4  ;;  %v1283_v5 = vld [vmem:[%s6768_s29 + $0x840] sm:$0xff]  ;;  %v1285_v6 = vld [vmem:[%s6768_s29 + $0x850] sm:$0xff] }
  0xb5   : > { %v1287_v7 = vld [vmem:[%s6768_s29 + $0x860] sm:$0xff]  ;;  %1284 = vst [vmem:[%s6773_s11 + $0x420] sm:$0xff] %v1283_v5  ;;  %1286 = vst [vmem:[%s6773_s11 + $0x428] sm:$0xff] %v1285_v6  ;;  %v1289_v8 = vld [vmem:[%s6768_s29 + $0x870] sm:$0xff] }
  0xb6   : > { %1288 = vst [vmem:[%s6773_s11 + $0x430] sm:$0xff] %v1287_v7  ;;  %v1291_v9 = vld [vmem:[%s6768_s29 + $0x880] sm:$0xff]  ;;  %v1293_v10 = vld [vmem:[%s6768_s29 + $0x890] sm:$0xff]  ;;  %1290 = vst [vmem:[%s6773_s11 + $0x438] sm:$0xff] %v1289_v8 }
  0xb7   : > { %1292 = vst [vmem:[%s6773_s11 + $0x440] sm:$0xff] %v1291_v9  ;;  %1294 = vst [vmem:[%s6773_s11 + $0x448] sm:$0xff] %v1293_v10  ;;  %v1295_v11 = vld [vmem:[%s6768_s29 + $0x8a0] sm:$0xff]  ;;  %v1297_v12 = vld [vmem:[%s6768_s29 + $0x8b0] sm:$0xff] }
  0xb8   : > { %v1299_v13 = vld [vmem:[%s6768_s29 + $0x8c0] sm:$0xff]  ;;  %1296 = vst [vmem:[%s6773_s11 + $0x450] sm:$0xff] %v1295_v11  ;;  %1298 = vst [vmem:[%s6773_s11 + $0x458] sm:$0xff] %v1297_v12  ;;  %v1301_v14 = vld [vmem:[%s6768_s29 + $0x8d0] sm:$0xff] }
  0xb9   : > { %1300 = vst [vmem:[%s6773_s11 + $0x460] sm:$0xff] %v1299_v13  ;;  %v1303_v15 = vld [vmem:[%s6768_s29 + $0x8e0] sm:$0xff]  ;;  %v1305_v16 = vld [vmem:[%s6768_s29 + $0x8f0] sm:$0xff]  ;;  %1302 = vst [vmem:[%s6773_s11 + $0x468] sm:$0xff] %v1301_v14 }
  0xba   : > { %1304 = vst [vmem:[%s6773_s11 + $0x470] sm:$0xff] %v1303_v15  ;;  %1306 = vst [vmem:[%s6773_s11 + $0x478] sm:$0xff] %v1305_v16  ;;  %v1307_v17 = vld [vmem:[%s6768_s29 + $0x900] sm:$0xff]  ;;  %v1309_v18 = vld [vmem:[%s6768_s29 + $0x910] sm:$0xff] }
  0xbb   : > { %v1311_v19 = vld [vmem:[%s6768_s29 + $0x920] sm:$0xff]  ;;  %1308 = vst [vmem:[%s6773_s11 + $0x480] sm:$0xff] %v1307_v17  ;;  %1310 = vst [vmem:[%s6773_s11 + $0x488] sm:$0xff] %v1309_v18  ;;  %v1313_v20 = vld [vmem:[%s6768_s29 + $0x930] sm:$0xff] }
  0xbc   : > { %1312 = vst [vmem:[%s6773_s11 + $0x490] sm:$0xff] %v1311_v19  ;;  %v1315_v21 = vld [vmem:[%s6768_s29 + $0x940] sm:$0xff]  ;;  %v1317_v22 = vld [vmem:[%s6768_s29 + $0x950] sm:$0xff]  ;;  %1314 = vst [vmem:[%s6773_s11 + $0x498] sm:$0xff] %v1313_v20 }
  0xbd   : > { %1316 = vst [vmem:[%s6773_s11 + $0x4a0] sm:$0xff] %v1315_v21  ;;  %1318 = vst [vmem:[%s6773_s11 + $0x4a8] sm:$0xff] %v1317_v22  ;;  %v1319_v23 = vld [vmem:[%s6768_s29 + $0x960] sm:$0xff]  ;;  %v1321_v24 = vld [vmem:[%s6768_s29 + $0x970] sm:$0xff] }
  0xbe   : > { %v1323_v25 = vld [vmem:[%s6768_s29 + $0x980] sm:$0xff]  ;;  %1320 = vst [vmem:[%s6773_s11 + $0x4b0] sm:$0xff] %v1319_v23  ;;  %1322 = vst [vmem:[%s6773_s11 + $0x4b8] sm:$0xff] %v1321_v24  ;;  %v1325_v26 = vld [vmem:[%s6768_s29 + $0x990] sm:$0xff] }
  0xbf   : > { %1324 = vst [vmem:[%s6773_s11 + $0x4c0] sm:$0xff] %v1323_v25  ;;  %v1327_v27 = vld [vmem:[%s6768_s29 + $0x9a0] sm:$0xff]  ;;  %v1329_v28 = vld [vmem:[%s6768_s29 + $0x9b0] sm:$0xff]  ;;  %1326 = vst [vmem:[%s6773_s11 + $0x4c8] sm:$0xff] %v1325_v26 }
  0xc0   : > { %1328 = vst [vmem:[%s6773_s11 + $0x4d0] sm:$0xff] %v1327_v27  ;;  %1330 = vst [vmem:[%s6773_s11 + $0x4d8] sm:$0xff] %v1329_v28  ;;  %v1331_v29 = vld [vmem:[%s6768_s29 + $0x9c0] sm:$0xff]  ;;  %v1333_v30 = vld [vmem:[%s6768_s29 + $0x9d0] sm:$0xff] }
  0xc1   : > { %v1335_v31 = vld [vmem:[%s6768_s29 + $0x9e0] sm:$0xff]  ;;  %1332 = vst [vmem:[%s6773_s11 + $0x4e0] sm:$0xff] %v1331_v29  ;;  %1334 = vst [vmem:[%s6773_s11 + $0x4e8] sm:$0xff] %v1333_v30  ;;  %v1337_v32 = vld [vmem:[%s6768_s29 + $0x9f0] sm:$0xff] }
  0xc2   : > { %1336 = vst [vmem:[%s6773_s11 + $0x4f0] sm:$0xff] %v1335_v31  ;;  %v1339_v33 = vld [vmem:[%s6768_s29 + $0xa00] sm:$0xff]  ;;  %v1341_v34 = vld [vmem:[%s6768_s29 + $0xa10] sm:$0xff]  ;;  %1338 = vst [vmem:[%s6773_s11 + $0x4f8] sm:$0xff] %v1337_v32 }
  0xc3   : > { %1340 = vst [vmem:[%s6773_s11 + $0x500] sm:$0xff] %v1339_v33  ;;  %1342 = vst [vmem:[%s6773_s11 + $0x508] sm:$0xff] %v1341_v34  ;;  %v1343_v35 = vld [vmem:[%s6768_s29 + $0xa20] sm:$0xff]  ;;  %v1345_v36 = vld [vmem:[%s6768_s29 + $0xa30] sm:$0xff] }
  0xc4   : > { %v1347_v37 = vld [vmem:[%s6768_s29 + $0xa40] sm:$0xff]  ;;  %1344 = vst [vmem:[%s6773_s11 + $0x510] sm:$0xff] %v1343_v35  ;;  %1346 = vst [vmem:[%s6773_s11 + $0x518] sm:$0xff] %v1345_v36  ;;  %v1349_v38 = vld [vmem:[%s6768_s29 + $0xa50] sm:$0xff] }
  0xc5   : > { %1348 = vst [vmem:[%s6773_s11 + $0x520] sm:$0xff] %v1347_v37  ;;  %v1351_v39 = vld [vmem:[%s6768_s29 + $0xa60] sm:$0xff]  ;;  %v1353_v40 = vld [vmem:[%s6768_s29 + $0xa70] sm:$0xff]  ;;  %1350 = vst [vmem:[%s6773_s11 + $0x528] sm:$0xff] %v1349_v38 }
  0xc6   : > { %1352 = vst [vmem:[%s6773_s11 + $0x530] sm:$0xff] %v1351_v39  ;;  %1354 = vst [vmem:[%s6773_s11 + $0x538] sm:$0xff] %v1353_v40  ;;  %v1355_v41 = vld [vmem:[%s6768_s29 + $0xa80] sm:$0xff]  ;;  %v1357_v42 = vld [vmem:[%s6768_s29 + $0xa90] sm:$0xff] }
  0xc7   : > { %v1359_v43 = vld [vmem:[%s6768_s29 + $0xaa0] sm:$0xff]  ;;  %1356 = vst [vmem:[%s6773_s11 + $0x540] sm:$0xff] %v1355_v41  ;;  %1358 = vst [vmem:[%s6773_s11 + $0x548] sm:$0xff] %v1357_v42  ;;  %v1361_v44 = vld [vmem:[%s6768_s29 + $0xab0] sm:$0xff] }
  0xc8   : > { %1360 = vst [vmem:[%s6773_s11 + $0x550] sm:$0xff] %v1359_v43  ;;  %v1363_v45 = vld [vmem:[%s6768_s29 + $0xac0] sm:$0xff]  ;;  %v1365_v46 = vld [vmem:[%s6768_s29 + $0xad0] sm:$0xff]  ;;  %1362 = vst [vmem:[%s6773_s11 + $0x558] sm:$0xff] %v1361_v44 }
  0xc9   : > { %1364 = vst [vmem:[%s6773_s11 + $0x560] sm:$0xff] %v1363_v45  ;;  %1366 = vst [vmem:[%s6773_s11 + $0x568] sm:$0xff] %v1365_v46  ;;  %v1367_v47 = vld [vmem:[%s6768_s29 + $0xae0] sm:$0xff]  ;;  %v1369_v48 = vld [vmem:[%s6768_s29 + $0xaf0] sm:$0xff] }
  0xca   : > { %v1371_v49 = vld [vmem:[%s6768_s29 + $0xb00] sm:$0xff]  ;;  %1368 = vst [vmem:[%s6773_s11 + $0x570] sm:$0xff] %v1367_v47  ;;  %1370 = vst [vmem:[%s6773_s11 + $0x578] sm:$0xff] %v1369_v48  ;;  %v1373_v50 = vld [vmem:[%s6768_s29 + $0xb10] sm:$0xff] }
  0xcb   : > { %1372 = vst [vmem:[%s6773_s11 + $0x580] sm:$0xff] %v1371_v49  ;;  %v1375_v51 = vld [vmem:[%s6768_s29 + $0xb20] sm:$0xff]  ;;  %v1377_v52 = vld [vmem:[%s6768_s29 + $0xb30] sm:$0xff]  ;;  %1374 = vst [vmem:[%s6773_s11 + $0x588] sm:$0xff] %v1373_v50 }
  0xcc   : > { %1376 = vst [vmem:[%s6773_s11 + $0x590] sm:$0xff] %v1375_v51  ;;  %1378 = vst [vmem:[%s6773_s11 + $0x598] sm:$0xff] %v1377_v52  ;;  %v1379_v53 = vld [vmem:[%s6768_s29 + $0xb40] sm:$0xff]  ;;  %v1381_v54 = vld [vmem:[%s6768_s29 + $0xb50] sm:$0xff] }
  0xcd   : > { %v1383_v55 = vld [vmem:[%s6768_s29 + $0xb60] sm:$0xff]  ;;  %1380 = vst [vmem:[%s6773_s11 + $0x5a0] sm:$0xff] %v1379_v53  ;;  %1382 = vst [vmem:[%s6773_s11 + $0x5a8] sm:$0xff] %v1381_v54  ;;  %v1385_v56 = vld [vmem:[%s6768_s29 + $0xb70] sm:$0xff] }
  0xce   : > { %1384 = vst [vmem:[%s6773_s11 + $0x5b0] sm:$0xff] %v1383_v55  ;;  %v1387_v57 = vld [vmem:[%s6768_s29 + $0xb80] sm:$0xff]  ;;  %v1389_v58 = vld [vmem:[%s6768_s29 + $0xb90] sm:$0xff]  ;;  %1386 = vst [vmem:[%s6773_s11 + $0x5b8] sm:$0xff] %v1385_v56 }
  0xcf   : > { %1388 = vst [vmem:[%s6773_s11 + $0x5c0] sm:$0xff] %v1387_v57  ;;  %1390 = vst [vmem:[%s6773_s11 + $0x5c8] sm:$0xff] %v1389_v58  ;;  %v1391_v59 = vld [vmem:[%s6768_s29 + $0xba0] sm:$0xff]  ;;  %v1393_v60 = vld [vmem:[%s6768_s29 + $0xbb0] sm:$0xff] }
  0xd0   : > { %v1395_v61 = vld [vmem:[%s6768_s29 + $0xbc0] sm:$0xff]  ;;  %1392 = vst [vmem:[%s6773_s11 + $0x5d0] sm:$0xff] %v1391_v59  ;;  %1394 = vst [vmem:[%s6773_s11 + $0x5d8] sm:$0xff] %v1393_v60  ;;  %v1397_v62 = vld [vmem:[%s6768_s29 + $0xbd0] sm:$0xff] }
  0xd1   : > { %1396 = vst [vmem:[%s6773_s11 + $0x5e0] sm:$0xff] %v1395_v61  ;;  %v1399_v63 = vld [vmem:[%s6768_s29 + $0xbe0] sm:$0xff]  ;;  %v1401_v0 = vld [vmem:[%s6768_s29 + $0xbf0] sm:$0xff]  ;;  %1398 = vst [vmem:[%s6773_s11 + $0x5e8] sm:$0xff] %v1397_v62 }
  0xd2   : > { %1400 = vst [vmem:[%s6773_s11 + $0x5f0] sm:$0xff] %v1399_v63  ;;  %1402 = vst [vmem:[%s6773_s11 + $0x5f8] sm:$0xff] %v1401_v0  ;;  %v1403_v1 = vld [vmem:[%s6768_s29 + $0xc00] sm:$0xff]  ;;  %v1405_v2 = vld [vmem:[%s6768_s29 + $0xc10] sm:$0xff] }
  0xd3   : > { %v1407_v3 = vld [vmem:[%s6768_s29 + $0xc20] sm:$0xff]  ;;  %1404 = vst [vmem:[%s6773_s11 + $0x600] sm:$0xff] %v1403_v1  ;;  %1406 = vst [vmem:[%s6773_s11 + $0x608] sm:$0xff] %v1405_v2  ;;  %v1409_v4 = vld [vmem:[%s6768_s29 + $0xc30] sm:$0xff] }
  0xd4   : > { %1408 = vst [vmem:[%s6773_s11 + $0x610] sm:$0xff] %v1407_v3  ;;  %v1411_v5 = vld [vmem:[%s6768_s29 + $0xc40] sm:$0xff]  ;;  %v1413_v6 = vld [vmem:[%s6768_s29 + $0xc50] sm:$0xff]  ;;  %1410 = vst [vmem:[%s6773_s11 + $0x618] sm:$0xff] %v1409_v4 }
  0xd5   : > { %1412 = vst [vmem:[%s6773_s11 + $0x620] sm:$0xff] %v1411_v5  ;;  %1414 = vst [vmem:[%s6773_s11 + $0x628] sm:$0xff] %v1413_v6  ;;  %v1415_v7 = vld [vmem:[%s6768_s29 + $0xc60] sm:$0xff]  ;;  %v1417_v8 = vld [vmem:[%s6768_s29 + $0xc70] sm:$0xff] }
  0xd6   : > { %v1419_v9 = vld [vmem:[%s6768_s29 + $0xc80] sm:$0xff]  ;;  %1416 = vst [vmem:[%s6773_s11 + $0x630] sm:$0xff] %v1415_v7  ;;  %1418 = vst [vmem:[%s6773_s11 + $0x638] sm:$0xff] %v1417_v8  ;;  %v1421_v10 = vld [vmem:[%s6768_s29 + $0xc90] sm:$0xff] }
  0xd7   : > { %1420 = vst [vmem:[%s6773_s11 + $0x640] sm:$0xff] %v1419_v9  ;;  %v1423_v11 = vld [vmem:[%s6768_s29 + $0xca0] sm:$0xff]  ;;  %v1425_v12 = vld [vmem:[%s6768_s29 + $0xcb0] sm:$0xff]  ;;  %1422 = vst [vmem:[%s6773_s11 + $0x648] sm:$0xff] %v1421_v10 }
  0xd8   : > { %1424 = vst [vmem:[%s6773_s11 + $0x650] sm:$0xff] %v1423_v11  ;;  %1426 = vst [vmem:[%s6773_s11 + $0x658] sm:$0xff] %v1425_v12  ;;  %v1427_v13 = vld [vmem:[%s6768_s29 + $0xcc0] sm:$0xff]  ;;  %v1429_v14 = vld [vmem:[%s6768_s29 + $0xcd0] sm:$0xff] }
  0xd9   : > { %v1431_v15 = vld [vmem:[%s6768_s29 + $0xce0] sm:$0xff]  ;;  %1428 = vst [vmem:[%s6773_s11 + $0x660] sm:$0xff] %v1427_v13  ;;  %1430 = vst [vmem:[%s6773_s11 + $0x668] sm:$0xff] %v1429_v14  ;;  %v1433_v16 = vld [vmem:[%s6768_s29 + $0xcf0] sm:$0xff] }
  0xda   : > { %1432 = vst [vmem:[%s6773_s11 + $0x670] sm:$0xff] %v1431_v15  ;;  %v1435_v17 = vld [vmem:[%s6768_s29 + $0xd00] sm:$0xff]  ;;  %v1437_v18 = vld [vmem:[%s6768_s29 + $0xd10] sm:$0xff]  ;;  %1434 = vst [vmem:[%s6773_s11 + $0x678] sm:$0xff] %v1433_v16 }
  0xdb   : > { %1436 = vst [vmem:[%s6773_s11 + $0x680] sm:$0xff] %v1435_v17  ;;  %1438 = vst [vmem:[%s6773_s11 + $0x688] sm:$0xff] %v1437_v18  ;;  %v1439_v19 = vld [vmem:[%s6768_s29 + $0xd20] sm:$0xff]  ;;  %v1441_v20 = vld [vmem:[%s6768_s29 + $0xd30] sm:$0xff] }
  0xdc   : > { %v1443_v21 = vld [vmem:[%s6768_s29 + $0xd40] sm:$0xff]  ;;  %1440 = vst [vmem:[%s6773_s11 + $0x690] sm:$0xff] %v1439_v19  ;;  %1442 = vst [vmem:[%s6773_s11 + $0x698] sm:$0xff] %v1441_v20  ;;  %v1445_v22 = vld [vmem:[%s6768_s29 + $0xd50] sm:$0xff] }
  0xdd   : > { %1444 = vst [vmem:[%s6773_s11 + $0x6a0] sm:$0xff] %v1443_v21  ;;  %v1447_v23 = vld [vmem:[%s6768_s29 + $0xd60] sm:$0xff]  ;;  %v1449_v24 = vld [vmem:[%s6768_s29 + $0xd70] sm:$0xff]  ;;  %1446 = vst [vmem:[%s6773_s11 + $0x6a8] sm:$0xff] %v1445_v22 }
  0xde   : > { %1448 = vst [vmem:[%s6773_s11 + $0x6b0] sm:$0xff] %v1447_v23  ;;  %1450 = vst [vmem:[%s6773_s11 + $0x6b8] sm:$0xff] %v1449_v24  ;;  %v1451_v25 = vld [vmem:[%s6768_s29 + $0xd80] sm:$0xff]  ;;  %v1453_v26 = vld [vmem:[%s6768_s29 + $0xd90] sm:$0xff] }
  0xdf   : > { %v1455_v27 = vld [vmem:[%s6768_s29 + $0xda0] sm:$0xff]  ;;  %1452 = vst [vmem:[%s6773_s11 + $0x6c0] sm:$0xff] %v1451_v25  ;;  %1454 = vst [vmem:[%s6773_s11 + $0x6c8] sm:$0xff] %v1453_v26  ;;  %v1457_v28 = vld [vmem:[%s6768_s29 + $0xdb0] sm:$0xff] }
  0xe0   : > { %1456 = vst [vmem:[%s6773_s11 + $0x6d0] sm:$0xff] %v1455_v27  ;;  %v1459_v29 = vld [vmem:[%s6768_s29 + $0xdc0] sm:$0xff]  ;;  %v1461_v30 = vld [vmem:[%s6768_s29 + $0xdd0] sm:$0xff]  ;;  %1458 = vst [vmem:[%s6773_s11 + $0x6d8] sm:$0xff] %v1457_v28 }
  0xe1   : > { %1460 = vst [vmem:[%s6773_s11 + $0x6e0] sm:$0xff] %v1459_v29  ;;  %1462 = vst [vmem:[%s6773_s11 + $0x6e8] sm:$0xff] %v1461_v30  ;;  %v1463_v31 = vld [vmem:[%s6768_s29 + $0xde0] sm:$0xff]  ;;  %v1465_v32 = vld [vmem:[%s6768_s29 + $0xdf0] sm:$0xff] }
  0xe2   : > { %v1467_v33 = vld [vmem:[%s6768_s29 + $0xe00] sm:$0xff]  ;;  %1464 = vst [vmem:[%s6773_s11 + $0x6f0] sm:$0xff] %v1463_v31  ;;  %1466 = vst [vmem:[%s6773_s11 + $0x6f8] sm:$0xff] %v1465_v32  ;;  %v1469_v34 = vld [vmem:[%s6768_s29 + $0xe10] sm:$0xff] }
  0xe3   : > { %1468 = vst [vmem:[%s6773_s11 + $0x700] sm:$0xff] %v1467_v33  ;;  %v1471_v35 = vld [vmem:[%s6768_s29 + $0xe20] sm:$0xff]  ;;  %v1473_v36 = vld [vmem:[%s6768_s29 + $0xe30] sm:$0xff]  ;;  %1470 = vst [vmem:[%s6773_s11 + $0x708] sm:$0xff] %v1469_v34 }
  0xe4   : > { %1472 = vst [vmem:[%s6773_s11 + $0x710] sm:$0xff] %v1471_v35  ;;  %1474 = vst [vmem:[%s6773_s11 + $0x718] sm:$0xff] %v1473_v36  ;;  %v1475_v37 = vld [vmem:[%s6768_s29 + $0xe40] sm:$0xff]  ;;  %v1477_v38 = vld [vmem:[%s6768_s29 + $0xe50] sm:$0xff] }
  0xe5   : > { %v1479_v39 = vld [vmem:[%s6768_s29 + $0xe60] sm:$0xff]  ;;  %1476 = vst [vmem:[%s6773_s11 + $0x720] sm:$0xff] %v1475_v37  ;;  %1478 = vst [vmem:[%s6773_s11 + $0x728] sm:$0xff] %v1477_v38  ;;  %v1481_v40 = vld [vmem:[%s6768_s29 + $0xe70] sm:$0xff] }
  0xe6   : > { %1480 = vst [vmem:[%s6773_s11 + $0x730] sm:$0xff] %v1479_v39  ;;  %v1483_v41 = vld [vmem:[%s6768_s29 + $0xe80] sm:$0xff]  ;;  %v1485_v42 = vld [vmem:[%s6768_s29 + $0xe90] sm:$0xff]  ;;  %1482 = vst [vmem:[%s6773_s11 + $0x738] sm:$0xff] %v1481_v40 }
  0xe7   : > { %1484 = vst [vmem:[%s6773_s11 + $0x740] sm:$0xff] %v1483_v41  ;;  %1486 = vst [vmem:[%s6773_s11 + $0x748] sm:$0xff] %v1485_v42  ;;  %v1487_v43 = vld [vmem:[%s6768_s29 + $0xea0] sm:$0xff]  ;;  %v1489_v44 = vld [vmem:[%s6768_s29 + $0xeb0] sm:$0xff] }
  0xe8   : > { %v1491_v45 = vld [vmem:[%s6768_s29 + $0xec0] sm:$0xff]  ;;  %1488 = vst [vmem:[%s6773_s11 + $0x750] sm:$0xff] %v1487_v43  ;;  %1490 = vst [vmem:[%s6773_s11 + $0x758] sm:$0xff] %v1489_v44  ;;  %v1493_v46 = vld [vmem:[%s6768_s29 + $0xed0] sm:$0xff] }
  0xe9   : > { %1492 = vst [vmem:[%s6773_s11 + $0x760] sm:$0xff] %v1491_v45  ;;  %v1495_v47 = vld [vmem:[%s6768_s29 + $0xee0] sm:$0xff]  ;;  %v1497_v48 = vld [vmem:[%s6768_s29 + $0xef0] sm:$0xff]  ;;  %1494 = vst [vmem:[%s6773_s11 + $0x768] sm:$0xff] %v1493_v46 }
  0xea   : > { %1496 = vst [vmem:[%s6773_s11 + $0x770] sm:$0xff] %v1495_v47  ;;  %1498 = vst [vmem:[%s6773_s11 + $0x778] sm:$0xff] %v1497_v48  ;;  %v1499_v49 = vld [vmem:[%s6768_s29 + $0xf00] sm:$0xff]  ;;  %v1501_v50 = vld [vmem:[%s6768_s29 + $0xf10] sm:$0xff] }
  0xeb   : > { %v1503_v51 = vld [vmem:[%s6768_s29 + $0xf20] sm:$0xff]  ;;  %1500 = vst [vmem:[%s6773_s11 + $0x780] sm:$0xff] %v1499_v49  ;;  %1502 = vst [vmem:[%s6773_s11 + $0x788] sm:$0xff] %v1501_v50  ;;  %v1505_v52 = vld [vmem:[%s6768_s29 + $0xf30] sm:$0xff] }
  0xec   : > { %1504 = vst [vmem:[%s6773_s11 + $0x790] sm:$0xff] %v1503_v51  ;;  %v1507_v53 = vld [vmem:[%s6768_s29 + $0xf40] sm:$0xff]  ;;  %v1509_v54 = vld [vmem:[%s6768_s29 + $0xf50] sm:$0xff]  ;;  %1506 = vst [vmem:[%s6773_s11 + $0x798] sm:$0xff] %v1505_v52 }
  0xed   : > { %1508 = vst [vmem:[%s6773_s11 + $0x7a0] sm:$0xff] %v1507_v53  ;;  %1510 = vst [vmem:[%s6773_s11 + $0x7a8] sm:$0xff] %v1509_v54  ;;  %v1511_v55 = vld [vmem:[%s6768_s29 + $0xf60] sm:$0xff]  ;;  %v1513_v56 = vld [vmem:[%s6768_s29 + $0xf70] sm:$0xff] }
  0xee   : > { %v1515_v57 = vld [vmem:[%s6768_s29 + $0xf80] sm:$0xff]  ;;  %1512 = vst [vmem:[%s6773_s11 + $0x7b0] sm:$0xff] %v1511_v55  ;;  %1514 = vst [vmem:[%s6773_s11 + $0x7b8] sm:$0xff] %v1513_v56  ;;  %v1517_v58 = vld [vmem:[%s6768_s29 + $0xf90] sm:$0xff] }
  0xef   : > { %1516 = vst [vmem:[%s6773_s11 + $0x7c0] sm:$0xff] %v1515_v57  ;;  %v1519_v59 = vld [vmem:[%s6768_s29 + $0xfa0] sm:$0xff]  ;;  %v1521_v60 = vld [vmem:[%s6768_s29 + $0xfb0] sm:$0xff]  ;;  %1518 = vst [vmem:[%s6773_s11 + $0x7c8] sm:$0xff] %v1517_v58 }
  0xf0   : > { %1520 = vst [vmem:[%s6773_s11 + $0x7d0] sm:$0xff] %v1519_v59  ;;  %1522 = vst [vmem:[%s6773_s11 + $0x7d8] sm:$0xff] %v1521_v60  ;;  %v1523_v61 = vld [vmem:[%s6768_s29 + $0xfc0] sm:$0xff]  ;;  %v1525_v62 = vld [vmem:[%s6768_s29 + $0xfd0] sm:$0xff] }
  0xf1   : > { %v1527_v63 = vld [vmem:[%s6768_s29 + $0xfe0] sm:$0xff]  ;;  %1524 = vst [vmem:[%s6773_s11 + $0x7e0] sm:$0xff] %v1523_v61  ;;  %1526 = vst [vmem:[%s6773_s11 + $0x7e8] sm:$0xff] %v1525_v62  ;;  %v1529_v0 = vld [vmem:[%s6768_s29 + $0xff0] sm:$0xff] }
  0xf2   : > { %1528 = vst [vmem:[%s6773_s11 + $0x7f0] sm:$0xff] %v1527_v63  ;;  %1530 = vst [vmem:[%s6773_s11 + $0x7f8] sm:$0xff] %v1529_v0 }
  0xf3 PF: > { %p5401_p0 = scmp.ge.s32.totalorder %s6362_s26, 1  ;;  %p1543_p1 = scmp.lt.s32.totalorder %s6362_s26, 5 }
  0xf5   : > { %p1544_p2 = pnand %p5401_p0, %p1543_p1 }
  0xf7   : > { %1547 = sbr.rel (%p1544_p2) target bundleno = 990 (0x3de), region = 89 }
  0xfc   : > { %s1550_s0 = sand.u32 1, %s6338_s21   ;;  %s1557_s10 = sand.u32 1, %s6330_s19  }
  0xfd   : > { %s5402_s27 = sshll.u32 %s1550_s0, 10  ;;  %s5403_s6 = sshll.u32 %s1557_s10, 11 }
  0xfe   : > { %s1586_s12 = sand.u32 1, %s6322_s17   ;;  %s5405_s16 = sshll.u32 %s6350_s24, 1 }
  0xff   : > { %s5404_s29 = sshll.u32 %s1586_s12, 8  ;;  %p1594_p3 = scmp.lt.s32.totalorder %s5405_s16, 3 }
 0x100   : > { %s7296_s9 = scalar_lea.vmem [#allocation4], %s5402_s27  ;;  %s7298_s11 = scalar_lea.vmem [#allocation5], %s5403_s6 }
 0x101   : > { %s8602_s16 = smov (!%p1594_p3, %s5405_s16), 3  ;;  %s7300_s1 = scalar_lea.vmem [#allocation6], %s5404_s29 }
 0x102   : > { %s1596_s7 = scalar_lea.vmem %s8470_s2, %s8602_s16  ;;  %p5406_p4 = scmp.ne.s32.totalorder %s6346_s23, 0 }
 0x104   : > { %1603 = sbr.rel (%p5406_p4) target bundleno = 282 (0x11a), region = 101 }
 0x109   : > { %v6364_v1 = vmov 0.0  }
 0x10a   : > { %1604 = vst [vmem:[#allocation2 + $0xb0] sm:$0xff] %v6364_v1  ;;  %1605 = vst [vmem:[#allocation2] sm:$0xff] %v6364_v1 }
 0x10b   : > { %1606 = vst [vmem:[#allocation2 + $0xd8] sm:$0xff] %v6364_v1  ;;  %1607 = vst [vmem:[#allocation2 + $0x18] sm:$0xff] %v6364_v1 }
 0x10c   : > { %1608 = vst [vmem:[#allocation2 + $0x50] sm:$0xff] %v6364_v1  ;;  %1609 = vst [vmem:[#allocation2 + $0x68] sm:$0xff] %v6364_v1 }
 0x10d   : > { %1610 = vst [vmem:[#allocation2 + $0x30] sm:$0xff] %v6364_v1  ;;  %1611 = vst [vmem:[#allocation2 + $0x48] sm:$0xff] %v6364_v1 }
 0x10e   : > { %1612 = vst [vmem:[#allocation2 + $0x80] sm:$0xff] %v6364_v1  ;;  %1613 = vst [vmem:[#allocation2 + $0x88] sm:$0xff] %v6364_v1 }
 0x10f   : > { %1614 = vst [vmem:[#allocation2 + $0xe8] sm:$0xff] %v6364_v1  ;;  %1615 = vst [vmem:[#allocation2 + $0xb8] sm:$0xff] %v6364_v1 }
 0x110   : > { %1616 = vst [vmem:[#allocation2 + $0x60] sm:$0xff] %v6364_v1  ;;  %1617 = vst [vmem:[#allocation2 + $0xf0] sm:$0xff] %v6364_v1 }
 0x111   : > { %1618 = vst [vmem:[#allocation2 + $0x8] sm:$0xff] %v6364_v1  ;;  %1619 = vst [vmem:[#allocation2 + $0x78] sm:$0xff] %v6364_v1 }
 0x112   : > { %1620 = vst [vmem:[#allocation2 + $0x38] sm:$0xff] %v6364_v1  ;;  %1621 = vst [vmem:[#allocation2 + $0x58] sm:$0xff] %v6364_v1 }
 0x113   : > { %1622 = vst [vmem:[#allocation2 + $0x40] sm:$0xff] %v6364_v1  ;;  %1623 = vst [vmem:[#allocation2 + $0xc8] sm:$0xff] %v6364_v1 }
 0x114   : > { %1624 = vst [vmem:[#allocation2 + $0xe0] sm:$0xff] %v6364_v1  ;;  %1625 = vst [vmem:[#allocation2 + $0x90] sm:$0xff] %v6364_v1 }
 0x115   : > { %1626 = vst [vmem:[#allocation2 + $0x70] sm:$0xff] %v6364_v1  ;;  %1627 = vst [vmem:[#allocation2 + $0xc0] sm:$0xff] %v6364_v1 }
 0x116   : > { %1628 = vst [vmem:[#allocation2 + $0xa8] sm:$0xff] %v6364_v1  ;;  %1629 = vst [vmem:[#allocation2 + $0xd0] sm:$0xff] %v6364_v1 }
 0x117   : > { %1630 = vst [vmem:[#allocation2 + $0x10] sm:$0xff] %v6364_v1  ;;  %1631 = vst [vmem:[#allocation2 + $0x28] sm:$0xff] %v6364_v1 }
 0x118   : > { %1632 = vst [vmem:[#allocation2 + $0xa0] sm:$0xff] %v6364_v1  ;;  %1633 = vst [vmem:[#allocation2 + $0xf8] sm:$0xff] %v6364_v1 }
 0x119   : > { %1634 = vst [vmem:[#allocation2 + $0x20] sm:$0xff] %v6364_v1  ;;  %1635 = vst [vmem:[#allocation2 + $0x98] sm:$0xff] %v6364_v1 }
 0x11a PF: > { %v5891_v2 = vld [vmem:[%s7298_s11 + $0x74] ss:$8 sps:$4 sm:$0xff]   ;;  %v5895_v4 = vld [vmem:[%s7298_s11 + $0x70] ss:$8 sps:$4 sm:$0xff]   ;;  %v5897_v6 = vld [vmem:[%s7298_s11 + $0x64] ss:$8 sps:$4 sm:$0xff]  }
 0x11b   : > { %v5893_v3 = vld [vmem:[%s7298_s11 + $0x174] ss:$8 sps:$4 sm:$0xff]   ;;  %3972 = vmatprep.subr.bf16.mxu0 %v5891_v2  ;;  %v5896_v5 = vld [vmem:[%s7298_s11 + $0x170] ss:$8 sps:$4 sm:$0xff]   ;;  %v5899_v7 = vld [vmem:[%s7298_s11 + $0x164] ss:$8 sps:$4 sm:$0xff]  }
 0x11c   : > { %4085 = vmatprep.subr.bf16.mxu1 %v5893_v3  ;;  %3973 = vmatpush1.bf16.msra.mxu0 %v5895_v4  ;;  %v5901_v8 = vld [vmem:[%s7298_s11 + $0x60] ss:$8 sps:$4 sm:$0xff]   ;;  %v5903_v10 = vld [vmem:[%s7298_s11 + $0x54] ss:$8 sps:$4 sm:$0xff]   ;;  %v5907_v12 = vld [vmem:[%s7298_s11 + $0x50] ss:$8 sps:$4 sm:$0xff]  }
 0x11d   : > { %4086 = vmatpush1.bf16.msra.mxu1 %v5896_v5  ;;  %3974 = vmatprep.subr.bf16.mxu0 %v5897_v6  ;;  %v5902_v9 = vld [vmem:[%s7298_s11 + $0x160] ss:$8 sps:$4 sm:$0xff]   ;;  %v5905_v11 = vld [vmem:[%s7298_s11 + $0x154] ss:$8 sps:$4 sm:$0xff]   ;;  %v5908_v13 = vld [vmem:[%s7298_s11 + $0x150] ss:$8 sps:$4 sm:$0xff]  }
 0x11e   : > { %4087 = vmatprep.subr.bf16.mxu1 %v5899_v7  ;;  %v5909_v14 = vld [vmem:[%s7298_s11 + $0x44] ss:$8 sps:$4 sm:$0xff]   ;;  %v5913_v16 = vld [vmem:[%s7298_s11 + $0x40] ss:$8 sps:$4 sm:$0xff]   ;;  %v5915_v18 = vld [vmem:[%s7298_s11 + $0x34] ss:$8 sps:$4 sm:$0xff]  }
 0x11f   : > { %v5911_v15 = vld [vmem:[%s7298_s11 + $0x144] ss:$8 sps:$4 sm:$0xff]   ;;  %v5914_v17 = vld [vmem:[%s7298_s11 + $0x140] ss:$8 sps:$4 sm:$0xff]   ;;  %v5917_v19 = vld [vmem:[%s7298_s11 + $0x134] ss:$8 sps:$4 sm:$0xff]  }
 0x120   : > { %3975 = vmatpush1.bf16.msra.mxu0 %v5901_v8  ;;  %v5919_v20 = vld [vmem:[%s7298_s11 + $0x30] ss:$8 sps:$4 sm:$0xff]   ;;  %v5921_v22 = vld [vmem:[%s7298_s11 + $0x24] ss:$8 sps:$4 sm:$0xff]   ;;  %v5925_v24 = vld [vmem:[%s7298_s11 + $0x20] ss:$8 sps:$4 sm:$0xff]  }
 0x121   : > { %4088 = vmatpush1.bf16.msra.mxu1 %v5902_v9  ;;  %3976 = vmatprep.subr.bf16.mxu0 %v5903_v10  ;;  %v5920_v21 = vld [vmem:[%s7298_s11 + $0x130] ss:$8 sps:$4 sm:$0xff]   ;;  %v5923_v23 = vld [vmem:[%s7298_s11 + $0x124] ss:$8 sps:$4 sm:$0xff]   ;;  %v5926_v25 = vld [vmem:[%s7298_s11 + $0x120] ss:$8 sps:$4 sm:$0xff]  }
 0x122   : > { %4089 = vmatprep.subr.bf16.mxu1 %v5905_v11  ;;  %v5927_v26 = vld [vmem:[%s7298_s11 + $0x14] ss:$8 sps:$4 sm:$0xff]   ;;  %v5931_v28 = vld [vmem:[%s7298_s11 + $0x10] ss:$8 sps:$4 sm:$0xff]   ;;  %v5933_v30 = vld [vmem:[%s7298_s11 + $0x4] ss:$8 sps:$4 sm:$0xff]  }
 0x123   : > { %v5929_v27 = vld [vmem:[%s7298_s11 + $0x114] ss:$8 sps:$4 sm:$0xff]   ;;  %v5932_v29 = vld [vmem:[%s7298_s11 + $0x110] ss:$8 sps:$4 sm:$0xff]   ;;  %v5935_v31 = vld [vmem:[%s7298_s11 + $0x104] ss:$8 sps:$4 sm:$0xff]  }
 0x124   : > { %3977 = vmatpush1.bf16.msra.mxu0 %v5907_v12  ;;  %v5937_v32 = vld [vmem:[%s7298_s11] ss:$8 sps:$4 sm:$0xff]   ;;  %v5939_v34 = vld [vmem:[%s7298_s11 + $0xf4] ss:$8 sps:$4 sm:$0xff]   ;;  %v5943_v36 = vld [vmem:[%s7298_s11 + $0xf0] ss:$8 sps:$4 sm:$0xff]  }
 0x125   : > { %4090 = vmatpush1.bf16.msra.mxu1 %v5908_v13  ;;  %3978 = vmatprep.subr.bf16.mxu0 %v5909_v14  ;;  %v5938_v33 = vld [vmem:[%s7298_s11 + $0x100] ss:$8 sps:$4 sm:$0xff]   ;;  %v5941_v35 = vld [vmem:[%s7298_s11 + $0x1f4] ss:$8 sps:$4 sm:$0xff]   ;;  %v5944_v37 = vld [vmem:[%s7298_s11 + $0x1f0] ss:$8 sps:$4 sm:$0xff]  }
 0x126   : > { %4091 = vmatprep.subr.bf16.mxu1 %v5911_v15  ;;  %v5945_v38 = vld [vmem:[%s7298_s11 + $0xe4] ss:$8 sps:$4 sm:$0xff]   ;;  %v5949_v40 = vld [vmem:[%s7298_s11 + $0xe0] ss:$8 sps:$4 sm:$0xff]   ;;  %v5951_v42 = vld [vmem:[%s7298_s11 + $0xd4] ss:$8 sps:$4 sm:$0xff]  }
 0x127   : > { %v5947_v39 = vld [vmem:[%s7298_s11 + $0x1e4] ss:$8 sps:$4 sm:$0xff]   ;;  %v5950_v41 = vld [vmem:[%s7298_s11 + $0x1e0] ss:$8 sps:$4 sm:$0xff]   ;;  %v5953_v43 = vld [vmem:[%s7298_s11 + $0x1d4] ss:$8 sps:$4 sm:$0xff]  }
 0x128   : > { %3979 = vmatpush1.bf16.msra.mxu0 %v5913_v16  ;;  %v5955_v44 = vld [vmem:[%s7298_s11 + $0xd0] ss:$8 sps:$4 sm:$0xff]   ;;  %v5957_v46 = vld [vmem:[%s7298_s11 + $0xc4] ss:$8 sps:$4 sm:$0xff]   ;;  %v5961_v48 = vld [vmem:[%s7298_s11 + $0xc0] ss:$8 sps:$4 sm:$0xff]  }
 0x129   : > { %4092 = vmatpush1.bf16.msra.mxu1 %v5914_v17  ;;  %3980 = vmatprep.subr.bf16.mxu0 %v5915_v18  ;;  %v5956_v45 = vld [vmem:[%s7298_s11 + $0x1d0] ss:$8 sps:$4 sm:$0xff]   ;;  %v5959_v47 = vld [vmem:[%s7298_s11 + $0x1c4] ss:$8 sps:$4 sm:$0xff]   ;;  %v5962_v49 = vld [vmem:[%s7298_s11 + $0x1c0] ss:$8 sps:$4 sm:$0xff]  }
 0x12a   : > { %4093 = vmatprep.subr.bf16.mxu1 %v5917_v19  ;;  %v1668_v50 = vld [vmem:[%s7296_s9] sm:$0xff]  ;;  %v1669_v52 = vld [vmem:[%s7296_s9 + $0x8] sm:$0xff]  ;;  %v5963_v54 = vld [vmem:[%s7298_s11 + $0xb4] ss:$8 sps:$4 sm:$0xff]   ;;  %p5791_p5 = scmp.ne.s32.totalorder %s6346_s23, 1 }
 0x12b   : > { %v1676_v51 = vld [vmem:[%s7296_s9 + $0x40] sm:$0xff]  ;;  %v1677_v53 = vld [vmem:[%s7296_s9 + $0x48] sm:$0xff]  ;;  %v5965_v56 = vld [vmem:[%s7298_s11 + $0x1b4] ss:$8 sps:$4 sm:$0xff]  }
 0x12c   : > { %3981 = vmatpush1.bf16.msra.mxu0 %v5919_v20  ;;  %v5408_v55 = vcombine.high %v1668_v50, %v1676_v51  ;;  %v5410_v57 = vcombine.high %v1669_v52, %v1677_v53  ;;  %v5967_v58 = vld [vmem:[%s7298_s11 + $0xb0] ss:$8 sps:$4 sm:$0xff]   ;;  %v5969_v60 = vld [vmem:[%s7298_s11 + $0xa4] ss:$8 sps:$4 sm:$0xff]   ;;  %v5973_v62 = vld [vmem:[%s7298_s11 + $0xa0] ss:$8 sps:$4 sm:$0xff]   ;;  %v5407_v13 = vcombine.low %v1668_v50, %v1676_v51  ;;  %v5409_v14 = vcombine.low %v1669_v52, %v1677_v53 }
 0x12d   : > { %4094 = vmatpush1.bf16.msra.mxu1 %v5920_v21  ;;  %3982 = vmatprep.subr.bf16.mxu0 %v5921_v22  ;;  %v5968_v59 = vld [vmem:[%s7298_s11 + $0x1b0] ss:$8 sps:$4 sm:$0xff]   ;;  %v5971_v61 = vld [vmem:[%s7298_s11 + $0x1a4] ss:$8 sps:$4 sm:$0xff]   ;;  %v5974_v63 = vld [vmem:[%s7298_s11 + $0x1a0] ss:$8 sps:$4 sm:$0xff]  }
 0x12e   : > { %4095 = vmatprep.subr.bf16.mxu1 %v5923_v23  ;;  %4004 = vmatprep.mubr.bf16.mxu0 %v5408_v55  ;;  %v5975_v0 = vld [vmem:[%s7298_s11 + $0x94] ss:$8 sps:$4 sm:$0xff]   ;;  %v5979_v2 = vld [vmem:[%s7298_s11 + $0x90] ss:$8 sps:$4 sm:$0xff]   ;;  %v5981_v4 = vld [vmem:[%s7298_s11 + $0x84] ss:$8 sps:$4 sm:$0xff]  }
 0x12f   : > { %4117 = vmatprep.mubr.bf16.mxu1 %v5410_v57  ;;  %v5977_v1 = vld [vmem:[%s7298_s11 + $0x194] ss:$8 sps:$4 sm:$0xff]   ;;  %v5980_v3 = vld [vmem:[%s7298_s11 + $0x190] ss:$8 sps:$4 sm:$0xff]   ;;  %v5983_v5 = vld [vmem:[%s7298_s11 + $0x184] ss:$8 sps:$4 sm:$0xff]  }
 0x130   : > { %3983 = vmatpush1.bf16.msra.mxu0 %v5925_v24  ;;  %v5985_v6 = vld [vmem:[%s7298_s11 + $0x80] ss:$8 sps:$4 sm:$0xff]   ;;  %v5989_v8 = vld [vmem:[%s7298_s11 + $0x274] ss:$8 sps:$4 sm:$0xff]   ;;  %v5987_v10 = vld [vmem:[%s7298_s11 + $0x270] ss:$8 sps:$4 sm:$0xff]  }
 0x131   : > { %4096 = vmatpush1.bf16.msra.mxu1 %v5926_v25  ;;  %3984 = vmatprep.subr.bf16.mxu0 %v5927_v26  ;;  %v5986_v7 = vld [vmem:[%s7298_s11 + $0x180] ss:$8 sps:$4 sm:$0xff]   ;;  %v5992_v9 = vld [vmem:[%s7298_s11 + $0x374] ss:$8 sps:$4 sm:$0xff]   ;;  %v5990_v11 = vld [vmem:[%s7298_s11 + $0x370] ss:$8 sps:$4 sm:$0xff]  }
 0x132   : > { %4097 = vmatprep.subr.bf16.mxu1 %v5929_v27  ;;  %v1684_v12 = vld [vmem:[%s7296_s9 + $0x80] sm:$0xff]  ;;  %v1685_v16 = vld [vmem:[%s7296_s9 + $0x88] sm:$0xff]  ;;  %v6001_v24 = vld [vmem:[%s7298_s11 + $0x254] ss:$8 sps:$4 sm:$0xff]  }
 0x133   : > { %v1692_v15 = vld [vmem:[%s7296_s9 + $0xc0] sm:$0xff]  ;;  %v1693_v17 = vld [vmem:[%s7296_s9 + $0xc8] sm:$0xff]  ;;  %v6004_v25 = vld [vmem:[%s7298_s11 + $0x354] ss:$8 sps:$4 sm:$0xff]  }
 0x134   : > { %3985 = vmatpush1.bf16.msra.mxu0 %v5931_v28  ;;  %v5995_v18 = vld [vmem:[%s7298_s11 + $0x264] ss:$8 sps:$4 sm:$0xff]   ;;  %v5424_v20 = vcombine.high %v1684_v12, %v1692_v15  ;;  %v5426_v21 = vcombine.high %v1685_v16, %v1693_v17  ;;  %v5993_v22 = vld [vmem:[%s7298_s11 + $0x260] ss:$8 sps:$4 sm:$0xff]   ;;  %v5999_v26 = vld [vmem:[%s7298_s11 + $0x250] ss:$8 sps:$4 sm:$0xff]  }
 0x135   : > { %4098 = vmatpush1.bf16.msra.mxu1 %v5932_v29  ;;  %3986 = vmatprep.subr.bf16.mxu0 %v5933_v30  ;;  %v5998_v19 = vld [vmem:[%s7298_s11 + $0x364] ss:$8 sps:$4 sm:$0xff]   ;;  %v5996_v23 = vld [vmem:[%s7298_s11 + $0x360] ss:$8 sps:$4 sm:$0xff]   ;;  %v6002_v27 = vld [vmem:[%s7298_s11 + $0x350] ss:$8 sps:$4 sm:$0xff]   ;;  %v5423_v30 = vcombine.low %v1684_v12, %v1692_v15 }
 0x136   : > { %4099 = vmatprep.subr.bf16.mxu1 %v5935_v31  ;;  %v1700_v28 = vld [vmem:[%s7296_s9 + $0x100] sm:$0xff]  ;;  %v5425_v31 = vcombine.low %v1685_v16, %v1693_v17  ;;  %v6028_v57 = vld [vmem:[%s7298_s11 + $0x314] ss:$8 sps:$4 sm:$0xff]   ;;  %v1757_v15 = vld [vmem:[%s7296_s9 + $0x2c8] sm:$0xff] }
 0x137   : > { %v1708_v29 = vld [vmem:[%s7296_s9 + $0x140] sm:$0xff]  ;;  %v6035_v16 = vld [vmem:[%s7298_s11 + $0x2f0] ss:$8 sps:$4 sm:$0xff]  }
 0x138   : > { %3987 = vmatpush1.bf16.msra.mxu0 %v5937_v32  ;;  %v1701_v32 = vld [vmem:[%s7296_s9 + $0x108] sm:$0xff]  ;;  %v6038_v17 = vld [vmem:[%s7298_s11 + $0x3f0] ss:$8 sps:$4 sm:$0xff]  }
 0x139   : > { %4100 = vmatpush1.bf16.msra.mxu1 %v5938_v33  ;;  %3988 = vmatprep.subr.bf16.mxu0 %v5939_v34  ;;  %v1709_v33 = vld [vmem:[%s7296_s9 + $0x148] sm:$0xff] }
 0x13a   : > { %4101 = vmatprep.subr.bf16.mxu1 %v5941_v35  ;;  %v6007_v34 = vld [vmem:[%s7298_s11 + $0x244] ss:$8 sps:$4 sm:$0xff]   ;;  %v6020_v55 = vld [vmem:[%s7298_s11 + $0x320] ss:$8 sps:$4 sm:$0xff]  }
 0x13b   : > { %v6010_v35 = vld [vmem:[%s7298_s11 + $0x344] ss:$8 sps:$4 sm:$0xff]  }
 0x13c   : > { %3989 = vmatpush2.bf16.msra.mxu0 %v5943_v36  ;;  %v5440_v36 = vcombine.high %v1700_v28, %v1708_v29  ;;  %v6019_v50 = vld [vmem:[%s7298_s11 + $0x224] ss:$8 sps:$4 sm:$0xff]  }
 0x13d   : > { %4102 = vmatpush2.bf16.msra.mxu1 %v5944_v37  ;;  %3990 = vmatprep.subr.bf16.mxu0 %v5945_v38  ;;  %v5442_v37 = vcombine.high %v1701_v32, %v1709_v33  ;;  %v6005_v38 = vld [vmem:[%s7298_s11 + $0x240] ss:$8 sps:$4 sm:$0xff]   ;;  %v6022_v51 = vld [vmem:[%s7298_s11 + $0x324] ss:$8 sps:$4 sm:$0xff]  }
 0x13e   : > { %4103 = vmatprep.subr.bf16.mxu1 %v5947_v39  ;;  %v6008_v39 = vld [vmem:[%s7298_s11 + $0x340] ss:$8 sps:$4 sm:$0xff]  }
 0x140   : > { %3991 = vmatpush2.bf16.msra.mxu0 %v5949_v40  ;;  %v6013_v40 = vld [vmem:[%s7298_s11 + $0x234] ss:$8 sps:$4 sm:$0xff]  }
 0x141   : > { %4104 = vmatpush2.bf16.msra.mxu1 %v5950_v41  ;;  %3992 = vmatprep.subr.bf16.mxu0 %v5951_v42  ;;  %v6016_v41 = vld [vmem:[%s7298_s11 + $0x334] ss:$8 sps:$4 sm:$0xff]   ;;  %v6011_v42 = vld [vmem:[%s7298_s11 + $0x230] ss:$8 sps:$4 sm:$0xff]  }
 0x142   : > { %4105 = vmatprep.subr.bf16.mxu1 %v5953_v43  ;;  %v6014_v43 = vld [vmem:[%s7298_s11 + $0x330] ss:$8 sps:$4 sm:$0xff]  }
 0x144   : > { %3993 = vmatpush2.bf16.msra.mxu0 %v5955_v44  ;;  %v1716_v44 = vld [vmem:[%s7296_s9 + $0x180] sm:$0xff] }
 0x145   : > { %4106 = vmatpush2.bf16.msra.mxu1 %v5956_v45  ;;  %3994 = vmatprep.subr.bf16.mxu0 %v5957_v46  ;;  %v1724_v45 = vld [vmem:[%s7296_s9 + $0x1c0] sm:$0xff]  ;;  %v5439_v46 = vcombine.low %v1700_v28, %v1708_v29 }
 0x146   : > { %4107 = vmatprep.subr.bf16.mxu1 %v5959_v47  ;;  %v5441_v47 = vcombine.low %v1701_v32, %v1709_v33  ;;  %v5456_v52 = vcombine.high %v1716_v44, %v1724_v45  ;;  %v1764_v28 = vld [vmem:[%s7296_s9 + $0x300] sm:$0xff]  ;;  %v1765_v32 = vld [vmem:[%s7296_s9 + $0x308] sm:$0xff] }
 0x147   : > { %v1773_v33 = vld [vmem:[%s7296_s9 + $0x348] sm:$0xff] }
 0x148   : > { %3995 = vmatpush2.bf16.msra.mxu0 %v5961_v48  ;;  %v1717_v48 = vld [vmem:[%s7296_s9 + $0x188] sm:$0xff] }
 0x149   : > { %4108 = vmatpush2.bf16.msra.mxu1 %v5962_v49  ;;  %3996 = vmatprep.subr.bf16.mxu0 %v5963_v54  ;;  %v1725_v49 = vld [vmem:[%s7296_s9 + $0x1c8] sm:$0xff] }
 0x14a   : > { %4109 = vmatprep.subr.bf16.mxu1 %v5965_v56  ;;  %v5458_v53 = vcombine.high %v1717_v48, %v1725_v49  ;;  %v6017_v54 = vld [vmem:[%s7298_s11 + $0x220] ss:$8 sps:$4 sm:$0xff]   ;;  %v6025_v56 = vld [vmem:[%s7298_s11 + $0x214] ss:$8 sps:$4 sm:$0xff]  }
 0x14c   : > { %3997 = vmatpush2.bf16.msra.mxu0 %v5967_v58  ;;  %v6023_v58 = vld [vmem:[%s7298_s11 + $0x210] ss:$8 sps:$4 sm:$0xff]  }
 0x14d   : > { %4110 = vmatpush2.bf16.msra.mxu1 %v5968_v59  ;;  %3998 = vmatprep.subr.bf16.mxu0 %v5969_v60  ;;  %v1732_v59 = vld [vmem:[%s7296_s9 + $0x200] sm:$0xff] }
 0x14e   : > { %4111 = vmatprep.subr.bf16.mxu1 %v5971_v61  ;;  %v1740_v60 = vld [vmem:[%s7296_s9 + $0x240] sm:$0xff]  ;;  %v5455_v61 = vcombine.low %v1716_v44, %v1724_v45 }
 0x14f   : > { %v5471_v12 = vcombine.low %v1732_v59, %v1740_v60  ;;  %v1780_v44 = vld [vmem:[%s7296_s9 + $0x380] sm:$0xff] }
 0x150   : > { %3999 = vmatpush2.bf16.msra.mxu0 %v5973_v62  ;;  %v5457_v62 = vcombine.low %v1717_v48, %v1725_v49  ;;  %v1788_v45 = vld [vmem:[%s7296_s9 + $0x3c0] sm:$0xff]  ;;  %v1781_v48 = vld [vmem:[%s7296_s9 + $0x388] sm:$0xff] }
 0x151   : > { %4112 = vmatpush2.bf16.msra.mxu1 %v5974_v63  ;;  %4000 = vmatprep.subr.bf16.mxu0 %v5975_v0  ;;  %v1733_v63 = vld [vmem:[%s7296_s9 + $0x208] sm:$0xff] }
 0x152   : > { %4113 = vmatprep.subr.bf16.mxu1 %v5977_v1  ;;  %v1741_v0 = vld [vmem:[%s7296_s9 + $0x248] sm:$0xff]  ;;  %v6026_v1 = vld [vmem:[%s7298_s11 + $0x310] ss:$8 sps:$4 sm:$0xff]  }
 0x153   : > { %v1789_v49 = vld [vmem:[%s7296_s9 + $0x3c8] sm:$0xff] }
 0x154   : > { %4001 = vmatpush2.bf16.msra.mxu0 %v5979_v2  ;;  %v6031_v2 = vld [vmem:[%s7298_s11 + $0x204] ss:$8 sps:$4 sm:$0xff]  }
 0x155   : > { %4114 = vmatpush2.bf16.msra.mxu1 %v5980_v3  ;;  %4002 = vmatprep.subr.bf16.mxu0 %v5981_v4  ;;  %v6034_v3 = vld [vmem:[%s7298_s11 + $0x304] ss:$8 sps:$4 sm:$0xff]   ;;  %v5472_v4 = vcombine.high %v1732_v59, %v1740_v60  ;;  %v6074_v59 = vld [vmem:[%s7298_s11 + $0x390] ss:$8 sps:$4 sm:$0xff]  }
 0x156   : > { %4115 = vmatprep.subr.bf16.mxu1 %v5983_v5  ;;  %v5474_v5 = vcombine.high %v1733_v63, %v1741_v0  ;;  %v1670_v60 = vld [vmem:[%s7296_s9 + $0x10] sm:$0xff] }
 0x158   : > { %4003 = vmatpush2.bf16.msra.mxu0 %v5985_v6  ;;  %v6029_v6 = vld [vmem:[%s7298_s11 + $0x200] ss:$8 sps:$4 sm:$0xff]  }
 0x159   : > { %4116 = vmatpush2.bf16.msra.mxu1 %v5986_v7  ;;  %4198 = vmatprep.subr.bf16.mxu0 %v5989_v8  ;;  %v6032_v7 = vld [vmem:[%s7298_s11 + $0x300] ss:$8 sps:$4 sm:$0xff]   ;;  %v6037_v8 = vld [vmem:[%s7298_s11 + $0x2f4] ss:$8 sps:$4 sm:$0xff]  }
 0x15a   : > { %4311 = vmatprep.subr.bf16.mxu1 %v5992_v9  ;;  %v6040_v9 = vld [vmem:[%s7298_s11 + $0x3f4] ss:$8 sps:$4 sm:$0xff]  }
 0x15b   : > { %4005 = vmatmul.mubr.bf16.vlgmr.msra.gmra.mxu0 %v5407_v13  ;;  %v5473_v13 = vcombine.low %v1733_v63, %v1741_v0  ;;  %v5521_v63 = vcombine.low %v1781_v48, %v1789_v49  ;;  %v1671_v0 = vld [vmem:[%s7296_s9 + $0x18] sm:$0xff] }
 0x15c   : > { %4118 = vmatmul.mubr.bf16.vlgmr.msra.gmra.mxu1 %v5409_v14  ;;  %4199 = vmatpush1.bf16.msra.mxu0 %v5987_v10  ;;  %v1748_v10 = vld [vmem:[%s7296_s9 + $0x280] sm:$0xff]  ;;  %v1749_v14 = vld [vmem:[%s7296_s9 + $0x288] sm:$0xff] }
 0x15d   : > { %4312 = vmatpush1.bf16.msra.mxu1 %v5990_v11  ;;  %4200 = vmatprep.subr.bf16.mxu0 %v5995_v18  ;;  %v1756_v11 = vld [vmem:[%s7296_s9 + $0x2c0] sm:$0xff] }
 0x15e   : > { %4313 = vmatprep.subr.bf16.mxu1 %v5998_v19  ;;  %4014 = vmatprep.mubr.bf16.mxu0 %v5424_v20  ;;  %v6043_v18 = vld [vmem:[%s7298_s11 + $0x2e4] ss:$8 sps:$4 sm:$0xff]   ;;  %v5488_v20 = vcombine.high %v1748_v10, %v1756_v11  ;;  %v5487_v29 = vcombine.low %v1748_v10, %v1756_v11  ;;  %v6083_v10 = vld [vmem:[%s7298_s11 + $0x470] ss:$8 sps:$4 sm:$0xff]  }
 0x15f   : > { %4127 = vmatprep.mubr.bf16.mxu1 %v5426_v21  ;;  %v6046_v19 = vld [vmem:[%s7298_s11 + $0x3e4] ss:$8 sps:$4 sm:$0xff]   ;;  %v5490_v21 = vcombine.high %v1749_v14, %v1757_v15  ;;  %v1686_v11 = vld [vmem:[%s7296_s9 + $0x90] sm:$0xff] }
 0x160   : > { %4201 = vmatpush1.bf16.msra.mxu0 %v5993_v22  ;;  %v6041_v22 = vld [vmem:[%s7298_s11 + $0x2e0] ss:$8 sps:$4 sm:$0xff]  }
 0x161   : > { %4314 = vmatpush1.bf16.msra.mxu1 %v5996_v23  ;;  %4202 = vmatprep.subr.bf16.mxu0 %v6001_v24  ;;  %v6044_v23 = vld [vmem:[%s7298_s11 + $0x3e0] ss:$8 sps:$4 sm:$0xff]   ;;  %v6049_v24 = vld [vmem:[%s7298_s11 + $0x2d4] ss:$8 sps:$4 sm:$0xff]  }
 0x162   : > { %4315 = vmatprep.subr.bf16.mxu1 %v6004_v25  ;;  %v6052_v25 = vld [vmem:[%s7298_s11 + $0x3d4] ss:$8 sps:$4 sm:$0xff]  }
 0x163   : > { %4015 = vmatmul.mubr.bf16.gmra.mxu0 %v5423_v30  ;;  %v5489_v30 = vcombine.low %v1749_v14, %v1757_v15  ;;  %v1687_v15 = vld [vmem:[%s7296_s9 + $0x98] sm:$0xff] }
 0x164   : > { %4128 = vmatmul.mubr.bf16.gmra.mxu1 %v5425_v31  ;;  %4203 = vmatpush1.bf16.msra.mxu0 %v5999_v26  ;;  %v6047_v26 = vld [vmem:[%s7298_s11 + $0x2d0] ss:$8 sps:$4 sm:$0xff]   ;;  %v1772_v31 = vld [vmem:[%s7296_s9 + $0x340] sm:$0xff] }
 0x165   : > { %4316 = vmatpush1.bf16.msra.mxu1 %v6002_v27  ;;  %4204 = vmatprep.subr.bf16.mxu0 %v6007_v34  ;;  %v6050_v27 = vld [vmem:[%s7298_s11 + $0x3d0] ss:$8 sps:$4 sm:$0xff]   ;;  %v6055_v34 = vld [vmem:[%s7298_s11 + $0x2c4] ss:$8 sps:$4 sm:$0xff]  }
 0x166   : > { %4317 = vmatprep.subr.bf16.mxu1 %v6010_v35  ;;  %4024 = vmatprep.mubr.bf16.mxu0 %v5440_v36  ;;  %v6058_v35 = vld [vmem:[%s7298_s11 + $0x3c4] ss:$8 sps:$4 sm:$0xff]   ;;  %v5504_v36 = vcombine.high %v1764_v28, %v1772_v31 }
 0x167   : > { %4137 = vmatprep.mubr.bf16.mxu1 %v5442_v37  ;;  %v5506_v37 = vcombine.high %v1765_v32, %v1773_v33 }
 0x168   : > { %4205 = vmatpush1.bf16.msra.mxu0 %v6005_v38  ;;  %v6053_v38 = vld [vmem:[%s7298_s11 + $0x2c0] ss:$8 sps:$4 sm:$0xff]  }
 0x169   : > { %4318 = vmatpush1.bf16.msra.mxu1 %v6008_v39  ;;  %4206 = vmatprep.subr.bf16.mxu0 %v6013_v40  ;;  %v6056_v39 = vld [vmem:[%s7298_s11 + $0x3c0] ss:$8 sps:$4 sm:$0xff]   ;;  %v6061_v40 = vld [vmem:[%s7298_s11 + $0x2b4] ss:$8 sps:$4 sm:$0xff]  }
 0x16a   : > { %4319 = vmatprep.subr.bf16.mxu1 %v6016_v41  ;;  %v6064_v41 = vld [vmem:[%s7298_s11 + $0x3b4] ss:$8 sps:$4 sm:$0xff]  }
 0x16b   : > { %4025 = vmatmul.mubr.bf16.gmra.mxu0 %v5439_v46  ;;  %v5503_v46 = vcombine.low %v1764_v28, %v1772_v31  ;;  %v1711_v31 = vld [vmem:[%s7296_s9 + $0x158] sm:$0xff] }
 0x16c   : > { %4138 = vmatmul.mubr.bf16.gmra.mxu1 %v5441_v47  ;;  %4207 = vmatpush1.bf16.msra.mxu0 %v6011_v42  ;;  %v6059_v42 = vld [vmem:[%s7298_s11 + $0x2b0] ss:$8 sps:$4 sm:$0xff]   ;;  %v5505_v47 = vcombine.low %v1765_v32, %v1773_v33 }
 0x16d   : > { %4320 = vmatpush1.bf16.msra.mxu1 %v6014_v43  ;;  %4208 = vmatprep.subr.bf16.mxu0 %v6019_v50  ;;  %v6062_v43 = vld [vmem:[%s7298_s11 + $0x3b0] ss:$8 sps:$4 sm:$0xff]   ;;  %v6067_v50 = vld [vmem:[%s7298_s11 + $0x2a4] ss:$8 sps:$4 sm:$0xff]  }
 0x16e   : > { %4321 = vmatprep.subr.bf16.mxu1 %v6022_v51  ;;  %4034 = vmatprep.mubr.bf16.mxu0 %v5456_v52  ;;  %v6070_v51 = vld [vmem:[%s7298_s11 + $0x3a4] ss:$8 sps:$4 sm:$0xff]   ;;  %v5520_v52 = vcombine.high %v1780_v44, %v1788_v45  ;;  %v6095_v32 = vld [vmem:[%s7298_s11 + $0x450] ss:$8 sps:$4 sm:$0xff]  }
 0x16f   : > { %4147 = vmatprep.mubr.bf16.mxu1 %v5458_v53  ;;  %v5522_v53 = vcombine.high %v1781_v48, %v1789_v49  ;;  %v6098_v33 = vld [vmem:[%s7298_s11 + $0x550] ss:$8 sps:$4 sm:$0xff]  }
 0x170   : > { %4209 = vmatpush1.bf16.msra.mxu0 %v6017_v54  ;;  %v6065_v54 = vld [vmem:[%s7298_s11 + $0x2a0] ss:$8 sps:$4 sm:$0xff]   ;;  %v1719_v48 = vld [vmem:[%s7296_s9 + $0x198] sm:$0xff] }
 0x171   : > { %4322 = vmatpush1.bf16.msra.mxu1 %v6020_v55  ;;  %4210 = vmatprep.subr.bf16.mxu0 %v6025_v56  ;;  %v6068_v55 = vld [vmem:[%s7298_s11 + $0x3a0] ss:$8 sps:$4 sm:$0xff]   ;;  %v6073_v56 = vld [vmem:[%s7298_s11 + $0x294] ss:$8 sps:$4 sm:$0xff]  }
 0x172   : > { %4323 = vmatprep.subr.bf16.mxu1 %v6028_v57  ;;  %v6076_v57 = vld [vmem:[%s7298_s11 + $0x394] ss:$8 sps:$4 sm:$0xff]  }
 0x173   : > { %4035 = vmatmul.mubr.bf16.gmra.mxu0 %v5455_v61  ;;  %v1678_v61 = vld [vmem:[%s7296_s9 + $0x50] sm:$0xff]  ;;  %v1727_v49 = vld [vmem:[%s7296_s9 + $0x1d8] sm:$0xff] }
 0x174   : > { %4148 = vmatmul.mubr.bf16.gmra.mxu1 %v5457_v62  ;;  %4211 = vmatpush1.bf16.msra.mxu0 %v6023_v58  ;;  %v6071_v58 = vld [vmem:[%s7298_s11 + $0x290] ss:$8 sps:$4 sm:$0xff]   ;;  %v5519_v62 = vcombine.low %v1780_v44, %v1788_v45 }
 0x175   : > { %4324 = vmatpush1.bf16.msra.mxu1 %v6026_v1  ;;  %4212 = vmatprep.subr.bf16.mxu0 %v6031_v2  ;;  %v1679_v1 = vld [vmem:[%s7296_s9 + $0x58] sm:$0xff]  ;;  %v6079_v2 = vld [vmem:[%s7298_s11 + $0x284] ss:$8 sps:$4 sm:$0xff]   ;;  %v1718_v44 = vld [vmem:[%s7296_s9 + $0x190] sm:$0xff] }
 0x176   : > { %4325 = vmatprep.subr.bf16.mxu1 %v6034_v3  ;;  %4044 = vmatprep.mubr.bf16.mxu0 %v5472_v4  ;;  %v6082_v3 = vld [vmem:[%s7298_s11 + $0x384] ss:$8 sps:$4 sm:$0xff]   ;;  %v5412_v4 = vcombine.high %v1670_v60, %v1678_v61  ;;  %v5413_v14 = vcombine.low %v1671_v0, %v1679_v1 }
 0x177   : > { %4157 = vmatprep.mubr.bf16.mxu1 %v5474_v5  ;;  %v5414_v5 = vcombine.high %v1671_v0, %v1679_v1  ;;  %v1735_v0 = vld [vmem:[%s7296_s9 + $0x218] sm:$0xff] }
 0x178   : > { %4213 = vmatpush1.bf16.msra.mxu0 %v6029_v6  ;;  %v6077_v6 = vld [vmem:[%s7298_s11 + $0x280] ss:$8 sps:$4 sm:$0xff]   ;;  %v1743_v1 = vld [vmem:[%s7296_s9 + $0x258] sm:$0xff] }
 0x179   : > { %4326 = vmatpush1.bf16.msra.mxu1 %v6032_v7  ;;  %4214 = vmatprep.subr.bf16.mxu0 %v6037_v8  ;;  %v6080_v7 = vld [vmem:[%s7298_s11 + $0x380] ss:$8 sps:$4 sm:$0xff]   ;;  %v6085_v8 = vld [vmem:[%s7298_s11 + $0x474] ss:$8 sps:$4 sm:$0xff]  }
 0x17a   : > { %4327 = vmatprep.subr.bf16.mxu1 %v6040_v9  ;;  %v6088_v9 = vld [vmem:[%s7298_s11 + $0x574] ss:$8 sps:$4 sm:$0xff]  }
 0x17b   : > { %4045 = vmatmul.mubr.bf16.gmra.mxu0 %v5471_v12  ;;  %v1694_v12 = vld [vmem:[%s7296_s9 + $0xd0] sm:$0xff] }
 0x17c   : > { %4158 = vmatmul.mubr.bf16.gmra.mxu1 %v5473_v13  ;;  %4215 = vmatpush2.bf16.msra.mxu0 %v6035_v16  ;;  %v5411_v13 = vcombine.low %v1670_v60, %v1678_v61  ;;  %v1695_v16 = vld [vmem:[%s7296_s9 + $0xd8] sm:$0xff]  ;;  %v5427_v28 = vcombine.low %v1686_v11, %v1694_v12  ;;  %v1734_v60 = vld [vmem:[%s7296_s9 + $0x210] sm:$0xff] }
 0x17d   : > { %4328 = vmatpush2.bf16.msra.mxu1 %v6038_v17  ;;  %4216 = vmatprep.subr.bf16.mxu0 %v6043_v18  ;;  %v6086_v17 = vld [vmem:[%s7298_s11 + $0x570] ss:$8 sps:$4 sm:$0xff]   ;;  %v6091_v18 = vld [vmem:[%s7298_s11 + $0x464] ss:$8 sps:$4 sm:$0xff]  }
 0x17e   : > { %4329 = vmatprep.subr.bf16.mxu1 %v6046_v19  ;;  %4054 = vmatprep.mubr.bf16.mxu0 %v5488_v20  ;;  %v6094_v19 = vld [vmem:[%s7298_s11 + $0x564] ss:$8 sps:$4 sm:$0xff]   ;;  %v5428_v20 = vcombine.high %v1686_v11, %v1694_v12  ;;  %v1742_v61 = vld [vmem:[%s7296_s9 + $0x250] sm:$0xff] }
 0x17f   : > { %4167 = vmatprep.mubr.bf16.mxu1 %v5490_v21  ;;  %v5430_v21 = vcombine.high %v1687_v15, %v1695_v16  ;;  %v6134_v11 = vld [vmem:[%s7298_s11 + $0x5f0] ss:$8 sps:$4 sm:$0xff]  }
 0x180   : > { %4217 = vmatpush2.bf16.msra.mxu0 %v6041_v22  ;;  %v6089_v22 = vld [vmem:[%s7298_s11 + $0x460] ss:$8 sps:$4 sm:$0xff]   ;;  %v1750_v12 = vld [vmem:[%s7296_s9 + $0x290] sm:$0xff] }
 0x181   : > { %4330 = vmatpush2.bf16.msra.mxu1 %v6044_v23  ;;  %4218 = vmatprep.subr.bf16.mxu0 %v6049_v24  ;;  %v6092_v23 = vld [vmem:[%s7298_s11 + $0x560] ss:$8 sps:$4 sm:$0xff]   ;;  %v6097_v24 = vld [vmem:[%s7298_s11 + $0x454] ss:$8 sps:$4 sm:$0xff]  }
 0x182   : > { %4331 = vmatprep.subr.bf16.mxu1 %v6052_v25  ;;  %v6100_v25 = vld [vmem:[%s7298_s11 + $0x554] ss:$8 sps:$4 sm:$0xff]  }
 0x183   : > { %4055 = vmatmul.mubr.bf16.gmra.mxu0 %v5487_v29  ;;  %v5429_v29 = vcombine.low %v1687_v15, %v1695_v16  ;;  %v5477_v15 = vcombine.low %v1735_v0, %v1743_v1  ;;  %v1751_v16 = vld [vmem:[%s7296_s9 + $0x298] sm:$0xff] }
 0x184   : > { %4168 = vmatmul.mubr.bf16.gmra.mxu1 %v5489_v30  ;;  %4219 = vmatpush2.bf16.msra.mxu0 %v6047_v26  ;;  %v1702_v26 = vld [vmem:[%s7296_s9 + $0x110] sm:$0xff]  ;;  %v1703_v30 = vld [vmem:[%s7296_s9 + $0x118] sm:$0xff] }
 0x185   : > { %4332 = vmatpush2.bf16.msra.mxu1 %v6050_v27  ;;  %4220 = vmatprep.subr.bf16.mxu0 %v6055_v34  ;;  %v1710_v27 = vld [vmem:[%s7296_s9 + $0x150] sm:$0xff]  ;;  %v6103_v34 = vld [vmem:[%s7298_s11 + $0x444] ss:$8 sps:$4 sm:$0xff]  }
 0x186   : > { %4333 = vmatprep.subr.bf16.mxu1 %v6058_v35  ;;  %4064 = vmatprep.mubr.bf16.mxu0 %v5504_v36  ;;  %v6106_v35 = vld [vmem:[%s7298_s11 + $0x544] ss:$8 sps:$4 sm:$0xff]   ;;  %v5444_v36 = vcombine.high %v1702_v26, %v1710_v27  ;;  %v5443_v45 = vcombine.low %v1702_v26, %v1710_v27  ;;  %v6143_v26 = vld [vmem:[%s7298_s11 + $0x4d0] ss:$8 sps:$4 sm:$0xff]  }
 0x187   : > { %4177 = vmatprep.mubr.bf16.mxu1 %v5506_v37  ;;  %v5446_v37 = vcombine.high %v1703_v30, %v1711_v31  ;;  %v1766_v27 = vld [vmem:[%s7296_s9 + $0x310] sm:$0xff] }
 0x188   : > { %4221 = vmatpush2.bf16.msra.mxu0 %v6053_v38  ;;  %v6101_v38 = vld [vmem:[%s7298_s11 + $0x440] ss:$8 sps:$4 sm:$0xff]  }
 0x189   : > { %4334 = vmatpush2.bf16.msra.mxu1 %v6056_v39  ;;  %4222 = vmatprep.subr.bf16.mxu0 %v6061_v40  ;;  %v6104_v39 = vld [vmem:[%s7298_s11 + $0x540] ss:$8 sps:$4 sm:$0xff]   ;;  %v6109_v40 = vld [vmem:[%s7298_s11 + $0x434] ss:$8 sps:$4 sm:$0xff]  }
 0x18a   : > { %4335 = vmatprep.subr.bf16.mxu1 %v6064_v41  ;;  %v6112_v41 = vld [vmem:[%s7298_s11 + $0x534] ss:$8 sps:$4 sm:$0xff]  }
 0x18b   : > { %4065 = vmatmul.mubr.bf16.gmra.mxu0 %v5503_v46  ;;  %v5445_v46 = vcombine.low %v1703_v30, %v1711_v31  ;;  %v1767_v31 = vld [vmem:[%s7296_s9 + $0x318] sm:$0xff] }
 0x18c   : > { %4178 = vmatmul.mubr.bf16.gmra.mxu1 %v5505_v47  ;;  %4223 = vmatpush2.bf16.msra.mxu0 %v6059_v42  ;;  %v6107_v42 = vld [vmem:[%s7298_s11 + $0x430] ss:$8 sps:$4 sm:$0xff]  }
 0x18d   : > { %4336 = vmatpush2.bf16.msra.mxu1 %v6062_v43  ;;  %4224 = vmatprep.subr.bf16.mxu0 %v6067_v50  ;;  %v6110_v43 = vld [vmem:[%s7298_s11 + $0x530] ss:$8 sps:$4 sm:$0xff]   ;;  %v6115_v50 = vld [vmem:[%s7298_s11 + $0x424] ss:$8 sps:$4 sm:$0xff]  }
 0x18e   : > { %4337 = vmatprep.subr.bf16.mxu1 %v6070_v51  ;;  %4074 = vmatprep.mubr.bf16.mxu0 %v5520_v52  ;;  %v1726_v47 = vld [vmem:[%s7296_s9 + $0x1d0] sm:$0xff]  ;;  %v6118_v51 = vld [vmem:[%s7298_s11 + $0x524] ss:$8 sps:$4 sm:$0xff]  }
 0x18f   : > { %4187 = vmatprep.mubr.bf16.mxu1 %v5522_v53  ;;  %v5460_v52 = vcombine.high %v1718_v44, %v1726_v47  ;;  %v5462_v53 = vcombine.high %v1719_v48, %v1727_v49 }
 0x190   : > { %4225 = vmatpush2.bf16.msra.mxu0 %v6065_v54  ;;  %v6113_v54 = vld [vmem:[%s7298_s11 + $0x420] ss:$8 sps:$4 sm:$0xff]  }
 0x191   : > { %4338 = vmatpush2.bf16.msra.mxu1 %v6068_v55  ;;  %4226 = vmatprep.subr.bf16.mxu0 %v6073_v56  ;;  %v6116_v55 = vld [vmem:[%s7298_s11 + $0x520] ss:$8 sps:$4 sm:$0xff]   ;;  %v6121_v56 = vld [vmem:[%s7298_s11 + $0x414] ss:$8 sps:$4 sm:$0xff]  }
 0x192   : > { %4339 = vmatprep.subr.bf16.mxu1 %v6076_v57  ;;  %v6124_v57 = vld [vmem:[%s7298_s11 + $0x514] ss:$8 sps:$4 sm:$0xff]  }
 0x193   : > { %4075 = vmatmul.mubr.bf16.gmra.mxu0 %v5519_v62  ;;  %v5459_v62 = vcombine.low %v1718_v44, %v1726_v47  ;;  %v1791_v47 = vld [vmem:[%s7296_s9 + $0x3d8] sm:$0xff] }
 0x194   : > { %4188 = vmatmul.mubr.bf16.gmra.mxu1 %v5521_v63  ;;  %4227 = vmatpush2.bf16.msra.mxu0 %v6071_v58  ;;  %v6119_v58 = vld [vmem:[%s7298_s11 + $0x410] ss:$8 sps:$4 sm:$0xff]   ;;  %v5461_v63 = vcombine.low %v1719_v48, %v1727_v49 }
 0x195   : > { %4340 = vmatpush2.bf16.msra.mxu1 %v6074_v59  ;;  %4228 = vmatprep.subr.bf16.mxu0 %v6079_v2  ;;  %v6122_v59 = vld [vmem:[%s7298_s11 + $0x510] ss:$8 sps:$4 sm:$0xff]   ;;  %v6127_v2 = vld [vmem:[%s7298_s11 + $0x404] ss:$8 sps:$4 sm:$0xff]  }
 0x196   : > { %4341 = vmatprep.subr.bf16.mxu1 %v6082_v3  ;;  %4230 = vmatprep.mubr.bf16.mxu0 %v5412_v4  ;;  %v6130_v3 = vld [vmem:[%s7298_s11 + $0x504] ss:$8 sps:$4 sm:$0xff]   ;;  %v5476_v4 = vcombine.high %v1734_v60, %v1742_v61  ;;  %v6155_v48 = vld [vmem:[%s7298_s11 + $0x4b0] ss:$8 sps:$4 sm:$0xff]  }
 0x197   : > { %4343 = vmatprep.mubr.bf16.mxu1 %v5414_v5  ;;  %v5478_v5 = vcombine.high %v1735_v0, %v1743_v1  ;;  %v6158_v49 = vld [vmem:[%s7298_s11 + $0x5b0] ss:$8 sps:$4 sm:$0xff]   ;;  %v1673_v0 = vld [vmem:[%s7296_s9 + $0x28] sm:$0xff] }
 0x198   : > { %4229 = vmatpush2.bf16.msra.mxu0 %v6077_v6  ;;  %v6125_v6 = vld [vmem:[%s7298_s11 + $0x400] ss:$8 sps:$4 sm:$0xff]  }
 0x199   : > { %4342 = vmatpush2.bf16.msra.mxu1 %v6080_v7  ;;  %4424 = vmatprep.subr.bf16.mxu0 %v6085_v8  ;;  %v6128_v7 = vld [vmem:[%s7298_s11 + $0x500] ss:$8 sps:$4 sm:$0xff]   ;;  %v6133_v8 = vld [vmem:[%s7298_s11 + $0x4f4] ss:$8 sps:$4 sm:$0xff]  }
 0x19a   : > { %4537 = vmatprep.subr.bf16.mxu1 %v6088_v9  ;;  %v6136_v9 = vld [vmem:[%s7298_s11 + $0x5f4] ss:$8 sps:$4 sm:$0xff]   ;;  %v1681_v1 = vld [vmem:[%s7296_s9 + $0x68] sm:$0xff] }
 0x19b   : > { %4231 = vmatmul.mubr.bf16.vlgmr.msra.gmra.mxu0 %v5411_v13  ;;  %v1758_v13 = vld [vmem:[%s7296_s9 + $0x2d0] sm:$0xff] }
 0x19c   : > { %4344 = vmatmul.mubr.bf16.vlgmr.msra.gmra.mxu1 %v5413_v14  ;;  %4425 = vmatpush1.bf16.msra.mxu0 %v6083_v10  ;;  %v6131_v10 = vld [vmem:[%s7298_s11 + $0x4f0] ss:$8 sps:$4 sm:$0xff]   ;;  %v5475_v14 = vcombine.low %v1734_v60, %v1742_v61  ;;  %v1672_v60 = vld [vmem:[%s7296_s9 + $0x20] sm:$0xff] }
 0x19d   : > { %4538 = vmatpush1.bf16.msra.mxu1 %v6086_v17  ;;  %4426 = vmatprep.subr.bf16.mxu0 %v6091_v18  ;;  %v1759_v17 = vld [vmem:[%s7296_s9 + $0x2d8] sm:$0xff]  ;;  %v6139_v18 = vld [vmem:[%s7298_s11 + $0x4e4] ss:$8 sps:$4 sm:$0xff]  }
 0x19e   : > { %4539 = vmatprep.subr.bf16.mxu1 %v6094_v19  ;;  %4240 = vmatprep.mubr.bf16.mxu0 %v5428_v20  ;;  %v6142_v19 = vld [vmem:[%s7298_s11 + $0x5e4] ss:$8 sps:$4 sm:$0xff]   ;;  %v5492_v20 = vcombine.high %v1750_v12, %v1758_v13  ;;  %v5493_v30 = vcombine.low %v1751_v16, %v1759_v17 }
 0x19f   : > { %4353 = vmatprep.mubr.bf16.mxu1 %v5430_v21  ;;  %v5494_v21 = vcombine.high %v1751_v16, %v1759_v17  ;;  %v1689_v16 = vld [vmem:[%s7296_s9 + $0xa8] sm:$0xff] }
 0x1a0   : > { %4427 = vmatpush1.bf16.msra.mxu0 %v6089_v22  ;;  %v6137_v22 = vld [vmem:[%s7298_s11 + $0x4e0] ss:$8 sps:$4 sm:$0xff]  }
 0x1a1   : > { %4540 = vmatpush1.bf16.msra.mxu1 %v6092_v23  ;;  %4428 = vmatprep.subr.bf16.mxu0 %v6097_v24  ;;  %v6140_v23 = vld [vmem:[%s7298_s11 + $0x5e0] ss:$8 sps:$4 sm:$0xff]   ;;  %v6145_v24 = vld [vmem:[%s7298_s11 + $0x4d4] ss:$8 sps:$4 sm:$0xff]  }
 0x1a2   : > { %4541 = vmatprep.subr.bf16.mxu1 %v6100_v25  ;;  %v6148_v25 = vld [vmem:[%s7298_s11 + $0x5d4] ss:$8 sps:$4 sm:$0xff]   ;;  %v1697_v17 = vld [vmem:[%s7296_s9 + $0xe8] sm:$0xff] }
 0x1a3   : > { %4241 = vmatmul.mubr.bf16.gmra.mxu0 %v5427_v28  ;;  %v1774_v28 = vld [vmem:[%s7296_s9 + $0x350] sm:$0xff] }
 0x1a4   : > { %4354 = vmatmul.mubr.bf16.gmra.mxu1 %v5429_v29  ;;  %4429 = vmatpush1.bf16.msra.mxu0 %v6095_v32  ;;  %v5491_v29 = vcombine.low %v1750_v12, %v1758_v13  ;;  %v1775_v32 = vld [vmem:[%s7296_s9 + $0x358] sm:$0xff]  ;;  %v5507_v44 = vcombine.low %v1766_v27, %v1774_v28  ;;  %v1688_v12 = vld [vmem:[%s7296_s9 + $0xa0] sm:$0xff] }
 0x1a5   : > { %4542 = vmatpush1.bf16.msra.mxu1 %v6098_v33  ;;  %4430 = vmatprep.subr.bf16.mxu0 %v6103_v34  ;;  %v6146_v33 = vld [vmem:[%s7298_s11 + $0x5d0] ss:$8 sps:$4 sm:$0xff]   ;;  %v6151_v34 = vld [vmem:[%s7298_s11 + $0x4c4] ss:$8 sps:$4 sm:$0xff]  }
 0x1a6   : > { %4543 = vmatprep.subr.bf16.mxu1 %v6106_v35  ;;  %4250 = vmatprep.mubr.bf16.mxu0 %v5444_v36  ;;  %v6154_v35 = vld [vmem:[%s7298_s11 + $0x5c4] ss:$8 sps:$4 sm:$0xff]   ;;  %v5508_v36 = vcombine.high %v1766_v27, %v1774_v28  ;;  %v6194_v27 = vld [vmem:[%s7298_s11 + $0x750] ss:$8 sps:$4 sm:$0xff]  }
 0x1a7   : > { %4363 = vmatprep.mubr.bf16.mxu1 %v5446_v37  ;;  %v5510_v37 = vcombine.high %v1767_v31, %v1775_v32  ;;  %v1696_v13 = vld [vmem:[%s7296_s9 + $0xe0] sm:$0xff] }
 0x1a8   : > { %4431 = vmatpush1.bf16.msra.mxu0 %v6101_v38  ;;  %v6149_v38 = vld [vmem:[%s7298_s11 + $0x4c0] ss:$8 sps:$4 sm:$0xff]  }
 0x1a9   : > { %4544 = vmatpush1.bf16.msra.mxu1 %v6104_v39  ;;  %4432 = vmatprep.subr.bf16.mxu0 %v6109_v40  ;;  %v6152_v39 = vld [vmem:[%s7298_s11 + $0x5c0] ss:$8 sps:$4 sm:$0xff]   ;;  %v6157_v40 = vld [vmem:[%s7298_s11 + $0x4b4] ss:$8 sps:$4 sm:$0xff]  }
 0x1aa   : > { %4545 = vmatprep.subr.bf16.mxu1 %v6112_v41  ;;  %v6160_v41 = vld [vmem:[%s7298_s11 + $0x5b4] ss:$8 sps:$4 sm:$0xff]   ;;  %v1704_v28 = vld [vmem:[%s7296_s9 + $0x120] sm:$0xff] }
 0x1ab   : > { %4251 = vmatmul.mubr.bf16.gmra.mxu0 %v5443_v45  ;;  %v5509_v45 = vcombine.low %v1767_v31, %v1775_v32  ;;  %v5433_v31 = vcombine.low %v1689_v16, %v1697_v17  ;;  %v1705_v32 = vld [vmem:[%s7296_s9 + $0x128] sm:$0xff] }
 0x1ac   : > { %4364 = vmatmul.mubr.bf16.gmra.mxu1 %v5445_v46  ;;  %4433 = vmatpush1.bf16.msra.mxu0 %v6107_v42  ;;  %v1782_v42 = vld [vmem:[%s7296_s9 + $0x390] sm:$0xff]  ;;  %v1783_v46 = vld [vmem:[%s7296_s9 + $0x398] sm:$0xff] }
 0x1ad   : > { %4546 = vmatpush1.bf16.msra.mxu1 %v6110_v43  ;;  %4434 = vmatprep.subr.bf16.mxu0 %v6115_v50  ;;  %v1790_v43 = vld [vmem:[%s7296_s9 + $0x3d0] sm:$0xff]  ;;  %v6163_v50 = vld [vmem:[%s7298_s11 + $0x4a4] ss:$8 sps:$4 sm:$0xff]  }
 0x1ae   : > { %4547 = vmatprep.subr.bf16.mxu1 %v6118_v51  ;;  %4260 = vmatprep.mubr.bf16.mxu0 %v5460_v52  ;;  %v6166_v51 = vld [vmem:[%s7298_s11 + $0x5a4] ss:$8 sps:$4 sm:$0xff]   ;;  %v5524_v52 = vcombine.high %v1782_v42, %v1790_v43  ;;  %v5523_v61 = vcombine.low %v1782_v42, %v1790_v43 }
 0x1af   : > { %4373 = vmatprep.mubr.bf16.mxu1 %v5462_v53  ;;  %v5526_v53 = vcombine.high %v1783_v46, %v1791_v47  ;;  %v1720_v42 = vld [vmem:[%s7296_s9 + $0x1a0] sm:$0xff] }
 0x1b0   : > { %4435 = vmatpush1.bf16.msra.mxu0 %v6113_v54  ;;  %v6161_v54 = vld [vmem:[%s7298_s11 + $0x4a0] ss:$8 sps:$4 sm:$0xff]  }
 0x1b1   : > { %4548 = vmatpush1.bf16.msra.mxu1 %v6116_v55  ;;  %4436 = vmatprep.subr.bf16.mxu0 %v6121_v56  ;;  %v6164_v55 = vld [vmem:[%s7298_s11 + $0x5a0] ss:$8 sps:$4 sm:$0xff]   ;;  %v6169_v56 = vld [vmem:[%s7298_s11 + $0x494] ss:$8 sps:$4 sm:$0xff]  }
 0x1b2   : > { %4549 = vmatprep.subr.bf16.mxu1 %v6124_v57  ;;  %v6172_v57 = vld [vmem:[%s7298_s11 + $0x594] ss:$8 sps:$4 sm:$0xff]  }
 0x1b3   : > { %4261 = vmatmul.mubr.bf16.gmra.mxu0 %v5459_v62  ;;  %v5525_v62 = vcombine.low %v1783_v46, %v1791_v47  ;;  %v1721_v46 = vld [vmem:[%s7296_s9 + $0x1a8] sm:$0xff] }
 0x1b4   : > { %4374 = vmatmul.mubr.bf16.gmra.mxu1 %v5461_v63  ;;  %4437 = vmatpush1.bf16.msra.mxu0 %v6119_v58  ;;  %v6167_v58 = vld [vmem:[%s7298_s11 + $0x490] ss:$8 sps:$4 sm:$0xff]   ;;  %v1680_v63 = vld [vmem:[%s7296_s9 + $0x60] sm:$0xff]  ;;  %v1729_v47 = vld [vmem:[%s7296_s9 + $0x1e8] sm:$0xff] }
 0x1b5   : > { %4550 = vmatpush1.bf16.msra.mxu1 %v6122_v59  ;;  %4438 = vmatprep.subr.bf16.mxu0 %v6127_v2  ;;  %v6170_v59 = vld [vmem:[%s7298_s11 + $0x590] ss:$8 sps:$4 sm:$0xff]   ;;  %v6175_v2 = vld [vmem:[%s7298_s11 + $0x484] ss:$8 sps:$4 sm:$0xff]  }
 0x1b6   : > { %4551 = vmatprep.subr.bf16.mxu1 %v6130_v3  ;;  %4270 = vmatprep.mubr.bf16.mxu0 %v5476_v4  ;;  %v6178_v3 = vld [vmem:[%s7298_s11 + $0x584] ss:$8 sps:$4 sm:$0xff]   ;;  %v5416_v4 = vcombine.high %v1672_v60, %v1680_v63 }
 0x1b7   : > { %4383 = vmatprep.mubr.bf16.mxu1 %v5478_v5  ;;  %v5418_v5 = vcombine.high %v1673_v0, %v1681_v1 }
 0x1b8   : > { %4439 = vmatpush1.bf16.msra.mxu0 %v6125_v6  ;;  %v6173_v6 = vld [vmem:[%s7298_s11 + $0x480] ss:$8 sps:$4 sm:$0xff]  }
 0x1b9   : > { %4552 = vmatpush1.bf16.msra.mxu1 %v6128_v7  ;;  %4440 = vmatprep.subr.bf16.mxu0 %v6133_v8  ;;  %v6176_v7 = vld [vmem:[%s7298_s11 + $0x580] ss:$8 sps:$4 sm:$0xff]   ;;  %v6181_v8 = vld [vmem:[%s7298_s11 + $0x674] ss:$8 sps:$4 sm:$0xff]  }
 0x1ba   : > { %4553 = vmatprep.subr.bf16.mxu1 %v6136_v9  ;;  %v6184_v9 = vld [vmem:[%s7298_s11 + $0x774] ss:$8 sps:$4 sm:$0xff]  }
 0x1bb   : > { %4271 = vmatmul.mubr.bf16.gmra.mxu0 %v5475_v14  ;;  %v5415_v14 = vcombine.low %v1672_v60, %v1680_v63  ;;  %v5465_v60 = vcombine.low %v1721_v46, %v1729_v47  ;;  %v1745_v63 = vld [vmem:[%s7296_s9 + $0x268] sm:$0xff] }
 0x1bc   : > { %4384 = vmatmul.mubr.bf16.gmra.mxu1 %v5477_v15  ;;  %4441 = vmatpush2.bf16.msra.mxu0 %v6131_v10  ;;  %v6179_v10 = vld [vmem:[%s7298_s11 + $0x670] ss:$8 sps:$4 sm:$0xff]   ;;  %v5417_v15 = vcombine.low %v1673_v0, %v1681_v1 }
 0x1bd   : > { %4554 = vmatpush2.bf16.msra.mxu1 %v6134_v11  ;;  %4442 = vmatprep.subr.bf16.mxu0 %v6139_v18  ;;  %v6182_v11 = vld [vmem:[%s7298_s11 + $0x770] ss:$8 sps:$4 sm:$0xff]   ;;  %v6187_v18 = vld [vmem:[%s7298_s11 + $0x664] ss:$8 sps:$4 sm:$0xff]  }
 0x1be   : > { %4555 = vmatprep.subr.bf16.mxu1 %v6142_v19  ;;  %4280 = vmatprep.mubr.bf16.mxu0 %v5492_v20  ;;  %v6190_v19 = vld [vmem:[%s7298_s11 + $0x764] ss:$8 sps:$4 sm:$0xff]   ;;  %v5432_v20 = vcombine.high %v1688_v12, %v1696_v13  ;;  %v6215_v0 = vld [vmem:[%s7298_s11 + $0x610] ss:$8 sps:$4 sm:$0xff]  }
 0x1bf   : > { %4393 = vmatprep.mubr.bf16.mxu1 %v5494_v21  ;;  %v5434_v21 = vcombine.high %v1689_v16, %v1697_v17  ;;  %v6218_v1 = vld [vmem:[%s7298_s11 + $0x710] ss:$8 sps:$4 sm:$0xff]  }
 0x1c0   : > { %4443 = vmatpush2.bf16.msra.mxu0 %v6137_v22  ;;  %v6185_v22 = vld [vmem:[%s7298_s11 + $0x660] ss:$8 sps:$4 sm:$0xff]   ;;  %v6227_v16 = vld [vmem:[%s7298_s11 + $0x6f0] ss:$8 sps:$4 sm:$0xff]  }
 0x1c1   : > { %4556 = vmatpush2.bf16.msra.mxu1 %v6140_v23  ;;  %4444 = vmatprep.subr.bf16.mxu0 %v6145_v24  ;;  %v6188_v23 = vld [vmem:[%s7298_s11 + $0x760] ss:$8 sps:$4 sm:$0xff]   ;;  %v6193_v24 = vld [vmem:[%s7298_s11 + $0x654] ss:$8 sps:$4 sm:$0xff]   ;;  %v6230_v17 = vld [vmem:[%s7298_s11 + $0x7f0] ss:$8 sps:$4 sm:$0xff]  }
 0x1c2   : > { %4557 = vmatprep.subr.bf16.mxu1 %v6148_v25  ;;  %v6196_v25 = vld [vmem:[%s7298_s11 + $0x754] ss:$8 sps:$4 sm:$0xff]  }
 0x1c3   : > { %4281 = vmatmul.mubr.bf16.gmra.mxu0 %v5491_v29  ;;  %v1712_v29 = vld [vmem:[%s7296_s9 + $0x160] sm:$0xff] }
 0x1c4   : > { %4394 = vmatmul.mubr.bf16.gmra.mxu1 %v5493_v30  ;;  %4445 = vmatpush2.bf16.msra.mxu0 %v6143_v26  ;;  %v6191_v26 = vld [vmem:[%s7298_s11 + $0x650] ss:$8 sps:$4 sm:$0xff]   ;;  %v5431_v30 = vcombine.low %v1688_v12, %v1696_v13  ;;  %v5447_v43 = vcombine.low %v1704_v28, %v1712_v29  ;;  %v1760_v13 = vld [vmem:[%s7296_s9 + $0x2e0] sm:$0xff] }
 0x1c5   : > { %4558 = vmatpush2.bf16.msra.mxu1 %v6146_v33  ;;  %4446 = vmatprep.subr.bf16.mxu0 %v6151_v34  ;;  %v1713_v33 = vld [vmem:[%s7296_s9 + $0x168] sm:$0xff] }
 0x1c6   : > { %4559 = vmatprep.subr.bf16.mxu1 %v6154_v35  ;;  %4290 = vmatprep.mubr.bf16.mxu0 %v5508_v36  ;;  %v6199_v34 = vld [vmem:[%s7298_s11 + $0x644] ss:$8 sps:$4 sm:$0xff]   ;;  %v5448_v36 = vcombine.high %v1704_v28, %v1712_v29 }
 0x1c7   : > { %4403 = vmatprep.mubr.bf16.mxu1 %v5510_v37  ;;  %v6202_v35 = vld [vmem:[%s7298_s11 + $0x744] ss:$8 sps:$4 sm:$0xff]   ;;  %v5450_v37 = vcombine.high %v1705_v32, %v1713_v33 }
 0x1c8   : > { %4447 = vmatpush2.bf16.msra.mxu0 %v6149_v38  ;;  %v6197_v38 = vld [vmem:[%s7298_s11 + $0x640] ss:$8 sps:$4 sm:$0xff]  }
 0x1c9   : > { %4560 = vmatpush2.bf16.msra.mxu1 %v6152_v39  ;;  %4448 = vmatprep.subr.bf16.mxu0 %v6157_v40  ;;  %v6200_v39 = vld [vmem:[%s7298_s11 + $0x740] ss:$8 sps:$4 sm:$0xff]   ;;  %v6205_v40 = vld [vmem:[%s7298_s11 + $0x634] ss:$8 sps:$4 sm:$0xff]  }
 0x1ca   : > { %4561 = vmatprep.subr.bf16.mxu1 %v6160_v41  ;;  %v6208_v41 = vld [vmem:[%s7298_s11 + $0x734] ss:$8 sps:$4 sm:$0xff]   ;;  %v1776_v29 = vld [vmem:[%s7296_s9 + $0x360] sm:$0xff] }
 0x1cb   : > { %4291 = vmatmul.mubr.bf16.gmra.mxu0 %v5507_v44  ;;  %v5449_v44 = vcombine.low %v1705_v32, %v1713_v33  ;;  %v6239_v32 = vld [vmem:[%s7298_s11 + $0x6d0] ss:$8 sps:$4 sm:$0xff]  }
 0x1cc   : > { %4404 = vmatmul.mubr.bf16.gmra.mxu1 %v5509_v45  ;;  %4449 = vmatpush2.bf16.msra.mxu0 %v6155_v48  ;;  %v1728_v45 = vld [vmem:[%s7296_s9 + $0x1e0] sm:$0xff]  ;;  %v6203_v48 = vld [vmem:[%s7298_s11 + $0x630] ss:$8 sps:$4 sm:$0xff]  }
 0x1cd   : > { %4562 = vmatpush2.bf16.msra.mxu1 %v6158_v49  ;;  %4450 = vmatprep.subr.bf16.mxu0 %v6163_v50  ;;  %v6206_v49 = vld [vmem:[%s7298_s11 + $0x730] ss:$8 sps:$4 sm:$0xff]   ;;  %v6211_v50 = vld [vmem:[%s7298_s11 + $0x624] ss:$8 sps:$4 sm:$0xff]  }
 0x1ce   : > { %4563 = vmatprep.subr.bf16.mxu1 %v6166_v51  ;;  %4300 = vmatprep.mubr.bf16.mxu0 %v5524_v52  ;;  %v6214_v51 = vld [vmem:[%s7298_s11 + $0x724] ss:$8 sps:$4 sm:$0xff]   ;;  %v5464_v52 = vcombine.high %v1720_v42, %v1728_v45  ;;  %v6242_v33 = vld [vmem:[%s7298_s11 + $0x7d0] ss:$8 sps:$4 sm:$0xff]  }
 0x1cf   : > { %4413 = vmatprep.mubr.bf16.mxu1 %v5526_v53  ;;  %v5466_v53 = vcombine.high %v1721_v46, %v1729_v47  ;;  %v1785_v46 = vld [vmem:[%s7296_s9 + $0x3a8] sm:$0xff] }
 0x1d0   : > { %4451 = vmatpush2.bf16.msra.mxu0 %v6161_v54  ;;  %v6209_v54 = vld [vmem:[%s7298_s11 + $0x620] ss:$8 sps:$4 sm:$0xff]  }
 0x1d1   : > { %4564 = vmatpush2.bf16.msra.mxu1 %v6164_v55  ;;  %4452 = vmatprep.subr.bf16.mxu0 %v6169_v56  ;;  %v6212_v55 = vld [vmem:[%s7298_s11 + $0x720] ss:$8 sps:$4 sm:$0xff]   ;;  %v6217_v56 = vld [vmem:[%s7298_s11 + $0x614] ss:$8 sps:$4 sm:$0xff]  }
 0x1d2   : > { %4565 = vmatprep.subr.bf16.mxu1 %v6172_v57  ;;  %v6220_v57 = vld [vmem:[%s7298_s11 + $0x714] ss:$8 sps:$4 sm:$0xff]   ;;  %v1793_v47 = vld [vmem:[%s7296_s9 + $0x3e8] sm:$0xff] }
 0x1d3   : > { %4301 = vmatmul.mubr.bf16.gmra.mxu0 %v5523_v61  ;;  %v1744_v61 = vld [vmem:[%s7296_s9 + $0x260] sm:$0xff] }
 0x1d4   : > { %4414 = vmatmul.mubr.bf16.gmra.mxu1 %v5525_v62  ;;  %4453 = vmatpush2.bf16.msra.mxu0 %v6167_v58  ;;  %v1736_v58 = vld [vmem:[%s7296_s9 + $0x220] sm:$0xff]  ;;  %v1737_v62 = vld [vmem:[%s7296_s9 + $0x228] sm:$0xff] }
 0x1d5   : > { %4566 = vmatpush2.bf16.msra.mxu1 %v6170_v59  ;;  %4454 = vmatprep.subr.bf16.mxu0 %v6175_v2  ;;  %v5463_v59 = vcombine.low %v1720_v42, %v1728_v45  ;;  %v6223_v2 = vld [vmem:[%s7298_s11 + $0x604] ss:$8 sps:$4 sm:$0xff]   ;;  %v5481_v12 = vcombine.low %v1737_v62, %v1745_v63 }
 0x1d6   : > { %4567 = vmatprep.subr.bf16.mxu1 %v6178_v3  ;;  %4456 = vmatprep.mubr.bf16.mxu0 %v5416_v4  ;;  %v6226_v3 = vld [vmem:[%s7298_s11 + $0x704] ss:$8 sps:$4 sm:$0xff]   ;;  %v5480_v4 = vcombine.high %v1736_v58, %v1744_v61 }
 0x1d7   : > { %4569 = vmatprep.mubr.bf16.mxu1 %v5418_v5  ;;  %v5482_v5 = vcombine.high %v1737_v62, %v1745_v63  ;;  %v1784_v42 = vld [vmem:[%s7296_s9 + $0x3a0] sm:$0xff]  ;;  %v1675_v62 = vld [vmem:[%s7296_s9 + $0x38] sm:$0xff] }
 0x1d8   : > { %4455 = vmatpush2.bf16.msra.mxu0 %v6173_v6  ;;  %v6221_v6 = vld [vmem:[%s7298_s11 + $0x600] ss:$8 sps:$4 sm:$0xff]   ;;  %v1683_v63 = vld [vmem:[%s7296_s9 + $0x78] sm:$0xff] }
 0x1d9   : > { %4568 = vmatpush2.bf16.msra.mxu1 %v6176_v7  ;;  %4650 = vmatprep.subr.bf16.mxu0 %v6181_v8  ;;  %v6224_v7 = vld [vmem:[%s7298_s11 + $0x700] ss:$8 sps:$4 sm:$0xff]   ;;  %v6229_v8 = vld [vmem:[%s7298_s11 + $0x6f4] ss:$8 sps:$4 sm:$0xff]  }
 0x1da   : > { %4763 = vmatprep.subr.bf16.mxu1 %v6184_v9  ;;  %v6232_v9 = vld [vmem:[%s7298_s11 + $0x7f4] ss:$8 sps:$4 sm:$0xff]   ;;  %v1792_v45 = vld [vmem:[%s7296_s9 + $0x3e0] sm:$0xff] }
 0x1db   : > { %4457 = vmatmul.mubr.bf16.vlgmr.msra.gmra.mxu0 %v5415_v14  ;;  %v1753_v14 = vld [vmem:[%s7296_s9 + $0x2a8] sm:$0xff] }
 0x1dc   : > { %4570 = vmatmul.mubr.bf16.vlgmr.msra.gmra.mxu1 %v5417_v15  ;;  %4651 = vmatpush1.bf16.msra.mxu0 %v6179_v10  ;;  %v1752_v10 = vld [vmem:[%s7296_s9 + $0x2a0] sm:$0xff]  ;;  %v1761_v15 = vld [vmem:[%s7296_s9 + $0x2e8] sm:$0xff] }
 0x1dd   : > { %4764 = vmatpush1.bf16.msra.mxu1 %v6182_v11  ;;  %4652 = vmatprep.subr.bf16.mxu0 %v6187_v18  ;;  %v5479_v11 = vcombine.low %v1736_v58, %v1744_v61  ;;  %v6235_v18 = vld [vmem:[%s7298_s11 + $0x6e4] ss:$8 sps:$4 sm:$0xff]   ;;  %v5497_v28 = vcombine.low %v1753_v14, %v1761_v15  ;;  %v1674_v58 = vld [vmem:[%s7296_s9 + $0x30] sm:$0xff] }
 0x1de   : > { %4765 = vmatprep.subr.bf16.mxu1 %v6190_v19  ;;  %4466 = vmatprep.mubr.bf16.mxu0 %v5432_v20  ;;  %v6238_v19 = vld [vmem:[%s7298_s11 + $0x7e4] ss:$8 sps:$4 sm:$0xff]   ;;  %v5496_v20 = vcombine.high %v1752_v10, %v1760_v13  ;;  %v1682_v61 = vld [vmem:[%s7296_s9 + $0x70] sm:$0xff] }
 0x1df   : > { %4579 = vmatprep.mubr.bf16.mxu1 %v5434_v21  ;;  %v5498_v21 = vcombine.high %v1753_v14, %v1761_v15 }
 0x1e0   : > { %4653 = vmatpush1.bf16.msra.mxu0 %v6185_v22  ;;  %v6233_v22 = vld [vmem:[%s7298_s11 + $0x6e0] ss:$8 sps:$4 sm:$0xff]  }
 0x1e1   : > { %4766 = vmatpush1.bf16.msra.mxu1 %v6188_v23  ;;  %4654 = vmatprep.subr.bf16.mxu0 %v6193_v24  ;;  %v6236_v23 = vld [vmem:[%s7298_s11 + $0x7e0] ss:$8 sps:$4 sm:$0xff]   ;;  %v6241_v24 = vld [vmem:[%s7298_s11 + $0x6d4] ss:$8 sps:$4 sm:$0xff]  }
 0x1e2   : > { %4767 = vmatprep.subr.bf16.mxu1 %v6196_v25  ;;  %v6244_v25 = vld [vmem:[%s7298_s11 + $0x7d4] ss:$8 sps:$4 sm:$0xff]  }
 0x1e3   : > { %4467 = vmatmul.mubr.bf16.gmra.mxu0 %v5431_v30  ;;  %v1769_v30 = vld [vmem:[%s7296_s9 + $0x328] sm:$0xff] }
 0x1e4   : > { %4580 = vmatmul.mubr.bf16.gmra.mxu1 %v5433_v31  ;;  %4655 = vmatpush1.bf16.msra.mxu0 %v6191_v26  ;;  %v1768_v26 = vld [vmem:[%s7296_s9 + $0x320] sm:$0xff]  ;;  %v1777_v31 = vld [vmem:[%s7296_s9 + $0x368] sm:$0xff] }
 0x1e5   : > { %4768 = vmatpush1.bf16.msra.mxu1 %v6194_v27  ;;  %4656 = vmatprep.subr.bf16.mxu0 %v6199_v34  ;;  %v5495_v27 = vcombine.low %v1752_v10, %v1760_v13  ;;  %v6247_v34 = vld [vmem:[%s7298_s11 + $0x6c4] ss:$8 sps:$4 sm:$0xff]   ;;  %v1691_v10 = vld [vmem:[%s7296_s9 + $0xb8] sm:$0xff]  ;;  %v5421_v13 = vcombine.low %v1675_v62, %v1683_v63 }
 0x1e6   : > { %4769 = vmatprep.subr.bf16.mxu1 %v6202_v35  ;;  %4476 = vmatprep.mubr.bf16.mxu0 %v5448_v36  ;;  %v6250_v35 = vld [vmem:[%s7298_s11 + $0x7c4] ss:$8 sps:$4 sm:$0xff]   ;;  %v5512_v36 = vcombine.high %v1768_v26, %v1776_v29 }
 0x1e7   : > { %4589 = vmatprep.mubr.bf16.mxu1 %v5450_v37  ;;  %v5514_v37 = vcombine.high %v1769_v30, %v1777_v31 }
 0x1e8   : > { %4657 = vmatpush1.bf16.msra.mxu0 %v6197_v38  ;;  %v6245_v38 = vld [vmem:[%s7298_s11 + $0x6c0] ss:$8 sps:$4 sm:$0xff]  }
 0x1e9   : > { %4770 = vmatpush1.bf16.msra.mxu1 %v6200_v39  ;;  %4658 = vmatprep.subr.bf16.mxu0 %v6205_v40  ;;  %v6248_v39 = vld [vmem:[%s7298_s11 + $0x7c0] ss:$8 sps:$4 sm:$0xff]   ;;  %v6253_v40 = vld [vmem:[%s7298_s11 + $0x6b4] ss:$8 sps:$4 sm:$0xff]  }
 0x1ea   : > { %4771 = vmatprep.subr.bf16.mxu1 %v6208_v41  ;;  %v6256_v41 = vld [vmem:[%s7298_s11 + $0x7b4] ss:$8 sps:$4 sm:$0xff]  }
 0x1eb   : > { %4477 = vmatmul.mubr.bf16.gmra.mxu0 %v5447_v43  ;;  %v5511_v43 = vcombine.low %v1768_v26, %v1776_v29 }
 0x1ec   : > { %4590 = vmatmul.mubr.bf16.gmra.mxu1 %v5449_v44  ;;  %4659 = vmatpush1.bf16.msra.mxu0 %v6203_v48  ;;  %v5513_v44 = vcombine.low %v1769_v30, %v1777_v31  ;;  %v6251_v48 = vld [vmem:[%s7298_s11 + $0x6b0] ss:$8 sps:$4 sm:$0xff]  }
 0x1ed   : > { %4772 = vmatpush1.bf16.msra.mxu1 %v6206_v49  ;;  %4660 = vmatprep.subr.bf16.mxu0 %v6211_v50  ;;  %v6254_v49 = vld [vmem:[%s7298_s11 + $0x7b0] ss:$8 sps:$4 sm:$0xff]   ;;  %v6259_v50 = vld [vmem:[%s7298_s11 + $0x6a4] ss:$8 sps:$4 sm:$0xff]  }
 0x1ee   : > { %4773 = vmatprep.subr.bf16.mxu1 %v6214_v51  ;;  %4486 = vmatprep.mubr.bf16.mxu0 %v5464_v52  ;;  %v6262_v51 = vld [vmem:[%s7298_s11 + $0x7a4] ss:$8 sps:$4 sm:$0xff]   ;;  %v5528_v52 = vcombine.high %v1784_v42, %v1792_v45 }
 0x1ef   : > { %4599 = vmatprep.mubr.bf16.mxu1 %v5466_v53  ;;  %v5530_v53 = vcombine.high %v1785_v46, %v1793_v47 }
 0x1f0   : > { %4661 = vmatpush1.bf16.msra.mxu0 %v6209_v54  ;;  %v6257_v54 = vld [vmem:[%s7298_s11 + $0x6a0] ss:$8 sps:$4 sm:$0xff]  }
 0x1f1   : > { %4774 = vmatpush1.bf16.msra.mxu1 %v6212_v55  ;;  %4662 = vmatprep.subr.bf16.mxu0 %v6217_v56  ;;  %v6260_v55 = vld [vmem:[%s7298_s11 + $0x7a0] ss:$8 sps:$4 sm:$0xff]   ;;  %v6265_v56 = vld [vmem:[%s7298_s11 + $0x694] ss:$8 sps:$4 sm:$0xff]  }
 0x1f2   : > { %4775 = vmatprep.subr.bf16.mxu1 %v6220_v57  ;;  %v6268_v57 = vld [vmem:[%s7298_s11 + $0x794] ss:$8 sps:$4 sm:$0xff]  }
 0x1f3   : > { %4487 = vmatmul.mubr.bf16.gmra.mxu0 %v5463_v59  ;;  %v5527_v59 = vcombine.low %v1784_v42, %v1792_v45  ;;  %v1730_v42 = vld [vmem:[%s7296_s9 + $0x1f0] sm:$0xff] }
 0x1f4   : > { %4600 = vmatmul.mubr.bf16.gmra.mxu1 %v5465_v60  ;;  %4663 = vmatpush1.bf16.msra.mxu0 %v6215_v0  ;;  %v5529_v60 = vcombine.low %v1785_v46, %v1793_v47  ;;  %v6263_v0 = vld [vmem:[%s7298_s11 + $0x690] ss:$8 sps:$4 sm:$0xff]  }
 0x1f5   : > { %4776 = vmatpush1.bf16.msra.mxu1 %v6218_v1  ;;  %4664 = vmatprep.subr.bf16.mxu0 %v6223_v2  ;;  %v6266_v1 = vld [vmem:[%s7298_s11 + $0x790] ss:$8 sps:$4 sm:$0xff]   ;;  %v6271_v2 = vld [vmem:[%s7298_s11 + $0x684] ss:$8 sps:$4 sm:$0xff]  }
 0x1f6   : > { %4777 = vmatprep.subr.bf16.mxu1 %v6226_v3  ;;  %4496 = vmatprep.mubr.bf16.mxu0 %v5480_v4  ;;  %v6274_v3 = vld [vmem:[%s7298_s11 + $0x784] ss:$8 sps:$4 sm:$0xff]   ;;  %v5420_v4 = vcombine.high %v1674_v58, %v1682_v61 }
 0x1f7   : > { %4609 = vmatprep.mubr.bf16.mxu1 %v5482_v5  ;;  %v5422_v5 = vcombine.high %v1675_v62, %v1683_v63  ;;  %v1746_v62 = vld [vmem:[%s7296_s9 + $0x270] sm:$0xff]  ;;  %v1739_v63 = vld [vmem:[%s7296_s9 + $0x238] sm:$0xff] }
 0x1f8   : > { %4665 = vmatpush1.bf16.msra.mxu0 %v6221_v6  ;;  %v6269_v6 = vld [vmem:[%s7298_s11 + $0x680] ss:$8 sps:$4 sm:$0xff]  }
 0x1f9   : > { %4778 = vmatpush1.bf16.msra.mxu1 %v6224_v7  ;;  %4666 = vmatprep.subr.bf16.mxu0 %v6229_v8  ;;  %v6272_v7 = vld [vmem:[%s7298_s11 + $0x780] ss:$8 sps:$4 sm:$0xff]   ;;  %v1690_v8 = vld [vmem:[%s7296_s9 + $0xb0] sm:$0xff] }
 0x1fa   : > { %4779 = vmatprep.subr.bf16.mxu1 %v6232_v9  ;;  %v1698_v9 = vld [vmem:[%s7296_s9 + $0xf0] sm:$0xff] }
 0x1fb   : > { %4497 = vmatmul.mubr.bf16.gmra.mxu0 %v5479_v11  ;;  %v1699_v11 = vld [vmem:[%s7296_s9 + $0xf8] sm:$0xff]  ;;  %v5436_v14 = vcombine.high %v1690_v8, %v1698_v9 }
 0x1fc   : > { %4610 = vmatmul.mubr.bf16.gmra.mxu1 %v5481_v12  ;;  %4667 = vmatpush2.bf16.msra.mxu0 %v6227_v16  ;;  %v5419_v12 = vcombine.low %v1674_v58, %v1682_v61  ;;  %v5438_v15 = vcombine.high %v1691_v10, %v1699_v11  ;;  %v5437_v29 = vcombine.low %v1691_v10, %v1699_v11 }
 0x1fd   : > { %4780 = vmatpush2.bf16.msra.mxu1 %v6230_v17  ;;  %4668 = vmatprep.subr.bf16.mxu0 %v6235_v18 }
 0x1fe   : > { %4781 = vmatprep.subr.bf16.mxu1 %v6238_v19  ;;  %4506 = vmatprep.mubr.bf16.mxu0 %v5496_v20  ;;  %v1706_v19 = vld [vmem:[%s7296_s9 + $0x130] sm:$0xff] }
 0x1ff   : > { %4619 = vmatprep.mubr.bf16.mxu1 %v5498_v21 }
 0x200   : > { %4669 = vmatpush2.bf16.msra.mxu0 %v6233_v22  ;;  %v1714_v22 = vld [vmem:[%s7296_s9 + $0x170] sm:$0xff] }
 0x201   : > { %4782 = vmatpush2.bf16.msra.mxu1 %v6236_v23  ;;  %4670 = vmatprep.subr.bf16.mxu0 %v6241_v24  ;;  %v1707_v23 = vld [vmem:[%s7296_s9 + $0x138] sm:$0xff]  ;;  %v5452_v31 = vcombine.high %v1706_v19, %v1714_v22 }
 0x202   : > { %4783 = vmatprep.subr.bf16.mxu1 %v6244_v25  ;;  %v1715_v24 = vld [vmem:[%s7296_s9 + $0x178] sm:$0xff] }
 0x203   : > { %4507 = vmatmul.mubr.bf16.gmra.mxu0 %v5495_v27 }
 0x204   : > { %4620 = vmatmul.mubr.bf16.gmra.mxu1 %v5497_v28  ;;  %4671 = vmatpush2.bf16.msra.mxu0 %v6239_v32  ;;  %v5435_v28 = vcombine.low %v1690_v8, %v1698_v9  ;;  %v5454_v32 = vcombine.high %v1707_v23, %v1715_v24 }
 0x205   : > { %4784 = vmatpush2.bf16.msra.mxu1 %v6242_v33  ;;  %4672 = vmatprep.subr.bf16.mxu0 %v6247_v34 }
 0x206   : > { %4785 = vmatprep.subr.bf16.mxu1 %v6250_v35  ;;  %4516 = vmatprep.mubr.bf16.mxu0 %v5512_v36 }
 0x207   : > { %4629 = vmatprep.mubr.bf16.mxu1 %v5514_v37 }
 0x208   : > { %4673 = vmatpush2.bf16.msra.mxu0 %v6245_v38 }
 0x209   : > { %4786 = vmatpush2.bf16.msra.mxu1 %v6248_v39  ;;  %4674 = vmatprep.subr.bf16.mxu0 %v6253_v40  ;;  %v1722_v39 = vld [vmem:[%s7296_s9 + $0x1b0] sm:$0xff] }
 0x20a   : > { %4787 = vmatprep.subr.bf16.mxu1 %v6256_v41 }
 0x20b   : > { %4517 = vmatmul.mubr.bf16.gmra.mxu0 %v5511_v43  ;;  %v1723_v43 = vld [vmem:[%s7296_s9 + $0x1b8] sm:$0xff] }
 0x20c   : > { %4630 = vmatmul.mubr.bf16.gmra.mxu1 %v5513_v44  ;;  %4675 = vmatpush2.bf16.msra.mxu0 %v6251_v48  ;;  %v1731_v44 = vld [vmem:[%s7296_s9 + $0x1f8] sm:$0xff]  ;;  %v5451_v48 = vcombine.low %v1706_v19, %v1714_v22  ;;  %v1762_v19 = vld [vmem:[%s7296_s9 + $0x2f0] sm:$0xff] }
 0x20d   : > { %4788 = vmatpush2.bf16.msra.mxu1 %v6254_v49  ;;  %4676 = vmatprep.subr.bf16.mxu0 %v6259_v50  ;;  %v5453_v49 = vcombine.low %v1707_v23, %v1715_v24 }
 0x20e   : > { %4789 = vmatprep.subr.bf16.mxu1 %v6262_v51  ;;  %4526 = vmatprep.mubr.bf16.mxu0 %v5528_v52  ;;  %v5468_v51 = vcombine.high %v1722_v39, %v1730_v42  ;;  %v5470_v52 = vcombine.high %v1723_v43, %v1731_v44 }
 0x20f   : > { %4639 = vmatprep.mubr.bf16.mxu1 %v5530_v53 }
 0x210   : > { %4677 = vmatpush2.bf16.msra.mxu0 %v6257_v54 }
 0x211   : > { %4790 = vmatpush2.bf16.msra.mxu1 %v6260_v55  ;;  %4678 = vmatprep.subr.bf16.mxu0 %v6265_v56 }
 0x212   : > { %4791 = vmatprep.subr.bf16.mxu1 %v6268_v57 }
 0x213   : > { %4527 = vmatmul.mubr.bf16.gmra.mxu0 %v5527_v59  ;;  %v1738_v59 = vld [vmem:[%s7296_s9 + $0x230] sm:$0xff] }
 0x214   : > { %4640 = vmatmul.mubr.bf16.gmra.mxu1 %v5529_v60  ;;  %4679 = vmatpush2.bf16.msra.mxu0 %v6263_v0  ;;  %v1747_v0 = vld [vmem:[%s7296_s9 + $0x278] sm:$0xff] }
 0x215   : > { %4792 = vmatpush2.bf16.msra.mxu1 %v6266_v1  ;;  %4680 = vmatprep.subr.bf16.mxu0 %v6271_v2  ;;  %v5486_v8 = vcombine.high %v1739_v63, %v1747_v0 }
 0x216   : > { %4793 = vmatprep.subr.bf16.mxu1 %v6274_v3  ;;  %4682 = vmatprep.mubr.bf16.mxu0 %v5420_v4  ;;  %v5467_v4 = vcombine.low %v1722_v39, %v1730_v42 }
 0x217   : > { %4795 = vmatprep.mubr.bf16.mxu1 %v5422_v5  ;;  %v5469_v5 = vcombine.low %v1723_v43, %v1731_v44  ;;  %v1778_v43 = vld [vmem:[%s7296_s9 + $0x370] sm:$0xff]  ;;  %v1771_v44 = vld [vmem:[%s7296_s9 + $0x338] sm:$0xff] }
 0x218   : > { %4681 = vmatpush2.bf16.msra.mxu0 %v6269_v6 }
 0x219   : > { %4794 = vmatpush2.bf16.msra.mxu1 %v6272_v7  ;;  %v5484_v7 = vcombine.high %v1738_v59, %v1746_v62 }
 0x21b   : > { %v4006_v16 = vpop.f32.mrf.mxu0  ;;  %4683 = vmatmul.mubr.bf16.vlgmr.msra.gmra.mxu0 %v5419_v12 }
 0x21c   : > { %v4119_v17 = vpop.f32.mrf.mxu1  ;;  %4796 = vmatmul.mubr.bf16.vlgmr.msra.gmra.mxu1 %v5421_v13  ;;  %4692 = vmatprep.mubr.bf16.mxu0 %v5436_v14 }
 0x21d   : > { %v7663_v18 = vadd.f32 %v4119_v17, %v4006_v16  ;;  %4805 = vmatprep.mubr.bf16.mxu1 %v5438_v15  ;;  %v4008_v20 = vpop.f32.mrf.mxu0  ;;  %v1754_v15 = vld [vmem:[%s7296_s9 + $0x2b0] sm:$0xff] }
 0x21e   : > { %v4121_v21 = vpop.f32.mrf.mxu1 }
 0x21f   : > { %v7669_v25 = vadd.f32 %v4121_v21, %v4008_v20  ;;  %v4010_v26 = vpop.f32.mrf.mxu0  ;;  %v1755_v20 = vld [vmem:[%s7296_s9 + $0x2b8] sm:$0xff] }
 0x220   : > { %v4123_v27 = vpop.f32.mrf.mxu1  ;;  %v1763_v21 = vld [vmem:[%s7296_s9 + $0x2f8] sm:$0xff] }
 0x221   : > { %v7671_v30 = vadd.f32 %v4123_v27, %v4010_v26  ;;  %v4012_v33 = vpop.f32.mrf.mxu0  ;;  %v5483_v26 = vcombine.low %v1738_v59, %v1746_v62  ;;  %v5485_v27 = vcombine.low %v1739_v63, %v1747_v0  ;;  %v1786_v0 = vld [vmem:[%s7296_s9 + $0x3b0] sm:$0xff] }
 0x222   : > { %v4125_v34 = vpop.f32.mrf.mxu1 }
 0x223   : > { %v7673_v35 = vadd.f32 %v4125_v34, %v4012_v33  ;;  %v4016_v36 = vpop.f32.mrf.mxu0  ;;  %4693 = vmatmul.mubr.bf16.gmra.mxu0 %v5435_v28 }
 0x224   : > { %v4129_v37 = vpop.f32.mrf.mxu1  ;;  %4806 = vmatmul.mubr.bf16.gmra.mxu1 %v5437_v29  ;;  %4702 = vmatprep.mubr.bf16.mxu0 %v5452_v31  ;;  %v5500_v29 = vcombine.high %v1754_v15, %v1762_v19  ;;  %v5502_v31 = vcombine.high %v1755_v20, %v1763_v21 }
 0x225   : > { %v7675_v38 = vadd.f32 %v4129_v37, %v4016_v36  ;;  %4815 = vmatprep.mubr.bf16.mxu1 %v5454_v32  ;;  %v4018_v40 = vpop.f32.mrf.mxu0 }
 0x226   : > { %v4131_v41 = vpop.f32.mrf.mxu1 }
 0x227   : > { %v7681_v45 = vadd.f32 %v4131_v41, %v4018_v40  ;;  %v4020_v46 = vpop.f32.mrf.mxu0  ;;  %v1770_v40 = vld [vmem:[%s7296_s9 + $0x330] sm:$0xff] }
 0x228   : > { %v4133_v47 = vpop.f32.mrf.mxu1 }
 0x229   : > { %v7683_v50 = vadd.f32 %v4133_v47, %v4020_v46  ;;  %v4022_v53 = vpop.f32.mrf.mxu0  ;;  %v1779_v46 = vld [vmem:[%s7296_s9 + $0x378] sm:$0xff] }
 0x22a   : > { %v4135_v54 = vpop.f32.mrf.mxu1 }
 0x22b   : > { %v7685_v55 = vadd.f32 %v4135_v54, %v4022_v53  ;;  %v4026_v56 = vpop.f32.mrf.mxu0  ;;  %4703 = vmatmul.mubr.bf16.gmra.mxu0 %v5451_v48  ;;  %v5516_v54 = vcombine.high %v1770_v40, %v1778_v43 }
 0x22c   : > { %v4139_v57 = vpop.f32.mrf.mxu1  ;;  %4816 = vmatmul.mubr.bf16.gmra.mxu1 %v5453_v49  ;;  %4712 = vmatprep.mubr.bf16.mxu0 %v5468_v51  ;;  %v5499_v51 = vcombine.low %v1754_v15, %v1762_v19 }
 0x22d   : > { %v7687_v58 = vadd.f32 %v4139_v57, %v4026_v56  ;;  %4825 = vmatprep.mubr.bf16.mxu1 %v5470_v52  ;;  %v4028_v60 = vpop.f32.mrf.mxu0  ;;  %v5501_v52 = vcombine.low %v1755_v20, %v1763_v21  ;;  %v5518_v56 = vcombine.high %v1771_v44, %v1779_v46 }
 0x22e   : > { %v4141_v61 = vpop.f32.mrf.mxu1 }
 0x22f   : > { %v7693_v1 = vadd.f32 %v4141_v61, %v4028_v60  ;;  %v4030_v2 = vpop.f32.mrf.mxu0 }
 0x230   : > { %v4143_v3 = vpop.f32.mrf.mxu1 }
 0x231   : > { %v7695_v6 = vadd.f32 %v4143_v3, %v4030_v2  ;;  %v4032_v9 = vpop.f32.mrf.mxu0 }
 0x232   : > { %v4145_v10 = vpop.f32.mrf.mxu1 }
 0x233   : > { %v7697_v11 = vadd.f32 %v4145_v10, %v4032_v9  ;;  %v4036_v12 = vpop.f32.mrf.mxu0  ;;  %4713 = vmatmul.mubr.bf16.gmra.mxu0 %v5467_v4  ;;  %v1794_v4 = vld [vmem:[%s7296_s9 + $0x3f0] sm:$0xff] }
 0x234   : > { %v4149_v13 = vpop.f32.mrf.mxu1  ;;  %4826 = vmatmul.mubr.bf16.gmra.mxu1 %v5469_v5  ;;  %4722 = vmatprep.mubr.bf16.mxu0 %v5484_v7  ;;  %v1787_v5 = vld [vmem:[%s7296_s9 + $0x3b8] sm:$0xff] }
 0x235   : > { %v7699_v14 = vadd.f32 %v4149_v13, %v4036_v12  ;;  %4835 = vmatprep.mubr.bf16.mxu1 %v5486_v8  ;;  %v4038_v16 = vpop.f32.mrf.mxu0  ;;  %v1795_v7 = vld [vmem:[%s7296_s9 + $0x3f8] sm:$0xff]  ;;  %v5515_v12 = vcombine.low %v1770_v40, %v1778_v43  ;;  %v5517_v13 = vcombine.low %v1771_v44, %v1779_v46 }
 0x236   : > { %v4151_v17 = vpop.f32.mrf.mxu1 }
 0x237   : > { %v7705_v22 = vadd.f32 %v4151_v17, %v4038_v16  ;;  %v4040_v23 = vpop.f32.mrf.mxu0  ;;  %v5532_v16 = vcombine.high %v1786_v0, %v1794_v4  ;;  %v5534_v17 = vcombine.high %v1787_v5, %v1795_v7 }
 0x238   : > { %v4153_v24 = vpop.f32.mrf.mxu1 }
 0x239   : > { %v7707_v28 = vadd.f32 %v4153_v24, %v4040_v23  ;;  %v4042_v32 = vpop.f32.mrf.mxu0 }
 0x23a   : > { %v4155_v33 = vpop.f32.mrf.mxu1 }
 0x23b   : > { %v7709_v34 = vadd.f32 %v4155_v33, %v4042_v32  ;;  %v4046_v36 = vpop.f32.mrf.mxu0  ;;  %4723 = vmatmul.mubr.bf16.gmra.mxu0 %v5483_v26 }
 0x23c   : > { %v4159_v37 = vpop.f32.mrf.mxu1  ;;  %4836 = vmatmul.mubr.bf16.gmra.mxu1 %v5485_v27  ;;  %4732 = vmatprep.mubr.bf16.mxu0 %v5500_v29 }
 0x23d   : > { %v7711_v39 = vadd.f32 %v4159_v37, %v4046_v36  ;;  %4845 = vmatprep.mubr.bf16.mxu1 %v5502_v31  ;;  %v4048_v41 = vpop.f32.mrf.mxu0  ;;  %v5531_v36 = vcombine.low %v1786_v0, %v1794_v4  ;;  %v5533_v37 = vcombine.low %v1787_v5, %v1795_v7 }
 0x23e   : > { %v4161_v42 = vpop.f32.mrf.mxu1 }
 0x23f   : > { %v7717_v47 = vadd.f32 %v4161_v42, %v4048_v41  ;;  %v4050_v48 = vpop.f32.mrf.mxu0 }
 0x240   : > { %v4163_v49 = vpop.f32.mrf.mxu1 }
 0x241   : > { %v7719_v53 = vadd.f32 %v4163_v49, %v4050_v48  ;;  %v4052_v57 = vpop.f32.mrf.mxu0 }
 0x242   : > { %v4165_v59 = vpop.f32.mrf.mxu1 }
 0x243   : > { %v7721_v60 = vadd.f32 %v4165_v59, %v4052_v57  ;;  %v4056_v61 = vpop.f32.mrf.mxu0  ;;  %4733 = vmatmul.mubr.bf16.gmra.mxu0 %v5499_v51 }
 0x244   : > { %v4169_v62 = vpop.f32.mrf.mxu1  ;;  %4846 = vmatmul.mubr.bf16.gmra.mxu1 %v5501_v52  ;;  %4742 = vmatprep.mubr.bf16.mxu0 %v5516_v54 }
 0x245   : > { %v7723_v63 = vadd.f32 %v4169_v62, %v4056_v61  ;;  %4855 = vmatprep.mubr.bf16.mxu1 %v5518_v56  ;;  %v4058_v2 = vpop.f32.mrf.mxu0 }
 0x246   : > { %v4171_v3 = vpop.f32.mrf.mxu1 }
 0x247   : > { %v7729_v8 = vadd.f32 %v4171_v3, %v4058_v2  ;;  %v4060_v9 = vpop.f32.mrf.mxu0 }
 0x248   : > { %v4173_v10 = vpop.f32.mrf.mxu1 }
 0x249   : > { %v7731_v15 = vadd.f32 %v4173_v10, %v4060_v9  ;;  %v4062_v19 = vpop.f32.mrf.mxu0 }
 0x24a   : > { %v4175_v20 = vpop.f32.mrf.mxu1 }
 0x24b   : > { %v7733_v21 = vadd.f32 %v4175_v20, %v4062_v19  ;;  %v4066_v23 = vpop.f32.mrf.mxu0  ;;  %4743 = vmatmul.mubr.bf16.gmra.mxu0 %v5515_v12 }
 0x24c   : > { %v4179_v24 = vpop.f32.mrf.mxu1  ;;  %4856 = vmatmul.mubr.bf16.gmra.mxu1 %v5517_v13  ;;  %4752 = vmatprep.mubr.bf16.mxu0 %v5532_v16 }
 0x24d   : > { %v7735_v26 = vadd.f32 %v4179_v24, %v4066_v23  ;;  %4865 = vmatprep.mubr.bf16.mxu1 %v5534_v17  ;;  %v4068_v27 = vpop.f32.mrf.mxu0 }
 0x24e   : > { %v4181_v29 = vpop.f32.mrf.mxu1 }
 0x24f   : > { %v7737_v31 = vadd.f32 %v4181_v29, %v4068_v27  ;;  %v4070_v32 = vpop.f32.mrf.mxu0 }
 0x250   : > { %v4183_v33 = vpop.f32.mrf.mxu1 }
 0x251   : > { %v7739_v40 = vadd.f32 %v4183_v33, %v4070_v32  ;;  %v4072_v41 = vpop.f32.mrf.mxu0 }
 0x252   : > { %v4185_v42 = vpop.f32.mrf.mxu1 }
 0x253   : > { %v7741_v43 = vadd.f32 %v4185_v42, %v4072_v41  ;;  %v4076_v44 = vpop.f32.mrf.mxu0  ;;  %4753 = vmatmul.mubr.bf16.gmra.mxu0 %v5531_v36 }
 0x254   : > { %v4189_v46 = vpop.f32.mrf.mxu1  ;;  %4866 = vmatmul.mubr.bf16.gmra.mxu1 %v5533_v37 }
 0x255   : > { %v7743_v48 = vadd.f32 %v4189_v46, %v4076_v44  ;;  %v4078_v49 = vpop.f32.mrf.mxu0 }
 0x256   : > { %v4191_v51 = vpop.f32.mrf.mxu1 }
 0x257   : > { %v7745_v52 = vadd.f32 %v4191_v51, %v4078_v49  ;;  %v4080_v54 = vpop.f32.mrf.mxu0 }
 0x258   : > { %v4193_v56 = vpop.f32.mrf.mxu1 }
 0x259   : > { %v7747_v57 = vadd.f32 %v4193_v56, %v4080_v54  ;;  %v4082_v59 = vpop.f32.mrf.mxu0 }
 0x25a   : > { %v4195_v61 = vpop.f32.mrf.mxu1 }
 0x25b   : > { %v7749_v62 = vadd.f32 %v4195_v61, %v4082_v59  ;;  %v4232_v0 = vpop.f32.mrf.mxu0 }
 0x25c   : > { %v4345_v2 = vpop.f32.mrf.mxu1  ;;  %v4233_v3 = vadd.f32 %v4232_v0, %v7663_v18 }
 0x25d   : > { %v4234_v4 = vpop.f32.mrf.mxu0 }
 0x25e   : > { %v4347_v5 = vpop.f32.mrf.mxu1  ;;  %v7752_v7 = vadd.f32 %v4345_v2, %v4233_v3  ;;  %v4235_v9 = vadd.f32 %v4234_v4, %v7669_v25 }
 0x25f   : > { %v4236_v10 = vpop.f32.mrf.mxu0 }
 0x260   : > { %v4349_v12 = vpop.f32.mrf.mxu1  ;;  %v7755_v13 = vadd.f32 %v4347_v5, %v4235_v9  ;;  %v4237_v16 = vadd.f32 %v4236_v10, %v7671_v30 }
 0x261   : > { %v4238_v17 = vpop.f32.mrf.mxu0 }
 0x262   : > { %v4351_v19 = vpop.f32.mrf.mxu1  ;;  %v7758_v20 = vadd.f32 %v4349_v12, %v4237_v16  ;;  %v4239_v23 = vadd.f32 %v4238_v17, %v7673_v35 }
 0x263   : > { %v4242_v24 = vpop.f32.mrf.mxu0 }
 0x264   : > { %v4355_v18 = vpop.f32.mrf.mxu1  ;;  %v7761_v27 = vadd.f32 %v4351_v19, %v4239_v23  ;;  %v4243_v29 = vadd.f32 %v4242_v24, %v7675_v38 }
 0x265   : > { %v4244_v32 = vpop.f32.mrf.mxu0 }
 0x266   : > { %v4357_v25 = vpop.f32.mrf.mxu1  ;;  %v7764_v33 = vadd.f32 %v4355_v18, %v4243_v29  ;;  %v4245_v36 = vadd.f32 %v4244_v32, %v7681_v45 }
 0x267   : > { %v4246_v37 = vpop.f32.mrf.mxu0 }
 0x268   : > { %v4359_v30 = vpop.f32.mrf.mxu1  ;;  %v7767_v41 = vadd.f32 %v4357_v25, %v4245_v36  ;;  %v4247_v42 = vadd.f32 %v4246_v37, %v7683_v50 }
 0x269   : > { %v4248_v44 = vpop.f32.mrf.mxu0 }
 0x26a   : > { %v4361_v35 = vpop.f32.mrf.mxu1  ;;  %v7770_v46 = vadd.f32 %v4359_v30, %v4247_v42  ;;  %v4249_v49 = vadd.f32 %v4248_v44, %v7685_v55 }
 0x26b   : > { %v4252_v51 = vpop.f32.mrf.mxu0 }
 0x26c   : > { %v4365_v38 = vpop.f32.mrf.mxu1  ;;  %v7773_v54 = vadd.f32 %v4361_v35, %v4249_v49  ;;  %v4253_v56 = vadd.f32 %v4252_v51, %v7687_v58 }
 0x26d   : > { %v4254_v59 = vpop.f32.mrf.mxu0 }
 0x26e   : > { %v4367_v45 = vpop.f32.mrf.mxu1  ;;  %v7776_v61 = vadd.f32 %v4365_v38, %v4253_v56  ;;  %v4255_v0 = vadd.f32 %v4254_v59, %v7693_v1 }
 0x26f   : > { %v4256_v2 = vpop.f32.mrf.mxu0 }
 0x270   : > { %v4369_v50 = vpop.f32.mrf.mxu1  ;;  %v7779_v3 = vadd.f32 %v4367_v45, %v4255_v0  ;;  %v4257_v4 = vadd.f32 %v4256_v2, %v7695_v6 }
 0x271   : > { %v4258_v5 = vpop.f32.mrf.mxu0 }
 0x272   : > { %v4371_v55 = vpop.f32.mrf.mxu1  ;;  %v7782_v9 = vadd.f32 %v4369_v50, %v4257_v4  ;;  %v4259_v10 = vadd.f32 %v4258_v5, %v7697_v11 }
 0x273   : > { %v4262_v12 = vpop.f32.mrf.mxu0 }
 0x274   : > { %v4375_v58 = vpop.f32.mrf.mxu1  ;;  %v7785_v16 = vadd.f32 %v4371_v55, %v4259_v10  ;;  %v4263_v17 = vadd.f32 %v4262_v12, %v7699_v14 }
 0x275   : > { %v4264_v19 = vpop.f32.mrf.mxu0 }
 0x276   : > { %v4377_v1 = vpop.f32.mrf.mxu1  ;;  %v7788_v23 = vadd.f32 %v4375_v58, %v4263_v17  ;;  %v4265_v24 = vadd.f32 %v4264_v19, %v7705_v22 }
 0x277   : > { %v4266_v18 = vpop.f32.mrf.mxu0 }
 0x278   : > { %v4379_v6 = vpop.f32.mrf.mxu1  ;;  %v7791_v29 = vadd.f32 %v4377_v1, %v4265_v24  ;;  %v4267_v32 = vadd.f32 %v4266_v18, %v7707_v28 }
 0x279   : > { %v4268_v25 = vpop.f32.mrf.mxu0 }
 0x27a   : > { %v4381_v11 = vpop.f32.mrf.mxu1  ;;  %v7794_v36 = vadd.f32 %v4379_v6, %v4267_v32  ;;  %v4269_v37 = vadd.f32 %v4268_v25, %v7709_v34 }
 0x27b   : > { %v4272_v30 = vpop.f32.mrf.mxu0 }
 0x27c   : > { %v4385_v14 = vpop.f32.mrf.mxu1  ;;  %v7797_v42 = vadd.f32 %v4381_v11, %v4269_v37  ;;  %v4273_v44 = vadd.f32 %v4272_v30, %v7711_v39 }
 0x27d   : > { %v4274_v35 = vpop.f32.mrf.mxu0 }
 0x27e   : > { %v4387_v22 = vpop.f32.mrf.mxu1  ;;  %v7800_v49 = vadd.f32 %v4385_v14, %v4273_v44  ;;  %v4275_v51 = vadd.f32 %v4274_v35, %v7717_v47 }
 0x27f   : > { %v4276_v38 = vpop.f32.mrf.mxu0 }
 0x280   : > { %v4389_v28 = vpop.f32.mrf.mxu1  ;;  %v7803_v56 = vadd.f32 %v4387_v22, %v4275_v51  ;;  %v4277_v59 = vadd.f32 %v4276_v38, %v7719_v53 }
 0x281   : > { %v4278_v45 = vpop.f32.mrf.mxu0 }
 0x282   : > { %v4391_v34 = vpop.f32.mrf.mxu1  ;;  %v7806_v0 = vadd.f32 %v4389_v28, %v4277_v59  ;;  %v4279_v2 = vadd.f32 %v4278_v45, %v7721_v60 }
 0x283   : > { %v4282_v50 = vpop.f32.mrf.mxu0 }
 0x284   : > { %8482 = vst [vmem:[#allocation8_spill] sm:$0xff] %v7806_v0  ;;  %v4395_v39 = vpop.f32.mrf.mxu1  ;;  %v7809_v4 = vadd.f32 %v4391_v34, %v4279_v2  ;;  %v4283_v5 = vadd.f32 %v4282_v50, %v7723_v63 }
 0x285   : > { %v4284_v55 = vpop.f32.mrf.mxu0 }
 0x286   : > { %8483 = vst [vmem:[#allocation9_spill] sm:$0xff] %v7809_v4  ;;  %v4397_v47 = vpop.f32.mrf.mxu1  ;;  %v7812_v10 = vadd.f32 %v4395_v39, %v4283_v5  ;;  %v4285_v12 = vadd.f32 %v4284_v55, %v7729_v8 }
 0x287   : > { %v4286_v58 = vpop.f32.mrf.mxu0 }
 0x288   : > { %8484 = vst [vmem:[#allocation10_spill] sm:$0xff] %v7812_v10  ;;  %v4399_v53 = vpop.f32.mrf.mxu1  ;;  %v7815_v17 = vadd.f32 %v4397_v47, %v4285_v12  ;;  %v4287_v19 = vadd.f32 %v4286_v58, %v7731_v15 }
 0x289   : > { %v4288_v1 = vpop.f32.mrf.mxu0 }
 0x28a   : > { %8485 = vst [vmem:[#allocation11_spill] sm:$0xff] %v7815_v17  ;;  %v4401_v60 = vpop.f32.mrf.mxu1  ;;  %v7818_v24 = vadd.f32 %v4399_v53, %v4287_v19  ;;  %v4289_v18 = vadd.f32 %v4288_v1, %v7733_v21 }
 0x28b   : > { %v4292_v6 = vpop.f32.mrf.mxu0 }
 0x28c   : > { %8486 = vst [vmem:[#allocation12_spill] sm:$0xff] %v7818_v24  ;;  %v4405_v63 = vpop.f32.mrf.mxu1  ;;  %v7821_v32 = vadd.f32 %v4401_v60, %v4289_v18  ;;  %v4293_v25 = vadd.f32 %v4292_v6, %v7735_v26 }
 0x28d   : > { %v4294_v11 = vpop.f32.mrf.mxu0 }
 0x28e   : > { %8487 = vst [vmem:[#allocation13_spill] sm:$0xff] %v7821_v32  ;;  %v4407_v8 = vpop.f32.mrf.mxu1  ;;  %v7824_v37 = vadd.f32 %v4405_v63, %v4293_v25  ;;  %v4295_v30 = vadd.f32 %v4294_v11, %v7737_v31 }
 0x28f   : > { %v4296_v14 = vpop.f32.mrf.mxu0 }
 0x290   : > { %8488 = vst [vmem:[#allocation14_spill] sm:$0xff] %v7824_v37  ;;  %v4409_v15 = vpop.f32.mrf.mxu1  ;;  %v7827_v44 = vadd.f32 %v4407_v8, %v4295_v30  ;;  %v4297_v35 = vadd.f32 %v4296_v14, %v7739_v40 }
 0x291   : > { %v4298_v22 = vpop.f32.mrf.mxu0 }
 0x292   : > { %8489 = vst [vmem:[#allocation15_spill] sm:$0xff] %v7827_v44  ;;  %v4411_v21 = vpop.f32.mrf.mxu1  ;;  %v7830_v51 = vadd.f32 %v4409_v15, %v4297_v35  ;;  %v4299_v38 = vadd.f32 %v4298_v22, %v7741_v43 }
 0x293   : > { %v4302_v28 = vpop.f32.mrf.mxu0 }
 0x294   : > { %8490 = vst [vmem:[#allocation16_spill] sm:$0xff] %v7830_v51  ;;  %v4415_v26 = vpop.f32.mrf.mxu1  ;;  %v7833_v59 = vadd.f32 %v4411_v21, %v4299_v38  ;;  %v4303_v45 = vadd.f32 %v4302_v28, %v7743_v48 }
 0x295   : > { %v4304_v34 = vpop.f32.mrf.mxu0 }
 0x296   : > { %8491 = vst [vmem:[#allocation17_spill] sm:$0xff] %v7833_v59  ;;  %v4417_v31 = vpop.f32.mrf.mxu1  ;;  %v7836_v2 = vadd.f32 %v4415_v26, %v4303_v45  ;;  %v4305_v50 = vadd.f32 %v4304_v34, %v7745_v52 }
 0x297   : > { %v4306_v39 = vpop.f32.mrf.mxu0 }
 0x298   : > { %8492 = vst [vmem:[#allocation18_spill] sm:$0xff] %v7836_v2  ;;  %v4419_v40 = vpop.f32.mrf.mxu1  ;;  %v7839_v5 = vadd.f32 %v4417_v31, %v4305_v50  ;;  %v4307_v55 = vadd.f32 %v4306_v39, %v7747_v57 }
 0x299   : > { %v4308_v47 = vpop.f32.mrf.mxu0 }
 0x29a   : > { %8493 = vst [vmem:[#allocation19_spill] sm:$0xff] %v7839_v5  ;;  %v4421_v43 = vpop.f32.mrf.mxu1  ;;  %v7842_v12 = vadd.f32 %v4419_v40, %v4307_v55  ;;  %v4309_v58 = vadd.f32 %v4308_v47, %v7749_v62 }
 0x29b   : > { %v4458_v53 = vpop.f32.mrf.mxu0 }
 0x29c   : > { %8494 = vst [vmem:[#allocation20_spill] sm:$0xff] %v7842_v12  ;;  %v7845_v48 = vpop.f32.mrf.mxu1  ;;  %v7847_v19 = vadd.f32 %v4421_v43, %v4309_v58 }
 0x29d   : > { %v4460_v1 = vpop.f32.mrf.mxu0 }
 0x29e   : > { %8495 = vst [vmem:[#allocation21_spill] sm:$0xff] %v7847_v19  ;;  %v7849_v60 = vpop.f32.mrf.mxu1 }
 0x29f   : > { %v7851_v52 = vpop.f32.mrf.mxu0 }
 0x2a0   : > { %v7853_v18 = vpop.f32.mrf.mxu1 }
 0x2a1   : > { %v7855_v6 = vpop.f32.mrf.mxu0 }
 0x2a2   : > { %v7857_v57 = vpop.f32.mrf.mxu1 }
 0x2a3   : > { %v7859_v63 = vpop.f32.mrf.mxu0 }
 0x2a4   : > { %v7861_v25 = vpop.f32.mrf.mxu1 }
 0x2a5   : > { %v7863_v62 = vpop.f32.mrf.mxu0 }
 0x2a6   : > { %v7865_v11 = vpop.f32.mrf.mxu1 }
 0x2a7   : > { %v7867_v8 = vpop.f32.mrf.mxu0 }
 0x2a8   : > { %v7869_v30 = vpop.f32.mrf.mxu1 }
 0x2a9   : > { %v7871_v14 = vpop.f32.mrf.mxu0 }
 0x2aa   : > { %v7873_v15 = vpop.f32.mrf.mxu1 }
 0x2ab   : > { %v7875_v35 = vpop.f32.mrf.mxu0 }
 0x2ac   : > { %v7877_v22 = vpop.f32.mrf.mxu1 }
 0x2ad   : > { %v7879_v21 = vpop.f32.mrf.mxu0 }
 0x2ae   : > { %v7881_v38 = vpop.f32.mrf.mxu1 }
 0x2af   : > { %v7883_v28 = vpop.f32.mrf.mxu0 }
 0x2b0   : > { %v7885_v26 = vpop.f32.mrf.mxu1 }
 0x2b1   : > { %v7887_v45 = vpop.f32.mrf.mxu0 }
 0x2b2   : > { %v7889_v34 = vpop.f32.mrf.mxu1 }
 0x2b3   : > { %v7891_v31 = vpop.f32.mrf.mxu0 }
 0x2b4   : > { %v7893_v50 = vpop.f32.mrf.mxu1 }
 0x2b5   : > { %v7895_v39 = vpop.f32.mrf.mxu0 }
 0x2b6   : > { %v7897_v40 = vpop.f32.mrf.mxu1 }
 0x2b7   : > { %v7899_v55 = vpop.f32.mrf.mxu0 }
 0x2b8   : > { %v7901_v47 = vpop.f32.mrf.mxu1 }
 0x2b9   : > { %v7903_v43 = vpop.f32.mrf.mxu0 }
 0x2ba   : > { %v7905_v58 = vpop.f32.mrf.mxu1 }
 0x2bb   : > { %v7907_v19 = vpop.f32.mrf.mxu0 }
 0x2bc   : > { %v7909_v12 = vpop.f32.mrf.mxu1 }
 0x2bd   : > { %8496 = vst [vmem:[#allocation22_spill] sm:$0xff] %v7909_v12  ;;  %v7911_v5 = vpop.f32.mrf.mxu0 }
 0x2be   : > { %v7913_v2 = vpop.f32.mrf.mxu1 }
 0x2bf   : > { %8497 = vst [vmem:[#allocation23_spill] sm:$0xff] %v7913_v2  ;;  %v7915_v59 = vpop.f32.mrf.mxu0 }
 0x2c0   : > { %8498 = vst [vmem:[#allocation24_spill] sm:$0xff] %v7915_v59  ;;  %v7917_v51 = vpop.f32.mrf.mxu1 }
 0x2c1   : > { %8499 = vst [vmem:[#allocation25_spill] sm:$0xff] %v7917_v51  ;;  %v7919_v44 = vpop.f32.mrf.mxu0 }
 0x2c2   : > { %8500 = vst [vmem:[#allocation26_spill] sm:$0xff] %v7919_v44  ;;  %v7921_v37 = vpop.f32.mrf.mxu1 }
 0x2c3   : > { %8501 = vst [vmem:[#allocation27_spill] sm:$0xff] %v7921_v37  ;;  %v7923_v32 = vpop.f32.mrf.mxu0 }
 0x2c4   : > { %8502 = vst [vmem:[#allocation28_spill] sm:$0xff] %v7923_v32  ;;  %v7925_v24 = vpop.f32.mrf.mxu1 }
 0x2c5   : > { %8503 = vst [vmem:[#allocation29_spill] sm:$0xff] %v7925_v24  ;;  %v7927_v17 = vpop.f32.mrf.mxu0 }
 0x2c6   : > { %8504 = vst [vmem:[#allocation30_spill] sm:$0xff] %v7927_v17  ;;  %v7929_v10 = vpop.f32.mrf.mxu1 }
 0x2c7   : > { %8505 = vst [vmem:[#allocation31_spill] sm:$0xff] %v7929_v10  ;;  %v7931_v4 = vpop.f32.mrf.mxu0 }
 0x2c8   : > { %8506 = vst [vmem:[#allocation32_spill] sm:$0xff] %v7931_v4  ;;  %v7933_v0 = vpop.f32.mrf.mxu1 }
 0x2c9   : > { %8507 = vst [vmem:[#allocation33_spill] sm:$0xff] %v7933_v0  ;;  %v7935_v2 = vpop.f32.mrf.mxu0 }
 0x2ca   : > { %8508 = vst [vmem:[#allocation34_spill] sm:$0xff] %v7935_v2  ;;  %v7937_v59 = vpop.f32.mrf.mxu1 }
 0x2cb   : > { %8509 = vst [vmem:[#allocation35_spill] sm:$0xff] %v7937_v59  ;;  %v7939_v51 = vpop.f32.mrf.mxu0 }
 0x2cc   : > { %8510 = vst [vmem:[#allocation36_spill] sm:$0xff] %v7939_v51  ;;  %v7941_v44 = vpop.f32.mrf.mxu1 }
 0x2cd   : > { %8511 = vst [vmem:[#allocation37_spill] sm:$0xff] %v7941_v44  ;;  %v7943_v37 = vpop.f32.mrf.mxu0  ;;  %v4459_v44 = vadd.f32 %v4458_v53, %v7752_v7  ;;  %v4465_v7 = vadd.f32 %v7855_v6, %v7761_v27  ;;  %v1638_v6 = vld [vmem:[#allocation2 + $0xd8] sm:$0xff] }
 0x2ce   : > { %8512 = vst [vmem:[#allocation38_spill] sm:$0xff] %v7943_v37  ;;  %v7945_v32 = vpop.f32.mrf.mxu1 }
 0x2cf   : > { %8513 = vst [vmem:[#allocation39_spill] sm:$0xff] %v7945_v32  ;;  %v7947_v24 = vpop.f32.mrf.mxu0 }
 0x2d0   : > { %8514 = vst [vmem:[#allocation40_spill] sm:$0xff] %v7947_v24  ;;  %v7949_v17 = vpop.f32.mrf.mxu1 }
 0x2d1   : > { %8515 = vst [vmem:[#allocation41_spill] sm:$0xff] %v7949_v17  ;;  %v7951_v10 = vpop.f32.mrf.mxu0  ;;  %v4461_v17 = vadd.f32 %v4460_v1, %v7755_v13  ;;  %v4469_v13 = vadd.f32 %v7859_v63, %v7764_v33  ;;  %v1636_v1 = vld [vmem:[#allocation2 + $0xb0] sm:$0xff] }
 0x2d2   : > { %8516 = vst [vmem:[#allocation42_spill] sm:$0xff] %v7951_v10  ;;  %v7953_v4 = vpop.f32.mrf.mxu1 }
 0x2d3   : > { %8517 = vst [vmem:[#allocation43_spill] sm:$0xff] %v7953_v4  ;;  %v7955_v0 = vpop.f32.mrf.mxu0  ;;  %v4572_v4 = vadd.f32 %v7845_v48, %v4459_v44  ;;  %v4582_v33 = vadd.f32 %v7861_v25, %v4469_v13 }
 0x2d4   : > { %8518 = vst [vmem:[#allocation44_spill] sm:$0xff] %v7955_v0  ;;  %v7957_v2 = vpop.f32.mrf.mxu1 }
 0x2d5   : > { %8519 = vst [vmem:[#allocation45_spill] sm:$0xff] %v7957_v2  ;;  %v7959_v59 = vpop.f32.mrf.mxu0  ;;  %v4463_v2 = vadd.f32 %v7851_v52, %v7758_v20  ;;  %v4471_v20 = vadd.f32 %v7863_v62, %v7767_v41  ;;  %v1637_v52 = vld [vmem:[#allocation2] sm:$0xff] }
 0x2d6   : > { %8520 = vst [vmem:[#allocation46_spill] sm:$0xff] %v7959_v59  ;;  %v7961_v51 = vpop.f32.mrf.mxu1 }
 0x2d7   : > { %8521 = vst [vmem:[#allocation47_spill] sm:$0xff] %v7961_v51  ;;  %v7964_v37 = vpop.f32.mrf.mxu0  ;;  %v4574_v51 = vadd.f32 %v7849_v60, %v4461_v17  ;;  %v4578_v60 = vadd.f32 %v7857_v57, %v4465_v7  ;;  %v4479_v7 = vadd.f32 %v7875_v35, %v7776_v61 }
 0x2d8   : > { %8522 = vst [vmem:[#allocation48_spill] sm:$0xff] %v7964_v37  ;;  %v7966_v32 = vpop.f32.mrf.mxu1 }
 0x2d9   : > { %8523 = vst [vmem:[#allocation49_spill] sm:$0xff] %v7966_v32  ;;  %v7969_v24 = vpop.f32.mrf.mxu0 }
 0x2da   : > { %8524 = vst [vmem:[#allocation50_spill] sm:$0xff] %v7969_v24  ;;  %v7971_v10 = vpop.f32.mrf.mxu1 }
 0x2db   : > { %8525 = vst [vmem:[#allocation51_spill] sm:$0xff] %v7971_v10  ;;  %v4684_v59 = vpop.f32.mrf.mxu0  ;;  %v4576_v10 = vadd.f32 %v7853_v18, %v4463_v2  ;;  %v4584_v2 = vadd.f32 %v7865_v11, %v4471_v20  ;;  %v1639_v18 = vld [vmem:[#allocation2 + $0x18] sm:$0xff] }
 0x2dc   : > { %v4797_v0 = vpop.f32.mrf.mxu1  ;;  %v4685_v53 = vadd.f32 %v4684_v59, %v4572_v4 }
 0x2dd   : > { %v4686_v32 = vpop.f32.mrf.mxu0 }
 0x2de   : > { %v4799_v24 = vpop.f32.mrf.mxu1  ;;  %v4798_v44 = vadd.f32 %v4797_v0, %v4685_v53  ;;  %v4687_v48 = vadd.f32 %v4686_v32, %v4574_v51  ;;  %v4473_v0 = vadd.f32 %v7867_v8, %v7770_v46  ;;  %v1640_v46 = vld [vmem:[#allocation2 + $0x50] sm:$0xff] }
 0x2df   : > { %v4688_v37 = vpop.f32.mrf.mxu0 }
 0x2e0   : > { %v4801_v17 = vpop.f32.mrf.mxu1  ;;  %v4876_v27 = vadd.f32 %v4798_v44, %v1636_v1  ;;  %v4800_v4 = vadd.f32 %v4799_v24, %v4687_v48  ;;  %v4689_v59 = vadd.f32 %v4688_v37, %v4576_v10  ;;  %v4475_v10 = vadd.f32 %v7871_v14, %v7773_v54  ;;  %v1641_v54 = vld [vmem:[#allocation2 + $0x68] sm:$0xff] }
 0x2e1   : > { %v4690_v63 = vpop.f32.mrf.mxu0  ;;  %v4586_v13 = vadd.f32 %v7869_v30, %v4473_v0  ;;  %v4481_v48 = vadd.f32 %v7879_v21, %v7779_v3  ;;  %v4485_v0 = vadd.f32 %v7887_v45, %v7785_v16  ;;  %v1645_v16 = vld [vmem:[#allocation2 + $0x88] sm:$0xff] }
 0x2e2   : > { %v4803_v12 = vpop.f32.mrf.mxu1  ;;  %4908 = vst [vmem:[#allocation2 + $0xb0] sm:$0xff] %v4876_v27  ;;  %v4877_v32 = vadd.f32 %v4800_v4, %v1637_v52  ;;  %v4802_v51 = vadd.f32 %v4801_v17, %v4689_v59  ;;  %v4691_v41 = vadd.f32 %v4690_v63, %v4578_v60  ;;  %v4592_v17 = vadd.f32 %v7877_v22, %v4479_v7  ;;  %v1642_v60 = vld [vmem:[#allocation2 + $0x30] sm:$0xff] }
 0x2e3   : > { %v4694_v62 = vpop.f32.mrf.mxu0  ;;  %v4483_v4 = vadd.f32 %v7883_v28, %v7782_v9  ;;  %v1644_v9 = vld [vmem:[#allocation2 + $0x80] sm:$0xff] }
 0x2e4   : > { %v4807_v57 = vpop.f32.mrf.mxu1  ;;  %4909 = vst [vmem:[#allocation2] sm:$0xff] %v4877_v32  ;;  %v4878_v24 = vadd.f32 %v4802_v51, %v1638_v6  ;;  %v4804_v37 = vadd.f32 %v4803_v12, %v4691_v41  ;;  %v4695_v25 = vadd.f32 %v4694_v62, %v4582_v33  ;;  %v4588_v12 = vadd.f32 %v7873_v15, %v4475_v10  ;;  %v1643_v6 = vld [vmem:[#allocation2 + $0x48] sm:$0xff] }
 0x2e5   : > { %v4696_v8 = vpop.f32.mrf.mxu0  ;;  %v4594_v33 = vadd.f32 %v7881_v38, %v4481_v48  ;;  %v4489_v41 = vadd.f32 %v7891_v31, %v7788_v23  ;;  %v4491_v10 = vadd.f32 %v7895_v39, %v7791_v29  ;;  %v4495_v48 = vadd.f32 %v7903_v43, %v7797_v42  ;;  %v1649_v42 = vld [vmem:[#allocation2 + $0xf0] sm:$0xff] }
 0x2e6   : > { %v4809_v53 = vpop.f32.mrf.mxu1  ;;  %4910 = vst [vmem:[#allocation2 + $0xd8] sm:$0xff] %v4878_v24  ;;  %v4879_v11 = vadd.f32 %v4804_v37, %v1639_v18  ;;  %v4808_v1 = vadd.f32 %v4807_v57, %v4695_v25  ;;  %v4697_v44 = vadd.f32 %v4696_v8, %v4584_v2  ;;  %v4596_v18 = vadd.f32 %v7885_v26, %v4483_v4  ;;  %v8526_v4 = vld [vmem:[#allocation22_spill] sm:$0xff] }
 0x2e7   : > { %v4698_v14 = vpop.f32.mrf.mxu0  ;;  %v4598_v37 = vadd.f32 %v7889_v34, %v4485_v0  ;;  %v4602_v7 = vadd.f32 %v7893_v50, %v4489_v41  ;;  %v8529_v0 = vld [vmem:[#allocation23_spill] sm:$0xff]  ;;  %v8530_v41 = vld [vmem:[#allocation9_spill] sm:$0xff] }
 0x2e8   : > { %v4811_v20 = vpop.f32.mrf.mxu1  ;;  %4911 = vst [vmem:[#allocation2 + $0x18] sm:$0xff] %v4879_v11  ;;  %v4880_v52 = vadd.f32 %v4808_v1, %v1640_v46  ;;  %v4810_v61 = vadd.f32 %v4809_v53, %v4697_v44  ;;  %v4699_v35 = vadd.f32 %v4698_v14, %v4586_v13  ;;  %v1646_v46 = vld [vmem:[#allocation2 + $0xe8] sm:$0xff]  ;;  %v4493_v53 = vadd.f32 %v7899_v55, %v7794_v36  ;;  %v1647_v1 = vld [vmem:[#allocation2 + $0xb8] sm:$0xff]  ;;  %v1648_v36 = vld [vmem:[#allocation2 + $0x60] sm:$0xff] }
 0x2e9   : > { %v4700_v30 = vpop.f32.mrf.mxu0  ;;  %v4604_v11 = vadd.f32 %v7897_v40, %v4491_v10 }
 0x2ea   : > { %v4813_v27 = vpop.f32.mrf.mxu1  ;;  %4912 = vst [vmem:[#allocation2 + $0x50] sm:$0xff] %v4880_v52  ;;  %v4881_v59 = vadd.f32 %v4810_v61, %v1641_v54  ;;  %v4812_v3 = vadd.f32 %v4811_v20, %v4699_v35  ;;  %v4701_v21 = vadd.f32 %v4700_v30, %v4588_v12  ;;  %v4499_v20 = vadd.f32 %v7907_v19, %v7800_v49 }
 0x2eb   : > { %v4704_v15 = vpop.f32.mrf.mxu0  ;;  %v4606_v52 = vadd.f32 %v7901_v47, %v4493_v53  ;;  %v4608_v30 = vadd.f32 %v7905_v58, %v4495_v48  ;;  %v1653_v53 = vld [vmem:[#allocation2 + $0x58] sm:$0xff]  ;;  %v8538_v48 = vld [vmem:[#allocation29_spill] sm:$0xff] }
 0x2ec   : > { %v4817_v63 = vpop.f32.mrf.mxu1  ;;  %4913 = vst [vmem:[#allocation2 + $0x68] sm:$0xff] %v4881_v59  ;;  %v4882_v22 = vadd.f32 %v4812_v3, %v1642_v60  ;;  %v4814_v32 = vadd.f32 %v4813_v27, %v4701_v21  ;;  %v4705_v51 = vadd.f32 %v4704_v15, %v4592_v17  ;;  %v4501_v17 = vadd.f32 %v7911_v5, %v7803_v56  ;;  %v1650_v3 = vld [vmem:[#allocation2 + $0x8] sm:$0xff] }
 0x2ed   : > { %v4706_v28 = vpop.f32.mrf.mxu0  ;;  %v4612_v59 = vadd.f32 %v8526_v4, %v4499_v20 }
 0x2ee   : > { %v4819_v2 = vpop.f32.mrf.mxu1  ;;  %4914 = vst [vmem:[#allocation2 + $0x30] sm:$0xff] %v4882_v22  ;;  %v4883_v38 = vadd.f32 %v4814_v32, %v1643_v6  ;;  %v4818_v62 = vadd.f32 %v4817_v63, %v4705_v51  ;;  %v4707_v57 = vadd.f32 %v4706_v28, %v4594_v33  ;;  %v8527_v33 = vld [vmem:[#allocation8_spill] sm:$0xff]  ;;  %v4614_v22 = vadd.f32 %v8529_v0, %v4501_v17  ;;  %v1651_v32 = vld [vmem:[#allocation2 + $0x78] sm:$0xff] }
 0x2ef   : > { %v4708_v45 = vpop.f32.mrf.mxu0  ;;  %v8528_v6 = vld [vmem:[#allocation24_spill] sm:$0xff] }
 0x2f0   : > { %v4821_v24 = vpop.f32.mrf.mxu1  ;;  %4915 = vst [vmem:[#allocation2 + $0x48] sm:$0xff] %v4883_v38  ;;  %v4884_v25 = vadd.f32 %v4818_v62, %v1644_v9  ;;  %v4820_v23 = vadd.f32 %v4819_v2, %v4707_v57  ;;  %v4709_v31 = vadd.f32 %v4708_v45, %v4596_v18  ;;  %v4503_v15 = vadd.f32 %v8528_v6, %v8527_v33  ;;  %v8531_v9 = vld [vmem:[#allocation26_spill] sm:$0xff]  ;;  %v8533_v57 = vld [vmem:[#allocation28_spill] sm:$0xff] }
 0x2f1   : > { %v4710_v26 = vpop.f32.mrf.mxu0  ;;  %v4505_v28 = vadd.f32 %v8531_v9, %v8530_v41  ;;  %v8532_v62 = vld [vmem:[#allocation10_spill] sm:$0xff]  ;;  %v1656_v33 = vld [vmem:[#allocation2 + $0xe0] sm:$0xff] }
 0x2f2   : > { %v4823_v8 = vpop.f32.mrf.mxu1  ;;  %4916 = vst [vmem:[#allocation2 + $0x80] sm:$0xff] %v4884_v25  ;;  %v4885_v13 = vadd.f32 %v4820_v23, %v1645_v16  ;;  %v4822_v29 = vadd.f32 %v4821_v24, %v4709_v31  ;;  %v4711_v39 = vadd.f32 %v4710_v26, %v4598_v37  ;;  %v4509_v10 = vadd.f32 %v8533_v57, %v8532_v62  ;;  %v1652_v16 = vld [vmem:[#allocation2 + $0x38] sm:$0xff]  ;;  %v8534_v37 = vld [vmem:[#allocation25_spill] sm:$0xff] }
 0x2f3   : > { %v4714_v34 = vpop.f32.mrf.mxu0  ;;  %v4616_v25 = vadd.f32 %v8534_v37, %v4503_v15  ;;  %v8536_v26 = vld [vmem:[#allocation30_spill] sm:$0xff] }
 0x2f4   : > { %v4827_v44 = vpop.f32.mrf.mxu1  ;;  %4917 = vst [vmem:[#allocation2 + $0x88] sm:$0xff] %v4885_v13  ;;  %v4886_v50 = vadd.f32 %v4822_v29, %v1646_v46  ;;  %v4824_v54 = vadd.f32 %v4823_v8, %v4711_v39  ;;  %v4715_v14 = vadd.f32 %v4714_v34, %v4602_v7  ;;  %v8535_v46 = vld [vmem:[#allocation11_spill] sm:$0xff]  ;;  %v1657_v41 = vld [vmem:[#allocation2 + $0x90] sm:$0xff] }
 0x2f5   : > { %v4716_v55 = vpop.f32.mrf.mxu0  ;;  %v4511_v8 = vadd.f32 %v8536_v26, %v8535_v46  ;;  %v8537_v39 = vld [vmem:[#allocation27_spill] sm:$0xff] }
 0x2f6   : > { %v4829_v12 = vpop.f32.mrf.mxu1  ;;  %4918 = vst [vmem:[#allocation2 + $0xe8] sm:$0xff] %v4886_v50  ;;  %v4887_v40 = vadd.f32 %v4824_v54, %v1647_v1  ;;  %v4828_v61 = vadd.f32 %v4827_v44, %v4715_v14  ;;  %v4717_v35 = vadd.f32 %v4716_v55, %v4604_v11  ;;  %v4618_v11 = vadd.f32 %v8537_v39, %v4505_v28  ;;  %v1654_v54 = vld [vmem:[#allocation2 + $0x40] sm:$0xff] }
 0x2f7   : > { %v4718_v43 = vpop.f32.mrf.mxu0  ;;  %v4622_v50 = vadd.f32 %v8538_v48, %v4509_v10  ;;  %v8540_v55 = vld [vmem:[#allocation32_spill] sm:$0xff]  ;;  %v8550_v10 = vld [vmem:[#allocation37_spill] sm:$0xff] }
 0x2f8   : > { %v4831_v60 = vpop.f32.mrf.mxu1  ;;  %4919 = vst [vmem:[#allocation2 + $0xb8] sm:$0xff] %v4887_v40  ;;  %v4888_v27 = vadd.f32 %v4828_v61, %v1648_v36  ;;  %v4830_v49 = vadd.f32 %v4829_v12, %v4717_v35  ;;  %v4719_v19 = vadd.f32 %v4718_v43, %v4606_v52  ;;  %v8539_v36 = vld [vmem:[#allocation12_spill] sm:$0xff]  ;;  %v8541_v35 = vld [vmem:[#allocation31_spill] sm:$0xff] }
 0x2f9   : > { %v4720_v47 = vpop.f32.mrf.mxu0  ;;  %v4513_v12 = vadd.f32 %v8540_v55, %v8539_v36  ;;  %v4624_v17 = vadd.f32 %v8541_v35, %v4511_v8  ;;  %v8553_v8 = vld [vmem:[#allocation39_spill] sm:$0xff]  ;;  %v1660_v36 = vld [vmem:[#allocation2 + $0xa8] sm:$0xff] }
 0x2fa   : > { %v4833_v21 = vpop.f32.mrf.mxu1  ;;  %4920 = vst [vmem:[#allocation2 + $0x60] sm:$0xff] %v4888_v27  ;;  %v4889_v63 = vadd.f32 %v4830_v49, %v1649_v42  ;;  %v4832_v56 = vadd.f32 %v4831_v60, %v4719_v19  ;;  %v4721_v5 = vadd.f32 %v4720_v47, %v4608_v30  ;;  %v1655_v42 = vld [vmem:[#allocation2 + $0xc8] sm:$0xff]  ;;  %v8543_v27 = vld [vmem:[#allocation34_spill] sm:$0xff] }
 0x2fb   : > { %v4724_v58 = vpop.f32.mrf.mxu0  ;;  %v8542_v30 = vld [vmem:[#allocation13_spill] sm:$0xff]  ;;  %v8545_v47 = vld [vmem:[#allocation36_spill] sm:$0xff] }
 0x2fc   : > { %v4837_v51 = vpop.f32.mrf.mxu1  ;;  %4921 = vst [vmem:[#allocation2 + $0xf0] sm:$0xff] %v4889_v63  ;;  %v4890_v2 = vadd.f32 %v4832_v56, %v1650_v3  ;;  %v4834_v18 = vadd.f32 %v4833_v21, %v4721_v5  ;;  %v4725_v38 = vadd.f32 %v4724_v58, %v4612_v59  ;;  %v4515_v49 = vadd.f32 %v8543_v27, %v8542_v30  ;;  %v8544_v3 = vld [vmem:[#allocation14_spill] sm:$0xff]  ;;  %v8546_v63 = vld [vmem:[#allocation33_spill] sm:$0xff] }
 0x2fd   : > { %v4726_v45 = vpop.f32.mrf.mxu0  ;;  %v4519_v21 = vadd.f32 %v8545_v47, %v8544_v3  ;;  %v4626_v56 = vadd.f32 %v8546_v63, %v4513_v12  ;;  %v8548_v58 = vld [vmem:[#allocation38_spill] sm:$0xff] }
 0x2fe   : > { %v4839_v24 = vpop.f32.mrf.mxu1  ;;  %4922 = vst [vmem:[#allocation2 + $0x8] sm:$0xff] %v4890_v2  ;;  %v4891_v23 = vadd.f32 %v4834_v18, %v1651_v32  ;;  %v4838_v31 = vadd.f32 %v4837_v51, %v4725_v38  ;;  %v4727_v7 = vadd.f32 %v4726_v45, %v4614_v22  ;;  %v8547_v32 = vld [vmem:[#allocation15_spill] sm:$0xff]  ;;  %v1658_v45 = vld [vmem:[#allocation2 + $0x70] sm:$0xff] }
 0x2ff   : > { %v4728_v13 = vpop.f32.mrf.mxu0  ;;  %v4521_v51 = vadd.f32 %v8548_v58, %v8547_v32  ;;  %v8549_v2 = vld [vmem:[#allocation35_spill] sm:$0xff]  ;;  %v1661_v30 = vld [vmem:[#allocation2 + $0xd0] sm:$0xff] }
 0x300   : > { %v4841_v29 = vpop.f32.mrf.mxu1  ;;  %4923 = vst [vmem:[#allocation2 + $0x78] sm:$0xff] %v4891_v23  ;;  %v4892_v1 = vadd.f32 %v4838_v31, %v1652_v16  ;;  %v4840_v34 = vadd.f32 %v4839_v24, %v4727_v7  ;;  %v4729_v44 = vadd.f32 %v4728_v13, %v4616_v25  ;;  %v4628_v18 = vadd.f32 %v8549_v2, %v4515_v49  ;;  %v8551_v25 = vld [vmem:[#allocation16_spill] sm:$0xff] }
 0x301   : > { %v4730_v14 = vpop.f32.mrf.mxu0  ;;  %v4632_v16 = vadd.f32 %v8550_v10, %v4519_v21  ;;  %v8552_v23 = vld [vmem:[#allocation40_spill] sm:$0xff]  ;;  %v8562_v21 = vld [vmem:[#allocation45_spill] sm:$0xff] }
 0x302   : > { %v4843_v20 = vpop.f32.mrf.mxu1  ;;  %4924 = vst [vmem:[#allocation2 + $0x38] sm:$0xff] %v4892_v1  ;;  %v4893_v52 = vadd.f32 %v4840_v34, %v1653_v53  ;;  %v4842_v40 = vadd.f32 %v4841_v29, %v4729_v44  ;;  %v4731_v61 = vadd.f32 %v4730_v14, %v4618_v11  ;;  %v4523_v31 = vadd.f32 %v8552_v23, %v8551_v25  ;;  %v1659_v13 = vld [vmem:[#allocation2 + $0xc0] sm:$0xff]  ;;  %v8554_v11 = vld [vmem:[#allocation17_spill] sm:$0xff]  ;;  %v8555_v1 = vld [vmem:[#allocation42_spill] sm:$0xff] }
 0x303   : > { %v4734_v43 = vpop.f32.mrf.mxu0  ;;  %v4634_v53 = vadd.f32 %v8553_v8, %v4521_v51  ;;  %v4525_v34 = vadd.f32 %v8555_v1, %v8554_v11  ;;  %v8557_v14 = vld [vmem:[#allocation44_spill] sm:$0xff]  ;;  %v8565_v51 = vld [vmem:[#allocation47_spill] sm:$0xff]  ;;  %v8568_v25 = vld [vmem:[#allocation49_spill] sm:$0xff] }
 0x304   : > { %v4847_v60 = vpop.f32.mrf.mxu1  ;;  %4925 = vst [vmem:[#allocation2 + $0x58] sm:$0xff] %v4893_v52  ;;  %v4894_v19 = vadd.f32 %v4842_v40, %v1654_v54  ;;  %v4844_v4 = vadd.f32 %v4843_v20, %v4731_v61  ;;  %v4735_v59 = vadd.f32 %v4734_v43, %v4622_v50  ;;  %v8556_v54 = vld [vmem:[#allocation18_spill] sm:$0xff]  ;;  %v8558_v52 = vld [vmem:[#allocation41_spill] sm:$0xff] }
 0x305   : > { %v4736_v6 = vpop.f32.mrf.mxu0  ;;  %v4529_v20 = vadd.f32 %v8557_v14, %v8556_v54  ;;  %v4636_v40 = vadd.f32 %v8558_v52, %v4523_v31  ;;  %v8560_v43 = vld [vmem:[#allocation46_spill] sm:$0xff] }
 0x306   : > { %v4849_v15 = vpop.f32.mrf.mxu1  ;;  %4926 = vst [vmem:[#allocation2 + $0x40] sm:$0xff] %v4894_v19  ;;  %v4895_v5 = vadd.f32 %v4844_v4, %v1655_v42  ;;  %v4848_v0 = vadd.f32 %v4847_v60, %v4735_v59  ;;  %v4737_v22 = vadd.f32 %v4736_v6, %v4624_v17  ;;  %v8559_v42 = vld [vmem:[#allocation19_spill] sm:$0xff]  ;;  %v1662_v6 = vld [vmem:[#allocation2 + $0x10] sm:$0xff] }
 0x307   : > { %v4738_v9 = vpop.f32.mrf.mxu0  ;;  %v4531_v60 = vadd.f32 %v8560_v43, %v8559_v42  ;;  %v8561_v19 = vld [vmem:[#allocation43_spill] sm:$0xff] }
 0x308   : > { %v4851_v28 = vpop.f32.mrf.mxu1  ;;  %4927 = vst [vmem:[#allocation2 + $0xc8] sm:$0xff] %v4895_v5  ;;  %v4896_v38 = vadd.f32 %v4848_v0, %v1656_v33  ;;  %v4850_v62 = vadd.f32 %v4849_v15, %v4737_v22  ;;  %v4739_v57 = vadd.f32 %v4738_v9, %v4626_v56  ;;  %v4638_v4 = vadd.f32 %v8561_v19, %v4525_v34  ;;  %v8563_v56 = vld [vmem:[#allocation20_spill] sm:$0xff]  ;;  %v1667_v14 = vld [vmem:[#allocation2 + $0x98] sm:$0xff] }
 0x309   : > { %v4740_v24 = vpop.f32.mrf.mxu0  ;;  %v4642_v33 = vadd.f32 %v8562_v21, %v4529_v20  ;;  %v8564_v5 = vld [vmem:[#allocation48_spill] sm:$0xff] }
 0x30a   : > { %v4853_v37 = vpop.f32.mrf.mxu1  ;;  %4928 = vst [vmem:[#allocation2 + $0xe0] sm:$0xff] %v4896_v38  ;;  %v4897_v7 = vadd.f32 %v4850_v62, %v1657_v41  ;;  %v4852_v46 = vadd.f32 %v4851_v28, %v4739_v57  ;;  %v4741_v26 = vadd.f32 %v4740_v24, %v4628_v18  ;;  %v4533_v0 = vadd.f32 %v8564_v5, %v8563_v56  ;;  %v1663_v9 = vld [vmem:[#allocation2 + $0x28] sm:$0xff]  ;;  %v8567_v38 = vld [vmem:[#allocation50_spill] sm:$0xff]  ;;  %v1666_v34 = vld [vmem:[#allocation2 + $0x20] sm:$0xff] }
 0x30b   : > { %v4744_v29 = vpop.f32.mrf.mxu0  ;;  %v4644_v41 = vadd.f32 %v8565_v51, %v4531_v60  ;;  %v8566_v18 = vld [vmem:[#allocation21_spill] sm:$0xff] }
 0x30c   : > { %v4857_v39 = vpop.f32.mrf.mxu1  ;;  %4929 = vst [vmem:[#allocation2 + $0x90] sm:$0xff] %v4897_v7  ;;  %v4898_v44 = vadd.f32 %v4852_v46, %v1658_v45  ;;  %v4854_v48 = vadd.f32 %v4853_v37, %v4741_v26  ;;  %v4745_v50 = vadd.f32 %v4744_v29, %v4632_v16  ;;  %v4535_v62 = vadd.f32 %v8567_v38, %v8566_v18  ;;  %v1664_v45 = vld [vmem:[#allocation2 + $0xa0] sm:$0xff]  ;;  %v1665_v26 = vld [vmem:[#allocation2 + $0xf8] sm:$0xff] }
 0x30d   : > { %v4746_v55 = vpop.f32.mrf.mxu0  ;;  %v4646_v23 = vadd.f32 %v8568_v25, %v4533_v0 }
 0x30e   : > { %v4859_v12 = vpop.f32.mrf.mxu1  ;;  %4930 = vst [vmem:[#allocation2 + $0x70] sm:$0xff] %v4898_v44  ;;  %v4899_v61 = vadd.f32 %v4854_v48, %v1659_v13  ;;  %v4858_v35 = vadd.f32 %v4857_v39, %v4745_v50  ;;  %v4747_v17 = vadd.f32 %v4746_v55, %v4634_v53  ;;  %v8569_v13 = vld [vmem:[#allocation51_spill] sm:$0xff] }
 0x30f   : > { %v4748_v27 = vpop.f32.mrf.mxu0  ;;  %v4648_v29 = vadd.f32 %v8569_v13, %v4535_v62 }
 0x310   : > { %v4861_v49 = vpop.f32.mrf.mxu1  ;;  %4931 = vst [vmem:[#allocation2 + $0xc0] sm:$0xff] %v4899_v61  ;;  %v4900_v59 = vadd.f32 %v4858_v35, %v1660_v36  ;;  %v4860_v3 = vadd.f32 %v4859_v12, %v4747_v17  ;;  %v4749_v47 = vadd.f32 %v4748_v27, %v4636_v40 }
 0x311   : > { %v4750_v15 = vpop.f32.mrf.mxu0 }
 0x312   : > { %v4863_v63 = vpop.f32.mrf.mxu1  ;;  %4932 = vst [vmem:[#allocation2 + $0xa8] sm:$0xff] %v4900_v59  ;;  %v4901_v22 = vadd.f32 %v4860_v3, %v1661_v30  ;;  %v4862_v32 = vadd.f32 %v4861_v49, %v4749_v47  ;;  %v4751_v58 = vadd.f32 %v4750_v15, %v4638_v4 }
 0x313   : > { %v4754_v28 = vpop.f32.mrf.mxu0 }
 0x314   : > { %v4867_v2 = vpop.f32.mrf.mxu1  ;;  %4933 = vst [vmem:[#allocation2 + $0xd0] sm:$0xff] %v4901_v22  ;;  %v4902_v57 = vadd.f32 %v4862_v32, %v1662_v6  ;;  %v4864_v10 = vadd.f32 %v4863_v63, %v4751_v58  ;;  %v4755_v16 = vadd.f32 %v4754_v28, %v4642_v33 }
 0x315   : > { %v4756_v24 = vpop.f32.mrf.mxu0 }
 0x316   : > { %v4869_v37 = vpop.f32.mrf.mxu1  ;;  %4934 = vst [vmem:[#allocation2 + $0x10] sm:$0xff] %v4902_v57  ;;  %v4903_v31 = vadd.f32 %v4864_v10, %v1663_v9  ;;  %v4868_v7 = vadd.f32 %v4867_v2, %v4755_v16  ;;  %v4757_v46 = vadd.f32 %v4756_v24, %v4644_v41 }
 0x317   : > { %v4758_v8 = vpop.f32.mrf.mxu0 }
 0x318   : > { %v4871_v53 = vpop.f32.mrf.mxu1  ;;  %4935 = vst [vmem:[#allocation2 + $0x28] sm:$0xff] %v4903_v31  ;;  %v4904_v39 = vadd.f32 %v4868_v7, %v1664_v45  ;;  %v4870_v11 = vadd.f32 %v4869_v37, %v4757_v46  ;;  %v4759_v1 = vadd.f32 %v4758_v8, %v4646_v23 }
 0x319   : > { %v4760_v44 = vpop.f32.mrf.mxu0 }
 0x31a   : > { %4936 = vst [vmem:[#allocation2 + $0xa0] sm:$0xff] %v4904_v39  ;;  %v4905_v48 = vadd.f32 %v4870_v11, %v1665_v26  ;;  %v4872_v50 = vadd.f32 %v4871_v53, %v4759_v1  ;;  %v4761_v54 = vadd.f32 %v4760_v44, %v4648_v29  ;;  %v4873_v20 = vpop.f32.mrf.mxu1 }
 0x31c   : > { %4937 = vst [vmem:[#allocation2 + $0xf8] sm:$0xff] %v4905_v48  ;;  %v4906_v36 = vadd.f32 %v4872_v50, %v1666_v34  ;;  %v4874_v55 = vadd.f32 %v4873_v20, %v4761_v54  ;;  %4943 = sbr.rel (%p5791_p5) target bundleno = 972 (0x3cc), region = 105 }
 0x31e   : > { %4938 = vst [vmem:[#allocation2 + $0x20] sm:$0xff] %v4906_v36  ;;  %v4907_v12 = vadd.f32 %v4874_v55, %v1667_v14 }
 0x320   : > { %4939 = vst [vmem:[#allocation2 + $0x98] sm:$0xff] %v4907_v12 }
 0x321   : > { %v5792_v52 = vld [vmem:[#allocation3] ss:$0 sm:$0xff]  ;;  %v6365_v40 = vmov 0   ;;  %v5020_v61 = vlaneseq  ;;  %v4944_v17 = vld [vmem:[#allocation2 + $0xb0] sm:$0xff]  ;;  %v4946_v43 = vld [vmem:[#allocation2 + $0xd8] sm:$0xff] }
 0x322   : > { %6275 = vset.pattern.permute.xlu0 %v6365_v40  ;;  %v4945_v42 = vld [vmem:[#allocation2] sm:$0xff]  ;;  %v4947_v60 = vld [vmem:[#allocation2 + $0x18] sm:$0xff]  ;;  %v4948_v49 = vld [vmem:[#allocation2 + $0x50] sm:$0xff] }
 0x323   : > { %4983 = vperm.xlu0 %6275, %v5792_v52   ;;  %v5021_v35 = vshrl.u32 %v5020_v61, 7  ;;  %v4949_v19 = vld [vmem:[#allocation2 + $0x68] sm:$0xff]  ;;  %v4950_v4 = vld [vmem:[#allocation2 + $0x30] sm:$0xff]  ;;  %v5018_v3 = vld [vmem:[%s1596_s7] sm:$0x3] }
 0x324   : > { %v4951_v59 = vld [vmem:[#allocation2 + $0x48] sm:$0xff]  ;;  %v4952_v21 = vld [vmem:[#allocation2 + $0x80] sm:$0xff]  ;;  %v4955_v15 = vld [vmem:[#allocation2 + $0xb8] sm:$0xff] }
 0x325   : > { %v5022_v30 = vsub.s32 0, %v5021_v35  ;;  %v5026_v27 = vsub.s32 1, %v5021_v35  ;;  %v4953_v33 = vld [vmem:[#allocation2 + $0x88] sm:$0xff]  ;;  %v4956_v63 = vld [vmem:[#allocation2 + $0x60] sm:$0xff]  ;;  %v4957_v56 = vld [vmem:[#allocation2 + $0xf0] sm:$0xff] }
 0x326   : > { %v4954_v6 = vld [vmem:[#allocation2 + $0xe8] sm:$0xff]  ;;  %v4959_v0 = vld [vmem:[#allocation2 + $0x78] sm:$0xff]  ;;  %v4962_v41 = vld [vmem:[#allocation2 + $0x40] sm:$0xff] }
 0x327   : > { %v4958_v5 = vld [vmem:[#allocation2 + $0x8] sm:$0xff]  ;;  %v4960_v22 = vld [vmem:[#allocation2 + $0x38] sm:$0xff]  ;;  %v8071_v32 = vrot.slane %v5018_v3, %v5022_v30  ;;  %v8073_v58 = vrot.slane %v5018_v3, %v5026_v27  ;;  %v4964_v62 = vld [vmem:[#allocation2 + $0xe0] sm:$0xff] }
 0x328   : > { %v4961_v51 = vld [vmem:[#allocation2 + $0x58] sm:$0xff]  ;;  %v4963_v9 = vld [vmem:[#allocation2 + $0xc8] sm:$0xff]  ;;  %v4965_v57 = vld [vmem:[#allocation2 + $0x90] sm:$0xff] }
 0x329   : > { %v4966_v10 = vld [vmem:[#allocation2 + $0x70] sm:$0xff]  ;;  %v4967_v25 = vld [vmem:[#allocation2 + $0xc0] sm:$0xff]  ;;  %v4968_v23 = vld [vmem:[#allocation2 + $0xa8] sm:$0xff] }
 0x32a   : > { %v4969_v31 = vld [vmem:[#allocation2 + $0xd0] sm:$0xff]  ;;  %v4971_v13 = vld [vmem:[#allocation2 + $0x28] sm:$0xff]  ;;  %v4972_v29 = vld [vmem:[#allocation2 + $0xa0] sm:$0xff] }
 0x32b   : > { %v4970_v53 = vld [vmem:[#allocation2 + $0x10] sm:$0xff]  ;;  %v4973_v44 = vld [vmem:[#allocation2 + $0xf8] sm:$0xff]  ;;  %v4974_v48 = vld [vmem:[#allocation2 + $0x20] sm:$0xff] }
 0x32c   : > { %v4975_v50 = vld [vmem:[#allocation2 + $0x98] sm:$0xff] }
 0x39e   : > { %v4984_v47 = vpop.permute.xlu0 %4983 }
 0x39f   : > { %v4986_v28 = vmul.f32 %v4984_v47, %v4944_v17  ;;  %v4987_v2 = vmul.f32 %v4984_v47, %v4945_v42  ;;  %v4988_v18 = vmul.f32 %v4984_v47, %v4946_v43  ;;  %v4989_v38 = vmul.f32 %v4984_v47, %v4947_v60 }
 0x3a0   : > { %v4990_v16 = vmul.f32 %v4984_v47, %v4948_v49  ;;  %v4991_v45 = vmul.f32 %v4984_v47, %v4949_v19  ;;  %v4992_v24 = vmul.f32 %v4984_v47, %v4950_v4  ;;  %v4993_v37 = vmul.f32 %v4984_v47, %v4951_v59 }
 0x3a1   : > { %v4994_v7 = vmul.f32 %v4984_v47, %v4952_v21  ;;  %v4995_v46 = vmul.f32 %v4984_v47, %v4953_v33  ;;  %v4996_v26 = vmul.f32 %v4984_v47, %v4954_v6  ;;  %v4997_v8 = vmul.f32 %v4984_v47, %v4955_v15 }
 0x3a2   : > { %v4998_v39 = vmul.f32 %v4984_v47, %v4956_v63  ;;  %v4999_v11 = vmul.f32 %v4984_v47, %v4957_v56  ;;  %v5000_v1 = vmul.f32 %v4984_v47, %v4958_v5  ;;  %v5001_v34 = vmul.f32 %v4984_v47, %v4959_v0 }
 0x3a3   : > { %v5002_v54 = vmul.f32 %v4984_v47, %v4960_v22  ;;  %v5003_v14 = vmul.f32 %v4984_v47, %v4961_v51  ;;  %v5004_v20 = vmul.f32 %v4984_v47, %v4962_v41  ;;  %v5005_v36 = vmul.f32 %v4984_v47, %v4963_v9 }
 0x3a4   : > { %v5006_v55 = vmul.f32 %v4984_v47, %v4964_v62  ;;  %v5007_v12 = vmul.f32 %v4984_v47, %v4965_v57  ;;  %v5008_v52 = vmul.f32 %v4984_v47, %v4966_v10  ;;  %v5009_v40 = vmul.f32 %v4984_v47, %v4967_v25 }
 0x3a5   : > { %v5010_v61 = vmul.f32 %v4984_v47, %v4968_v23  ;;  %v5011_v35 = vmul.f32 %v4984_v47, %v4969_v31  ;;  %v5012_v17 = vmul.f32 %v4984_v47, %v4970_v53  ;;  %v5013_v42 = vmul.f32 %v4984_v47, %v4971_v13 }
 0x3a6   : > { %v5014_v43 = vmul.f32 %v4984_v47, %v4972_v29  ;;  %v5015_v60 = vmul.f32 %v4984_v47, %v4973_v44  ;;  %v5016_v30 = vmul.f32 %v4984_v47, %v4974_v48  ;;  %v5017_v27 = vmul.f32 %v4984_v47, %v4975_v50 }
 0x3a7   : > { %v8076_v49 = vadd.f32 %v8071_v32, %v4986_v28  ;;  %v8079_v19 = vadd.f32 %v8073_v58, %v4987_v2  ;;  %v8082_v4 = vadd.f32 %v8071_v32, %v4988_v18  ;;  %v8085_v59 = vadd.f32 %v8073_v58, %v4989_v38 }
 0x3a8   : > { %v8088_v3 = vadd.f32 %v8071_v32, %v4990_v16  ;;  %v8091_v21 = vadd.f32 %v8073_v58, %v4991_v45  ;;  %v8094_v47 = vadd.f32 %v8071_v32, %v4992_v24  ;;  %v8097_v33 = vadd.f32 %v8073_v58, %v4993_v37 }
 0x3a9   : > { %v8100_v6 = vadd.f32 %v8071_v32, %v4994_v7  ;;  %v8103_v15 = vadd.f32 %v8073_v58, %v4995_v46  ;;  %v8106_v63 = vadd.f32 %v8071_v32, %v4996_v26  ;;  %v8109_v56 = vadd.f32 %v8073_v58, %v4997_v8 }
 0x3aa   : > { %v8112_v5 = vadd.f32 %v8071_v32, %v4998_v39  ;;  %v8115_v0 = vadd.f32 %v8073_v58, %v4999_v11  ;;  %v8118_v22 = vadd.f32 %v8071_v32, %v5000_v1  ;;  %v8121_v51 = vadd.f32 %v8073_v58, %v5001_v34 }
 0x3ab   : > { %v8124_v41 = vadd.f32 %v8071_v32, %v5002_v54  ;;  %v8127_v9 = vadd.f32 %v8073_v58, %v5003_v14  ;;  %v8130_v28 = vadd.f32 %v8071_v32, %v5004_v20  ;;  %v8133_v2 = vadd.f32 %v8073_v58, %v5005_v36 }
 0x3ac   : > { %v8136_v18 = vadd.f32 %v8071_v32, %v5006_v55  ;;  %v8139_v38 = vadd.f32 %v8073_v58, %v5007_v12  ;;  %v8142_v62 = vadd.f32 %v8071_v32, %v5008_v52  ;;  %v8145_v57 = vadd.f32 %v8073_v58, %v5009_v40 }
 0x3ad   : > { %v8148_v10 = vadd.f32 %v8071_v32, %v5010_v61  ;;  %v8151_v16 = vadd.f32 %v8073_v58, %v5011_v35  ;;  %v8154_v45 = vadd.f32 %v8071_v32, %v5012_v17  ;;  %v8157_v24 = vadd.f32 %v8073_v58, %v5013_v42 }
 0x3ae   : > { %v8160_v37 = vadd.f32 %v8071_v32, %v5014_v43  ;;  %v8163_v25 = vadd.f32 %v8073_v58, %v5015_v60  ;;  %vm5062_vm0 = vcmp.gt.f32.partialorder %v8076_v49, 0.0  ;;  %vm5063_vm1 = vcmp.gt.f32.partialorder %v8079_v19, 0.0 }
 0x3af   : > { %vm5064_vm2 = vcmp.gt.f32.partialorder %v8082_v4, 0.0  ;;  %vm5065_vm3 = vcmp.gt.f32.partialorder %v8085_v59, 0.0  ;;  %vm5066_vm4 = vcmp.gt.f32.partialorder %v8088_v3, 0.0  ;;  %vm5067_vm5 = vcmp.gt.f32.partialorder %v8091_v21, 0.0 }
 0x3b0   : > { %vm5068_vm6 = vcmp.gt.f32.partialorder %v8094_v47, 0.0  ;;  %vm5069_vm7 = vcmp.gt.f32.partialorder %v8097_v33, 0.0  ;;  %vm5070_vm8 = vcmp.gt.f32.partialorder %v8100_v6, 0.0  ;;  %v8176_v23 = vadd.f32 %v8071_v32, %v5016_v30 }
 0x3b1   : > { %v5094_v31 = vmul.f32 0.2, %v8076_v49  ;;  %v5095_v7 = vmul.f32 0.2, %v8079_v19  ;;  %v5096_v46 = vmul.f32 0.2, %v8082_v4  ;;  %v8186_v26 = vadd.f32 %v8073_v58, %v5017_v27 }
 0x3b2   : > { %vm5077_vm15 = vcmp.gt.f32.partialorder %v8121_v51, 0.0  ;;  %vm5078_vm10 = vcmp.gt.f32.partialorder %v8124_v41, 0.0  ;;  %v5097_v32 = vmul.f32 0.2, %v8085_v59  ;;  %v5098_v8 = vmul.f32 0.2, %v8088_v3 }
 0x3b3   : > { %v5099_v53 = vmul.f32 0.2, %v8091_v21  ;;  %vm5083_vm14 = vcmp.gt.f32.partialorder %v8139_v38, 0.0  ;;  %v5100_v58 = vmul.f32 0.2, %v8094_v47  ;;  %v5126_v39 = vsel %vm5062_vm0, %v8076_v49, %v5094_v31 }
 0x3b4   : > { %v5101_v13 = vmul.f32 0.2, %v8097_v33  ;;  %v5102_v29 = vmul.f32 0.2, %v8100_v6  ;;  %vm5084_vm11 = vcmp.gt.f32.partialorder %v8142_v62, 0.0  ;;  %v5127_v44 = vsel %vm5063_vm1, %v8079_v19, %v5095_v7  ;;  %5158 = vst [vmem:[%s7300_s1] sm:$0xff] %v5126_v39 }
 0x3b5   : > { %v5103_v11 = vmul.f32 0.2, %v8103_v15  ;;  %v5104_v1 = vmul.f32 0.2, %v8106_v63  ;;  %v5105_v34 = vmul.f32 0.2, %v8109_v56  ;;  %v5128_v14 = vsel %vm5064_vm2, %v8082_v4, %v5096_v46 }
 0x3b6   : > { %vm5088_vm0 = vcmp.gt.f32.partialorder %v8154_v45, 0.0  ;;  %vm5090_vm12 = vcmp.gt.f32.partialorder %v8160_v37, 0.0  ;;  %vm5091_vm9 = vcmp.gt.f32.partialorder %v8163_v25, 0.0  ;;  %v5106_v48 = vmul.f32 0.2, %v8112_v5  ;;  %5159 = vst [vmem:[%s7300_s1 + $0x8] sm:$0xff] %v5127_v44 }
 0x3b7   : > { %v5107_v50 = vmul.f32 0.2, %v8115_v0  ;;  %v5108_v54 = vmul.f32 0.2, %v8118_v22  ;;  %vm5092_vm1 = vcmp.gt.f32.partialorder %v8176_v23, 0.0  ;;  %vm5093_vm13 = vcmp.gt.f32.partialorder %v8186_v26, 0.0 }
 0x3b8   : > { %v5109_v20 = vmul.f32 0.2, %v8121_v51  ;;  %v5110_v36 = vmul.f32 0.2, %v8124_v41  ;;  %v5111_v55 = vmul.f32 0.2, %v8127_v9  ;;  %v5129_v12 = vsel %vm5065_vm3, %v8085_v59, %v5097_v32 }
 0x3b9   : > { %5160 = vst [vmem:[%s7300_s1 + $0x10] sm:$0xff] %v5128_v14  ;;  %v5112_v52 = vmul.f32 0.2, %v8130_v28  ;;  %v5113_v40 = vmul.f32 0.2, %v8133_v2  ;;  %v5130_v35 = vsel %vm5066_vm4, %v8088_v3, %v5098_v8  ;;  %5161 = vst [vmem:[%s7300_s1 + $0x18] sm:$0xff] %v5129_v12  ;;  %v5131_v60 = vsel %vm5067_vm5, %v8091_v21, %v5099_v53 }
 0x3ba   : > { %v5114_v61 = vmul.f32 0.2, %v8136_v18  ;;  %v5115_v17 = vmul.f32 0.2, %v8139_v38  ;;  %v5116_v42 = vmul.f32 0.2, %v8142_v62  ;;  %v5132_v19 = vsel %vm5068_vm6, %v8094_v47, %v5100_v58 }
 0x3bb   : > { %v5117_v43 = vmul.f32 0.2, %v8145_v57  ;;  %5162 = vst [vmem:[%s7300_s1 + $0x20] sm:$0xff] %v5130_v35  ;;  %v5118_v30 = vmul.f32 0.2, %v8148_v10  ;;  %5163 = vst [vmem:[%s7300_s1 + $0x28] sm:$0xff] %v5131_v60  ;;  %v5133_v21 = vsel %vm5069_vm7, %v8097_v33, %v5101_v13  ;;  %v5134_v7 = vsel %vm5070_vm8, %v8100_v6, %v5102_v29 }
 0x3bc   : > { %v5119_v27 = vmul.f32 0.2, %v8151_v16  ;;  %v5120_v49 = vmul.f32 0.2, %v8154_v45  ;;  %v5121_v4 = vmul.f32 0.2, %v8157_v24 }
 0x3bd   : > { %v5122_v59 = vmul.f32 0.2, %v8160_v37  ;;  %v5123_v3 = vmul.f32 0.2, %v8163_v25  ;;  %5164 = vst [vmem:[%s7300_s1 + $0x30] sm:$0xff] %v5132_v19  ;;  %vm8570_vm2 = vcmp.gt.f32.partialorder %v8103_v15, 0.0 }
 0x3be   : > { %v5124_v31 = vmul.f32 0.2, %v8176_v23  ;;  %v5125_v47 = vmul.f32 0.2, %v8186_v26  ;;  %v5135_v46 = vsel %vm8570_vm2, %v8103_v15, %v5103_v11  ;;  %5165 = vst [vmem:[%s7300_s1 + $0x38] sm:$0xff] %v5133_v21  ;;  %vm8571_vm3 = vcmp.gt.f32.partialorder %v8106_v63, 0.0 }
 0x3bf   : > { %v5136_v33 = vsel %vm8571_vm3, %v8106_v63, %v5104_v1  ;;  %vm8572_vm4 = vcmp.gt.f32.partialorder %v8109_v56, 0.0  ;;  %vm8573_vm5 = vcmp.gt.f32.partialorder %v8112_v5, 0.0  ;;  %vm8574_vm6 = vcmp.gt.f32.partialorder %v8115_v0, 0.0  ;;  %5166 = vst [vmem:[%s7300_s1 + $0x40] sm:$0xff] %v5134_v7  ;;  %5167 = vst [vmem:[%s7300_s1 + $0x48] sm:$0xff] %v5135_v46 }
 0x3c0   : > { %v5137_v32 = vsel %vm8572_vm4, %v8109_v56, %v5105_v34  ;;  %v5138_v8 = vsel %vm8573_vm5, %v8112_v5, %v5106_v48  ;;  %v5139_v6 = vsel %vm8574_vm6, %v8115_v0, %v5107_v50  ;;  %vm8575_vm7 = vcmp.gt.f32.partialorder %v8118_v22, 0.0  ;;  %5168 = vst [vmem:[%s7300_s1 + $0x50] sm:$0xff] %v5136_v33 }
 0x3c1   : > { %v5140_v15 = vsel %vm8575_vm7, %v8118_v22, %v5108_v54  ;;  %v5141_v63 = vsel %vm5077_vm15, %v8121_v51, %v5109_v20  ;;  %v5142_v56 = vsel %vm5078_vm10, %v8124_v41, %v5110_v36  ;;  %vm8576_vm8 = vcmp.gt.f32.partialorder %v8127_v9, 0.0  ;;  %5169 = vst [vmem:[%s7300_s1 + $0x58] sm:$0xff] %v5137_v32  ;;  %5170 = vst [vmem:[%s7300_s1 + $0x60] sm:$0xff] %v5138_v8 }
 0x3c2   : > { %v5143_v5 = vsel %vm8576_vm8, %v8127_v9, %v5111_v55  ;;  %5171 = vst [vmem:[%s7300_s1 + $0x68] sm:$0xff] %v5139_v6  ;;  %vm8577_vm2 = vcmp.gt.f32.partialorder %v8130_v28, 0.0  ;;  %vm8578_vm15 = vcmp.gt.f32.partialorder %v8133_v2, 0.0  ;;  %vm8579_vm10 = vcmp.gt.f32.partialorder %v8136_v18, 0.0  ;;  %5172 = vst [vmem:[%s7300_s1 + $0x70] sm:$0xff] %v5140_v15 }
 0x3c3   : > { %v5144_v0 = vsel %vm8577_vm2, %v8130_v28, %v5112_v52  ;;  %v5145_v22 = vsel %vm8578_vm15, %v8133_v2, %v5113_v40  ;;  %v5146_v51 = vsel %vm8579_vm10, %v8136_v18, %v5114_v61  ;;  %v5147_v41 = vsel %vm5083_vm14, %v8139_v38, %v5115_v17  ;;  %5173 = vst [vmem:[%s7300_s1 + $0x78] sm:$0xff] %v5141_v63 }
 0x3c4   : > { %5174 = vst [vmem:[%s7300_s1 + $0x80] sm:$0xff] %v5142_v56  ;;  %5175 = vst [vmem:[%s7300_s1 + $0x88] sm:$0xff] %v5143_v5  ;;  %v5148_v9 = vsel %vm5084_vm11, %v8142_v62, %v5116_v42  ;;  %vm8580_vm3 = vcmp.gt.f32.partialorder %v8145_v57, 0.0  ;;  %vm8581_vm4 = vcmp.gt.f32.partialorder %v8148_v10, 0.0  ;;  %vm8582_vm14 = vcmp.gt.f32.partialorder %v8151_v16, 0.0 }
 0x3c5   : > { %v5149_v28 = vsel %vm8580_vm3, %v8145_v57, %v5117_v43  ;;  %v5150_v2 = vsel %vm8581_vm4, %v8148_v10, %v5118_v30  ;;  %v5151_v18 = vsel %vm8582_vm14, %v8151_v16, %v5119_v27  ;;  %5176 = vst [vmem:[%s7300_s1 + $0x90] sm:$0xff] %v5144_v0  ;;  %5177 = vst [vmem:[%s7300_s1 + $0x98] sm:$0xff] %v5145_v22  ;;  %vm8583_vm11 = vcmp.gt.f32.partialorder %v8157_v24, 0.0 }
 0x3c6   : > { %5178 = vst [vmem:[%s7300_s1 + $0xa0] sm:$0xff] %v5146_v51  ;;  %5179 = vst [vmem:[%s7300_s1 + $0xa8] sm:$0xff] %v5147_v41  ;;  %v5152_v38 = vsel %vm5088_vm0, %v8154_v45, %v5120_v49  ;;  %v5153_v62 = vsel %vm8583_vm11, %v8157_v24, %v5121_v4  ;;  %v5154_v57 = vsel %vm5090_vm12, %v8160_v37, %v5122_v59 }
 0x3c7   : > { %v5155_v10 = vsel %vm5091_vm9, %v8163_v25, %v5123_v3  ;;  %5180 = vst [vmem:[%s7300_s1 + $0xb0] sm:$0xff] %v5148_v9  ;;  %5181 = vst [vmem:[%s7300_s1 + $0xb8] sm:$0xff] %v5149_v28  ;;  %v5156_v16 = vsel %vm5092_vm1, %v8176_v23, %v5124_v31  ;;  %v5157_v45 = vsel %vm5093_vm13, %v8186_v26, %v5125_v47 }
 0x3c8   : > { %5182 = vst [vmem:[%s7300_s1 + $0xc0] sm:$0xff] %v5150_v2  ;;  %5183 = vst [vmem:[%s7300_s1 + $0xc8] sm:$0xff] %v5151_v18 }
 0x3c9   : > { %5184 = vst [vmem:[%s7300_s1 + $0xd0] sm:$0xff] %v5152_v38  ;;  %5185 = vst [vmem:[%s7300_s1 + $0xd8] sm:$0xff] %v5153_v62 }
 0x3ca   : > { %5186 = vst [vmem:[%s7300_s1 + $0xe0] sm:$0xff] %v5154_v57  ;;  %5187 = vst [vmem:[%s7300_s1 + $0xe8] sm:$0xff] %v5155_v10 }
 0x3cb   : > { %5188 = vst [vmem:[%s7300_s1 + $0xf0] sm:$0xff] %v5156_v16  ;;  %5189 = vst [vmem:[%s7300_s1 + $0xf8] sm:$0xff] %v5157_v45 }
 0x3cc PF: > { %5196 = sbr.rel (!%p6488_p12) target bundleno = 990 (0x3de), region = 109  ;;  %s5800_s21 = sshll.u32 (%p6488_p12), %s6350_s24, 4  ;;  %v5215_v24 = vld [vmem:[%s7300_s1] sm:$0xff] (%p6488_p12)  ;;  %v5217_v37 = vld [vmem:[%s7300_s1 + $0x8] sm:$0xff] (%p6488_p12)  ;;  %v5219_v25 = vld [vmem:[%s7300_s1 + $0x10] sm:$0xff] (%p6488_p12) }
 0x3cd   : > { %s8372_s10 = scalar_lea.vmem (%p6488_p12), %s8472_s4, %s5800_s21  ;;  %v5221_v23 = vld [vmem:[%s7300_s1 + $0x18] sm:$0xff] (%p6488_p12)  ;;  %v5223_v26 = vld [vmem:[%s7300_s1 + $0x20] sm:$0xff] (%p6488_p12)  ;;  %v5225_v53 = vld [vmem:[%s7300_s1 + $0x28] sm:$0xff] (%p6488_p12) }
 0x3ce   : > { %5216 = vst [vmem:[%s8372_s10] sm:$0xff] (%p6488_p12), %v5215_v24  ;;  %5218 = vst [vmem:[%s8372_s10 + $0x8] sm:$0xff] (%p6488_p12), %v5217_v37  ;;  %v5227_v58 = vld [vmem:[%s7300_s1 + $0x30] sm:$0xff] (%p6488_p12)  ;;  %v5229_v13 = vld [vmem:[%s7300_s1 + $0x38] sm:$0xff] (%p6488_p12) }
 0x3cf   : > { %5220 = vst [vmem:[%s8372_s10 + $0x20] sm:$0xff] (%p6488_p12), %v5219_v25  ;;  %5222 = vst [vmem:[%s8372_s10 + $0x28] sm:$0xff] (%p6488_p12), %v5221_v23  ;;  %v5231_v29 = vld [vmem:[%s7300_s1 + $0x40] sm:$0xff] (%p6488_p12)  ;;  %v5233_v39 = vld [vmem:[%s7300_s1 + $0x48] sm:$0xff] (%p6488_p12) }
 0x3d0   : > { %5224 = vst [vmem:[%s8372_s10 + $0x40] sm:$0xff] (%p6488_p12), %v5223_v26  ;;  %5226 = vst [vmem:[%s8372_s10 + $0x48] sm:$0xff] (%p6488_p12), %v5225_v53  ;;  %v5235_v11 = vld [vmem:[%s7300_s1 + $0x50] sm:$0xff] (%p6488_p12)  ;;  %v5237_v1 = vld [vmem:[%s7300_s1 + $0x58] sm:$0xff] (%p6488_p12) }
 0x3d1   : > { %5228 = vst [vmem:[%s8372_s10 + $0x60] sm:$0xff] %v5227_v58  ;;  %5230 = vst [vmem:[%s8372_s10 + $0x68] sm:$0xff] %v5229_v13  ;;  %v5239_v34 = vld [vmem:[%s7300_s1 + $0x60] sm:$0xff]  ;;  %v5241_v44 = vld [vmem:[%s7300_s1 + $0x68] sm:$0xff] }
 0x3d2   : > { %5232 = vst [vmem:[%s8372_s10 + $0x80] sm:$0xff] %v5231_v29  ;;  %5234 = vst [vmem:[%s8372_s10 + $0x88] sm:$0xff] %v5233_v39  ;;  %v5243_v48 = vld [vmem:[%s7300_s1 + $0x70] sm:$0xff]  ;;  %v5245_v50 = vld [vmem:[%s7300_s1 + $0x78] sm:$0xff] }
 0x3d3   : > { %5236 = vst [vmem:[%s8372_s10 + $0xa0] sm:$0xff] %v5235_v11  ;;  %5238 = vst [vmem:[%s8372_s10 + $0xa8] sm:$0xff] %v5237_v1  ;;  %v5247_v54 = vld [vmem:[%s7300_s1 + $0x80] sm:$0xff]  ;;  %v5249_v14 = vld [vmem:[%s7300_s1 + $0x88] sm:$0xff] }
 0x3d4   : > { %5240 = vst [vmem:[%s8372_s10 + $0xc0] sm:$0xff] %v5239_v34  ;;  %5242 = vst [vmem:[%s8372_s10 + $0xc8] sm:$0xff] %v5241_v44  ;;  %v5251_v20 = vld [vmem:[%s7300_s1 + $0x90] sm:$0xff]  ;;  %v5253_v36 = vld [vmem:[%s7300_s1 + $0x98] sm:$0xff] }
 0x3d5   : > { %5244 = vst [vmem:[%s8372_s10 + $0xe0] sm:$0xff] %v5243_v48  ;;  %5246 = vst [vmem:[%s8372_s10 + $0xe8] sm:$0xff] %v5245_v50  ;;  %v5255_v55 = vld [vmem:[%s7300_s1 + $0xa0] sm:$0xff]  ;;  %v5257_v12 = vld [vmem:[%s7300_s1 + $0xa8] sm:$0xff] }
 0x3d6   : > { %5248 = vst [vmem:[%s8372_s10 + $0x100] sm:$0xff] %v5247_v54  ;;  %5250 = vst [vmem:[%s8372_s10 + $0x108] sm:$0xff] %v5249_v14  ;;  %v5259_v52 = vld [vmem:[%s7300_s1 + $0xb0] sm:$0xff]  ;;  %v5261_v40 = vld [vmem:[%s7300_s1 + $0xb8] sm:$0xff] }
 0x3d7   : > { %5252 = vst [vmem:[%s8372_s10 + $0x120] sm:$0xff] %v5251_v20  ;;  %5254 = vst [vmem:[%s8372_s10 + $0x128] sm:$0xff] %v5253_v36  ;;  %v5263_v61 = vld [vmem:[%s7300_s1 + $0xc0] sm:$0xff]  ;;  %v5265_v35 = vld [vmem:[%s7300_s1 + $0xc8] sm:$0xff] }
 0x3d8   : > { %5256 = vst [vmem:[%s8372_s10 + $0x140] sm:$0xff] %v5255_v55  ;;  %5258 = vst [vmem:[%s8372_s10 + $0x148] sm:$0xff] %v5257_v12  ;;  %v5267_v17 = vld [vmem:[%s7300_s1 + $0xd0] sm:$0xff]  ;;  %v5269_v42 = vld [vmem:[%s7300_s1 + $0xd8] sm:$0xff] }
 0x3d9   : > { %5260 = vst [vmem:[%s8372_s10 + $0x160] sm:$0xff] %v5259_v52  ;;  %5262 = vst [vmem:[%s8372_s10 + $0x168] sm:$0xff] %v5261_v40  ;;  %v5271_v43 = vld [vmem:[%s7300_s1 + $0xe0] sm:$0xff]  ;;  %v5273_v60 = vld [vmem:[%s7300_s1 + $0xe8] sm:$0xff] }
 0x3da   : > { %5264 = vst [vmem:[%s8372_s10 + $0x180] sm:$0xff] %v5263_v61  ;;  %5266 = vst [vmem:[%s8372_s10 + $0x188] sm:$0xff] %v5265_v35  ;;  %v5275_v30 = vld [vmem:[%s7300_s1 + $0xf0] sm:$0xff]  ;;  %v5277_v27 = vld [vmem:[%s7300_s1 + $0xf8] sm:$0xff] }
 0x3db   : > { %5268 = vst [vmem:[%s8372_s10 + $0x1a0] sm:$0xff] %v5267_v17  ;;  %5270 = vst [vmem:[%s8372_s10 + $0x1a8] sm:$0xff] %v5269_v42 }
 0x3dc   : > { %5272 = vst [vmem:[%s8372_s10 + $0x1c0] sm:$0xff] %v5271_v43  ;;  %5274 = vst [vmem:[%s8372_s10 + $0x1c8] sm:$0xff] %v5273_v60 }
 0x3dd   : > { %5276 = vst [vmem:[%s8372_s10 + $0x1e0] sm:$0xff] %v5275_v30  ;;  %5278 = vst [vmem:[%s8372_s10 + $0x1e8] sm:$0xff] %v5277_v27 }
 0x3de PF: > { %s16_s26 = sadd.s32 1, %s6362_s26   ;;  %s8584_s15 = sld [smem:[#allocation7_spill]] }
 0x3df   : > { %p13_p6 = scmp.ge.s32.totalorder %s16_s26, 6   ;;  %s8585_s17 = smov %s6326_s18 }
 0x3e0   : > { %s8586_s18 = smov %s6486_s14  ;;  %s8587_s19 = smov %s6334_s20 }
 0x3e1   : > { %s8588_s20 = smov %s6483_s13  ;;  %s8589_s21 = smov %s6342_s22 }
 0x3e2   : > { %s8590_s22 = smov %s6469_s8  ;;  %s8591_s23 = smov %s6354_s25 }
 0x3e3   : > { %s8592_s24 = smov %s6358_s3  ;;  %s8593_s25 = smov %s8596_s28 }
 0x3e4   : > { %s8594_s3 = smov %s8584_s15  ;;  %15 = sbr.rel (!%p13_p6) target bundleno = 9 (0x9), region = 174 }

// kernel: discriminator_forward.8
= control target key start
LH: loop header
LB: loop body
LE: loop exit
PB: predicated region body
PF: predicated region fallthrough
CT: control target
= control target key end

     0   :  { %s5866_s0 = inlined_call_operand.vmem [shape: bf16[32,8192], index: 0, kind: input, shape index: {}]   ;;  %s5867_s1 = inlined_call_operand.vmem [shape: bf16[8192,1024], index: 1, kind: input, shape index: {}]   ;;  %s5868_s2 = inlined_call_operand.vmem [shape: f32[1,1024], index: 2, kind: input, shape index: {}]   ;;  %s5869_s3 = inlined_call_operand.<no memory space> [shape: f32[1,1], index: 3, kind: input, shape index: {}]   ;;  %s5870_s4 = inlined_call_operand.vmem [shape: f32[32,1024], index: 4, kind: output, shape index: {}]  }
   0x1   :  { %5872 = sst [smem:[#allocation8_spill]] %s5866_s0  ;;  %v9_v0 = vstv %s5869_s3 }
   0x2   :  { %5873 = sst [smem:[#allocation9_spill]] %s5867_s1  ;;  %10 = vst [vmem:[#allocation3] sm:$0x1] %v9_v0 }
   0x3   :  { %s4738_s17 = smov 0   ;;  %s4740_s18 = smov 0  }
   0x4   :  { %s4742_s19 = smov 0   ;;  %s4744_s20 = smov 0  }
   0x5   :  { %s4746_s21 = smov 0   ;;  %s4748_s22 = smov 0  }
   0x6   :  { %s4750_s23 = smov 0   ;;  %s4752_s24 = smov 0  }
   0x7   :  { %s4754_s25 = smov 0   ;;  %s4756_s3 = smov 0  }
   0x8   :  { %s4758_s26 = smov 0  }
   0x9 LB: > { %s3829_s27 = sadd.s32 4294967295, %s4706_s26   ;;  %s28_s28 = sadd.s32 1, %s4698_s25  ;;  %s4706_s26 = sphi %s4758_s26, %s16_s26   ;;  %s4702_s3 = sphi %s4756_s3, %s5890_s3   ;;  %s4698_s25 = sphi %s4754_s25, %s5889_s25   ;;  %s4694_s24 = sphi %s4752_s24, %s5888_s24   ;;  %s4690_s23 = sphi %s4750_s23, %s5887_s23   ;;  %s4686_s22 = sphi %s4748_s22, %s5886_s22   ;;  %s4682_s21 = sphi %s4746_s21, %s5885_s21   ;;  %s4678_s20 = sphi %s4744_s20, %s5884_s20   ;;  %s4674_s19 = sphi %s4742_s19, %s5883_s19   ;;  %s4670_s18 = sphi %s4740_s18, %s5882_s18   ;;  %s4666_s17 = sphi %s4738_s17, %s5881_s17  }
   0xa   : > { %p29_p0 = scmp.ge.s32.totalorder %s28_s28, 4  ;;  %s31_s29 = sadd.s32 1, %s4702_s3 }
   0xb   : > { %s44_s30 = sadd.s32 1, %s4686_s22  ;;  %p51_p1 = scmp.ne.s32.totalorder %s4686_s22, %s4682_s21 }
   0xc   : > { %s5892_s28 = smov (%p29_p0, %s28_s28), 0  ;;  %s5894_s29 = smov (!%p29_p0, %s31_s29), %s4702_s3 }
   0xd   : > { %s40_s5 = ssub.s32 %s4698_s25, %s5892_s28  ;;  %p52_p2 = scmp.eq.s32.totalorder %s4706_s26, 0 }
   0xe   : > { %p33_p3 = scmp.ge.s32.totalorder %s5894_s29, 4  ;;  %p42_p4 = scmp.eq.s32.totalorder %s40_s5, 0 }
   0xf   : > { %p4805_p5 = por %p52_p2, %p51_p1  ;;  %s72_s7 = sadd.s32 1, %s4678_s20 }
  0x10   : > { %s5896_s29 = smov (%p33_p3, %s5894_s29), 0  ;;  %p79_p6 = scmp.ne.s32.totalorder %s4678_s20, %s4674_s19 }
  0x11   : > { %5875 = sst [smem:[#allocation7_spill]] %s5896_s29  ;;  %s68_s9 = ssub.s32 %s4702_s3, %s5896_s29 }
  0x12   : > { %s4813_s8 = scalar_select %p42_p4, %s4686_s22, %s44_s30  }
  0x13   : > { %s69_s10 = sor.u32 %s68_s9, %s40_s5  ;;  %p145_p7 = scmp.eq.s32.totalorder %s68_s9, 0 }
  0x14   : > { %p70_p8 = scmp.eq.s32.totalorder %s69_s10, 0  ;;  %p4819_p9 = por %p79_p6, %p52_p2 }
  0x15   : > { %s147_s12 = sadd.s32 1, %s4670_s18  ;;  %p157_p10 = scmp.ne.s32.totalorder %s4670_s18, %s4666_s17 }
  0x16   : > { %s4827_s13 = scalar_select %p70_p8, %s4678_s20, %s72_s7  }
  0x17   : > { %s4830_s14 = scalar_select %p145_p7, %s4670_s18, %s147_s12  }
  0x18   : > { %p158_p11 = scmp.eq.s32.totalorder %s3829_s27, 15  ;;  %p3832_p13 = scmp.ge.s32.totalorder %s4706_s26, 16 }
  0x1a   : > { %p4832_p12 = por %p158_p11, %p157_p10  ;;  %183 = sbr.rel (%p3832_p13) target bundleno = 323 (0x143), region = 20 }
  0x1f   : > { %186 = sbr.rel (!%p4805_p5) target bundleno = 57 (0x39), region = 24  ;;  %s188_s16 = sand.u32 (%p4805_p5), 1, %s4686_s22  }
  0x20   : > { %s4142_s30 = sshll.u32 (%p4805_p5), %s4698_s25, 6  ;;  %s3833_s5 = sshll.u32 (%p4805_p5), %s188_s16, 8 }
  0x21   : > { %s5878_s0 = sld [smem:[#allocation8_spill]] (%p4805_p5)  ;;  %s4849_s27 = scalar_lea.vmem (%p4805_p5), [#allocation4], %s3833_s5 }
  0x27   : > { %s4844_s10 = scalar_lea.vmem %s5878_s0, %s4142_s30 }
  0x28   : > { %v209_v1 = vld [vmem:[%s4844_s10] sm:$0xff]  ;;  %v211_v2 = vld [vmem:[%s4844_s10 + $0x8] sm:$0xff]  ;;  %v213_v3 = vld [vmem:[%s4844_s10 + $0x10] sm:$0xff] }
  0x29   : > { %210 = vst [vmem:[%s4849_s27] sm:$0xff] %v209_v1  ;;  %212 = vst [vmem:[%s4849_s27 + $0x8] sm:$0xff] %v211_v2  ;;  %v215_v4 = vld [vmem:[%s4844_s10 + $0x18] sm:$0xff]  ;;  %v217_v5 = vld [vmem:[%s4844_s10 + $0x20] sm:$0xff] }
  0x2a   : > { %214 = vst [vmem:[%s4849_s27 + $0x10] sm:$0xff] %v213_v3  ;;  %v219_v6 = vld [vmem:[%s4844_s10 + $0x28] sm:$0xff]  ;;  %216 = vst [vmem:[%s4849_s27 + $0x18] sm:$0xff] %v215_v4  ;;  %v221_v7 = vld [vmem:[%s4844_s10 + $0x30] sm:$0xff] }
  0x2b   : > { %218 = vst [vmem:[%s4849_s27 + $0x20] sm:$0xff] %v217_v5  ;;  %220 = vst [vmem:[%s4849_s27 + $0x28] sm:$0xff] %v219_v6  ;;  %v223_v8 = vld [vmem:[%s4844_s10 + $0x38] sm:$0xff]  ;;  %v225_v9 = vld [vmem:[%s4844_s10 + $0x100] sm:$0xff] }
  0x2c   : > { %222 = vst [vmem:[%s4849_s27 + $0x30] sm:$0xff] %v221_v7  ;;  %224 = vst [vmem:[%s4849_s27 + $0x38] sm:$0xff] %v223_v8  ;;  %v227_v10 = vld [vmem:[%s4844_s10 + $0x108] sm:$0xff]  ;;  %v229_v11 = vld [vmem:[%s4844_s10 + $0x110] sm:$0xff] }
  0x2d   : > { %226 = vst [vmem:[%s4849_s27 + $0x40] sm:$0xff] %v225_v9  ;;  %v231_v12 = vld [vmem:[%s4844_s10 + $0x118] sm:$0xff]  ;;  %228 = vst [vmem:[%s4849_s27 + $0x48] sm:$0xff] %v227_v10  ;;  %v233_v13 = vld [vmem:[%s4844_s10 + $0x120] sm:$0xff] }
  0x2e   : > { %230 = vst [vmem:[%s4849_s27 + $0x50] sm:$0xff] %v229_v11  ;;  %232 = vst [vmem:[%s4849_s27 + $0x58] sm:$0xff] %v231_v12  ;;  %v235_v14 = vld [vmem:[%s4844_s10 + $0x128] sm:$0xff]  ;;  %v237_v15 = vld [vmem:[%s4844_s10 + $0x130] sm:$0xff] }
  0x2f   : > { %234 = vst [vmem:[%s4849_s27 + $0x60] sm:$0xff] %v233_v13  ;;  %236 = vst [vmem:[%s4849_s27 + $0x68] sm:$0xff] %v235_v14  ;;  %v239_v16 = vld [vmem:[%s4844_s10 + $0x138] sm:$0xff]  ;;  %v241_v17 = vld [vmem:[%s4844_s10 + $0x200] sm:$0xff] }
  0x30   : > { %238 = vst [vmem:[%s4849_s27 + $0x70] sm:$0xff] %v237_v15  ;;  %v243_v18 = vld [vmem:[%s4844_s10 + $0x208] sm:$0xff]  ;;  %240 = vst [vmem:[%s4849_s27 + $0x78] sm:$0xff] %v239_v16  ;;  %v245_v19 = vld [vmem:[%s4844_s10 + $0x210] sm:$0xff] }
  0x31   : > { %242 = vst [vmem:[%s4849_s27 + $0x80] sm:$0xff] %v241_v17  ;;  %244 = vst [vmem:[%s4849_s27 + $0x88] sm:$0xff] %v243_v18  ;;  %v247_v20 = vld [vmem:[%s4844_s10 + $0x218] sm:$0xff]  ;;  %v249_v21 = vld [vmem:[%s4844_s10 + $0x220] sm:$0xff] }
  0x32   : > { %246 = vst [vmem:[%s4849_s27 + $0x90] sm:$0xff] %v245_v19  ;;  %248 = vst [vmem:[%s4849_s27 + $0x98] sm:$0xff] %v247_v20  ;;  %v251_v22 = vld [vmem:[%s4844_s10 + $0x228] sm:$0xff]  ;;  %v253_v23 = vld [vmem:[%s4844_s10 + $0x230] sm:$0xff] }
  0x33   : > { %250 = vst [vmem:[%s4849_s27 + $0xa0] sm:$0xff] %v249_v21  ;;  %v255_v24 = vld [vmem:[%s4844_s10 + $0x238] sm:$0xff]  ;;  %252 = vst [vmem:[%s4849_s27 + $0xa8] sm:$0xff] %v251_v22  ;;  %v257_v25 = vld [vmem:[%s4844_s10 + $0x300] sm:$0xff] }
  0x34   : > { %254 = vst [vmem:[%s4849_s27 + $0xb0] sm:$0xff] %v253_v23  ;;  %256 = vst [vmem:[%s4849_s27 + $0xb8] sm:$0xff] %v255_v24  ;;  %v259_v26 = vld [vmem:[%s4844_s10 + $0x308] sm:$0xff]  ;;  %v261_v27 = vld [vmem:[%s4844_s10 + $0x310] sm:$0xff] }
  0x35   : > { %258 = vst [vmem:[%s4849_s27 + $0xc0] sm:$0xff] %v257_v25  ;;  %260 = vst [vmem:[%s4849_s27 + $0xc8] sm:$0xff] %v259_v26  ;;  %v263_v28 = vld [vmem:[%s4844_s10 + $0x318] sm:$0xff]  ;;  %v265_v29 = vld [vmem:[%s4844_s10 + $0x320] sm:$0xff] }
  0x36   : > { %262 = vst [vmem:[%s4849_s27 + $0xd0] sm:$0xff] %v261_v27  ;;  %v267_v30 = vld [vmem:[%s4844_s10 + $0x328] sm:$0xff]  ;;  %264 = vst [vmem:[%s4849_s27 + $0xd8] sm:$0xff] %v263_v28  ;;  %v269_v31 = vld [vmem:[%s4844_s10 + $0x330] sm:$0xff] }
  0x37   : > { %266 = vst [vmem:[%s4849_s27 + $0xe0] sm:$0xff] %v265_v29  ;;  %268 = vst [vmem:[%s4849_s27 + $0xe8] sm:$0xff] %v267_v30  ;;  %v271_v32 = vld [vmem:[%s4844_s10 + $0x338] sm:$0xff] }
  0x38   : > { %270 = vst [vmem:[%s4849_s27 + $0xf0] sm:$0xff] %v269_v31  ;;  %272 = vst [vmem:[%s4849_s27 + $0xf8] sm:$0xff] %v271_v32 }
  0x39 PF: > { %278 = sbr.rel (!%p4819_p9) target bundleno = 323 (0x143), region = 47  ;;  %s280_s6 = sand.u32 (%p4819_p9), 1, %s4678_s20  }
  0x3a   : > { %s3838_s12 = sshll.u32 (%p4819_p9), %s4702_s3, 1  ;;  %s3836_s16 = sshll.u32 (%p4819_p9), %s280_s6, 11 }
  0x3b   : > { %s4143_s30 = sshll.u32 (%p4819_p9), %s4698_s25, 11  ;;  %s5879_s1 = sld [smem:[#allocation9_spill]] (%p4819_p9) }
  0x3c   : > { %s286_s5 = sadd.s32 (%p4819_p9), %s4143_s30, %s3838_s12  ;;  %s4925_s11 = scalar_lea.vmem (%p4819_p9), [#allocation5], %s3836_s16 }
  0x3d   : > { %s3840_s7 = sshll.u32 (%p4819_p9), %s286_s5, 2 }
  0x41   : > { %s4920_s29 = scalar_lea.vmem %s5879_s1, %s3840_s7 }
  0x42   : > { %v827_v33 = vld [vmem:[%s4920_s29] sm:$0xff] }
  0x43   : > { %v829_v34 = vld [vmem:[%s4920_s29 + $0x20] sm:$0xff]  ;;  %828 = vst [vmem:[%s4925_s11] sm:$0xff] %v827_v33 }
  0x44   : > { %v831_v35 = vld [vmem:[%s4920_s29 + $0x40] sm:$0xff]  ;;  %830 = vst [vmem:[%s4925_s11 + $0x8] sm:$0xff] %v829_v34 }
  0x45   : > { %832 = vst [vmem:[%s4925_s11 + $0x10] sm:$0xff] %v831_v35  ;;  %v833_v36 = vld [vmem:[%s4920_s29 + $0x60] sm:$0xff] }
  0x46   : > { %v835_v37 = vld [vmem:[%s4920_s29 + $0x80] sm:$0xff]  ;;  %834 = vst [vmem:[%s4925_s11 + $0x18] sm:$0xff] %v833_v36 }
  0x47   : > { %v837_v38 = vld [vmem:[%s4920_s29 + $0xa0] sm:$0xff]  ;;  %836 = vst [vmem:[%s4925_s11 + $0x20] sm:$0xff] %v835_v37 }
  0x48   : > { %838 = vst [vmem:[%s4925_s11 + $0x28] sm:$0xff] %v837_v38  ;;  %v839_v39 = vld [vmem:[%s4920_s29 + $0xc0] sm:$0xff] }
  0x49   : > { %v841_v40 = vld [vmem:[%s4920_s29 + $0xe0] sm:$0xff]  ;;  %840 = vst [vmem:[%s4925_s11 + $0x30] sm:$0xff] %v839_v39 }
  0x4a   : > { %v843_v41 = vld [vmem:[%s4920_s29 + $0x100] sm:$0xff]  ;;  %842 = vst [vmem:[%s4925_s11 + $0x38] sm:$0xff] %v841_v40 }
  0x4b   : > { %844 = vst [vmem:[%s4925_s11 + $0x40] sm:$0xff] %v843_v41  ;;  %v845_v42 = vld [vmem:[%s4920_s29 + $0x120] sm:$0xff] }
  0x4c   : > { %v847_v43 = vld [vmem:[%s4920_s29 + $0x140] sm:$0xff]  ;;  %846 = vst [vmem:[%s4925_s11 + $0x48] sm:$0xff] %v845_v42 }
  0x4d   : > { %v849_v44 = vld [vmem:[%s4920_s29 + $0x160] sm:$0xff]  ;;  %848 = vst [vmem:[%s4925_s11 + $0x50] sm:$0xff] %v847_v43 }
  0x4e   : > { %850 = vst [vmem:[%s4925_s11 + $0x58] sm:$0xff] %v849_v44  ;;  %v851_v45 = vld [vmem:[%s4920_s29 + $0x180] sm:$0xff] }
  0x4f   : > { %v853_v46 = vld [vmem:[%s4920_s29 + $0x1a0] sm:$0xff]  ;;  %852 = vst [vmem:[%s4925_s11 + $0x60] sm:$0xff] %v851_v45 }
  0x50   : > { %v855_v47 = vld [vmem:[%s4920_s29 + $0x1c0] sm:$0xff]  ;;  %854 = vst [vmem:[%s4925_s11 + $0x68] sm:$0xff] %v853_v46 }
  0x51   : > { %856 = vst [vmem:[%s4925_s11 + $0x70] sm:$0xff] %v855_v47  ;;  %v857_v48 = vld [vmem:[%s4920_s29 + $0x1e0] sm:$0xff] }
  0x52   : > { %v859_v49 = vld [vmem:[%s4920_s29 + $0x200] sm:$0xff]  ;;  %858 = vst [vmem:[%s4925_s11 + $0x78] sm:$0xff] %v857_v48 }
  0x53   : > { %v861_v50 = vld [vmem:[%s4920_s29 + $0x220] sm:$0xff]  ;;  %860 = vst [vmem:[%s4925_s11 + $0x80] sm:$0xff] %v859_v49 }
  0x54   : > { %862 = vst [vmem:[%s4925_s11 + $0x88] sm:$0xff] %v861_v50  ;;  %v863_v51 = vld [vmem:[%s4920_s29 + $0x240] sm:$0xff] }
  0x55   : > { %v865_v52 = vld [vmem:[%s4920_s29 + $0x260] sm:$0xff]  ;;  %864 = vst [vmem:[%s4925_s11 + $0x90] sm:$0xff] %v863_v51 }
  0x56   : > { %v867_v53 = vld [vmem:[%s4920_s29 + $0x280] sm:$0xff]  ;;  %866 = vst [vmem:[%s4925_s11 + $0x98] sm:$0xff] %v865_v52 }
  0x57   : > { %868 = vst [vmem:[%s4925_s11 + $0xa0] sm:$0xff] %v867_v53  ;;  %v869_v54 = vld [vmem:[%s4920_s29 + $0x2a0] sm:$0xff] }
  0x58   : > { %v871_v55 = vld [vmem:[%s4920_s29 + $0x2c0] sm:$0xff]  ;;  %870 = vst [vmem:[%s4925_s11 + $0xa8] sm:$0xff] %v869_v54 }
  0x59   : > { %v873_v56 = vld [vmem:[%s4920_s29 + $0x2e0] sm:$0xff]  ;;  %872 = vst [vmem:[%s4925_s11 + $0xb0] sm:$0xff] %v871_v55 }
  0x5a   : > { %874 = vst [vmem:[%s4925_s11 + $0xb8] sm:$0xff] %v873_v56  ;;  %v875_v57 = vld [vmem:[%s4920_s29 + $0x300] sm:$0xff] }
  0x5b   : > { %v877_v58 = vld [vmem:[%s4920_s29 + $0x320] sm:$0xff]  ;;  %876 = vst [vmem:[%s4925_s11 + $0xc0] sm:$0xff] %v875_v57 }
  0x5c   : > { %v879_v59 = vld [vmem:[%s4920_s29 + $0x340] sm:$0xff]  ;;  %878 = vst [vmem:[%s4925_s11 + $0xc8] sm:$0xff] %v877_v58 }
  0x5d   : > { %880 = vst [vmem:[%s4925_s11 + $0xd0] sm:$0xff] %v879_v59  ;;  %v881_v60 = vld [vmem:[%s4920_s29 + $0x360] sm:$0xff] }
  0x5e   : > { %v883_v61 = vld [vmem:[%s4920_s29 + $0x380] sm:$0xff]  ;;  %882 = vst [vmem:[%s4925_s11 + $0xd8] sm:$0xff] %v881_v60 }
  0x5f   : > { %v885_v62 = vld [vmem:[%s4920_s29 + $0x3a0] sm:$0xff]  ;;  %884 = vst [vmem:[%s4925_s11 + $0xe0] sm:$0xff] %v883_v61 }
  0x60   : > { %886 = vst [vmem:[%s4925_s11 + $0xe8] sm:$0xff] %v885_v62  ;;  %v887_v63 = vld [vmem:[%s4920_s29 + $0x3c0] sm:$0xff] }
  0x61   : > { %v889_v0 = vld [vmem:[%s4920_s29 + $0x3e0] sm:$0xff]  ;;  %888 = vst [vmem:[%s4925_s11 + $0xf0] sm:$0xff] %v887_v63 }
  0x62   : > { %v891_v1 = vld [vmem:[%s4920_s29 + $0x400] sm:$0xff]  ;;  %890 = vst [vmem:[%s4925_s11 + $0xf8] sm:$0xff] %v889_v0 }
  0x63   : > { %892 = vst [vmem:[%s4925_s11 + $0x100] sm:$0xff] %v891_v1  ;;  %v893_v2 = vld [vmem:[%s4920_s29 + $0x420] sm:$0xff] }
  0x64   : > { %v895_v3 = vld [vmem:[%s4920_s29 + $0x440] sm:$0xff]  ;;  %894 = vst [vmem:[%s4925_s11 + $0x108] sm:$0xff] %v893_v2 }
  0x65   : > { %v897_v4 = vld [vmem:[%s4920_s29 + $0x460] sm:$0xff]  ;;  %896 = vst [vmem:[%s4925_s11 + $0x110] sm:$0xff] %v895_v3 }
  0x66   : > { %898 = vst [vmem:[%s4925_s11 + $0x118] sm:$0xff] %v897_v4  ;;  %v899_v5 = vld [vmem:[%s4920_s29 + $0x480] sm:$0xff] }
  0x67   : > { %v901_v6 = vld [vmem:[%s4920_s29 + $0x4a0] sm:$0xff]  ;;  %900 = vst [vmem:[%s4925_s11 + $0x120] sm:$0xff] %v899_v5 }
  0x68   : > { %v903_v7 = vld [vmem:[%s4920_s29 + $0x4c0] sm:$0xff]  ;;  %902 = vst [vmem:[%s4925_s11 + $0x128] sm:$0xff] %v901_v6 }
  0x69   : > { %904 = vst [vmem:[%s4925_s11 + $0x130] sm:$0xff] %v903_v7  ;;  %v905_v8 = vld [vmem:[%s4920_s29 + $0x4e0] sm:$0xff] }
  0x6a   : > { %v907_v9 = vld [vmem:[%s4920_s29 + $0x500] sm:$0xff]  ;;  %906 = vst [vmem:[%s4925_s11 + $0x138] sm:$0xff] %v905_v8 }
  0x6b   : > { %v909_v10 = vld [vmem:[%s4920_s29 + $0x520] sm:$0xff]  ;;  %908 = vst [vmem:[%s4925_s11 + $0x140] sm:$0xff] %v907_v9 }
  0x6c   : > { %910 = vst [vmem:[%s4925_s11 + $0x148] sm:$0xff] %v909_v10  ;;  %v911_v11 = vld [vmem:[%s4920_s29 + $0x540] sm:$0xff] }
  0x6d   : > { %v913_v12 = vld [vmem:[%s4920_s29 + $0x560] sm:$0xff]  ;;  %912 = vst [vmem:[%s4925_s11 + $0x150] sm:$0xff] %v911_v11 }
  0x6e   : > { %v915_v13 = vld [vmem:[%s4920_s29 + $0x580] sm:$0xff]  ;;  %914 = vst [vmem:[%s4925_s11 + $0x158] sm:$0xff] %v913_v12 }
  0x6f   : > { %916 = vst [vmem:[%s4925_s11 + $0x160] sm:$0xff] %v915_v13  ;;  %v917_v14 = vld [vmem:[%s4920_s29 + $0x5a0] sm:$0xff] }
  0x70   : > { %v919_v15 = vld [vmem:[%s4920_s29 + $0x5c0] sm:$0xff]  ;;  %918 = vst [vmem:[%s4925_s11 + $0x168] sm:$0xff] %v917_v14 }
  0x71   : > { %v921_v16 = vld [vmem:[%s4920_s29 + $0x5e0] sm:$0xff]  ;;  %920 = vst [vmem:[%s4925_s11 + $0x170] sm:$0xff] %v919_v15 }
  0x72   : > { %922 = vst [vmem:[%s4925_s11 + $0x178] sm:$0xff] %v921_v16  ;;  %v923_v17 = vld [vmem:[%s4920_s29 + $0x600] sm:$0xff] }
  0x73   : > { %v925_v18 = vld [vmem:[%s4920_s29 + $0x620] sm:$0xff]  ;;  %924 = vst [vmem:[%s4925_s11 + $0x180] sm:$0xff] %v923_v17 }
  0x74   : > { %v927_v19 = vld [vmem:[%s4920_s29 + $0x640] sm:$0xff]  ;;  %926 = vst [vmem:[%s4925_s11 + $0x188] sm:$0xff] %v925_v18 }
  0x75   : > { %928 = vst [vmem:[%s4925_s11 + $0x190] sm:$0xff] %v927_v19  ;;  %v929_v20 = vld [vmem:[%s4920_s29 + $0x660] sm:$0xff] }
  0x76   : > { %v931_v21 = vld [vmem:[%s4920_s29 + $0x680] sm:$0xff]  ;;  %930 = vst [vmem:[%s4925_s11 + $0x198] sm:$0xff] %v929_v20 }
  0x77   : > { %v933_v22 = vld [vmem:[%s4920_s29 + $0x6a0] sm:$0xff]  ;;  %932 = vst [vmem:[%s4925_s11 + $0x1a0] sm:$0xff] %v931_v21 }
  0x78   : > { %934 = vst [vmem:[%s4925_s11 + $0x1a8] sm:$0xff] %v933_v22  ;;  %v935_v23 = vld [vmem:[%s4920_s29 + $0x6c0] sm:$0xff] }
  0x79   : > { %v937_v24 = vld [vmem:[%s4920_s29 + $0x6e0] sm:$0xff]  ;;  %936 = vst [vmem:[%s4925_s11 + $0x1b0] sm:$0xff] %v935_v23 }
  0x7a   : > { %v939_v25 = vld [vmem:[%s4920_s29 + $0x700] sm:$0xff]  ;;  %938 = vst [vmem:[%s4925_s11 + $0x1b8] sm:$0xff] %v937_v24 }
  0x7b   : > { %940 = vst [vmem:[%s4925_s11 + $0x1c0] sm:$0xff] %v939_v25  ;;  %v941_v26 = vld [vmem:[%s4920_s29 + $0x720] sm:$0xff] }
  0x7c   : > { %v943_v27 = vld [vmem:[%s4920_s29 + $0x740] sm:$0xff]  ;;  %942 = vst [vmem:[%s4925_s11 + $0x1c8] sm:$0xff] %v941_v26 }
  0x7d   : > { %v945_v28 = vld [vmem:[%s4920_s29 + $0x760] sm:$0xff]  ;;  %944 = vst [vmem:[%s4925_s11 + $0x1d0] sm:$0xff] %v943_v27 }
  0x7e   : > { %946 = vst [vmem:[%s4925_s11 + $0x1d8] sm:$0xff] %v945_v28  ;;  %v947_v29 = vld [vmem:[%s4920_s29 + $0x780] sm:$0xff] }
  0x7f   : > { %v949_v30 = vld [vmem:[%s4920_s29 + $0x7a0] sm:$0xff]  ;;  %948 = vst [vmem:[%s4925_s11 + $0x1e0] sm:$0xff] %v947_v29 }
  0x80   : > { %v951_v31 = vld [vmem:[%s4920_s29 + $0x7c0] sm:$0xff]  ;;  %950 = vst [vmem:[%s4925_s11 + $0x1e8] sm:$0xff] %v949_v30 }
  0x81   : > { %952 = vst [vmem:[%s4925_s11 + $0x1f0] sm:$0xff] %v951_v31  ;;  %v953_v32 = vld [vmem:[%s4920_s29 + $0x7e0] sm:$0xff] }
  0x82   : > { %v955_v33 = vld [vmem:[%s4920_s29 + $0x800] sm:$0xff]  ;;  %954 = vst [vmem:[%s4925_s11 + $0x1f8] sm:$0xff] %v953_v32 }
  0x83   : > { %v957_v34 = vld [vmem:[%s4920_s29 + $0x820] sm:$0xff]  ;;  %956 = vst [vmem:[%s4925_s11 + $0x200] sm:$0xff] %v955_v33 }
  0x84   : > { %958 = vst [vmem:[%s4925_s11 + $0x208] sm:$0xff] %v957_v34  ;;  %v959_v35 = vld [vmem:[%s4920_s29 + $0x840] sm:$0xff] }
  0x85   : > { %v961_v36 = vld [vmem:[%s4920_s29 + $0x860] sm:$0xff]  ;;  %960 = vst [vmem:[%s4925_s11 + $0x210] sm:$0xff] %v959_v35 }
  0x86   : > { %v963_v37 = vld [vmem:[%s4920_s29 + $0x880] sm:$0xff]  ;;  %962 = vst [vmem:[%s4925_s11 + $0x218] sm:$0xff] %v961_v36 }
  0x87   : > { %964 = vst [vmem:[%s4925_s11 + $0x220] sm:$0xff] %v963_v37  ;;  %v965_v38 = vld [vmem:[%s4920_s29 + $0x8a0] sm:$0xff] }
  0x88   : > { %v967_v39 = vld [vmem:[%s4920_s29 + $0x8c0] sm:$0xff]  ;;  %966 = vst [vmem:[%s4925_s11 + $0x228] sm:$0xff] %v965_v38 }
  0x89   : > { %v969_v40 = vld [vmem:[%s4920_s29 + $0x8e0] sm:$0xff]  ;;  %968 = vst [vmem:[%s4925_s11 + $0x230] sm:$0xff] %v967_v39 }
  0x8a   : > { %970 = vst [vmem:[%s4925_s11 + $0x238] sm:$0xff] %v969_v40  ;;  %v971_v41 = vld [vmem:[%s4920_s29 + $0x900] sm:$0xff] }
  0x8b   : > { %v973_v42 = vld [vmem:[%s4920_s29 + $0x920] sm:$0xff]  ;;  %972 = vst [vmem:[%s4925_s11 + $0x240] sm:$0xff] %v971_v41 }
  0x8c   : > { %v975_v43 = vld [vmem:[%s4920_s29 + $0x940] sm:$0xff]  ;;  %974 = vst [vmem:[%s4925_s11 + $0x248] sm:$0xff] %v973_v42 }
  0x8d   : > { %976 = vst [vmem:[%s4925_s11 + $0x250] sm:$0xff] %v975_v43  ;;  %v977_v44 = vld [vmem:[%s4920_s29 + $0x960] sm:$0xff] }
  0x8e   : > { %v979_v45 = vld [vmem:[%s4920_s29 + $0x980] sm:$0xff]  ;;  %978 = vst [vmem:[%s4925_s11 + $0x258] sm:$0xff] %v977_v44 }
  0x8f   : > { %v981_v46 = vld [vmem:[%s4920_s29 + $0x9a0] sm:$0xff]  ;;  %980 = vst [vmem:[%s4925_s11 + $0x260] sm:$0xff] %v979_v45 }
  0x90   : > { %982 = vst [vmem:[%s4925_s11 + $0x268] sm:$0xff] %v981_v46  ;;  %v983_v47 = vld [vmem:[%s4920_s29 + $0x9c0] sm:$0xff] }
  0x91   : > { %v985_v48 = vld [vmem:[%s4920_s29 + $0x9e0] sm:$0xff]  ;;  %984 = vst [vmem:[%s4925_s11 + $0x270] sm:$0xff] %v983_v47 }
  0x92   : > { %v987_v49 = vld [vmem:[%s4920_s29 + $0xa00] sm:$0xff]  ;;  %986 = vst [vmem:[%s4925_s11 + $0x278] sm:$0xff] %v985_v48 }
  0x93   : > { %988 = vst [vmem:[%s4925_s11 + $0x280] sm:$0xff] %v987_v49  ;;  %v989_v50 = vld [vmem:[%s4920_s29 + $0xa20] sm:$0xff] }
  0x94   : > { %v991_v51 = vld [vmem:[%s4920_s29 + $0xa40] sm:$0xff]  ;;  %990 = vst [vmem:[%s4925_s11 + $0x288] sm:$0xff] %v989_v50 }
  0x95   : > { %v993_v52 = vld [vmem:[%s4920_s29 + $0xa60] sm:$0xff]  ;;  %992 = vst [vmem:[%s4925_s11 + $0x290] sm:$0xff] %v991_v51 }
  0x96   : > { %994 = vst [vmem:[%s4925_s11 + $0x298] sm:$0xff] %v993_v52  ;;  %v995_v53 = vld [vmem:[%s4920_s29 + $0xa80] sm:$0xff] }
  0x97   : > { %v997_v54 = vld [vmem:[%s4920_s29 + $0xaa0] sm:$0xff]  ;;  %996 = vst [vmem:[%s4925_s11 + $0x2a0] sm:$0xff] %v995_v53 }
  0x98   : > { %v999_v55 = vld [vmem:[%s4920_s29 + $0xac0] sm:$0xff]  ;;  %998 = vst [vmem:[%s4925_s11 + $0x2a8] sm:$0xff] %v997_v54 }
  0x99   : > { %1000 = vst [vmem:[%s4925_s11 + $0x2b0] sm:$0xff] %v999_v55  ;;  %v1001_v56 = vld [vmem:[%s4920_s29 + $0xae0] sm:$0xff] }
  0x9a   : > { %v1003_v57 = vld [vmem:[%s4920_s29 + $0xb00] sm:$0xff]  ;;  %1002 = vst [vmem:[%s4925_s11 + $0x2b8] sm:$0xff] %v1001_v56 }
  0x9b   : > { %v1005_v58 = vld [vmem:[%s4920_s29 + $0xb20] sm:$0xff]  ;;  %1004 = vst [vmem:[%s4925_s11 + $0x2c0] sm:$0xff] %v1003_v57 }
  0x9c   : > { %1006 = vst [vmem:[%s4925_s11 + $0x2c8] sm:$0xff] %v1005_v58  ;;  %v1007_v59 = vld [vmem:[%s4920_s29 + $0xb40] sm:$0xff] }
  0x9d   : > { %v1009_v60 = vld [vmem:[%s4920_s29 + $0xb60] sm:$0xff]  ;;  %1008 = vst [vmem:[%s4925_s11 + $0x2d0] sm:$0xff] %v1007_v59 }
  0x9e   : > { %v1011_v61 = vld [vmem:[%s4920_s29 + $0xb80] sm:$0xff]  ;;  %1010 = vst [vmem:[%s4925_s11 + $0x2d8] sm:$0xff] %v1009_v60 }
  0x9f   : > { %1012 = vst [vmem:[%s4925_s11 + $0x2e0] sm:$0xff] %v1011_v61  ;;  %v1013_v62 = vld [vmem:[%s4920_s29 + $0xba0] sm:$0xff] }
  0xa0   : > { %v1015_v63 = vld [vmem:[%s4920_s29 + $0xbc0] sm:$0xff]  ;;  %1014 = vst [vmem:[%s4925_s11 + $0x2e8] sm:$0xff] %v1013_v62 }
  0xa1   : > { %v1017_v0 = vld [vmem:[%s4920_s29 + $0xbe0] sm:$0xff]  ;;  %1016 = vst [vmem:[%s4925_s11 + $0x2f0] sm:$0xff] %v1015_v63 }
  0xa2   : > { %1018 = vst [vmem:[%s4925_s11 + $0x2f8] sm:$0xff] %v1017_v0  ;;  %v1019_v1 = vld [vmem:[%s4920_s29 + $0xc00] sm:$0xff] }
  0xa3   : > { %v1021_v2 = vld [vmem:[%s4920_s29 + $0xc20] sm:$0xff]  ;;  %1020 = vst [vmem:[%s4925_s11 + $0x300] sm:$0xff] %v1019_v1 }
  0xa4   : > { %v1023_v3 = vld [vmem:[%s4920_s29 + $0xc40] sm:$0xff]  ;;  %1022 = vst [vmem:[%s4925_s11 + $0x308] sm:$0xff] %v1021_v2 }
  0xa5   : > { %1024 = vst [vmem:[%s4925_s11 + $0x310] sm:$0xff] %v1023_v3  ;;  %v1025_v4 = vld [vmem:[%s4920_s29 + $0xc60] sm:$0xff] }
  0xa6   : > { %v1027_v5 = vld [vmem:[%s4920_s29 + $0xc80] sm:$0xff]  ;;  %1026 = vst [vmem:[%s4925_s11 + $0x318] sm:$0xff] %v1025_v4 }
  0xa7   : > { %v1029_v6 = vld [vmem:[%s4920_s29 + $0xca0] sm:$0xff]  ;;  %1028 = vst [vmem:[%s4925_s11 + $0x320] sm:$0xff] %v1027_v5 }
  0xa8   : > { %1030 = vst [vmem:[%s4925_s11 + $0x328] sm:$0xff] %v1029_v6  ;;  %v1031_v7 = vld [vmem:[%s4920_s29 + $0xcc0] sm:$0xff] }
  0xa9   : > { %v1033_v8 = vld [vmem:[%s4920_s29 + $0xce0] sm:$0xff]  ;;  %1032 = vst [vmem:[%s4925_s11 + $0x330] sm:$0xff] %v1031_v7 }
  0xaa   : > { %v1035_v9 = vld [vmem:[%s4920_s29 + $0xd00] sm:$0xff]  ;;  %1034 = vst [vmem:[%s4925_s11 + $0x338] sm:$0xff] %v1033_v8 }
  0xab   : > { %1036 = vst [vmem:[%s4925_s11 + $0x340] sm:$0xff] %v1035_v9  ;;  %v1037_v10 = vld [vmem:[%s4920_s29 + $0xd20] sm:$0xff] }
  0xac   : > { %v1039_v11 = vld [vmem:[%s4920_s29 + $0xd40] sm:$0xff]  ;;  %1038 = vst [vmem:[%s4925_s11 + $0x348] sm:$0xff] %v1037_v10 }
  0xad   : > { %v1041_v12 = vld [vmem:[%s4920_s29 + $0xd60] sm:$0xff]  ;;  %1040 = vst [vmem:[%s4925_s11 + $0x350] sm:$0xff] %v1039_v11 }
  0xae   : > { %1042 = vst [vmem:[%s4925_s11 + $0x358] sm:$0xff] %v1041_v12  ;;  %v1043_v13 = vld [vmem:[%s4920_s29 + $0xd80] sm:$0xff] }
  0xaf   : > { %v1045_v14 = vld [vmem:[%s4920_s29 + $0xda0] sm:$0xff]  ;;  %1044 = vst [vmem:[%s4925_s11 + $0x360] sm:$0xff] %v1043_v13 }
  0xb0   : > { %v1047_v15 = vld [vmem:[%s4920_s29 + $0xdc0] sm:$0xff]  ;;  %1046 = vst [vmem:[%s4925_s11 + $0x368] sm:$0xff] %v1045_v14 }
  0xb1   : > { %1048 = vst [vmem:[%s4925_s11 + $0x370] sm:$0xff] %v1047_v15  ;;  %v1049_v16 = vld [vmem:[%s4920_s29 + $0xde0] sm:$0xff] }
  0xb2   : > { %v1051_v17 = vld [vmem:[%s4920_s29 + $0xe00] sm:$0xff]  ;;  %1050 = vst [vmem:[%s4925_s11 + $0x378] sm:$0xff] %v1049_v16 }
  0xb3   : > { %v1053_v18 = vld [vmem:[%s4920_s29 + $0xe20] sm:$0xff]  ;;  %1052 = vst [vmem:[%s4925_s11 + $0x380] sm:$0xff] %v1051_v17 }
  0xb4   : > { %1054 = vst [vmem:[%s4925_s11 + $0x388] sm:$0xff] %v1053_v18  ;;  %v1055_v19 = vld [vmem:[%s4920_s29 + $0xe40] sm:$0xff] }
  0xb5   : > { %v1057_v20 = vld [vmem:[%s4920_s29 + $0xe60] sm:$0xff]  ;;  %1056 = vst [vmem:[%s4925_s11 + $0x390] sm:$0xff] %v1055_v19 }
  0xb6   : > { %v1059_v21 = vld [vmem:[%s4920_s29 + $0xe80] sm:$0xff]  ;;  %1058 = vst [vmem:[%s4925_s11 + $0x398] sm:$0xff] %v1057_v20 }
  0xb7   : > { %1060 = vst [vmem:[%s4925_s11 + $0x3a0] sm:$0xff] %v1059_v21  ;;  %v1061_v22 = vld [vmem:[%s4920_s29 + $0xea0] sm:$0xff] }
  0xb8   : > { %v1063_v23 = vld [vmem:[%s4920_s29 + $0xec0] sm:$0xff]  ;;  %1062 = vst [vmem:[%s4925_s11 + $0x3a8] sm:$0xff] %v1061_v22 }
  0xb9   : > { %v1065_v24 = vld [vmem:[%s4920_s29 + $0xee0] sm:$0xff]  ;;  %1064 = vst [vmem:[%s4925_s11 + $0x3b0] sm:$0xff] %v1063_v23 }
  0xba   : > { %1066 = vst [vmem:[%s4925_s11 + $0x3b8] sm:$0xff] %v1065_v24  ;;  %v1067_v25 = vld [vmem:[%s4920_s29 + $0xf00] sm:$0xff] }
  0xbb   : > { %v1069_v26 = vld [vmem:[%s4920_s29 + $0xf20] sm:$0xff]  ;;  %1068 = vst [vmem:[%s4925_s11 + $0x3c0] sm:$0xff] %v1067_v25 }
  0xbc   : > { %v1071_v27 = vld [vmem:[%s4920_s29 + $0xf40] sm:$0xff]  ;;  %1070 = vst [vmem:[%s4925_s11 + $0x3c8] sm:$0xff] %v1069_v26 }
  0xbd   : > { %1072 = vst [vmem:[%s4925_s11 + $0x3d0] sm:$0xff] %v1071_v27  ;;  %v1073_v28 = vld [vmem:[%s4920_s29 + $0xf60] sm:$0xff] }
  0xbe   : > { %v1075_v29 = vld [vmem:[%s4920_s29 + $0xf80] sm:$0xff]  ;;  %1074 = vst [vmem:[%s4925_s11 + $0x3d8] sm:$0xff] %v1073_v28 }
  0xbf   : > { %v1077_v30 = vld [vmem:[%s4920_s29 + $0xfa0] sm:$0xff]  ;;  %1076 = vst [vmem:[%s4925_s11 + $0x3e0] sm:$0xff] %v1075_v29 }
  0xc0   : > { %1078 = vst [vmem:[%s4925_s11 + $0x3e8] sm:$0xff] %v1077_v30  ;;  %v1079_v31 = vld [vmem:[%s4920_s29 + $0xfc0] sm:$0xff] }
  0xc1   : > { %v1081_v32 = vld [vmem:[%s4920_s29 + $0xfe0] sm:$0xff]  ;;  %1080 = vst [vmem:[%s4925_s11 + $0x3f0] sm:$0xff] %v1079_v31 }
  0xc2   : > { %v1083_v33 = vld [vmem:[%s4920_s29 + $0x1000] sm:$0xff]  ;;  %1082 = vst [vmem:[%s4925_s11 + $0x3f8] sm:$0xff] %v1081_v32 }
  0xc3   : > { %1084 = vst [vmem:[%s4925_s11 + $0x400] sm:$0xff] %v1083_v33  ;;  %v1085_v34 = vld [vmem:[%s4920_s29 + $0x1020] sm:$0xff] }
  0xc4   : > { %v1087_v35 = vld [vmem:[%s4920_s29 + $0x1040] sm:$0xff]  ;;  %1086 = vst [vmem:[%s4925_s11 + $0x408] sm:$0xff] %v1085_v34 }
  0xc5   : > { %v1089_v36 = vld [vmem:[%s4920_s29 + $0x1060] sm:$0xff]  ;;  %1088 = vst [vmem:[%s4925_s11 + $0x410] sm:$0xff] %v1087_v35 }
  0xc6   : > { %1090 = vst [vmem:[%s4925_s11 + $0x418] sm:$0xff] %v1089_v36  ;;  %v1091_v37 = vld [vmem:[%s4920_s29 + $0x1080] sm:$0xff] }
  0xc7   : > { %v1093_v38 = vld [vmem:[%s4920_s29 + $0x10a0] sm:$0xff]  ;;  %1092 = vst [vmem:[%s4925_s11 + $0x420] sm:$0xff] %v1091_v37 }
  0xc8   : > { %v1095_v39 = vld [vmem:[%s4920_s29 + $0x10c0] sm:$0xff]  ;;  %1094 = vst [vmem:[%s4925_s11 + $0x428] sm:$0xff] %v1093_v38 }
  0xc9   : > { %1096 = vst [vmem:[%s4925_s11 + $0x430] sm:$0xff] %v1095_v39  ;;  %v1097_v40 = vld [vmem:[%s4920_s29 + $0x10e0] sm:$0xff] }
  0xca   : > { %v1099_v41 = vld [vmem:[%s4920_s29 + $0x1100] sm:$0xff]  ;;  %1098 = vst [vmem:[%s4925_s11 + $0x438] sm:$0xff] %v1097_v40 }
  0xcb   : > { %v1101_v42 = vld [vmem:[%s4920_s29 + $0x1120] sm:$0xff]  ;;  %1100 = vst [vmem:[%s4925_s11 + $0x440] sm:$0xff] %v1099_v41 }
  0xcc   : > { %1102 = vst [vmem:[%s4925_s11 + $0x448] sm:$0xff] %v1101_v42  ;;  %v1103_v43 = vld [vmem:[%s4920_s29 + $0x1140] sm:$0xff] }
  0xcd   : > { %v1105_v44 = vld [vmem:[%s4920_s29 + $0x1160] sm:$0xff]  ;;  %1104 = vst [vmem:[%s4925_s11 + $0x450] sm:$0xff] %v1103_v43 }
  0xce   : > { %v1107_v45 = vld [vmem:[%s4920_s29 + $0x1180] sm:$0xff]  ;;  %1106 = vst [vmem:[%s4925_s11 + $0x458] sm:$0xff] %v1105_v44 }
  0xcf   : > { %1108 = vst [vmem:[%s4925_s11 + $0x460] sm:$0xff] %v1107_v45  ;;  %v1109_v46 = vld [vmem:[%s4920_s29 + $0x11a0] sm:$0xff] }
  0xd0   : > { %v1111_v47 = vld [vmem:[%s4920_s29 + $0x11c0] sm:$0xff]  ;;  %1110 = vst [vmem:[%s4925_s11 + $0x468] sm:$0xff] %v1109_v46 }
  0xd1   : > { %v1113_v48 = vld [vmem:[%s4920_s29 + $0x11e0] sm:$0xff]  ;;  %1112 = vst [vmem:[%s4925_s11 + $0x470] sm:$0xff] %v1111_v47 }
  0xd2   : > { %1114 = vst [vmem:[%s4925_s11 + $0x478] sm:$0xff] %v1113_v48  ;;  %v1115_v49 = vld [vmem:[%s4920_s29 + $0x1200] sm:$0xff] }
  0xd3   : > { %v1117_v50 = vld [vmem:[%s4920_s29 + $0x1220] sm:$0xff]  ;;  %1116 = vst [vmem:[%s4925_s11 + $0x480] sm:$0xff] %v1115_v49 }
  0xd4   : > { %v1119_v51 = vld [vmem:[%s4920_s29 + $0x1240] sm:$0xff]  ;;  %1118 = vst [vmem:[%s4925_s11 + $0x488] sm:$0xff] %v1117_v50 }
  0xd5   : > { %1120 = vst [vmem:[%s4925_s11 + $0x490] sm:$0xff] %v1119_v51  ;;  %v1121_v52 = vld [vmem:[%s4920_s29 + $0x1260] sm:$0xff] }
  0xd6   : > { %v1123_v53 = vld [vmem:[%s4920_s29 + $0x1280] sm:$0xff]  ;;  %1122 = vst [vmem:[%s4925_s11 + $0x498] sm:$0xff] %v1121_v52 }
  0xd7   : > { %v1125_v54 = vld [vmem:[%s4920_s29 + $0x12a0] sm:$0xff]  ;;  %1124 = vst [vmem:[%s4925_s11 + $0x4a0] sm:$0xff] %v1123_v53 }
  0xd8   : > { %1126 = vst [vmem:[%s4925_s11 + $0x4a8] sm:$0xff] %v1125_v54  ;;  %v1127_v55 = vld [vmem:[%s4920_s29 + $0x12c0] sm:$0xff] }
  0xd9   : > { %v1129_v56 = vld [vmem:[%s4920_s29 + $0x12e0] sm:$0xff]  ;;  %1128 = vst [vmem:[%s4925_s11 + $0x4b0] sm:$0xff] %v1127_v55 }
  0xda   : > { %v1131_v57 = vld [vmem:[%s4920_s29 + $0x1300] sm:$0xff]  ;;  %1130 = vst [vmem:[%s4925_s11 + $0x4b8] sm:$0xff] %v1129_v56 }
  0xdb   : > { %1132 = vst [vmem:[%s4925_s11 + $0x4c0] sm:$0xff] %v1131_v57  ;;  %v1133_v58 = vld [vmem:[%s4920_s29 + $0x1320] sm:$0xff] }
  0xdc   : > { %v1135_v59 = vld [vmem:[%s4920_s29 + $0x1340] sm:$0xff]  ;;  %1134 = vst [vmem:[%s4925_s11 + $0x4c8] sm:$0xff] %v1133_v58 }
  0xdd   : > { %v1137_v60 = vld [vmem:[%s4920_s29 + $0x1360] sm:$0xff]  ;;  %1136 = vst [vmem:[%s4925_s11 + $0x4d0] sm:$0xff] %v1135_v59 }
  0xde   : > { %1138 = vst [vmem:[%s4925_s11 + $0x4d8] sm:$0xff] %v1137_v60  ;;  %v1139_v61 = vld [vmem:[%s4920_s29 + $0x1380] sm:$0xff] }
  0xdf   : > { %v1141_v62 = vld [vmem:[%s4920_s29 + $0x13a0] sm:$0xff]  ;;  %1140 = vst [vmem:[%s4925_s11 + $0x4e0] sm:$0xff] %v1139_v61 }
  0xe0   : > { %v1143_v63 = vld [vmem:[%s4920_s29 + $0x13c0] sm:$0xff]  ;;  %1142 = vst [vmem:[%s4925_s11 + $0x4e8] sm:$0xff] %v1141_v62 }
  0xe1   : > { %1144 = vst [vmem:[%s4925_s11 + $0x4f0] sm:$0xff] %v1143_v63  ;;  %v1145_v0 = vld [vmem:[%s4920_s29 + $0x13e0] sm:$0xff] }
  0xe2   : > { %v1147_v1 = vld [vmem:[%s4920_s29 + $0x1400] sm:$0xff]  ;;  %1146 = vst [vmem:[%s4925_s11 + $0x4f8] sm:$0xff] %v1145_v0 }
  0xe3   : > { %v1149_v2 = vld [vmem:[%s4920_s29 + $0x1420] sm:$0xff]  ;;  %1148 = vst [vmem:[%s4925_s11 + $0x500] sm:$0xff] %v1147_v1 }
  0xe4   : > { %1150 = vst [vmem:[%s4925_s11 + $0x508] sm:$0xff] %v1149_v2  ;;  %v1151_v3 = vld [vmem:[%s4920_s29 + $0x1440] sm:$0xff] }
  0xe5   : > { %v1153_v4 = vld [vmem:[%s4920_s29 + $0x1460] sm:$0xff]  ;;  %1152 = vst [vmem:[%s4925_s11 + $0x510] sm:$0xff] %v1151_v3 }
  0xe6   : > { %v1155_v5 = vld [vmem:[%s4920_s29 + $0x1480] sm:$0xff]  ;;  %1154 = vst [vmem:[%s4925_s11 + $0x518] sm:$0xff] %v1153_v4 }
  0xe7   : > { %1156 = vst [vmem:[%s4925_s11 + $0x520] sm:$0xff] %v1155_v5  ;;  %v1157_v6 = vld [vmem:[%s4920_s29 + $0x14a0] sm:$0xff] }
  0xe8   : > { %v1159_v7 = vld [vmem:[%s4920_s29 + $0x14c0] sm:$0xff]  ;;  %1158 = vst [vmem:[%s4925_s11 + $0x528] sm:$0xff] %v1157_v6 }
  0xe9   : > { %v1161_v8 = vld [vmem:[%s4920_s29 + $0x14e0] sm:$0xff]  ;;  %1160 = vst [vmem:[%s4925_s11 + $0x530] sm:$0xff] %v1159_v7 }
  0xea   : > { %1162 = vst [vmem:[%s4925_s11 + $0x538] sm:$0xff] %v1161_v8  ;;  %v1163_v9 = vld [vmem:[%s4920_s29 + $0x1500] sm:$0xff] }
  0xeb   : > { %v1165_v10 = vld [vmem:[%s4920_s29 + $0x1520] sm:$0xff]  ;;  %1164 = vst [vmem:[%s4925_s11 + $0x540] sm:$0xff] %v1163_v9 }
  0xec   : > { %v1167_v11 = vld [vmem:[%s4920_s29 + $0x1540] sm:$0xff]  ;;  %1166 = vst [vmem:[%s4925_s11 + $0x548] sm:$0xff] %v1165_v10 }
  0xed   : > { %1168 = vst [vmem:[%s4925_s11 + $0x550] sm:$0xff] %v1167_v11  ;;  %v1169_v12 = vld [vmem:[%s4920_s29 + $0x1560] sm:$0xff] }
  0xee   : > { %v1171_v13 = vld [vmem:[%s4920_s29 + $0x1580] sm:$0xff]  ;;  %1170 = vst [vmem:[%s4925_s11 + $0x558] sm:$0xff] %v1169_v12 }
  0xef   : > { %v1173_v14 = vld [vmem:[%s4920_s29 + $0x15a0] sm:$0xff]  ;;  %1172 = vst [vmem:[%s4925_s11 + $0x560] sm:$0xff] %v1171_v13 }
  0xf0   : > { %1174 = vst [vmem:[%s4925_s11 + $0x568] sm:$0xff] %v1173_v14  ;;  %v1175_v15 = vld [vmem:[%s4920_s29 + $0x15c0] sm:$0xff] }
  0xf1   : > { %v1177_v16 = vld [vmem:[%s4920_s29 + $0x15e0] sm:$0xff]  ;;  %1176 = vst [vmem:[%s4925_s11 + $0x570] sm:$0xff] %v1175_v15 }
  0xf2   : > { %v1179_v17 = vld [vmem:[%s4920_s29 + $0x1600] sm:$0xff]  ;;  %1178 = vst [vmem:[%s4925_s11 + $0x578] sm:$0xff] %v1177_v16 }
  0xf3   : > { %1180 = vst [vmem:[%s4925_s11 + $0x580] sm:$0xff] %v1179_v17  ;;  %v1181_v18 = vld [vmem:[%s4920_s29 + $0x1620] sm:$0xff] }
  0xf4   : > { %v1183_v19 = vld [vmem:[%s4920_s29 + $0x1640] sm:$0xff]  ;;  %1182 = vst [vmem:[%s4925_s11 + $0x588] sm:$0xff] %v1181_v18 }
  0xf5   : > { %v1185_v20 = vld [vmem:[%s4920_s29 + $0x1660] sm:$0xff]  ;;  %1184 = vst [vmem:[%s4925_s11 + $0x590] sm:$0xff] %v1183_v19 }
  0xf6   : > { %1186 = vst [vmem:[%s4925_s11 + $0x598] sm:$0xff] %v1185_v20  ;;  %v1187_v21 = vld [vmem:[%s4920_s29 + $0x1680] sm:$0xff] }
  0xf7   : > { %v1189_v22 = vld [vmem:[%s4920_s29 + $0x16a0] sm:$0xff]  ;;  %1188 = vst [vmem:[%s4925_s11 + $0x5a0] sm:$0xff] %v1187_v21 }
  0xf8   : > { %v1191_v23 = vld [vmem:[%s4920_s29 + $0x16c0] sm:$0xff]  ;;  %1190 = vst [vmem:[%s4925_s11 + $0x5a8] sm:$0xff] %v1189_v22 }
  0xf9   : > { %1192 = vst [vmem:[%s4925_s11 + $0x5b0] sm:$0xff] %v1191_v23  ;;  %v1193_v24 = vld [vmem:[%s4920_s29 + $0x16e0] sm:$0xff] }
  0xfa   : > { %v1195_v25 = vld [vmem:[%s4920_s29 + $0x1700] sm:$0xff]  ;;  %1194 = vst [vmem:[%s4925_s11 + $0x5b8] sm:$0xff] %v1193_v24 }
  0xfb   : > { %v1197_v26 = vld [vmem:[%s4920_s29 + $0x1720] sm:$0xff]  ;;  %1196 = vst [vmem:[%s4925_s11 + $0x5c0] sm:$0xff] %v1195_v25 }
  0xfc   : > { %1198 = vst [vmem:[%s4925_s11 + $0x5c8] sm:$0xff] %v1197_v26  ;;  %v1199_v27 = vld [vmem:[%s4920_s29 + $0x1740] sm:$0xff] }
  0xfd   : > { %v1201_v28 = vld [vmem:[%s4920_s29 + $0x1760] sm:$0xff]  ;;  %1200 = vst [vmem:[%s4925_s11 + $0x5d0] sm:$0xff] %v1199_v27 }
  0xfe   : > { %v1203_v29 = vld [vmem:[%s4920_s29 + $0x1780] sm:$0xff]  ;;  %1202 = vst [vmem:[%s4925_s11 + $0x5d8] sm:$0xff] %v1201_v28 }
  0xff   : > { %1204 = vst [vmem:[%s4925_s11 + $0x5e0] sm:$0xff] %v1203_v29  ;;  %v1205_v30 = vld [vmem:[%s4920_s29 + $0x17a0] sm:$0xff] }
 0x100   : > { %v1207_v31 = vld [vmem:[%s4920_s29 + $0x17c0] sm:$0xff]  ;;  %1206 = vst [vmem:[%s4925_s11 + $0x5e8] sm:$0xff] %v1205_v30 }
 0x101   : > { %v1209_v32 = vld [vmem:[%s4920_s29 + $0x17e0] sm:$0xff]  ;;  %1208 = vst [vmem:[%s4925_s11 + $0x5f0] sm:$0xff] %v1207_v31 }
 0x102   : > { %1210 = vst [vmem:[%s4925_s11 + $0x5f8] sm:$0xff] %v1209_v32  ;;  %v1211_v33 = vld [vmem:[%s4920_s29 + $0x1800] sm:$0xff] }
 0x103   : > { %v1213_v34 = vld [vmem:[%s4920_s29 + $0x1820] sm:$0xff]  ;;  %1212 = vst [vmem:[%s4925_s11 + $0x600] sm:$0xff] %v1211_v33 }
 0x104   : > { %v1215_v35 = vld [vmem:[%s4920_s29 + $0x1840] sm:$0xff]  ;;  %1214 = vst [vmem:[%s4925_s11 + $0x608] sm:$0xff] %v1213_v34 }
 0x105   : > { %1216 = vst [vmem:[%s4925_s11 + $0x610] sm:$0xff] %v1215_v35  ;;  %v1217_v36 = vld [vmem:[%s4920_s29 + $0x1860] sm:$0xff] }
 0x106   : > { %v1219_v37 = vld [vmem:[%s4920_s29 + $0x1880] sm:$0xff]  ;;  %1218 = vst [vmem:[%s4925_s11 + $0x618] sm:$0xff] %v1217_v36 }
 0x107   : > { %v1221_v38 = vld [vmem:[%s4920_s29 + $0x18a0] sm:$0xff]  ;;  %1220 = vst [vmem:[%s4925_s11 + $0x620] sm:$0xff] %v1219_v37 }
 0x108   : > { %1222 = vst [vmem:[%s4925_s11 + $0x628] sm:$0xff] %v1221_v38  ;;  %v1223_v39 = vld [vmem:[%s4920_s29 + $0x18c0] sm:$0xff] }
 0x109   : > { %v1225_v40 = vld [vmem:[%s4920_s29 + $0x18e0] sm:$0xff]  ;;  %1224 = vst [vmem:[%s4925_s11 + $0x630] sm:$0xff] %v1223_v39 }
 0x10a   : > { %v1227_v41 = vld [vmem:[%s4920_s29 + $0x1900] sm:$0xff]  ;;  %1226 = vst [vmem:[%s4925_s11 + $0x638] sm:$0xff] %v1225_v40 }
 0x10b   : > { %1228 = vst [vmem:[%s4925_s11 + $0x640] sm:$0xff] %v1227_v41  ;;  %v1229_v42 = vld [vmem:[%s4920_s29 + $0x1920] sm:$0xff] }
 0x10c   : > { %v1231_v43 = vld [vmem:[%s4920_s29 + $0x1940] sm:$0xff]  ;;  %1230 = vst [vmem:[%s4925_s11 + $0x648] sm:$0xff] %v1229_v42 }
 0x10d   : > { %v1233_v44 = vld [vmem:[%s4920_s29 + $0x1960] sm:$0xff]  ;;  %1232 = vst [vmem:[%s4925_s11 + $0x650] sm:$0xff] %v1231_v43 }
 0x10e   : > { %1234 = vst [vmem:[%s4925_s11 + $0x658] sm:$0xff] %v1233_v44  ;;  %v1235_v45 = vld [vmem:[%s4920_s29 + $0x1980] sm:$0xff] }
 0x10f   : > { %v1237_v46 = vld [vmem:[%s4920_s29 + $0x19a0] sm:$0xff]  ;;  %1236 = vst [vmem:[%s4925_s11 + $0x660] sm:$0xff] %v1235_v45 }
 0x110   : > { %v1239_v47 = vld [vmem:[%s4920_s29 + $0x19c0] sm:$0xff]  ;;  %1238 = vst [vmem:[%s4925_s11 + $0x668] sm:$0xff] %v1237_v46 }
 0x111   : > { %1240 = vst [vmem:[%s4925_s11 + $0x670] sm:$0xff] %v1239_v47  ;;  %v1241_v48 = vld [vmem:[%s4920_s29 + $0x19e0] sm:$0xff] }
 0x112   : > { %v1243_v49 = vld [vmem:[%s4920_s29 + $0x1a00] sm:$0xff]  ;;  %1242 = vst [vmem:[%s4925_s11 + $0x678] sm:$0xff] %v1241_v48 }
 0x113   : > { %v1245_v50 = vld [vmem:[%s4920_s29 + $0x1a20] sm:$0xff]  ;;  %1244 = vst [vmem:[%s4925_s11 + $0x680] sm:$0xff] %v1243_v49 }
 0x114   : > { %1246 = vst [vmem:[%s4925_s11 + $0x688] sm:$0xff] %v1245_v50  ;;  %v1247_v51 = vld [vmem:[%s4920_s29 + $0x1a40] sm:$0xff] }
 0x115   : > { %v1249_v52 = vld [vmem:[%s4920_s29 + $0x1a60] sm:$0xff]  ;;  %1248 = vst [vmem:[%s4925_s11 + $0x690] sm:$0xff] %v1247_v51 }
 0x116   : > { %v1251_v53 = vld [vmem:[%s4920_s29 + $0x1a80] sm:$0xff]  ;;  %1250 = vst [vmem:[%s4925_s11 + $0x698] sm:$0xff] %v1249_v52 }
 0x117   : > { %1252 = vst [vmem:[%s4925_s11 + $0x6a0] sm:$0xff] %v1251_v53  ;;  %v1253_v54 = vld [vmem:[%s4920_s29 + $0x1aa0] sm:$0xff] }
 0x118   : > { %v1255_v55 = vld [vmem:[%s4920_s29 + $0x1ac0] sm:$0xff]  ;;  %1254 = vst [vmem:[%s4925_s11 + $0x6a8] sm:$0xff] %v1253_v54 }
 0x119   : > { %v1257_v56 = vld [vmem:[%s4920_s29 + $0x1ae0] sm:$0xff]  ;;  %1256 = vst [vmem:[%s4925_s11 + $0x6b0] sm:$0xff] %v1255_v55 }
 0x11a   : > { %1258 = vst [vmem:[%s4925_s11 + $0x6b8] sm:$0xff] %v1257_v56  ;;  %v1259_v57 = vld [vmem:[%s4920_s29 + $0x1b00] sm:$0xff] }
 0x11b   : > { %v1261_v58 = vld [vmem:[%s4920_s29 + $0x1b20] sm:$0xff]  ;;  %1260 = vst [vmem:[%s4925_s11 + $0x6c0] sm:$0xff] %v1259_v57 }
 0x11c   : > { %v1263_v59 = vld [vmem:[%s4920_s29 + $0x1b40] sm:$0xff]  ;;  %1262 = vst [vmem:[%s4925_s11 + $0x6c8] sm:$0xff] %v1261_v58 }
 0x11d   : > { %1264 = vst [vmem:[%s4925_s11 + $0x6d0] sm:$0xff] %v1263_v59  ;;  %v1265_v60 = vld [vmem:[%s4920_s29 + $0x1b60] sm:$0xff] }
 0x11e   : > { %v1267_v61 = vld [vmem:[%s4920_s29 + $0x1b80] sm:$0xff]  ;;  %1266 = vst [vmem:[%s4925_s11 + $0x6d8] sm:$0xff] %v1265_v60 }
 0x11f   : > { %v1269_v62 = vld [vmem:[%s4920_s29 + $0x1ba0] sm:$0xff]  ;;  %1268 = vst [vmem:[%s4925_s11 + $0x6e0] sm:$0xff] %v1267_v61 }
 0x120   : > { %1270 = vst [vmem:[%s4925_s11 + $0x6e8] sm:$0xff] %v1269_v62  ;;  %v1271_v63 = vld [vmem:[%s4920_s29 + $0x1bc0] sm:$0xff] }
 0x121   : > { %v1273_v0 = vld [vmem:[%s4920_s29 + $0x1be0] sm:$0xff]  ;;  %1272 = vst [vmem:[%s4925_s11 + $0x6f0] sm:$0xff] %v1271_v63 }
 0x122   : > { %v1275_v1 = vld [vmem:[%s4920_s29 + $0x1c00] sm:$0xff]  ;;  %1274 = vst [vmem:[%s4925_s11 + $0x6f8] sm:$0xff] %v1273_v0 }
 0x123   : > { %1276 = vst [vmem:[%s4925_s11 + $0x700] sm:$0xff] %v1275_v1  ;;  %v1277_v2 = vld [vmem:[%s4920_s29 + $0x1c20] sm:$0xff] }
 0x124   : > { %v1279_v3 = vld [vmem:[%s4920_s29 + $0x1c40] sm:$0xff]  ;;  %1278 = vst [vmem:[%s4925_s11 + $0x708] sm:$0xff] %v1277_v2 }
 0x125   : > { %v1281_v4 = vld [vmem:[%s4920_s29 + $0x1c60] sm:$0xff]  ;;  %1280 = vst [vmem:[%s4925_s11 + $0x710] sm:$0xff] %v1279_v3 }
 0x126   : > { %1282 = vst [vmem:[%s4925_s11 + $0x718] sm:$0xff] %v1281_v4  ;;  %v1283_v5 = vld [vmem:[%s4920_s29 + $0x1c80] sm:$0xff] }
 0x127   : > { %v1285_v6 = vld [vmem:[%s4920_s29 + $0x1ca0] sm:$0xff]  ;;  %1284 = vst [vmem:[%s4925_s11 + $0x720] sm:$0xff] %v1283_v5 }
 0x128   : > { %v1287_v7 = vld [vmem:[%s4920_s29 + $0x1cc0] sm:$0xff]  ;;  %1286 = vst [vmem:[%s4925_s11 + $0x728] sm:$0xff] %v1285_v6 }
 0x129   : > { %1288 = vst [vmem:[%s4925_s11 + $0x730] sm:$0xff] %v1287_v7  ;;  %v1289_v8 = vld [vmem:[%s4920_s29 + $0x1ce0] sm:$0xff] }
 0x12a   : > { %v1291_v9 = vld [vmem:[%s4920_s29 + $0x1d00] sm:$0xff]  ;;  %1290 = vst [vmem:[%s4925_s11 + $0x738] sm:$0xff] %v1289_v8 }
 0x12b   : > { %v1293_v10 = vld [vmem:[%s4920_s29 + $0x1d20] sm:$0xff]  ;;  %1292 = vst [vmem:[%s4925_s11 + $0x740] sm:$0xff] %v1291_v9 }
 0x12c   : > { %1294 = vst [vmem:[%s4925_s11 + $0x748] sm:$0xff] %v1293_v10  ;;  %v1295_v11 = vld [vmem:[%s4920_s29 + $0x1d40] sm:$0xff] }
 0x12d   : > { %v1297_v12 = vld [vmem:[%s4920_s29 + $0x1d60] sm:$0xff]  ;;  %1296 = vst [vmem:[%s4925_s11 + $0x750] sm:$0xff] %v1295_v11 }
 0x12e   : > { %v1299_v13 = vld [vmem:[%s4920_s29 + $0x1d80] sm:$0xff]  ;;  %1298 = vst [vmem:[%s4925_s11 + $0x758] sm:$0xff] %v1297_v12 }
 0x12f   : > { %1300 = vst [vmem:[%s4925_s11 + $0x760] sm:$0xff] %v1299_v13  ;;  %v1301_v14 = vld [vmem:[%s4920_s29 + $0x1da0] sm:$0xff] }
 0x130   : > { %v1303_v15 = vld [vmem:[%s4920_s29 + $0x1dc0] sm:$0xff]  ;;  %1302 = vst [vmem:[%s4925_s11 + $0x768] sm:$0xff] %v1301_v14 }
 0x131   : > { %v1305_v16 = vld [vmem:[%s4920_s29 + $0x1de0] sm:$0xff]  ;;  %1304 = vst [vmem:[%s4925_s11 + $0x770] sm:$0xff] %v1303_v15 }
 0x132   : > { %1306 = vst [vmem:[%s4925_s11 + $0x778] sm:$0xff] %v1305_v16  ;;  %v1307_v17 = vld [vmem:[%s4920_s29 + $0x1e00] sm:$0xff] }
 0x133   : > { %v1309_v18 = vld [vmem:[%s4920_s29 + $0x1e20] sm:$0xff]  ;;  %1308 = vst [vmem:[%s4925_s11 + $0x780] sm:$0xff] %v1307_v17 }
 0x134   : > { %v1311_v19 = vld [vmem:[%s4920_s29 + $0x1e40] sm:$0xff]  ;;  %1310 = vst [vmem:[%s4925_s11 + $0x788] sm:$0xff] %v1309_v18 }
 0x135   : > { %1312 = vst [vmem:[%s4925_s11 + $0x790] sm:$0xff] %v1311_v19  ;;  %v1313_v20 = vld [vmem:[%s4920_s29 + $0x1e60] sm:$0xff] }
 0x136   : > { %v1315_v21 = vld [vmem:[%s4920_s29 + $0x1e80] sm:$0xff]  ;;  %1314 = vst [vmem:[%s4925_s11 + $0x798] sm:$0xff] %v1313_v20 }
 0x137   : > { %v1317_v22 = vld [vmem:[%s4920_s29 + $0x1ea0] sm:$0xff]  ;;  %1316 = vst [vmem:[%s4925_s11 + $0x7a0] sm:$0xff] %v1315_v21 }
 0x138   : > { %1318 = vst [vmem:[%s4925_s11 + $0x7a8] sm:$0xff] %v1317_v22  ;;  %v1319_v23 = vld [vmem:[%s4920_s29 + $0x1ec0] sm:$0xff] }
 0x139   : > { %v1321_v24 = vld [vmem:[%s4920_s29 + $0x1ee0] sm:$0xff]  ;;  %1320 = vst [vmem:[%s4925_s11 + $0x7b0] sm:$0xff] %v1319_v23 }
 0x13a   : > { %v1323_v25 = vld [vmem:[%s4920_s29 + $0x1f00] sm:$0xff]  ;;  %1322 = vst [vmem:[%s4925_s11 + $0x7b8] sm:$0xff] %v1321_v24 }
 0x13b   : > { %1324 = vst [vmem:[%s4925_s11 + $0x7c0] sm:$0xff] %v1323_v25  ;;  %v1325_v26 = vld [vmem:[%s4920_s29 + $0x1f20] sm:$0xff] }
 0x13c   : > { %v1327_v27 = vld [vmem:[%s4920_s29 + $0x1f40] sm:$0xff]  ;;  %1326 = vst [vmem:[%s4925_s11 + $0x7c8] sm:$0xff] %v1325_v26 }
 0x13d   : > { %v1329_v28 = vld [vmem:[%s4920_s29 + $0x1f60] sm:$0xff]  ;;  %1328 = vst [vmem:[%s4925_s11 + $0x7d0] sm:$0xff] %v1327_v27 }
 0x13e   : > { %1330 = vst [vmem:[%s4925_s11 + $0x7d8] sm:$0xff] %v1329_v28  ;;  %v1331_v29 = vld [vmem:[%s4920_s29 + $0x1f80] sm:$0xff] }
 0x13f   : > { %v1333_v30 = vld [vmem:[%s4920_s29 + $0x1fa0] sm:$0xff]  ;;  %1332 = vst [vmem:[%s4925_s11 + $0x7e0] sm:$0xff] %v1331_v29 }
 0x140   : > { %v1335_v31 = vld [vmem:[%s4920_s29 + $0x1fc0] sm:$0xff]  ;;  %1334 = vst [vmem:[%s4925_s11 + $0x7e8] sm:$0xff] %v1333_v30 }
 0x141   : > { %1336 = vst [vmem:[%s4925_s11 + $0x7f0] sm:$0xff] %v1335_v31  ;;  %v1337_v32 = vld [vmem:[%s4920_s29 + $0x1fe0] sm:$0xff] }
 0x142   : > { %1338 = vst [vmem:[%s4925_s11 + $0x7f8] sm:$0xff] %v1337_v32 }
 0x143 PF: > { %p3841_p0 = scmp.ge.s32.totalorder %s4706_s26, 1  ;;  %p1351_p1 = scmp.lt.s32.totalorder %s4706_s26, 17 }
 0x145   : > { %p1352_p2 = pnand %p3841_p0, %p1351_p1 }
 0x146   : > { %s1358_s0 = sand.u32 (!%p1352_p2), 1, %s4682_s21   ;;  %s1365_s10 = sand.u32 (!%p1352_p2), 1, %s4674_s19  }
 0x147   : > { %1355 = sbr.rel (%p1352_p2) target bundleno = 963 (0x3c3), region = 89  ;;  %s3842_s27 = sshll.u32 (!%p1352_p2), %s1358_s0, 8 }
 0x148   : > { %s3843_s6 = sshll.u32 (!%p1352_p2), %s1365_s10, 11  ;;  %s1394_s12 = sand.u32 (!%p1352_p2), 1, %s4666_s17  }
 0x149   : > { %s3845_s16 = sshll.u32 (!%p1352_p2), %s4694_s24, 1  ;;  %s3844_s29 = sshll.u32 (!%p1352_p2), %s1394_s12, 6 }
 0x14a   : > { %p1402_p3 = scmp.lt.s32.totalorder (!%p1352_p2), %s3845_s16, 7  ;;  %s5448_s9 = scalar_lea.vmem (!%p1352_p2), [#allocation4], %s3842_s27 }
 0x14b   : > { %s5450_s11 = scalar_lea.vmem (!%p1352_p2), [#allocation5], %s3843_s6  ;;  %s5452_s1 = scalar_lea.vmem (!%p1352_p2), [#allocation6], %s3844_s29 }
 0x14c   : > { %s5898_s16 = smov (!%p1402_p3, %s3845_s16), 7  ;;  %p3846_p4 = scmp.ne.s32.totalorder %s4690_s23, 0 }
 0x14d   : > { %s1404_s7 = scalar_lea.vmem %s5868_s2, %s5898_s16 }
 0x14e   : > { %1411 = sbr.rel (%p3846_p4) target bundleno = 344 (0x158), region = 101 }
 0x153   : > { %v4708_v33 = vmov 0.0  }
 0x154   : > { %1412 = vst [vmem:[#allocation2 + $0x30] sm:$0xff] %v4708_v33  ;;  %1413 = vst [vmem:[#allocation2] sm:$0xff] %v4708_v33 }
 0x155   : > { %1414 = vst [vmem:[#allocation2 + $0x18] sm:$0xff] %v4708_v33  ;;  %1415 = vst [vmem:[#allocation2 + $0x10] sm:$0xff] %v4708_v33 }
 0x156   : > { %1416 = vst [vmem:[#allocation2 + $0x8] sm:$0xff] %v4708_v33  ;;  %1417 = vst [vmem:[#allocation2 + $0x20] sm:$0xff] %v4708_v33 }
 0x157   : > { %1418 = vst [vmem:[#allocation2 + $0x28] sm:$0xff] %v4708_v33  ;;  %1419 = vst [vmem:[#allocation2 + $0x38] sm:$0xff] %v4708_v33 }
 0x158 PF: > { %v4235_v34 = vld [vmem:[%s5450_s11 + $0x74] ss:$8 sps:$4 sm:$0xff]   ;;  %v4239_v36 = vld [vmem:[%s5450_s11 + $0x70] ss:$8 sps:$4 sm:$0xff]   ;;  %v4241_v38 = vld [vmem:[%s5450_s11 + $0x64] ss:$8 sps:$4 sm:$0xff]  }
 0x159   : > { %v4237_v35 = vld [vmem:[%s5450_s11 + $0x174] ss:$8 sps:$4 sm:$0xff]   ;;  %3156 = vmatprep.subr.bf16.mxu0 %v4235_v34  ;;  %v4240_v37 = vld [vmem:[%s5450_s11 + $0x170] ss:$8 sps:$4 sm:$0xff]   ;;  %v4243_v39 = vld [vmem:[%s5450_s11 + $0x164] ss:$8 sps:$4 sm:$0xff]  }
 0x15a   : > { %3209 = vmatprep.subr.bf16.mxu1 %v4237_v35  ;;  %3157 = vmatpush1.bf16.msra.mxu0 %v4239_v36  ;;  %v4245_v40 = vld [vmem:[%s5450_s11 + $0x60] ss:$8 sps:$4 sm:$0xff]   ;;  %v4247_v42 = vld [vmem:[%s5450_s11 + $0x54] ss:$8 sps:$4 sm:$0xff]   ;;  %v4251_v44 = vld [vmem:[%s5450_s11 + $0x50] ss:$8 sps:$4 sm:$0xff]  }
 0x15b   : > { %3210 = vmatpush1.bf16.msra.mxu1 %v4240_v37  ;;  %3158 = vmatprep.subr.bf16.mxu0 %v4241_v38  ;;  %v4246_v41 = vld [vmem:[%s5450_s11 + $0x160] ss:$8 sps:$4 sm:$0xff]   ;;  %v4249_v43 = vld [vmem:[%s5450_s11 + $0x154] ss:$8 sps:$4 sm:$0xff]   ;;  %v4252_v45 = vld [vmem:[%s5450_s11 + $0x150] ss:$8 sps:$4 sm:$0xff]  }
 0x15c   : > { %3211 = vmatprep.subr.bf16.mxu1 %v4243_v39  ;;  %v4253_v46 = vld [vmem:[%s5450_s11 + $0x44] ss:$8 sps:$4 sm:$0xff]   ;;  %v4257_v48 = vld [vmem:[%s5450_s11 + $0x40] ss:$8 sps:$4 sm:$0xff]   ;;  %v4259_v50 = vld [vmem:[%s5450_s11 + $0x34] ss:$8 sps:$4 sm:$0xff]  }
 0x15d   : > { %v4255_v47 = vld [vmem:[%s5450_s11 + $0x144] ss:$8 sps:$4 sm:$0xff]   ;;  %v4258_v49 = vld [vmem:[%s5450_s11 + $0x140] ss:$8 sps:$4 sm:$0xff]   ;;  %v4261_v51 = vld [vmem:[%s5450_s11 + $0x134] ss:$8 sps:$4 sm:$0xff]  }
 0x15e   : > { %3159 = vmatpush1.bf16.msra.mxu0 %v4245_v40  ;;  %v4263_v52 = vld [vmem:[%s5450_s11 + $0x30] ss:$8 sps:$4 sm:$0xff]   ;;  %v4265_v54 = vld [vmem:[%s5450_s11 + $0x24] ss:$8 sps:$4 sm:$0xff]   ;;  %v4269_v56 = vld [vmem:[%s5450_s11 + $0x20] ss:$8 sps:$4 sm:$0xff]  }
 0x15f   : > { %3212 = vmatpush1.bf16.msra.mxu1 %v4246_v41  ;;  %3160 = vmatprep.subr.bf16.mxu0 %v4247_v42  ;;  %v4264_v53 = vld [vmem:[%s5450_s11 + $0x130] ss:$8 sps:$4 sm:$0xff]   ;;  %v4267_v55 = vld [vmem:[%s5450_s11 + $0x124] ss:$8 sps:$4 sm:$0xff]   ;;  %v4270_v57 = vld [vmem:[%s5450_s11 + $0x120] ss:$8 sps:$4 sm:$0xff]  }
 0x160   : > { %3213 = vmatprep.subr.bf16.mxu1 %v4249_v43  ;;  %v4271_v58 = vld [vmem:[%s5450_s11 + $0x14] ss:$8 sps:$4 sm:$0xff]   ;;  %v4275_v60 = vld [vmem:[%s5450_s11 + $0x10] ss:$8 sps:$4 sm:$0xff]   ;;  %v4277_v62 = vld [vmem:[%s5450_s11 + $0x4] ss:$8 sps:$4 sm:$0xff]  }
 0x161   : > { %v4273_v59 = vld [vmem:[%s5450_s11 + $0x114] ss:$8 sps:$4 sm:$0xff]   ;;  %v4276_v61 = vld [vmem:[%s5450_s11 + $0x110] ss:$8 sps:$4 sm:$0xff]   ;;  %v4279_v63 = vld [vmem:[%s5450_s11 + $0x104] ss:$8 sps:$4 sm:$0xff]  }
 0x162   : > { %3161 = vmatpush1.bf16.msra.mxu0 %v4251_v44  ;;  %v4281_v0 = vld [vmem:[%s5450_s11] ss:$8 sps:$4 sm:$0xff]   ;;  %v4283_v2 = vld [vmem:[%s5450_s11 + $0xf4] ss:$8 sps:$4 sm:$0xff]   ;;  %v4287_v4 = vld [vmem:[%s5450_s11 + $0xf0] ss:$8 sps:$4 sm:$0xff]  }
 0x163   : > { %3214 = vmatpush1.bf16.msra.mxu1 %v4252_v45  ;;  %3162 = vmatprep.subr.bf16.mxu0 %v4253_v46  ;;  %v4282_v1 = vld [vmem:[%s5450_s11 + $0x100] ss:$8 sps:$4 sm:$0xff]   ;;  %v4285_v3 = vld [vmem:[%s5450_s11 + $0x1f4] ss:$8 sps:$4 sm:$0xff]   ;;  %v4288_v5 = vld [vmem:[%s5450_s11 + $0x1f0] ss:$8 sps:$4 sm:$0xff]  }
 0x164   : > { %3215 = vmatprep.subr.bf16.mxu1 %v4255_v47  ;;  %v4289_v6 = vld [vmem:[%s5450_s11 + $0xe4] ss:$8 sps:$4 sm:$0xff]   ;;  %v4293_v8 = vld [vmem:[%s5450_s11 + $0xe0] ss:$8 sps:$4 sm:$0xff]   ;;  %v4295_v10 = vld [vmem:[%s5450_s11 + $0xd4] ss:$8 sps:$4 sm:$0xff]  }
 0x165   : > { %v4291_v7 = vld [vmem:[%s5450_s11 + $0x1e4] ss:$8 sps:$4 sm:$0xff]   ;;  %v4294_v9 = vld [vmem:[%s5450_s11 + $0x1e0] ss:$8 sps:$4 sm:$0xff]   ;;  %v4297_v11 = vld [vmem:[%s5450_s11 + $0x1d4] ss:$8 sps:$4 sm:$0xff]  }
 0x166   : > { %3163 = vmatpush1.bf16.msra.mxu0 %v4257_v48  ;;  %v4299_v12 = vld [vmem:[%s5450_s11 + $0xd0] ss:$8 sps:$4 sm:$0xff]   ;;  %v4301_v14 = vld [vmem:[%s5450_s11 + $0xc4] ss:$8 sps:$4 sm:$0xff]   ;;  %v4305_v16 = vld [vmem:[%s5450_s11 + $0xc0] ss:$8 sps:$4 sm:$0xff]  }
 0x167   : > { %3216 = vmatpush1.bf16.msra.mxu1 %v4258_v49  ;;  %3164 = vmatprep.subr.bf16.mxu0 %v4259_v50  ;;  %v4300_v13 = vld [vmem:[%s5450_s11 + $0x1d0] ss:$8 sps:$4 sm:$0xff]   ;;  %v4303_v15 = vld [vmem:[%s5450_s11 + $0x1c4] ss:$8 sps:$4 sm:$0xff]   ;;  %v4306_v17 = vld [vmem:[%s5450_s11 + $0x1c0] ss:$8 sps:$4 sm:$0xff]  }
 0x168   : > { %3217 = vmatprep.subr.bf16.mxu1 %v4261_v51  ;;  %v1428_v18 = vld [vmem:[%s5448_s9] sm:$0xff]  ;;  %v1429_v20 = vld [vmem:[%s5448_s9 + $0x8] sm:$0xff]  ;;  %v4307_v22 = vld [vmem:[%s5450_s11 + $0xb4] ss:$8 sps:$4 sm:$0xff]   ;;  %p4135_p5 = scmp.ne.s32.totalorder %s4690_s23, 3 }
 0x169   : > { %v1436_v19 = vld [vmem:[%s5448_s9 + $0x40] sm:$0xff]  ;;  %v1437_v21 = vld [vmem:[%s5448_s9 + $0x48] sm:$0xff]  ;;  %v4309_v24 = vld [vmem:[%s5450_s11 + $0x1b4] ss:$8 sps:$4 sm:$0xff]  }
 0x16a   : > { %3165 = vmatpush1.bf16.msra.mxu0 %v4263_v52  ;;  %v3848_v23 = vcombine.high %v1428_v18, %v1436_v19  ;;  %v3850_v25 = vcombine.high %v1429_v20, %v1437_v21  ;;  %v4311_v26 = vld [vmem:[%s5450_s11 + $0xb0] ss:$8 sps:$4 sm:$0xff]   ;;  %v4313_v28 = vld [vmem:[%s5450_s11 + $0xa4] ss:$8 sps:$4 sm:$0xff]   ;;  %v4317_v30 = vld [vmem:[%s5450_s11 + $0xa0] ss:$8 sps:$4 sm:$0xff]   ;;  %v3847_v42 = vcombine.low %v1428_v18, %v1436_v19  ;;  %v3849_v43 = vcombine.low %v1429_v20, %v1437_v21 }
 0x16b   : > { %3218 = vmatpush1.bf16.msra.mxu1 %v4264_v53  ;;  %3166 = vmatprep.subr.bf16.mxu0 %v4265_v54  ;;  %v4312_v27 = vld [vmem:[%s5450_s11 + $0x1b0] ss:$8 sps:$4 sm:$0xff]   ;;  %v4315_v29 = vld [vmem:[%s5450_s11 + $0x1a4] ss:$8 sps:$4 sm:$0xff]   ;;  %v4318_v31 = vld [vmem:[%s5450_s11 + $0x1a0] ss:$8 sps:$4 sm:$0xff]  }
 0x16c   : > { %3219 = vmatprep.subr.bf16.mxu1 %v4267_v55  ;;  %3188 = vmatprep.mubr.bf16.mxu0 %v3848_v23  ;;  %v4319_v32 = vld [vmem:[%s5450_s11 + $0x94] ss:$8 sps:$4 sm:$0xff]   ;;  %v4323_v34 = vld [vmem:[%s5450_s11 + $0x90] ss:$8 sps:$4 sm:$0xff]   ;;  %v4325_v36 = vld [vmem:[%s5450_s11 + $0x84] ss:$8 sps:$4 sm:$0xff]  }
 0x16d   : > { %3241 = vmatprep.mubr.bf16.mxu1 %v3850_v25  ;;  %v4321_v33 = vld [vmem:[%s5450_s11 + $0x194] ss:$8 sps:$4 sm:$0xff]   ;;  %v4324_v35 = vld [vmem:[%s5450_s11 + $0x190] ss:$8 sps:$4 sm:$0xff]   ;;  %v4327_v37 = vld [vmem:[%s5450_s11 + $0x184] ss:$8 sps:$4 sm:$0xff]  }
 0x16e   : > { %3167 = vmatpush1.bf16.msra.mxu0 %v4269_v56  ;;  %v4329_v38 = vld [vmem:[%s5450_s11 + $0x80] ss:$8 sps:$4 sm:$0xff]   ;;  %v4333_v40 = vld [vmem:[%s5450_s11 + $0x274] ss:$8 sps:$4 sm:$0xff]   ;;  %v4331_v44 = vld [vmem:[%s5450_s11 + $0x270] ss:$8 sps:$4 sm:$0xff]  }
 0x16f   : > { %3220 = vmatpush1.bf16.msra.mxu1 %v4270_v57  ;;  %3168 = vmatprep.subr.bf16.mxu0 %v4271_v58  ;;  %v4330_v39 = vld [vmem:[%s5450_s11 + $0x180] ss:$8 sps:$4 sm:$0xff]   ;;  %v4336_v41 = vld [vmem:[%s5450_s11 + $0x374] ss:$8 sps:$4 sm:$0xff]   ;;  %v4334_v45 = vld [vmem:[%s5450_s11 + $0x370] ss:$8 sps:$4 sm:$0xff]  }
 0x170   : > { %3221 = vmatprep.subr.bf16.mxu1 %v4273_v59  ;;  %v4339_v46 = vld [vmem:[%s5450_s11 + $0x264] ss:$8 sps:$4 sm:$0xff]   ;;  %v4337_v48 = vld [vmem:[%s5450_s11 + $0x260] ss:$8 sps:$4 sm:$0xff]   ;;  %v4345_v50 = vld [vmem:[%s5450_s11 + $0x254] ss:$8 sps:$4 sm:$0xff]  }
 0x171   : > { %v4342_v47 = vld [vmem:[%s5450_s11 + $0x364] ss:$8 sps:$4 sm:$0xff]   ;;  %v4340_v49 = vld [vmem:[%s5450_s11 + $0x360] ss:$8 sps:$4 sm:$0xff]   ;;  %v4348_v51 = vld [vmem:[%s5450_s11 + $0x354] ss:$8 sps:$4 sm:$0xff]  }
 0x172   : > { %3169 = vmatpush1.bf16.msra.mxu0 %v4275_v60  ;;  %v4343_v52 = vld [vmem:[%s5450_s11 + $0x250] ss:$8 sps:$4 sm:$0xff]   ;;  %v4351_v54 = vld [vmem:[%s5450_s11 + $0x244] ss:$8 sps:$4 sm:$0xff]   ;;  %v4349_v56 = vld [vmem:[%s5450_s11 + $0x240] ss:$8 sps:$4 sm:$0xff]  }
 0x173   : > { %3222 = vmatpush1.bf16.msra.mxu1 %v4276_v61  ;;  %3170 = vmatprep.subr.bf16.mxu0 %v4277_v62  ;;  %v4346_v53 = vld [vmem:[%s5450_s11 + $0x350] ss:$8 sps:$4 sm:$0xff]   ;;  %v4354_v55 = vld [vmem:[%s5450_s11 + $0x344] ss:$8 sps:$4 sm:$0xff]   ;;  %v4352_v57 = vld [vmem:[%s5450_s11 + $0x340] ss:$8 sps:$4 sm:$0xff]  }
 0x174   : > { %3223 = vmatprep.subr.bf16.mxu1 %v4279_v63  ;;  %v4357_v58 = vld [vmem:[%s5450_s11 + $0x234] ss:$8 sps:$4 sm:$0xff]   ;;  %v4355_v60 = vld [vmem:[%s5450_s11 + $0x230] ss:$8 sps:$4 sm:$0xff]   ;;  %v1444_v62 = vld [vmem:[%s5448_s9 + $0x80] sm:$0xff] }
 0x175   : > { %v4360_v59 = vld [vmem:[%s5450_s11 + $0x334] ss:$8 sps:$4 sm:$0xff]   ;;  %v4358_v61 = vld [vmem:[%s5450_s11 + $0x330] ss:$8 sps:$4 sm:$0xff]   ;;  %v1452_v63 = vld [vmem:[%s5448_s9 + $0xc0] sm:$0xff] }
 0x176   : > { %3171 = vmatpush1.bf16.msra.mxu0 %v4281_v0  ;;  %v1445_v0 = vld [vmem:[%s5448_s9 + $0x88] sm:$0xff]  ;;  %v5564_v18 = vld [vmem:[%s5448_s9 + $0x18] sm:$0xff] }
 0x177   : > { %3224 = vmatpush1.bf16.msra.mxu1 %v4282_v1  ;;  %3172 = vmatprep.subr.bf16.mxu0 %v4283_v2  ;;  %v1453_v1 = vld [vmem:[%s5448_s9 + $0xc8] sm:$0xff]  ;;  %v5569_v20 = vld [vmem:[%s5448_s9 + $0x58] sm:$0xff] }
 0x178   : > { %3225 = vmatprep.subr.bf16.mxu1 %v4285_v3  ;;  %v4363_v2 = vld [vmem:[%s5450_s11 + $0x224] ss:$8 sps:$4 sm:$0xff]   ;;  %v3864_v3 = vcombine.high %v1444_v62, %v1452_v63  ;;  %v3854_v21 = vcombine.high %v5564_v18, %v5569_v20  ;;  %v4376_v23 = vld [vmem:[%s5450_s11 + $0x300] ss:$8 sps:$4 sm:$0xff]   ;;  %v4384_v25 = vld [vmem:[%s5450_s11 + $0x3f4] ss:$8 sps:$4 sm:$0xff]  }
 0x17a   : > { %3173 = vmatpush2.bf16.msra.mxu0 %v4287_v4  ;;  %v3866_v4 = vcombine.high %v1445_v0, %v1453_v1 }
 0x17b   : > { %3226 = vmatpush2.bf16.msra.mxu1 %v4288_v5  ;;  %3174 = vmatprep.subr.bf16.mxu0 %v4289_v6  ;;  %v3863_v5 = vcombine.low %v1444_v62, %v1452_v63  ;;  %v4366_v6 = vld [vmem:[%s5450_s11 + $0x324] ss:$8 sps:$4 sm:$0xff]   ;;  %v3853_v63 = vcombine.low %v5564_v18, %v5569_v20 }
 0x17c   : > { %3227 = vmatprep.subr.bf16.mxu1 %v4291_v7  ;;  %v3865_v7 = vcombine.low %v1445_v0, %v1453_v1  ;;  %v1447_v0 = vld [vmem:[%s5448_s9 + $0x98] sm:$0xff]  ;;  %v4447_v18 = vld [vmem:[%s5450_s11 + $0x444] ss:$8 sps:$4 sm:$0xff]  }
 0x17d   : > { %v1455_v1 = vld [vmem:[%s5448_s9 + $0xd8] sm:$0xff] }
 0x17e   : > { %3175 = vmatpush2.bf16.msra.mxu0 %v4293_v8  ;;  %v4361_v8 = vld [vmem:[%s5450_s11 + $0x220] ss:$8 sps:$4 sm:$0xff]  }
 0x17f   : > { %3228 = vmatpush2.bf16.msra.mxu1 %v4294_v9  ;;  %3176 = vmatprep.subr.bf16.mxu0 %v4295_v10  ;;  %v4364_v9 = vld [vmem:[%s5450_s11 + $0x320] ss:$8 sps:$4 sm:$0xff]   ;;  %v4369_v10 = vld [vmem:[%s5450_s11 + $0x214] ss:$8 sps:$4 sm:$0xff]  }
 0x180   : > { %3229 = vmatprep.subr.bf16.mxu1 %v4297_v11  ;;  %v4372_v11 = vld [vmem:[%s5450_s11 + $0x314] ss:$8 sps:$4 sm:$0xff]  }
 0x182   : > { %3177 = vmatpush2.bf16.msra.mxu0 %v4299_v12  ;;  %v4367_v12 = vld [vmem:[%s5450_s11 + $0x210] ss:$8 sps:$4 sm:$0xff]  }
 0x183   : > { %3230 = vmatpush2.bf16.msra.mxu1 %v4300_v13  ;;  %3178 = vmatprep.subr.bf16.mxu0 %v4301_v14  ;;  %v4370_v13 = vld [vmem:[%s5450_s11 + $0x310] ss:$8 sps:$4 sm:$0xff]   ;;  %v4375_v14 = vld [vmem:[%s5450_s11 + $0x204] ss:$8 sps:$4 sm:$0xff]  }
 0x184   : > { %3231 = vmatprep.subr.bf16.mxu1 %v4303_v15  ;;  %v4378_v15 = vld [vmem:[%s5450_s11 + $0x304] ss:$8 sps:$4 sm:$0xff]  }
 0x186   : > { %3179 = vmatpush2.bf16.msra.mxu0 %v4305_v16  ;;  %v5558_v16 = vld [vmem:[%s5448_s9 + $0x10] sm:$0xff] }
 0x187   : > { %3232 = vmatpush2.bf16.msra.mxu1 %v4306_v17  ;;  %3180 = vmatprep.subr.bf16.mxu0 %v4307_v22  ;;  %v5561_v17 = vld [vmem:[%s5448_s9 + $0x50] sm:$0xff]  ;;  %v4373_v22 = vld [vmem:[%s5450_s11 + $0x200] ss:$8 sps:$4 sm:$0xff]  }
 0x188   : > { %3233 = vmatprep.subr.bf16.mxu1 %v4309_v24  ;;  %v3852_v19 = vcombine.high %v5558_v16, %v5561_v17  ;;  %v4381_v24 = vld [vmem:[%s5450_s11 + $0x2f4] ss:$8 sps:$4 sm:$0xff]   ;;  %v3851_v62 = vcombine.low %v5558_v16, %v5561_v17  ;;  %v5634_v16 = vld [vmem:[%s5448_s9 + $0x28] sm:$0xff] }
 0x189   : > { %v5637_v17 = vld [vmem:[%s5448_s9 + $0x68] sm:$0xff] }
 0x18a   : > { %3181 = vmatpush2.bf16.msra.mxu0 %v4311_v26  ;;  %v4379_v26 = vld [vmem:[%s5450_s11 + $0x2f0] ss:$8 sps:$4 sm:$0xff]  }
 0x18b   : > { %3234 = vmatpush2.bf16.msra.mxu1 %v4312_v27  ;;  %3182 = vmatprep.subr.bf16.mxu0 %v4313_v28  ;;  %v4382_v27 = vld [vmem:[%s5450_s11 + $0x3f0] ss:$8 sps:$4 sm:$0xff]   ;;  %v4387_v28 = vld [vmem:[%s5450_s11 + $0x2e4] ss:$8 sps:$4 sm:$0xff]  }
 0x18c   : > { %3235 = vmatprep.subr.bf16.mxu1 %v4315_v29  ;;  %v4390_v29 = vld [vmem:[%s5450_s11 + $0x3e4] ss:$8 sps:$4 sm:$0xff]  }
 0x18e   : > { %3183 = vmatpush2.bf16.msra.mxu0 %v4317_v30  ;;  %v4385_v30 = vld [vmem:[%s5450_s11 + $0x2e0] ss:$8 sps:$4 sm:$0xff]  }
 0x18f   : > { %3236 = vmatpush2.bf16.msra.mxu1 %v4318_v31  ;;  %3184 = vmatprep.subr.bf16.mxu0 %v4319_v32  ;;  %v4388_v31 = vld [vmem:[%s5450_s11 + $0x3e0] ss:$8 sps:$4 sm:$0xff]   ;;  %v4393_v32 = vld [vmem:[%s5450_s11 + $0x2d4] ss:$8 sps:$4 sm:$0xff]  }
 0x190   : > { %3237 = vmatprep.subr.bf16.mxu1 %v4321_v33  ;;  %v4396_v33 = vld [vmem:[%s5450_s11 + $0x3d4] ss:$8 sps:$4 sm:$0xff]  }
 0x192   : > { %3185 = vmatpush2.bf16.msra.mxu0 %v4323_v34  ;;  %v4391_v34 = vld [vmem:[%s5450_s11 + $0x2d0] ss:$8 sps:$4 sm:$0xff]  }
 0x193   : > { %3238 = vmatpush2.bf16.msra.mxu1 %v4324_v35  ;;  %3186 = vmatprep.subr.bf16.mxu0 %v4325_v36  ;;  %v4394_v35 = vld [vmem:[%s5450_s11 + $0x3d0] ss:$8 sps:$4 sm:$0xff]   ;;  %v4399_v36 = vld [vmem:[%s5450_s11 + $0x2c4] ss:$8 sps:$4 sm:$0xff]  }
 0x194   : > { %3239 = vmatprep.subr.bf16.mxu1 %v4327_v37  ;;  %v4402_v37 = vld [vmem:[%s5450_s11 + $0x3c4] ss:$8 sps:$4 sm:$0xff]  }
 0x196   : > { %3187 = vmatpush2.bf16.msra.mxu0 %v4329_v38  ;;  %v4397_v38 = vld [vmem:[%s5450_s11 + $0x2c0] ss:$8 sps:$4 sm:$0xff]  }
 0x197   : > { %3240 = vmatpush2.bf16.msra.mxu1 %v4330_v39  ;;  %3262 = vmatprep.subr.bf16.mxu0 %v4333_v40  ;;  %v4400_v39 = vld [vmem:[%s5450_s11 + $0x3c0] ss:$8 sps:$4 sm:$0xff]   ;;  %v4405_v40 = vld [vmem:[%s5450_s11 + $0x2b4] ss:$8 sps:$4 sm:$0xff]  }
 0x198   : > { %3315 = vmatprep.subr.bf16.mxu1 %v4336_v41  ;;  %v4408_v41 = vld [vmem:[%s5450_s11 + $0x3b4] ss:$8 sps:$4 sm:$0xff]  }
 0x199   : > { %3189 = vmatmul.mubr.bf16.vlgmr.msra.gmra.mxu0 %v3847_v42  ;;  %v4403_v42 = vld [vmem:[%s5450_s11 + $0x2b0] ss:$8 sps:$4 sm:$0xff]  }
 0x19a   : > { %3242 = vmatmul.mubr.bf16.vlgmr.msra.gmra.mxu1 %v3849_v43  ;;  %3263 = vmatpush1.bf16.msra.mxu0 %v4331_v44  ;;  %v4406_v43 = vld [vmem:[%s5450_s11 + $0x3b0] ss:$8 sps:$4 sm:$0xff]   ;;  %v4411_v44 = vld [vmem:[%s5450_s11 + $0x2a4] ss:$8 sps:$4 sm:$0xff]  }
 0x19b   : > { %3316 = vmatpush1.bf16.msra.mxu1 %v4334_v45  ;;  %3264 = vmatprep.subr.bf16.mxu0 %v4339_v46  ;;  %v4414_v45 = vld [vmem:[%s5450_s11 + $0x3a4] ss:$8 sps:$4 sm:$0xff]   ;;  %v4409_v46 = vld [vmem:[%s5450_s11 + $0x2a0] ss:$8 sps:$4 sm:$0xff]  }
 0x19c   : > { %3317 = vmatprep.subr.bf16.mxu1 %v4342_v47  ;;  %3198 = vmatprep.mubr.bf16.mxu0 %v3864_v3  ;;  %v4412_v47 = vld [vmem:[%s5450_s11 + $0x3a0] ss:$8 sps:$4 sm:$0xff]   ;;  %v4438_v3 = vld [vmem:[%s5450_s11 + $0x564] ss:$8 sps:$4 sm:$0xff]  }
 0x19d   : > { %3251 = vmatprep.mubr.bf16.mxu1 %v3866_v4 }
 0x19e   : > { %3265 = vmatpush1.bf16.msra.mxu0 %v4337_v48  ;;  %v4417_v48 = vld [vmem:[%s5450_s11 + $0x294] ss:$8 sps:$4 sm:$0xff]  }
 0x19f   : > { %3318 = vmatpush1.bf16.msra.mxu1 %v4340_v49  ;;  %3266 = vmatprep.subr.bf16.mxu0 %v4345_v50  ;;  %v4420_v49 = vld [vmem:[%s5450_s11 + $0x394] ss:$8 sps:$4 sm:$0xff]   ;;  %v4415_v50 = vld [vmem:[%s5450_s11 + $0x290] ss:$8 sps:$4 sm:$0xff]  }
 0x1a0   : > { %3319 = vmatprep.subr.bf16.mxu1 %v4348_v51  ;;  %v4418_v51 = vld [vmem:[%s5450_s11 + $0x390] ss:$8 sps:$4 sm:$0xff]  }
 0x1a1   : > { %3199 = vmatmul.mubr.bf16.gmra.mxu0 %v3863_v5  ;;  %v3870_v5 = vcombine.high %v1447_v0, %v1455_v1 }
 0x1a2   : > { %3267 = vmatpush1.bf16.msra.mxu0 %v4343_v52  ;;  %3252 = vmatmul.mubr.bf16.gmra.mxu1 %v3865_v7  ;;  %v4423_v52 = vld [vmem:[%s5450_s11 + $0x284] ss:$8 sps:$4 sm:$0xff]   ;;  %v4436_v7 = vld [vmem:[%s5450_s11 + $0x560] ss:$8 sps:$4 sm:$0xff]  }
 0x1a3   : > { %3320 = vmatpush1.bf16.msra.mxu1 %v4346_v53  ;;  %3268 = vmatprep.subr.bf16.mxu0 %v4351_v54  ;;  %v4426_v53 = vld [vmem:[%s5450_s11 + $0x384] ss:$8 sps:$4 sm:$0xff]   ;;  %v4421_v54 = vld [vmem:[%s5450_s11 + $0x280] ss:$8 sps:$4 sm:$0xff]  }
 0x1a4   : > { %3321 = vmatprep.subr.bf16.mxu1 %v4354_v55  ;;  %3294 = vmatprep.mubr.bf16.mxu0 %v3852_v19  ;;  %v4424_v55 = vld [vmem:[%s5450_s11 + $0x380] ss:$8 sps:$4 sm:$0xff]   ;;  %v4450_v19 = vld [vmem:[%s5450_s11 + $0x544] ss:$8 sps:$4 sm:$0xff]  }
 0x1a5   : > { %3347 = vmatprep.mubr.bf16.mxu1 %v3854_v21  ;;  %v3858_v21 = vcombine.high %v5634_v16, %v5637_v17 }
 0x1a6   : > { %3269 = vmatpush1.bf16.msra.mxu0 %v4349_v56  ;;  %v4429_v56 = vld [vmem:[%s5450_s11 + $0x474] ss:$8 sps:$4 sm:$0xff]  }
 0x1a7   : > { %3322 = vmatpush1.bf16.msra.mxu1 %v4352_v57  ;;  %3270 = vmatprep.subr.bf16.mxu0 %v4357_v58  ;;  %v4432_v57 = vld [vmem:[%s5450_s11 + $0x574] ss:$8 sps:$4 sm:$0xff]   ;;  %v4427_v58 = vld [vmem:[%s5450_s11 + $0x470] ss:$8 sps:$4 sm:$0xff]  }
 0x1a8   : > { %3323 = vmatprep.subr.bf16.mxu1 %v4360_v59  ;;  %v4430_v59 = vld [vmem:[%s5450_s11 + $0x570] ss:$8 sps:$4 sm:$0xff]  }
 0x1aa   : > { %3271 = vmatpush1.bf16.msra.mxu0 %v4355_v60  ;;  %v1446_v60 = vld [vmem:[%s5448_s9 + $0x90] sm:$0xff] }
 0x1ab   : > { %3324 = vmatpush1.bf16.msra.mxu1 %v4358_v61  ;;  %3272 = vmatprep.subr.bf16.mxu0 %v4363_v2  ;;  %v1454_v61 = vld [vmem:[%s5448_s9 + $0xd0] sm:$0xff]  ;;  %v4435_v2 = vld [vmem:[%s5450_s11 + $0x464] ss:$8 sps:$4 sm:$0xff]  }
 0x1ac   : > { %3325 = vmatprep.subr.bf16.mxu1 %v4366_v6  ;;  %v3868_v4 = vcombine.high %v1446_v60, %v1454_v61  ;;  %v4433_v6 = vld [vmem:[%s5450_s11 + $0x460] ss:$8 sps:$4 sm:$0xff]  }
 0x1ae   : > { %3273 = vmatpush1.bf16.msra.mxu0 %v4361_v8  ;;  %v4441_v8 = vld [vmem:[%s5450_s11 + $0x454] ss:$8 sps:$4 sm:$0xff]  }
 0x1af   : > { %3326 = vmatpush1.bf16.msra.mxu1 %v4364_v9  ;;  %3274 = vmatprep.subr.bf16.mxu0 %v4369_v10  ;;  %v4444_v9 = vld [vmem:[%s5450_s11 + $0x554] ss:$8 sps:$4 sm:$0xff]   ;;  %v4439_v10 = vld [vmem:[%s5450_s11 + $0x450] ss:$8 sps:$4 sm:$0xff]  }
 0x1b0   : > { %3327 = vmatprep.subr.bf16.mxu1 %v4372_v11  ;;  %v4442_v11 = vld [vmem:[%s5450_s11 + $0x550] ss:$8 sps:$4 sm:$0xff]  }
 0x1b2   : > { %3275 = vmatpush1.bf16.msra.mxu0 %v4367_v12  ;;  %v5628_v12 = vld [vmem:[%s5448_s9 + $0x20] sm:$0xff] }
 0x1b3   : > { %3328 = vmatpush1.bf16.msra.mxu1 %v4370_v13  ;;  %3276 = vmatprep.subr.bf16.mxu0 %v4375_v14  ;;  %v5631_v13 = vld [vmem:[%s5448_s9 + $0x60] sm:$0xff]  ;;  %v3867_v14 = vcombine.low %v1446_v60, %v1454_v61 }
 0x1b4   : > { %3329 = vmatprep.subr.bf16.mxu1 %v4378_v15  ;;  %v3869_v15 = vcombine.low %v1447_v0, %v1455_v1  ;;  %v3856_v20 = vcombine.high %v5628_v12, %v5631_v13  ;;  %v4507_v60 = vld [vmem:[%s5450_s11 + $0x4a4] ss:$8 sps:$4 sm:$0xff]   ;;  %v4513_v0 = vld [vmem:[%s5450_s11 + $0x494] ss:$8 sps:$4 sm:$0xff]  }
 0x1b5   : > { %v4510_v61 = vld [vmem:[%s5450_s11 + $0x5a4] ss:$8 sps:$4 sm:$0xff]   ;;  %v4516_v1 = vld [vmem:[%s5450_s11 + $0x594] ss:$8 sps:$4 sm:$0xff]  }
 0x1b6   : > { %3277 = vmatpush1.bf16.msra.mxu0 %v4373_v22  ;;  %v4445_v22 = vld [vmem:[%s5450_s11 + $0x440] ss:$8 sps:$4 sm:$0xff]  }
 0x1b7   : > { %3330 = vmatpush1.bf16.msra.mxu1 %v4376_v23  ;;  %3278 = vmatprep.subr.bf16.mxu0 %v4381_v24  ;;  %v4448_v23 = vld [vmem:[%s5450_s11 + $0x540] ss:$8 sps:$4 sm:$0xff]   ;;  %v4453_v24 = vld [vmem:[%s5450_s11 + $0x434] ss:$8 sps:$4 sm:$0xff]  }
 0x1b8   : > { %3331 = vmatprep.subr.bf16.mxu1 %v4384_v25  ;;  %v4456_v25 = vld [vmem:[%s5450_s11 + $0x534] ss:$8 sps:$4 sm:$0xff]  }
 0x1ba   : > { %3279 = vmatpush2.bf16.msra.mxu0 %v4379_v26  ;;  %v4451_v26 = vld [vmem:[%s5450_s11 + $0x430] ss:$8 sps:$4 sm:$0xff]  }
 0x1bb   : > { %3332 = vmatpush2.bf16.msra.mxu1 %v4382_v27  ;;  %3280 = vmatprep.subr.bf16.mxu0 %v4387_v28  ;;  %v4454_v27 = vld [vmem:[%s5450_s11 + $0x530] ss:$8 sps:$4 sm:$0xff]   ;;  %v4459_v28 = vld [vmem:[%s5450_s11 + $0x424] ss:$8 sps:$4 sm:$0xff]  }
 0x1bc   : > { %3333 = vmatprep.subr.bf16.mxu1 %v4390_v29  ;;  %v4462_v29 = vld [vmem:[%s5450_s11 + $0x524] ss:$8 sps:$4 sm:$0xff]  }
 0x1be   : > { %3281 = vmatpush2.bf16.msra.mxu0 %v4385_v30  ;;  %v4457_v30 = vld [vmem:[%s5450_s11 + $0x420] ss:$8 sps:$4 sm:$0xff]  }
 0x1bf   : > { %3334 = vmatpush2.bf16.msra.mxu1 %v4388_v31  ;;  %3282 = vmatprep.subr.bf16.mxu0 %v4393_v32  ;;  %v4460_v31 = vld [vmem:[%s5450_s11 + $0x520] ss:$8 sps:$4 sm:$0xff]   ;;  %v4465_v32 = vld [vmem:[%s5450_s11 + $0x414] ss:$8 sps:$4 sm:$0xff]  }
 0x1c0   : > { %3335 = vmatprep.subr.bf16.mxu1 %v4396_v33  ;;  %v4468_v33 = vld [vmem:[%s5450_s11 + $0x514] ss:$8 sps:$4 sm:$0xff]  }
 0x1c2   : > { %3283 = vmatpush2.bf16.msra.mxu0 %v4391_v34  ;;  %v4463_v34 = vld [vmem:[%s5450_s11 + $0x410] ss:$8 sps:$4 sm:$0xff]  }
 0x1c3   : > { %3336 = vmatpush2.bf16.msra.mxu1 %v4394_v35  ;;  %3284 = vmatprep.subr.bf16.mxu0 %v4399_v36  ;;  %v4466_v35 = vld [vmem:[%s5450_s11 + $0x510] ss:$8 sps:$4 sm:$0xff]   ;;  %v4471_v36 = vld [vmem:[%s5450_s11 + $0x404] ss:$8 sps:$4 sm:$0xff]  }
 0x1c4   : > { %3337 = vmatprep.subr.bf16.mxu1 %v4402_v37  ;;  %v4474_v37 = vld [vmem:[%s5450_s11 + $0x504] ss:$8 sps:$4 sm:$0xff]  }
 0x1c6   : > { %3285 = vmatpush2.bf16.msra.mxu0 %v4397_v38  ;;  %v4469_v38 = vld [vmem:[%s5450_s11 + $0x400] ss:$8 sps:$4 sm:$0xff]  }
 0x1c7   : > { %3338 = vmatpush2.bf16.msra.mxu1 %v4400_v39  ;;  %3286 = vmatprep.subr.bf16.mxu0 %v4405_v40  ;;  %v4472_v39 = vld [vmem:[%s5450_s11 + $0x500] ss:$8 sps:$4 sm:$0xff]   ;;  %v4477_v40 = vld [vmem:[%s5450_s11 + $0x4f4] ss:$8 sps:$4 sm:$0xff]  }
 0x1c8   : > { %3339 = vmatprep.subr.bf16.mxu1 %v4408_v41  ;;  %v4480_v41 = vld [vmem:[%s5450_s11 + $0x5f4] ss:$8 sps:$4 sm:$0xff]  }
 0x1ca   : > { %3287 = vmatpush2.bf16.msra.mxu0 %v4403_v42  ;;  %v4475_v42 = vld [vmem:[%s5450_s11 + $0x4f0] ss:$8 sps:$4 sm:$0xff]  }
 0x1cb   : > { %3340 = vmatpush2.bf16.msra.mxu1 %v4406_v43  ;;  %3288 = vmatprep.subr.bf16.mxu0 %v4411_v44  ;;  %v4478_v43 = vld [vmem:[%s5450_s11 + $0x5f0] ss:$8 sps:$4 sm:$0xff]   ;;  %v4483_v44 = vld [vmem:[%s5450_s11 + $0x4e4] ss:$8 sps:$4 sm:$0xff]  }
 0x1cc   : > { %3341 = vmatprep.subr.bf16.mxu1 %v4414_v45  ;;  %v4486_v45 = vld [vmem:[%s5450_s11 + $0x5e4] ss:$8 sps:$4 sm:$0xff]  }
 0x1ce   : > { %3289 = vmatpush2.bf16.msra.mxu0 %v4409_v46  ;;  %v4481_v46 = vld [vmem:[%s5450_s11 + $0x4e0] ss:$8 sps:$4 sm:$0xff]  }
 0x1cf   : > { %3342 = vmatpush2.bf16.msra.mxu1 %v4412_v47  ;;  %3290 = vmatprep.subr.bf16.mxu0 %v4417_v48  ;;  %v4484_v47 = vld [vmem:[%s5450_s11 + $0x5e0] ss:$8 sps:$4 sm:$0xff]   ;;  %v4489_v48 = vld [vmem:[%s5450_s11 + $0x4d4] ss:$8 sps:$4 sm:$0xff]  }
 0x1d0   : > { %3343 = vmatprep.subr.bf16.mxu1 %v4420_v49  ;;  %v4492_v49 = vld [vmem:[%s5450_s11 + $0x5d4] ss:$8 sps:$4 sm:$0xff]  }
 0x1d2   : > { %3291 = vmatpush2.bf16.msra.mxu0 %v4415_v50  ;;  %v4487_v50 = vld [vmem:[%s5450_s11 + $0x4d0] ss:$8 sps:$4 sm:$0xff]  }
 0x1d3   : > { %3344 = vmatpush2.bf16.msra.mxu1 %v4418_v51  ;;  %3292 = vmatprep.subr.bf16.mxu0 %v4423_v52  ;;  %v4490_v51 = vld [vmem:[%s5450_s11 + $0x5d0] ss:$8 sps:$4 sm:$0xff]   ;;  %v4495_v52 = vld [vmem:[%s5450_s11 + $0x4c4] ss:$8 sps:$4 sm:$0xff]  }
 0x1d4   : > { %3345 = vmatprep.subr.bf16.mxu1 %v4426_v53  ;;  %v4498_v53 = vld [vmem:[%s5450_s11 + $0x5c4] ss:$8 sps:$4 sm:$0xff]  }
 0x1d6   : > { %3293 = vmatpush2.bf16.msra.mxu0 %v4421_v54  ;;  %v4493_v54 = vld [vmem:[%s5450_s11 + $0x4c0] ss:$8 sps:$4 sm:$0xff]  }
 0x1d7   : > { %3346 = vmatpush2.bf16.msra.mxu1 %v4424_v55  ;;  %3368 = vmatprep.subr.bf16.mxu0 %v4429_v56  ;;  %v4496_v55 = vld [vmem:[%s5450_s11 + $0x5c0] ss:$8 sps:$4 sm:$0xff]   ;;  %v4501_v56 = vld [vmem:[%s5450_s11 + $0x4b4] ss:$8 sps:$4 sm:$0xff]  }
 0x1d8   : > { %3421 = vmatprep.subr.bf16.mxu1 %v4432_v57  ;;  %v4504_v57 = vld [vmem:[%s5450_s11 + $0x5b4] ss:$8 sps:$4 sm:$0xff]  }
 0x1d9   : > { %3295 = vmatmul.mubr.bf16.vlgmr.msra.gmra.mxu0 %v3851_v62  ;;  %v4505_v62 = vld [vmem:[%s5450_s11 + $0x4a0] ss:$8 sps:$4 sm:$0xff]  }
 0x1da   : > { %3348 = vmatmul.mubr.bf16.vlgmr.msra.gmra.mxu1 %v3853_v63  ;;  %3369 = vmatpush1.bf16.msra.mxu0 %v4427_v58  ;;  %v4499_v58 = vld [vmem:[%s5450_s11 + $0x4b0] ss:$8 sps:$4 sm:$0xff]   ;;  %v4508_v63 = vld [vmem:[%s5450_s11 + $0x5a0] ss:$8 sps:$4 sm:$0xff]  }
 0x1db   : > { %3422 = vmatpush1.bf16.msra.mxu1 %v4430_v59  ;;  %3370 = vmatprep.subr.bf16.mxu0 %v4435_v2  ;;  %v4502_v59 = vld [vmem:[%s5450_s11 + $0x5b0] ss:$8 sps:$4 sm:$0xff]  }
 0x1dc   : > { %3423 = vmatprep.subr.bf16.mxu1 %v4438_v3  ;;  %3304 = vmatprep.mubr.bf16.mxu0 %v3868_v4  ;;  %v4511_v2 = vld [vmem:[%s5450_s11 + $0x490] ss:$8 sps:$4 sm:$0xff]   ;;  %v4519_v4 = vld [vmem:[%s5450_s11 + $0x484] ss:$8 sps:$4 sm:$0xff]  }
 0x1dd   : > { %3357 = vmatprep.mubr.bf16.mxu1 %v3870_v5  ;;  %v4514_v3 = vld [vmem:[%s5450_s11 + $0x590] ss:$8 sps:$4 sm:$0xff]   ;;  %v4522_v5 = vld [vmem:[%s5450_s11 + $0x584] ss:$8 sps:$4 sm:$0xff]  }
 0x1de   : > { %3371 = vmatpush1.bf16.msra.mxu0 %v4433_v6  ;;  %v4517_v6 = vld [vmem:[%s5450_s11 + $0x480] ss:$8 sps:$4 sm:$0xff]  }
 0x1df   : > { %3424 = vmatpush1.bf16.msra.mxu1 %v4436_v7  ;;  %3372 = vmatprep.subr.bf16.mxu0 %v4441_v8  ;;  %v4520_v7 = vld [vmem:[%s5450_s11 + $0x580] ss:$8 sps:$4 sm:$0xff]   ;;  %v4525_v8 = vld [vmem:[%s5450_s11 + $0x674] ss:$8 sps:$4 sm:$0xff]  }
 0x1e0   : > { %3425 = vmatprep.subr.bf16.mxu1 %v4444_v9  ;;  %v4528_v9 = vld [vmem:[%s5450_s11 + $0x774] ss:$8 sps:$4 sm:$0xff]  }
 0x1e1   : > { %3305 = vmatmul.mubr.bf16.gmra.mxu0 %v3867_v14  ;;  %v3857_v14 = vcombine.low %v5634_v16, %v5637_v17  ;;  %v4529_v16 = vld [vmem:[%s5450_s11 + $0x660] ss:$8 sps:$4 sm:$0xff]  }
 0x1e2   : > { %3358 = vmatmul.mubr.bf16.gmra.mxu1 %v3869_v15  ;;  %3373 = vmatpush1.bf16.msra.mxu0 %v4439_v10  ;;  %v1448_v10 = vld [vmem:[%s5448_s9 + $0xa0] sm:$0xff] }
 0x1e3   : > { %3426 = vmatpush1.bf16.msra.mxu1 %v4442_v11  ;;  %3374 = vmatprep.subr.bf16.mxu0 %v4447_v18  ;;  %v3855_v11 = vcombine.low %v5628_v12, %v5631_v13  ;;  %v1456_v15 = vld [vmem:[%s5448_s9 + $0xe0] sm:$0xff]  ;;  %v1449_v18 = vld [vmem:[%s5448_s9 + $0xa8] sm:$0xff] }
 0x1e4   : > { %3427 = vmatprep.subr.bf16.mxu1 %v4450_v19  ;;  %3400 = vmatprep.mubr.bf16.mxu0 %v3856_v20  ;;  %v1457_v19 = vld [vmem:[%s5448_s9 + $0xe8] sm:$0xff]  ;;  %v4523_v20 = vld [vmem:[%s5450_s11 + $0x670] ss:$8 sps:$4 sm:$0xff]   ;;  %v3872_v12 = vcombine.high %v1448_v10, %v1456_v15 }
 0x1e5   : > { %3453 = vmatprep.mubr.bf16.mxu1 %v3858_v21  ;;  %v4526_v21 = vld [vmem:[%s5450_s11 + $0x770] ss:$8 sps:$4 sm:$0xff]   ;;  %v3874_v13 = vcombine.high %v1449_v18, %v1457_v19  ;;  %v4532_v17 = vld [vmem:[%s5450_s11 + $0x760] ss:$8 sps:$4 sm:$0xff]  }
 0x1e6   : > { %3375 = vmatpush1.bf16.msra.mxu0 %v4445_v22  ;;  %v4531_v22 = vld [vmem:[%s5450_s11 + $0x664] ss:$8 sps:$4 sm:$0xff]  }
 0x1e7   : > { %3428 = vmatpush1.bf16.msra.mxu1 %v4448_v23  ;;  %3376 = vmatprep.subr.bf16.mxu0 %v4453_v24  ;;  %v4534_v23 = vld [vmem:[%s5450_s11 + $0x764] ss:$8 sps:$4 sm:$0xff]   ;;  %v4537_v24 = vld [vmem:[%s5450_s11 + $0x654] ss:$8 sps:$4 sm:$0xff]  }
 0x1e8   : > { %3429 = vmatprep.subr.bf16.mxu1 %v4456_v25  ;;  %v4540_v25 = vld [vmem:[%s5450_s11 + $0x754] ss:$8 sps:$4 sm:$0xff]  }
 0x1ea   : > { %3377 = vmatpush1.bf16.msra.mxu0 %v4451_v26  ;;  %v5714_v26 = vld [vmem:[%s5448_s9 + $0x30] sm:$0xff] }
 0x1eb   : > { %3430 = vmatpush1.bf16.msra.mxu1 %v4454_v27  ;;  %3378 = vmatprep.subr.bf16.mxu0 %v4459_v28  ;;  %v3871_v27 = vcombine.low %v1448_v10, %v1456_v15  ;;  %v3873_v28 = vcombine.low %v1449_v18, %v1457_v19  ;;  %v4595_v10 = vld [vmem:[%s5450_s11 + $0x6b0] ss:$8 sps:$4 sm:$0xff]   ;;  %v4606_v15 = vld [vmem:[%s5450_s11 + $0x7a4] ss:$8 sps:$4 sm:$0xff]   ;;  %v4601_v18 = vld [vmem:[%s5450_s11 + $0x6a0] ss:$8 sps:$4 sm:$0xff]  }
 0x1ec   : > { %3431 = vmatprep.subr.bf16.mxu1 %v4462_v29  ;;  %v5717_v29 = vld [vmem:[%s5448_s9 + $0x70] sm:$0xff]  ;;  %v4604_v19 = vld [vmem:[%s5450_s11 + $0x7a0] ss:$8 sps:$4 sm:$0xff]  }
 0x1ee   : > { %3379 = vmatpush1.bf16.msra.mxu0 %v4457_v30  ;;  %v5720_v30 = vld [vmem:[%s5448_s9 + $0x38] sm:$0xff] }
 0x1ef   : > { %3432 = vmatpush1.bf16.msra.mxu1 %v4460_v31  ;;  %3380 = vmatprep.subr.bf16.mxu0 %v4465_v32  ;;  %v5723_v31 = vld [vmem:[%s5448_s9 + $0x78] sm:$0xff] }
 0x1f0   : > { %3433 = vmatprep.subr.bf16.mxu1 %v4468_v33  ;;  %v4535_v32 = vld [vmem:[%s5450_s11 + $0x650] ss:$8 sps:$4 sm:$0xff]  }
 0x1f1   : > { %v4538_v33 = vld [vmem:[%s5450_s11 + $0x750] ss:$8 sps:$4 sm:$0xff]  }
 0x1f2   : > { %3381 = vmatpush1.bf16.msra.mxu0 %v4463_v34  ;;  %v4543_v34 = vld [vmem:[%s5450_s11 + $0x644] ss:$8 sps:$4 sm:$0xff]  }
 0x1f3   : > { %3434 = vmatpush1.bf16.msra.mxu1 %v4466_v35  ;;  %3382 = vmatprep.subr.bf16.mxu0 %v4471_v36  ;;  %v4546_v35 = vld [vmem:[%s5450_s11 + $0x744] ss:$8 sps:$4 sm:$0xff]   ;;  %v3860_v36 = vcombine.high %v5714_v26, %v5717_v29 }
 0x1f4   : > { %3435 = vmatprep.subr.bf16.mxu1 %v4474_v37  ;;  %v3862_v37 = vcombine.high %v5720_v30, %v5723_v31 }
 0x1f6   : > { %3383 = vmatpush1.bf16.msra.mxu0 %v4469_v38  ;;  %v4541_v38 = vld [vmem:[%s5450_s11 + $0x640] ss:$8 sps:$4 sm:$0xff]  }
 0x1f7   : > { %3436 = vmatpush1.bf16.msra.mxu1 %v4472_v39  ;;  %3384 = vmatprep.subr.bf16.mxu0 %v4477_v40  ;;  %v4544_v39 = vld [vmem:[%s5450_s11 + $0x740] ss:$8 sps:$4 sm:$0xff]   ;;  %v4549_v40 = vld [vmem:[%s5450_s11 + $0x634] ss:$8 sps:$4 sm:$0xff]  }
 0x1f8   : > { %3437 = vmatprep.subr.bf16.mxu1 %v4480_v41  ;;  %v4552_v41 = vld [vmem:[%s5450_s11 + $0x734] ss:$8 sps:$4 sm:$0xff]  }
 0x1fa   : > { %3385 = vmatpush2.bf16.msra.mxu0 %v4475_v42  ;;  %v4547_v42 = vld [vmem:[%s5450_s11 + $0x630] ss:$8 sps:$4 sm:$0xff]  }
 0x1fb   : > { %3438 = vmatpush2.bf16.msra.mxu1 %v4478_v43  ;;  %3386 = vmatprep.subr.bf16.mxu0 %v4483_v44  ;;  %v4550_v43 = vld [vmem:[%s5450_s11 + $0x730] ss:$8 sps:$4 sm:$0xff]   ;;  %v4555_v44 = vld [vmem:[%s5450_s11 + $0x624] ss:$8 sps:$4 sm:$0xff]  }
 0x1fc   : > { %3439 = vmatprep.subr.bf16.mxu1 %v4486_v45  ;;  %v4558_v45 = vld [vmem:[%s5450_s11 + $0x724] ss:$8 sps:$4 sm:$0xff]  }
 0x1fe   : > { %3387 = vmatpush2.bf16.msra.mxu0 %v4481_v46  ;;  %v4553_v46 = vld [vmem:[%s5450_s11 + $0x620] ss:$8 sps:$4 sm:$0xff]  }
 0x1ff   : > { %3440 = vmatpush2.bf16.msra.mxu1 %v4484_v47  ;;  %3388 = vmatprep.subr.bf16.mxu0 %v4489_v48  ;;  %v4556_v47 = vld [vmem:[%s5450_s11 + $0x720] ss:$8 sps:$4 sm:$0xff]   ;;  %v4561_v48 = vld [vmem:[%s5450_s11 + $0x614] ss:$8 sps:$4 sm:$0xff]  }
 0x200   : > { %3441 = vmatprep.subr.bf16.mxu1 %v4492_v49  ;;  %v4564_v49 = vld [vmem:[%s5450_s11 + $0x714] ss:$8 sps:$4 sm:$0xff]  }
 0x202   : > { %3389 = vmatpush2.bf16.msra.mxu0 %v4487_v50  ;;  %v4559_v50 = vld [vmem:[%s5450_s11 + $0x610] ss:$8 sps:$4 sm:$0xff]  }
 0x203   : > { %3442 = vmatpush2.bf16.msra.mxu1 %v4490_v51  ;;  %3390 = vmatprep.subr.bf16.mxu0 %v4495_v52  ;;  %v4562_v51 = vld [vmem:[%s5450_s11 + $0x710] ss:$8 sps:$4 sm:$0xff]   ;;  %v4567_v52 = vld [vmem:[%s5450_s11 + $0x604] ss:$8 sps:$4 sm:$0xff]  }
 0x204   : > { %3443 = vmatprep.subr.bf16.mxu1 %v4498_v53  ;;  %v4570_v53 = vld [vmem:[%s5450_s11 + $0x704] ss:$8 sps:$4 sm:$0xff]  }
 0x206   : > { %3391 = vmatpush2.bf16.msra.mxu0 %v4493_v54  ;;  %v4565_v54 = vld [vmem:[%s5450_s11 + $0x600] ss:$8 sps:$4 sm:$0xff]  }
 0x207   : > { %3444 = vmatpush2.bf16.msra.mxu1 %v4496_v55  ;;  %3392 = vmatprep.subr.bf16.mxu0 %v4501_v56  ;;  %v4568_v55 = vld [vmem:[%s5450_s11 + $0x700] ss:$8 sps:$4 sm:$0xff]   ;;  %v4573_v56 = vld [vmem:[%s5450_s11 + $0x6f4] ss:$8 sps:$4 sm:$0xff]  }
 0x208   : > { %3445 = vmatprep.subr.bf16.mxu1 %v4504_v57  ;;  %v4576_v57 = vld [vmem:[%s5450_s11 + $0x7f4] ss:$8 sps:$4 sm:$0xff]  }
 0x20a   : > { %3393 = vmatpush2.bf16.msra.mxu0 %v4499_v58  ;;  %v4571_v58 = vld [vmem:[%s5450_s11 + $0x6f0] ss:$8 sps:$4 sm:$0xff]  }
 0x20b   : > { %3446 = vmatpush2.bf16.msra.mxu1 %v4502_v59  ;;  %3394 = vmatprep.subr.bf16.mxu0 %v4507_v60  ;;  %v4574_v59 = vld [vmem:[%s5450_s11 + $0x7f0] ss:$8 sps:$4 sm:$0xff]   ;;  %v4579_v60 = vld [vmem:[%s5450_s11 + $0x6e4] ss:$8 sps:$4 sm:$0xff]  }
 0x20c   : > { %3447 = vmatprep.subr.bf16.mxu1 %v4510_v61  ;;  %v4582_v61 = vld [vmem:[%s5450_s11 + $0x7e4] ss:$8 sps:$4 sm:$0xff]  }
 0x20e   : > { %3395 = vmatpush2.bf16.msra.mxu0 %v4505_v62  ;;  %v4577_v62 = vld [vmem:[%s5450_s11 + $0x6e0] ss:$8 sps:$4 sm:$0xff]  }
 0x20f   : > { %3448 = vmatpush2.bf16.msra.mxu1 %v4508_v63  ;;  %3396 = vmatprep.subr.bf16.mxu0 %v4513_v0  ;;  %v4580_v63 = vld [vmem:[%s5450_s11 + $0x7e0] ss:$8 sps:$4 sm:$0xff]   ;;  %v4585_v0 = vld [vmem:[%s5450_s11 + $0x6d4] ss:$8 sps:$4 sm:$0xff]  }
 0x210   : > { %3449 = vmatprep.subr.bf16.mxu1 %v4516_v1  ;;  %v4588_v1 = vld [vmem:[%s5450_s11 + $0x7d4] ss:$8 sps:$4 sm:$0xff]  }
 0x212   : > { %3397 = vmatpush2.bf16.msra.mxu0 %v4511_v2  ;;  %v4583_v2 = vld [vmem:[%s5450_s11 + $0x6d0] ss:$8 sps:$4 sm:$0xff]  }
 0x213   : > { %3450 = vmatpush2.bf16.msra.mxu1 %v4514_v3  ;;  %3398 = vmatprep.subr.bf16.mxu0 %v4519_v4  ;;  %v4586_v3 = vld [vmem:[%s5450_s11 + $0x7d0] ss:$8 sps:$4 sm:$0xff]   ;;  %v4591_v4 = vld [vmem:[%s5450_s11 + $0x6c4] ss:$8 sps:$4 sm:$0xff]  }
 0x214   : > { %3451 = vmatprep.subr.bf16.mxu1 %v4522_v5  ;;  %v4594_v5 = vld [vmem:[%s5450_s11 + $0x7c4] ss:$8 sps:$4 sm:$0xff]  }
 0x216   : > { %3399 = vmatpush2.bf16.msra.mxu0 %v4517_v6  ;;  %v4589_v6 = vld [vmem:[%s5450_s11 + $0x6c0] ss:$8 sps:$4 sm:$0xff]  }
 0x217   : > { %3452 = vmatpush2.bf16.msra.mxu1 %v4520_v7  ;;  %3474 = vmatprep.subr.bf16.mxu0 %v4525_v8  ;;  %v4592_v7 = vld [vmem:[%s5450_s11 + $0x7c0] ss:$8 sps:$4 sm:$0xff]   ;;  %v4597_v8 = vld [vmem:[%s5450_s11 + $0x6b4] ss:$8 sps:$4 sm:$0xff]  }
 0x218   : > { %3527 = vmatprep.subr.bf16.mxu1 %v4528_v9  ;;  %v4600_v9 = vld [vmem:[%s5450_s11 + $0x7b4] ss:$8 sps:$4 sm:$0xff]  }
 0x219   : > { %3401 = vmatmul.mubr.bf16.vlgmr.msra.gmra.mxu0 %v3855_v11  ;;  %v4598_v11 = vld [vmem:[%s5450_s11 + $0x7b0] ss:$8 sps:$4 sm:$0xff]  }
 0x21a   : > { %3454 = vmatmul.mubr.bf16.vlgmr.msra.gmra.mxu1 %v3857_v14  ;;  %3475 = vmatpush1.bf16.msra.mxu0 %v4523_v20  ;;  %v4603_v14 = vld [vmem:[%s5450_s11 + $0x6a4] ss:$8 sps:$4 sm:$0xff]   ;;  %v4609_v20 = vld [vmem:[%s5450_s11 + $0x694] ss:$8 sps:$4 sm:$0xff]  }
 0x21b   : > { %3528 = vmatpush1.bf16.msra.mxu1 %v4526_v21  ;;  %3476 = vmatprep.subr.bf16.mxu0 %v4531_v22  ;;  %v4612_v21 = vld [vmem:[%s5450_s11 + $0x794] ss:$8 sps:$4 sm:$0xff]   ;;  %v4607_v22 = vld [vmem:[%s5450_s11 + $0x690] ss:$8 sps:$4 sm:$0xff]  }
 0x21c   : > { %3529 = vmatprep.subr.bf16.mxu1 %v4534_v23  ;;  %3410 = vmatprep.mubr.bf16.mxu0 %v3872_v12  ;;  %v4610_v23 = vld [vmem:[%s5450_s11 + $0x790] ss:$8 sps:$4 sm:$0xff]   ;;  %v4615_v12 = vld [vmem:[%s5450_s11 + $0x684] ss:$8 sps:$4 sm:$0xff]  }
 0x21d   : > { %3463 = vmatprep.mubr.bf16.mxu1 %v3874_v13  ;;  %v4618_v13 = vld [vmem:[%s5450_s11 + $0x784] ss:$8 sps:$4 sm:$0xff]  }
 0x21e   : > { %3477 = vmatpush1.bf16.msra.mxu0 %v4529_v16  ;;  %v4613_v16 = vld [vmem:[%s5450_s11 + $0x680] ss:$8 sps:$4 sm:$0xff]  }
 0x21f   : > { %3530 = vmatpush1.bf16.msra.mxu1 %v4532_v17  ;;  %3478 = vmatprep.subr.bf16.mxu0 %v4537_v24  ;;  %v4616_v17 = vld [vmem:[%s5450_s11 + $0x780] ss:$8 sps:$4 sm:$0xff]   ;;  %v1450_v24 = vld [vmem:[%s5448_s9 + $0xb0] sm:$0xff] }
 0x220   : > { %3531 = vmatprep.subr.bf16.mxu1 %v4540_v25  ;;  %v1458_v25 = vld [vmem:[%s5448_s9 + $0xf0] sm:$0xff] }
 0x221   : > { %3411 = vmatmul.mubr.bf16.gmra.mxu0 %v3871_v27  ;;  %v1451_v27 = vld [vmem:[%s5448_s9 + $0xb8] sm:$0xff] }
 0x222   : > { %3464 = vmatmul.mubr.bf16.gmra.mxu1 %v3873_v28  ;;  %3479 = vmatpush1.bf16.msra.mxu0 %v4535_v32  ;;  %v1459_v28 = vld [vmem:[%s5448_s9 + $0xf8] sm:$0xff]  ;;  %v3859_v32 = vcombine.low %v5714_v26, %v5717_v29 }
 0x223   : > { %3532 = vmatpush1.bf16.msra.mxu1 %v4538_v33  ;;  %3480 = vmatprep.subr.bf16.mxu0 %v4543_v34  ;;  %v3861_v33 = vcombine.low %v5720_v30, %v5723_v31  ;;  %v3876_v34 = vcombine.high %v1450_v24, %v1458_v25 }
 0x224   : > { %3533 = vmatprep.subr.bf16.mxu1 %v4546_v35  ;;  %3506 = vmatprep.mubr.bf16.mxu0 %v3860_v36  ;;  %v3878_v35 = vcombine.high %v1451_v27, %v1459_v28  ;;  %v3875_v36 = vcombine.low %v1450_v24, %v1458_v25 }
 0x225   : > { %3559 = vmatprep.mubr.bf16.mxu1 %v3862_v37  ;;  %v3877_v37 = vcombine.low %v1451_v27, %v1459_v28 }
 0x226   : > { %3481 = vmatpush1.bf16.msra.mxu0 %v4541_v38 }
 0x227   : > { %3534 = vmatpush1.bf16.msra.mxu1 %v4544_v39  ;;  %3482 = vmatprep.subr.bf16.mxu0 %v4549_v40 }
 0x228   : > { %3535 = vmatprep.subr.bf16.mxu1 %v4552_v41 }
 0x22a   : > { %3483 = vmatpush1.bf16.msra.mxu0 %v4547_v42 }
 0x22b   : > { %3536 = vmatpush1.bf16.msra.mxu1 %v4550_v43  ;;  %3484 = vmatprep.subr.bf16.mxu0 %v4555_v44 }
 0x22c   : > { %3537 = vmatprep.subr.bf16.mxu1 %v4558_v45 }
 0x22e   : > { %3485 = vmatpush1.bf16.msra.mxu0 %v4553_v46 }
 0x22f   : > { %3538 = vmatpush1.bf16.msra.mxu1 %v4556_v47  ;;  %3486 = vmatprep.subr.bf16.mxu0 %v4561_v48 }
 0x230   : > { %3539 = vmatprep.subr.bf16.mxu1 %v4564_v49 }
 0x232   : > { %3487 = vmatpush1.bf16.msra.mxu0 %v4559_v50 }
 0x233   : > { %3540 = vmatpush1.bf16.msra.mxu1 %v4562_v51  ;;  %3488 = vmatprep.subr.bf16.mxu0 %v4567_v52 }
 0x234   : > { %3541 = vmatprep.subr.bf16.mxu1 %v4570_v53 }
 0x236   : > { %3489 = vmatpush1.bf16.msra.mxu0 %v4565_v54 }
 0x237   : > { %3542 = vmatpush1.bf16.msra.mxu1 %v4568_v55  ;;  %3490 = vmatprep.subr.bf16.mxu0 %v4573_v56 }
 0x238   : > { %3543 = vmatprep.subr.bf16.mxu1 %v4576_v57 }
 0x23a   : > { %3491 = vmatpush2.bf16.msra.mxu0 %v4571_v58 }
 0x23b   : > { %3544 = vmatpush2.bf16.msra.mxu1 %v4574_v59  ;;  %3492 = vmatprep.subr.bf16.mxu0 %v4579_v60 }
 0x23c   : > { %3545 = vmatprep.subr.bf16.mxu1 %v4582_v61 }
 0x23e   : > { %3493 = vmatpush2.bf16.msra.mxu0 %v4577_v62 }
 0x23f   : > { %3546 = vmatpush2.bf16.msra.mxu1 %v4580_v63  ;;  %3494 = vmatprep.subr.bf16.mxu0 %v4585_v0 }
 0x240   : > { %3547 = vmatprep.subr.bf16.mxu1 %v4588_v1 }
 0x242   : > { %3495 = vmatpush2.bf16.msra.mxu0 %v4583_v2 }
 0x243   : > { %3548 = vmatpush2.bf16.msra.mxu1 %v4586_v3  ;;  %3496 = vmatprep.subr.bf16.mxu0 %v4591_v4 }
 0x244   : > { %3549 = vmatprep.subr.bf16.mxu1 %v4594_v5 }
 0x246   : > { %3497 = vmatpush2.bf16.msra.mxu0 %v4589_v6 }
 0x247   : > { %3550 = vmatpush2.bf16.msra.mxu1 %v4592_v7  ;;  %3498 = vmatprep.subr.bf16.mxu0 %v4597_v8 }
 0x248   : > { %3551 = vmatprep.subr.bf16.mxu1 %v4600_v9 }
 0x24a   : > { %3499 = vmatpush2.bf16.msra.mxu0 %v4595_v10 }
 0x24b   : > { %3552 = vmatpush2.bf16.msra.mxu1 %v4598_v11  ;;  %3500 = vmatprep.subr.bf16.mxu0 %v4603_v14 }
 0x24c   : > { %3553 = vmatprep.subr.bf16.mxu1 %v4606_v15 }
 0x24e   : > { %3501 = vmatpush2.bf16.msra.mxu0 %v4601_v18 }
 0x24f   : > { %3554 = vmatpush2.bf16.msra.mxu1 %v4604_v19  ;;  %3502 = vmatprep.subr.bf16.mxu0 %v4609_v20 }
 0x250   : > { %3555 = vmatprep.subr.bf16.mxu1 %v4612_v21 }
 0x252   : > { %3503 = vmatpush2.bf16.msra.mxu0 %v4607_v22 }
 0x253   : > { %3556 = vmatpush2.bf16.msra.mxu1 %v4610_v23  ;;  %3504 = vmatprep.subr.bf16.mxu0 %v4615_v12 }
 0x254   : > { %3557 = vmatprep.subr.bf16.mxu1 %v4618_v13 }
 0x256   : > { %3505 = vmatpush2.bf16.msra.mxu0 %v4613_v16 }
 0x257   : > { %3558 = vmatpush2.bf16.msra.mxu1 %v4616_v17 }
 0x259   : > { %3507 = vmatmul.mubr.bf16.vlgmr.msra.gmra.mxu0 %v3859_v32  ;;  %v3190_v38 = vpop.f32.mrf.mxu0 }
 0x25a   : > { %3560 = vmatmul.mubr.bf16.vlgmr.msra.gmra.mxu1 %v3861_v33  ;;  %3516 = vmatprep.mubr.bf16.mxu0 %v3876_v34  ;;  %v3243_v39 = vpop.f32.mrf.mxu1 }
 0x25b   : > { %3569 = vmatprep.mubr.bf16.mxu1 %v3878_v35  ;;  %v3192_v40 = vpop.f32.mrf.mxu0  ;;  %v3244_v14 = vadd.f32 %v3243_v39, %v3190_v38 }
 0x25c   : > { %v3245_v41 = vpop.f32.mrf.mxu1 }
 0x25d   : > { %v3194_v26 = vpop.f32.mrf.mxu0  ;;  %v3246_v15 = vadd.f32 %v3245_v41, %v3192_v40 }
 0x25e   : > { %v3247_v29 = vpop.f32.mrf.mxu1 }
 0x25f   : > { %v3196_v42 = vpop.f32.mrf.mxu0  ;;  %v3248_v21 = vadd.f32 %v3247_v29, %v3194_v26 }
 0x260   : > { %v3249_v31 = vpop.f32.mrf.mxu1 }
 0x261   : > { %3517 = vmatmul.mubr.bf16.gmra.mxu0 %v3875_v36  ;;  %v3200_v30 = vpop.f32.mrf.mxu0  ;;  %v3250_v23 = vadd.f32 %v3249_v31, %v3196_v42 }
 0x262   : > { %3570 = vmatmul.mubr.bf16.gmra.mxu1 %v3877_v37  ;;  %v3253_v43 = vpop.f32.mrf.mxu1 }
 0x263   : > { %v3202_v44 = vpop.f32.mrf.mxu0  ;;  %v3254_v16 = vadd.f32 %v3253_v43, %v3200_v30 }
 0x264   : > { %v3255_v45 = vpop.f32.mrf.mxu1 }
 0x265   : > { %v3204_v46 = vpop.f32.mrf.mxu0  ;;  %v3256_v32 = vadd.f32 %v3255_v45, %v3202_v44 }
 0x266   : > { %v3257_v47 = vpop.f32.mrf.mxu1 }
 0x267   : > { %v3206_v48 = vpop.f32.mrf.mxu0  ;;  %v3258_v36 = vadd.f32 %v3257_v47, %v3204_v46 }
 0x268   : > { %v3259_v50 = vpop.f32.mrf.mxu1 }
 0x269   : > { %v3260_v29 = vadd.f32 %v3259_v50, %v3206_v48 }
 0x299   : > { %v3296_v49 = vpop.f32.mrf.mxu0 }
 0x29a   : > { %v3349_v51 = vpop.f32.mrf.mxu1  ;;  %v3297_v18 = vadd.f32 %v3296_v49, %v3244_v14 }
 0x29b   : > { %v3298_v52 = vpop.f32.mrf.mxu0 }
 0x29c   : > { %v3351_v53 = vpop.f32.mrf.mxu1  ;;  %v3299_v22 = vadd.f32 %v3298_v52, %v3246_v15  ;;  %v3350_v12 = vadd.f32 %v3349_v51, %v3297_v18  ;;  %v1423_v18 = vld [vmem:[#allocation2 + $0x10] sm:$0xff] }
 0x29d   : > { %v3300_v54 = vpop.f32.mrf.mxu0 }
 0x29e   : > { %v3353_v55 = vpop.f32.mrf.mxu1  ;;  %v3301_v13 = vadd.f32 %v3300_v54, %v3248_v21  ;;  %v3352_v25 = vadd.f32 %v3351_v53, %v3299_v22  ;;  %v1420_v54 = vld [vmem:[#allocation2 + $0x30] sm:$0xff] }
 0x29f   : > { %v3302_v56 = vpop.f32.mrf.mxu0 }
 0x2a0   : > { %v3355_v57 = vpop.f32.mrf.mxu1  ;;  %v3303_v27 = vadd.f32 %v3302_v56, %v3250_v23  ;;  %v3354_v34 = vadd.f32 %v3353_v55, %v3301_v13  ;;  %v1424_v13 = vld [vmem:[#allocation2 + $0x8] sm:$0xff] }
 0x2a1   : > { %v3306_v58 = vpop.f32.mrf.mxu0 }
 0x2a2   : > { %v3359_v59 = vpop.f32.mrf.mxu1  ;;  %v3307_v33 = vadd.f32 %v3306_v58, %v3254_v16  ;;  %v3356_v40 = vadd.f32 %v3355_v57, %v3303_v27 }
 0x2a3   : > { %v3308_v60 = vpop.f32.mrf.mxu0 }
 0x2a4   : > { %v3361_v61 = vpop.f32.mrf.mxu1  ;;  %v3309_v37 = vadd.f32 %v3308_v60, %v3256_v32  ;;  %v3360_v42 = vadd.f32 %v3359_v59, %v3307_v33 }
 0x2a5   : > { %v3310_v62 = vpop.f32.mrf.mxu0 }
 0x2a6   : > { %v3363_v63 = vpop.f32.mrf.mxu1  ;;  %v3311_v30 = vadd.f32 %v3310_v62, %v3258_v36  ;;  %v3362_v53 = vadd.f32 %v3361_v61, %v3309_v37  ;;  %v1426_v37 = vld [vmem:[#allocation2 + $0x28] sm:$0xff] }
 0x2a7   : > { %v3312_v0 = vpop.f32.mrf.mxu0 }
 0x2a8   : > { %v5791_v1 = vpop.f32.mrf.mxu1  ;;  %v3313_v44 = vadd.f32 %v3312_v0, %v3260_v29  ;;  %v3364_v57 = vadd.f32 %v3363_v63, %v3311_v30  ;;  %v1422_v0 = vld [vmem:[#allocation2 + $0x18] sm:$0xff] }
 0x2a9   : > { %v1427_v29 = vld [vmem:[#allocation2 + $0x38] sm:$0xff] }
 0x2d9   : > { %v3402_v2 = vpop.f32.mrf.mxu0 }
 0x2da   : > { %v3455_v3 = vpop.f32.mrf.mxu1  ;;  %v3403_v28 = vadd.f32 %v3402_v2, %v3350_v12  ;;  %v1421_v2 = vld [vmem:[#allocation2] sm:$0xff] }
 0x2db   : > { %v3404_v4 = vpop.f32.mrf.mxu0 }
 0x2dc   : > { %v3457_v5 = vpop.f32.mrf.mxu1  ;;  %v3405_v35 = vadd.f32 %v3404_v4, %v3352_v25  ;;  %v3456_v41 = vadd.f32 %v3455_v3, %v3403_v28  ;;  %v1425_v28 = vld [vmem:[#allocation2 + $0x20] sm:$0xff] }
 0x2dd   : > { %v3406_v6 = vpop.f32.mrf.mxu0 }
 0x2de   : > { %v3459_v7 = vpop.f32.mrf.mxu1  ;;  %v3407_v26 = vadd.f32 %v3406_v6, %v3354_v34  ;;  %v3458_v49 = vadd.f32 %v3457_v5, %v3405_v35  ;;  %v3366_v5 = vadd.f32 %v5791_v1, %v3313_v44 }
 0x2df   : > { %v3408_v8 = vpop.f32.mrf.mxu0 }
 0x2e0   : > { %v3461_v9 = vpop.f32.mrf.mxu1  ;;  %v3409_v51 = vadd.f32 %v3408_v8, %v3356_v40  ;;  %v3460_v47 = vadd.f32 %v3459_v7, %v3407_v26 }
 0x2e1   : > { %v3412_v10 = vpop.f32.mrf.mxu0 }
 0x2e2   : > { %v3465_v11 = vpop.f32.mrf.mxu1  ;;  %v3413_v45 = vadd.f32 %v3412_v10, %v3360_v42  ;;  %v3462_v59 = vadd.f32 %v3461_v9, %v3409_v51 }
 0x2e3   : > { %v3414_v19 = vpop.f32.mrf.mxu0 }
 0x2e4   : > { %v3467_v20 = vpop.f32.mrf.mxu1  ;;  %v3415_v60 = vadd.f32 %v3414_v19, %v3362_v53  ;;  %v3466_v61 = vadd.f32 %v3465_v11, %v3413_v45 }
 0x2e5   : > { %v3416_v17 = vpop.f32.mrf.mxu0 }
 0x2e6   : > { %v5793_v24 = vpop.f32.mrf.mxu1  ;;  %v3417_v10 = vadd.f32 %v3416_v17, %v3364_v57  ;;  %v3468_v63 = vadd.f32 %v3467_v20, %v3415_v60 }
 0x2e7   : > { %v3418_v38 = vpop.f32.mrf.mxu0 }
 0x2e8   : > { %v3471_v39 = vpop.f32.mrf.mxu1  ;;  %v3419_v22 = vadd.f32 %v3418_v38, %v3366_v5  ;;  %v3470_v16 = vadd.f32 %v5793_v24, %v3417_v10 }
 0x2ea   : > { %v3472_v33 = vadd.f32 %v3471_v39, %v3419_v22 }
 0x319   : > { %v3508_v31 = vpop.f32.mrf.mxu0 }
 0x31a   : > { %v3561_v43 = vpop.f32.mrf.mxu1  ;;  %v3509_v52 = vadd.f32 %v3508_v31, %v3456_v41 }
 0x31b   : > { %v3510_v55 = vpop.f32.mrf.mxu0 }
 0x31c   : > { %v3563_v46 = vpop.f32.mrf.mxu1  ;;  %v3562_v56 = vadd.f32 %v3561_v43, %v3509_v52  ;;  %v3511_v58 = vadd.f32 %v3510_v55, %v3458_v49 }
 0x31d   : > { %v3512_v48 = vpop.f32.mrf.mxu0 }
 0x31e   : > { %v3565_v50 = vpop.f32.mrf.mxu1  ;;  %v3580_v62 = vadd.f32 %v3562_v56, %v1420_v54  ;;  %v3564_v3 = vadd.f32 %v3563_v46, %v3511_v58  ;;  %v3513_v4 = vadd.f32 %v3512_v48, %v3460_v47 }
 0x31f   : > { %v3514_v6 = vpop.f32.mrf.mxu0 }
 0x320   : > { %v3567_v8 = vpop.f32.mrf.mxu1  ;;  %3588 = vst [vmem:[#allocation2 + $0x30] sm:$0xff] %v3580_v62  ;;  %v3581_v7 = vadd.f32 %v3564_v3, %v1421_v2  ;;  %v3566_v14 = vadd.f32 %v3565_v50, %v3513_v4  ;;  %v3515_v15 = vadd.f32 %v3514_v6, %v3462_v59 }
 0x321   : > { %v3518_v19 = vpop.f32.mrf.mxu0 }
 0x322   : > { %v3571_v21 = vpop.f32.mrf.mxu1  ;;  %3589 = vst [vmem:[#allocation2] sm:$0xff] %v3581_v7  ;;  %v3582_v9 = vadd.f32 %v3566_v14, %v1422_v0  ;;  %v3568_v23 = vadd.f32 %v3567_v8, %v3515_v15  ;;  %v3519_v12 = vadd.f32 %v3518_v19, %v3466_v61 }
 0x323   : > { %v3520_v1 = vpop.f32.mrf.mxu0 }
 0x324   : > { %v3573_v11 = vpop.f32.mrf.mxu1  ;;  %3590 = vst [vmem:[#allocation2 + $0x18] sm:$0xff] %v3582_v9  ;;  %v3583_v17 = vadd.f32 %v3568_v23, %v1423_v18  ;;  %v3572_v25 = vadd.f32 %v3571_v21, %v3519_v12  ;;  %v3521_v27 = vadd.f32 %v3520_v1, %v3468_v63 }
 0x325   : > { %v3522_v32 = vpop.f32.mrf.mxu0 }
 0x326   : > { %v3575_v20 = vpop.f32.mrf.mxu1  ;;  %3591 = vst [vmem:[#allocation2 + $0x10] sm:$0xff] %v3583_v17  ;;  %v3584_v34 = vadd.f32 %v3572_v25, %v1424_v13  ;;  %v3574_v35 = vadd.f32 %v3573_v11, %v3521_v27  ;;  %v3523_v36 = vadd.f32 %v3522_v32, %v3470_v16 }
 0x327   : > { %v3524_v38 = vpop.f32.mrf.mxu0 }
 0x328   : > { %3592 = vst [vmem:[#allocation2 + $0x8] sm:$0xff] %v3584_v34  ;;  %v3585_v40 = vadd.f32 %v3574_v35, %v1425_v28  ;;  %v3576_v41 = vadd.f32 %v3575_v20, %v3523_v36  ;;  %v3525_v26 = vadd.f32 %v3524_v38, %v3472_v33  ;;  %v3577_v24 = vpop.f32.mrf.mxu1 }
 0x32a   : > { %3593 = vst [vmem:[#allocation2 + $0x20] sm:$0xff] %v3585_v40  ;;  %v3586_v42 = vadd.f32 %v3576_v41, %v1426_v37  ;;  %v3578_v30 = vadd.f32 %v3577_v24, %v3525_v26  ;;  %3599 = sbr.rel (%p4135_p5) target bundleno = 955 (0x3bb), region = 105 }
 0x32c   : > { %3594 = vst [vmem:[#allocation2 + $0x28] sm:$0xff] %v3586_v42  ;;  %v3587_v31 = vadd.f32 %v3578_v30, %v1427_v29 }
 0x32e   : > { %3595 = vst [vmem:[#allocation2 + $0x38] sm:$0xff] %v3587_v31 }
 0x32f   : > { %v4136_v39 = vld [vmem:[#allocation3] ss:$0 sm:$0xff]  ;;  %v4709_v43 = vmov 0   ;;  %v3628_v49 = vlaneseq  ;;  %v3600_v45 = vld [vmem:[#allocation2 + $0x30] sm:$0xff]  ;;  %v3602_v55 = vld [vmem:[#allocation2 + $0x18] sm:$0xff] }
 0x330   : > { %4619 = vset.pattern.permute.xlu0 %v4709_v43  ;;  %v3626_v44 = vld [vmem:[%s1404_s7] sm:$0x3]  ;;  %v3603_v46 = vld [vmem:[#allocation2 + $0x10] sm:$0xff]  ;;  %v3604_v47 = vld [vmem:[#allocation2 + $0x8] sm:$0xff] }
 0x331   : > { %3615 = vperm.xlu0 %4619, %v4136_v39   ;;  %v3629_v51 = vshrl.u32 %v3628_v49, 7  ;;  %v3601_v54 = vld [vmem:[#allocation2] sm:$0xff] }
 0x332   : > { %v3605_v57 = vld [vmem:[#allocation2 + $0x20] sm:$0xff] }
 0x333   : > { %v3630_v52 = vsub.s32 0, %v3629_v51  ;;  %v3634_v53 = vsub.s32 1, %v3629_v51  ;;  %v3606_v60 = vld [vmem:[#allocation2 + $0x28] sm:$0xff] }
 0x335   : > { %v3631_v56 = vrot.slane %v3626_v44, %v3630_v52  ;;  %v3635_v58 = vrot.slane %v3626_v44, %v3634_v53  ;;  %v3607_v2 = vld [vmem:[#allocation2 + $0x38] sm:$0xff] }
 0x3ac   : > { %v3616_v48 = vpop.permute.xlu0 %3615 }
 0x3ad   : > { %v3618_v50 = vmul.f32 %v3616_v48, %v3600_v45  ;;  %v3619_v59 = vmul.f32 %v3616_v48, %v3601_v54  ;;  %v3620_v62 = vmul.f32 %v3616_v48, %v3602_v55  ;;  %v3621_v3 = vmul.f32 %v3616_v48, %v3603_v46 }
 0x3ae   : > { %v3622_v4 = vmul.f32 %v3616_v48, %v3604_v47  ;;  %v3623_v5 = vmul.f32 %v3616_v48, %v3605_v57  ;;  %v3624_v61 = vmul.f32 %v3616_v48, %v3606_v60  ;;  %v3625_v0 = vmul.f32 %v3616_v48, %v3607_v2 }
 0x3af   : > { %v3638_v6 = vadd.f32 %v3631_v56, %v3618_v50  ;;  %v3639_v8 = vadd.f32 %v3635_v58, %v3619_v59  ;;  %v3640_v10 = vadd.f32 %v3631_v56, %v3620_v62  ;;  %v3641_v7 = vadd.f32 %v3635_v58, %v3621_v3 }
 0x3b0   : > { %v3642_v14 = vadd.f32 %v3631_v56, %v3622_v4  ;;  %v3643_v15 = vadd.f32 %v3635_v58, %v3623_v5  ;;  %v3644_v63 = vadd.f32 %v3631_v56, %v3624_v61  ;;  %v3645_v18 = vadd.f32 %v3635_v58, %v3625_v0 }
 0x3b1   : > { %vm3646_vm0 = vcmp.gt.f32.partialorder %v3638_v6, 0.0  ;;  %vm3647_vm1 = vcmp.gt.f32.partialorder %v3639_v8, 0.0  ;;  %vm3648_vm2 = vcmp.gt.f32.partialorder %v3640_v10, 0.0  ;;  %vm3649_vm3 = vcmp.gt.f32.partialorder %v3641_v7, 0.0 }
 0x3b2   : > { %vm3650_vm4 = vcmp.gt.f32.partialorder %v3642_v14, 0.0  ;;  %vm3651_vm5 = vcmp.gt.f32.partialorder %v3643_v15, 0.0  ;;  %vm3652_vm6 = vcmp.gt.f32.partialorder %v3644_v63, 0.0  ;;  %vm3653_vm7 = vcmp.gt.f32.partialorder %v3645_v18, 0.0 }
 0x3b3   : > { %v3654_v19 = vmul.f32 0.2, %v3638_v6  ;;  %v3655_v21 = vmul.f32 0.2, %v3639_v8  ;;  %v3656_v22 = vmul.f32 0.2, %v3640_v10 }
 0x3b4   : > { %v3657_v9 = vmul.f32 0.2, %v3641_v7  ;;  %v3658_v23 = vmul.f32 0.2, %v3642_v14  ;;  %v3659_v12 = vmul.f32 0.2, %v3643_v15 }
 0x3b5   : > { %v3660_v13 = vmul.f32 0.2, %v3644_v63  ;;  %v3661_v1 = vmul.f32 0.2, %v3645_v18  ;;  %v3662_v11 = vsel %vm3646_vm0, %v3638_v6, %v3654_v19  ;;  %v3663_v16 = vsel %vm3647_vm1, %v3639_v8, %v3655_v21 }
 0x3b6   : > { %v3664_v17 = vsel %vm3648_vm2, %v3640_v10, %v3656_v22  ;;  %v3665_v25 = vsel %vm3649_vm3, %v3641_v7, %v3657_v9  ;;  %v3666_v27 = vsel %vm3650_vm4, %v3642_v14, %v3658_v23  ;;  %v3667_v28 = vsel %vm3651_vm5, %v3643_v15, %v3659_v12  ;;  %3670 = vst [vmem:[%s5452_s1] sm:$0xff] %v3662_v11 }
 0x3b7   : > { %3671 = vst [vmem:[%s5452_s1 + $0x8] sm:$0xff] %v3663_v16  ;;  %v3668_v32 = vsel %vm3652_vm6, %v3644_v63, %v3660_v13  ;;  %v3669_v20 = vsel %vm3653_vm7, %v3645_v18, %v3661_v1  ;;  %3672 = vst [vmem:[%s5452_s1 + $0x10] sm:$0xff] %v3664_v17 }
 0x3b8   : > { %3673 = vst [vmem:[%s5452_s1 + $0x18] sm:$0xff] %v3665_v25  ;;  %3674 = vst [vmem:[%s5452_s1 + $0x20] sm:$0xff] %v3666_v27 }
 0x3b9   : > { %3675 = vst [vmem:[%s5452_s1 + $0x28] sm:$0xff] %v3667_v28  ;;  %3676 = vst [vmem:[%s5452_s1 + $0x30] sm:$0xff] %v3668_v32 }
 0x3ba   : > { %3677 = vst [vmem:[%s5452_s1 + $0x38] sm:$0xff] %v3669_v20 }
 0x3bb PF: > { %3684 = sbr.rel (!%p4832_p12) target bundleno = 963 (0x3c3), region = 109  ;;  %s4144_s21 = sshll.u32 (%p4832_p12), %s4694_s24, 4 }
 0x3bc   : > { %s3690_s10 = scalar_lea.vmem (%p4832_p12), %s5870_s4, %s4144_s21 }
 0x3bd   : > { %v3703_v33 = vld [vmem:[%s5452_s1] sm:$0xff] (%p4832_p12) }
 0x3be   : > { %v3705_v34 = vld [vmem:[%s5452_s1 + $0x8] sm:$0xff] (%p4832_p12)  ;;  %v3707_v35 = vld [vmem:[%s5452_s1 + $0x10] sm:$0xff] (%p4832_p12)  ;;  %3704 = vst [vmem:[%s3690_s10] sm:$0xff] (%p4832_p12), %v3703_v33 }
 0x3bf   : > { %v3709_v36 = vld [vmem:[%s5452_s1 + $0x18] sm:$0xff] (%p4832_p12)  ;;  %v3711_v37 = vld [vmem:[%s5452_s1 + $0x20] sm:$0xff] (%p4832_p12)  ;;  %3706 = vst [vmem:[%s3690_s10 + $0x8] sm:$0xff] (%p4832_p12), %v3705_v34  ;;  %3708 = vst [vmem:[%s3690_s10 + $0x40] sm:$0xff] (%p4832_p12), %v3707_v35 }
 0x3c0   : > { %v3713_v38 = vld [vmem:[%s5452_s1 + $0x28] sm:$0xff]  ;;  %3710 = vst [vmem:[%s3690_s10 + $0x48] sm:$0xff] %v3709_v36  ;;  %3712 = vst [vmem:[%s3690_s10 + $0x80] sm:$0xff] %v3711_v37  ;;  %v3715_v40 = vld [vmem:[%s5452_s1 + $0x30] sm:$0xff] }
 0x3c1   : > { %3714 = vst [vmem:[%s3690_s10 + $0x88] sm:$0xff] %v3713_v38  ;;  %v3717_v41 = vld [vmem:[%s5452_s1 + $0x38] sm:$0xff]  ;;  %3716 = vst [vmem:[%s3690_s10 + $0xc0] sm:$0xff] %v3715_v40 }
 0x3c2   : > { %3718 = vst [vmem:[%s3690_s10 + $0xc8] sm:$0xff] %v3717_v41 }
 0x3c3 PF: > { %s16_s26 = sadd.s32 1, %s4706_s26   ;;  %s5880_s15 = sld [smem:[#allocation7_spill]] }
 0x3c4   : > { %p13_p6 = scmp.ge.s32.totalorder %s16_s26, 18   ;;  %s5881_s17 = smov %s4670_s18 }
 0x3c5   : > { %s5882_s18 = smov %s4830_s14  ;;  %s5883_s19 = smov %s4678_s20 }
 0x3c6   : > { %s5884_s20 = smov %s4827_s13  ;;  %s5885_s21 = smov %s4686_s22 }
 0x3c7   : > { %s5886_s22 = smov %s4813_s8  ;;  %s5887_s23 = smov %s4698_s25 }
 0x3c8   : > { %s5888_s24 = smov %s4702_s3  ;;  %s5889_s25 = smov %s5892_s28 }
 0x3c9   : > { %s5890_s3 = smov %s5880_s15  ;;  %15 = sbr.rel (!%p13_p6) target bundleno = 9 (0x9), region = 174 }

// kernel: discriminator_forward.9
= control target key start
LH: loop header
LB: loop body
LE: loop exit
PB: predicated region body
PF: predicated region fallthrough
CT: control target
= control target key end

     0   :  { %s2418_s19 = smov 0   ;;  %s2420_s20 = smov 0   ;;  %s2602_s0 = inlined_call_operand.vmem [shape: bf16[8,16384], index: 0, kind: input, shape index: {}]   ;;  %s2603_s1 = inlined_call_operand.vmem [shape: bf16[16384,1], index: 1, kind: input, shape index: {}]   ;;  %s2604_s2 = inlined_call_operand.<no memory space> [shape: f32[1,1], index: 2, kind: input, shape index: {}]   ;;  %s2605_s4 = inlined_call_operand.vmem [shape: f32[8,1], index: 4, kind: output, shape index: {}]   ;;  %s2606_s3 = inlined_call_operand.<no memory space> [shape: f32[1,1], index: 3, kind: input, shape index: {}]  }
   0x1   :  { %v9_v0 = vstv %s2604_s2  ;;  %v11_v1 = vstv %s2606_s3  ;;  %s2422_s21 = smov 0  }
   0x2   :  { %10 = vst [vmem:[#allocation3] sm:$0x1] %v9_v0  ;;  %12 = vst [vmem:[#allocation4] sm:$0x1] %v11_v1 }
   0x3 LB: > { %s30_s2 = sadd.s32 1, %s2380_s20  ;;  %p1853_p0 = scmp.ge.s32.totalorder %s2384_s21, 1  ;;  %s2384_s21 = sphi %s2422_s21, %s18_s21   ;;  %s2380_s20 = sphi %s2420_s20, %s2608_s20   ;;  %s2376_s19 = sphi %s2418_s19, %s2607_s19  }
   0x4   : > { %p31_p1 = scmp.ge.s32.totalorder %s30_s2, 8  ;;  %p218_p2 = scmp.lt.s32.totalorder %s2384_s21, 9 }
   0x6   : > { %s2610_s2 = smov (%p31_p1, %s30_s2), 0  ;;  %p219_p3 = pnand %p1853_p0, %p218_p2 }
   0x7   : > { %s1854_s3 = sshll.u32 (!%p219_p3), %s2376_s19, 4  ;;  %s1856_s22 = sshll.u32 (!%p219_p3), %s2376_s19, 8 }
   0x8   : > { %222 = sbr.rel (%p219_p3) target bundleno = 404 (0x194), region = 36  ;;  %p264_p4 = scmp.lt.s32.totalorder (!%p219_p3), %s1854_s3, 127 }
   0x9   : > { %p272_p5 = scmp.lt.s32.totalorder (!%p219_p3), %s1856_s22, 2047  ;;  %p1858_p6 = scmp.ne.s32.totalorder (!%p219_p3), %s2376_s19, 0 }
   0xd   : > { %s2612_s3 = smov (!%p264_p4, %s1854_s3), 127  ;;  %s2614_s22 = smov (!%p272_p5, %s1856_s22), 2047 }
   0xe   : > { %s1855_s23 = sshll.u32 %s2612_s3, 2  ;;  %s1857_s27 = sshll.u32 %s2614_s22, 2 }
   0xf   : > { %s2443_s26 = scalar_lea.vmem %s2602_s0, %s1855_s23  ;;  %s2448_s30 = scalar_lea.vmem %s2603_s1, %s1857_s27 }
  0x10   : > { %294 = sbr.rel (%p1858_p6) target bundleno = 23 (0x17), region = 40 }
  0x15   : > { %vm295_vm0 = vcmask 7168   ;;  %v2386_v2 = vmov 0.0  }
  0x16   : > { %296 = vst.msk [vmem:[#allocation2] sm:$0xff] %vm295_vm0, %v2386_v2 }
  0x17 PF: > { %v2210_v3 = vld [vmem:[%s2448_s30 + $0x78] sm:$0xff]   ;;  %v2214_v7 = vld [vmem:[%s2448_s30 + $0x70] sm:$0xff]   ;;  %v2218_v11 = vld [vmem:[%s2448_s30 + $0x68] sm:$0xff]   ;;  %vm1707_vm1 = vcmask 7168   ;;  %p2003_p7 = scmp.ne.s32.totalorder %s2376_s19, 7 }
  0x18   : > { %v2211_v4 = vld [vmem:[%s2448_s30 + $0xf8] sm:$0xff]   ;;  %2009 = vmatprep.subr.bf16.mxu0 %v2210_v3  ;;  %v2215_v8 = vld [vmem:[%s2448_s30 + $0xf0] sm:$0xff]   ;;  %v2219_v12 = vld [vmem:[%s2448_s30 + $0xe8] sm:$0xff]  }
  0x19   : > { %v2212_v5 = vld [vmem:[%s2448_s30 + $0x38] sm:$0xff]   ;;  %2031 = vmatprep.subr.bf16.mxu1 %v2211_v4  ;;  %v2216_v9 = vld [vmem:[%s2448_s30 + $0x30] sm:$0xff]   ;;  %v2220_v13 = vld [vmem:[%s2448_s30 + $0x28] sm:$0xff]  }
  0x1a   : > { %v2213_v6 = vld [vmem:[%s2448_s30 + $0xb8] sm:$0xff]   ;;  %2010 = vmatpush3.bf16.msra.mxu0 %v2212_v5  ;;  %v2217_v10 = vld [vmem:[%s2448_s30 + $0xb0] sm:$0xff]   ;;  %v2221_v14 = vld [vmem:[%s2448_s30 + $0xa8] sm:$0xff]  }
  0x1b   : > { %2032 = vmatpush3.bf16.msra.mxu1 %v2213_v6  ;;  %2011 = vmatprep.subr.bf16.mxu0 %v2214_v7  ;;  %v2222_v15 = vld [vmem:[%s2448_s30 + $0x60] sm:$0xff]   ;;  %v2226_v19 = vld [vmem:[%s2448_s30 + $0x58] sm:$0xff]   ;;  %v2230_v23 = vld [vmem:[%s2448_s30 + $0x50] sm:$0xff]  }
  0x1c   : > { %2033 = vmatprep.subr.bf16.mxu1 %v2215_v8  ;;  %v2223_v16 = vld [vmem:[%s2448_s30 + $0xe0] sm:$0xff]   ;;  %v2227_v20 = vld [vmem:[%s2448_s30 + $0xd8] sm:$0xff]   ;;  %v2231_v24 = vld [vmem:[%s2448_s30 + $0xd0] sm:$0xff]  }
  0x1d   : > { %v2224_v17 = vld [vmem:[%s2448_s30 + $0x20] sm:$0xff]   ;;  %v2228_v21 = vld [vmem:[%s2448_s30 + $0x18] sm:$0xff]   ;;  %v2232_v25 = vld [vmem:[%s2448_s30 + $0x10] sm:$0xff]  }
  0x1e   : > { %2012 = vmatpush3.bf16.msra.mxu0 %v2216_v9  ;;  %v2225_v18 = vld [vmem:[%s2448_s30 + $0xa0] sm:$0xff]   ;;  %v2229_v22 = vld [vmem:[%s2448_s30 + $0x98] sm:$0xff]   ;;  %v2233_v26 = vld [vmem:[%s2448_s30 + $0x90] sm:$0xff]  }
  0x1f   : > { %2034 = vmatpush3.bf16.msra.mxu1 %v2217_v10  ;;  %2013 = vmatprep.subr.bf16.mxu0 %v2218_v11  ;;  %v2234_v27 = vld [vmem:[%s2448_s30 + $0x48] sm:$0xff]   ;;  %v2238_v31 = vld [vmem:[%s2448_s30 + $0x40] sm:$0xff]   ;;  %v2246_v41 = vld [vmem:[%s2448_s30 + $0x178] sm:$0xff]  }
  0x20   : > { %2035 = vmatprep.subr.bf16.mxu1 %v2219_v12  ;;  %v2235_v28 = vld [vmem:[%s2448_s30 + $0xc8] sm:$0xff]   ;;  %v2239_v32 = vld [vmem:[%s2448_s30 + $0xc0] sm:$0xff]   ;;  %v2247_v42 = vld [vmem:[%s2448_s30 + $0x1f8] sm:$0xff]  }
  0x21   : > { %v2236_v29 = vld [vmem:[%s2448_s30 + $0x8] sm:$0xff]   ;;  %v2240_v33 = vld [vmem:[%s2448_s30] sm:$0xff]   ;;  %v2248_v43 = vld [vmem:[%s2448_s30 + $0x138] sm:$0xff]  }
  0x22   : > { %2014 = vmatpush3.bf16.msra.mxu0 %v2220_v13  ;;  %v2237_v30 = vld [vmem:[%s2448_s30 + $0x88] sm:$0xff]   ;;  %v2241_v34 = vld [vmem:[%s2448_s30 + $0x80] sm:$0xff]   ;;  %v2249_v44 = vld [vmem:[%s2448_s30 + $0x1b8] sm:$0xff]  }
  0x23   : > { %2036 = vmatpush3.bf16.msra.mxu1 %v2221_v14  ;;  %2015 = vmatprep.subr.bf16.mxu0 %v2222_v15  ;;  %v298_v35 = vld [vmem:[%s2443_s26] sm:$0xff]  ;;  %v299_v36 = vld [vmem:[%s2443_s26 + $0x8] sm:$0xff]  ;;  %v2250_v45 = vld [vmem:[%s2448_s30 + $0x170] sm:$0xff]  }
  0x24   : > { %2037 = vmatprep.subr.bf16.mxu1 %v2223_v16  ;;  %v1859_v37 = vcombine.low %v298_v35, %v298_v35  ;;  %v1860_v38 = vcombine.high %v298_v35, %v298_v35  ;;  %v1861_v39 = vcombine.low %v299_v36, %v299_v36  ;;  %v1862_v40 = vcombine.high %v299_v36, %v299_v36  ;;  %v2251_v46 = vld [vmem:[%s2448_s30 + $0x1f0] sm:$0xff]   ;;  %v2254_v49 = vld [vmem:[%s2448_s30 + $0x168] sm:$0xff]   ;;  %v2258_v53 = vld [vmem:[%s2448_s30 + $0x160] sm:$0xff]  }
  0x25   : > { %v2252_v47 = vld [vmem:[%s2448_s30 + $0x130] sm:$0xff]   ;;  %v2255_v50 = vld [vmem:[%s2448_s30 + $0x1e8] sm:$0xff]   ;;  %v2259_v54 = vld [vmem:[%s2448_s30 + $0x1e0] sm:$0xff]  }
  0x26   : > { %2016 = vmatpush3.bf16.msra.mxu0 %v2224_v17  ;;  %1418 = vmatprep.mubr.bf16.mxu0 %v1860_v38  ;;  %v2253_v48 = vld [vmem:[%s2448_s30 + $0x1b0] sm:$0xff]   ;;  %v2256_v51 = vld [vmem:[%s2448_s30 + $0x128] sm:$0xff]   ;;  %v2260_v55 = vld [vmem:[%s2448_s30 + $0x120] sm:$0xff]  }
  0x27   : > { %2038 = vmatpush3.bf16.msra.mxu1 %v2225_v18  ;;  %2017 = vmatprep.subr.bf16.mxu0 %v2226_v19  ;;  %v2257_v52 = vld [vmem:[%s2448_s30 + $0x1a8] sm:$0xff]   ;;  %v2261_v56 = vld [vmem:[%s2448_s30 + $0x1a0] sm:$0xff]   ;;  %v2262_v57 = vld [vmem:[%s2448_s30 + $0x158] sm:$0xff]  }
  0x28   : > { %2039 = vmatprep.subr.bf16.mxu1 %v2227_v20  ;;  %1458 = vmatprep.mubr.bf16.mxu1 %v1862_v40  ;;  %v2263_v58 = vld [vmem:[%s2448_s30 + $0x1d8] sm:$0xff]   ;;  %v2266_v61 = vld [vmem:[%s2448_s30 + $0x150] sm:$0xff]   ;;  %v2270_v1 = vld [vmem:[%s2448_s30 + $0x148] sm:$0xff]  }
  0x29   : > { %v2264_v59 = vld [vmem:[%s2448_s30 + $0x118] sm:$0xff]   ;;  %v2267_v62 = vld [vmem:[%s2448_s30 + $0x1d0] sm:$0xff]   ;;  %v2271_v2 = vld [vmem:[%s2448_s30 + $0x1c8] sm:$0xff]  }
  0x2a   : > { %2018 = vmatpush3.bf16.msra.mxu0 %v2228_v21  ;;  %v2265_v60 = vld [vmem:[%s2448_s30 + $0x198] sm:$0xff]   ;;  %v2268_v63 = vld [vmem:[%s2448_s30 + $0x110] sm:$0xff]   ;;  %v2272_v3 = vld [vmem:[%s2448_s30 + $0x108] sm:$0xff]  }
  0x2b   : > { %2040 = vmatpush3.bf16.msra.mxu1 %v2229_v22  ;;  %2019 = vmatprep.subr.bf16.mxu0 %v2230_v23  ;;  %v2269_v0 = vld [vmem:[%s2448_s30 + $0x190] sm:$0xff]   ;;  %v2273_v4 = vld [vmem:[%s2448_s30 + $0x188] sm:$0xff]   ;;  %v2274_v5 = vld [vmem:[%s2448_s30 + $0x140] sm:$0xff]  }
  0x2c   : > { %2041 = vmatprep.subr.bf16.mxu1 %v2231_v24  ;;  %v2275_v6 = vld [vmem:[%s2448_s30 + $0x1c0] sm:$0xff]   ;;  %v300_v9 = vld [vmem:[%s2443_s26 + $0x10] sm:$0xff]  ;;  %v301_v12 = vld [vmem:[%s2443_s26 + $0x18] sm:$0xff] }
  0x2d   : > { %v2276_v7 = vld [vmem:[%s2448_s30 + $0x100] sm:$0xff]   ;;  %v1863_v10 = vcombine.low %v300_v9, %v300_v9  ;;  %v1864_v11 = vcombine.high %v300_v9, %v300_v9  ;;  %v1865_v13 = vcombine.low %v301_v12, %v301_v12  ;;  %v1866_v14 = vcombine.high %v301_v12, %v301_v12  ;;  %v2282_v15 = vld [vmem:[%s2448_s30 + $0x278] sm:$0xff]   ;;  %v2286_v19 = vld [vmem:[%s2448_s30 + $0x270] sm:$0xff]  }
  0x2e   : > { %2020 = vmatpush3.bf16.msra.mxu0 %v2232_v25  ;;  %v2277_v8 = vld [vmem:[%s2448_s30 + $0x180] sm:$0xff]   ;;  %v2283_v16 = vld [vmem:[%s2448_s30 + $0x2f8] sm:$0xff]   ;;  %v2287_v20 = vld [vmem:[%s2448_s30 + $0x2f0] sm:$0xff]  }
  0x2f   : > { %2042 = vmatpush3.bf16.msra.mxu1 %v2233_v26  ;;  %2021 = vmatprep.subr.bf16.mxu0 %v2234_v27  ;;  %v2284_v17 = vld [vmem:[%s2448_s30 + $0x238] sm:$0xff]   ;;  %v2288_v21 = vld [vmem:[%s2448_s30 + $0x230] sm:$0xff]   ;;  %v2290_v23 = vld [vmem:[%s2448_s30 + $0x268] sm:$0xff]  }
  0x30   : > { %2043 = vmatprep.subr.bf16.mxu1 %v2235_v28  ;;  %v2285_v18 = vld [vmem:[%s2448_s30 + $0x2b8] sm:$0xff]   ;;  %v2289_v22 = vld [vmem:[%s2448_s30 + $0x2b0] sm:$0xff]   ;;  %v2291_v24 = vld [vmem:[%s2448_s30 + $0x2e8] sm:$0xff]  }
  0x31   : > { %v2292_v25 = vld [vmem:[%s2448_s30 + $0x228] sm:$0xff]   ;;  %v2294_v27 = vld [vmem:[%s2448_s30 + $0x260] sm:$0xff]   ;;  %v2302_v35 = vld [vmem:[%s2448_s30 + $0x250] sm:$0xff]  }
  0x32   : > { %2022 = vmatpush3.bf16.msra.mxu0 %v2236_v29  ;;  %v2293_v26 = vld [vmem:[%s2448_s30 + $0x2a8] sm:$0xff]   ;;  %v2295_v28 = vld [vmem:[%s2448_s30 + $0x2e0] sm:$0xff]   ;;  %v2303_v36 = vld [vmem:[%s2448_s30 + $0x2d0] sm:$0xff]  }
  0x33   : > { %2044 = vmatpush3.bf16.msra.mxu1 %v2237_v30  ;;  %2023 = vmatprep.subr.bf16.mxu0 %v2238_v31  ;;  %v2296_v29 = vld [vmem:[%s2448_s30 + $0x220] sm:$0xff]   ;;  %v2298_v31 = vld [vmem:[%s2448_s30 + $0x258] sm:$0xff]   ;;  %v2305_v38 = vld [vmem:[%s2448_s30 + $0x290] sm:$0xff]  }
  0x34   : > { %2045 = vmatprep.subr.bf16.mxu1 %v2239_v32  ;;  %v2297_v30 = vld [vmem:[%s2448_s30 + $0x2a0] sm:$0xff]   ;;  %v2299_v32 = vld [vmem:[%s2448_s30 + $0x2d8] sm:$0xff]   ;;  %v2307_v40 = vld [vmem:[%s2448_s30 + $0x2c8] sm:$0xff]  }
  0x35   : > { %v2338_v9 = vld [vmem:[%s2448_s30 + $0x350] sm:$0xff]  }
  0x36   : > { %2024 = vmatpush3.bf16.msra.mxu0 %v2240_v33  ;;  %v2300_v33 = vld [vmem:[%s2448_s30 + $0x218] sm:$0xff]   ;;  %v2341_v12 = vld [vmem:[%s2448_s30 + $0x390] sm:$0xff]  }
  0x37   : > { %2046 = vmatpush3.bf16.msra.mxu1 %v2241_v34  ;;  %2053 = vmatprep.subr.bf16.mxu0 %v2246_v41  ;;  %v2301_v34 = vld [vmem:[%s2448_s30 + $0x298] sm:$0xff]   ;;  %v2308_v41 = vld [vmem:[%s2448_s30 + $0x208] sm:$0xff]  }
  0x38   : > { %2075 = vmatprep.subr.bf16.mxu1 %v2247_v42  ;;  %v2309_v42 = vld [vmem:[%s2448_s30 + $0x288] sm:$0xff]  }
  0x39   : > { %1419 = vmatmul.mubr.bf16.vlgmr.msra.gmra.mxu0 %v1859_v37  ;;  %v2304_v37 = vld [vmem:[%s2448_s30 + $0x210] sm:$0xff]  }
  0x3a   : > { %1459 = vmatmul.mubr.bf16.vlgmr.msra.gmra.mxu1 %v1861_v39  ;;  %2054 = vmatpush3.bf16.msra.mxu0 %v2248_v43  ;;  %v2306_v39 = vld [vmem:[%s2448_s30 + $0x248] sm:$0xff]   ;;  %v2310_v43 = vld [vmem:[%s2448_s30 + $0x240] sm:$0xff]  }
  0x3b   : > { %2076 = vmatpush3.bf16.msra.mxu1 %v2249_v44  ;;  %2055 = vmatprep.subr.bf16.mxu0 %v2250_v45  ;;  %v2311_v44 = vld [vmem:[%s2448_s30 + $0x2c0] sm:$0xff]  }
  0x3c   : > { %2077 = vmatprep.subr.bf16.mxu1 %v2251_v46  ;;  %1498 = vmatprep.mubr.bf16.mxu0 %v1864_v11  ;;  %v2312_v45 = vld [vmem:[%s2448_s30 + $0x200] sm:$0xff]   ;;  %v2340_v11 = vld [vmem:[%s2448_s30 + $0x310] sm:$0xff]  }
  0x3d   : > { %1538 = vmatprep.mubr.bf16.mxu1 %v1866_v14  ;;  %v2313_v46 = vld [vmem:[%s2448_s30 + $0x280] sm:$0xff]   ;;  %v2343_v14 = vld [vmem:[%s2448_s30 + $0x3c8] sm:$0xff]  }
  0x3e   : > { %2056 = vmatpush3.bf16.msra.mxu0 %v2252_v47  ;;  %v302_v47 = vld [vmem:[%s2443_s26 + $0x20] sm:$0xff] }
  0x3f   : > { %2078 = vmatpush3.bf16.msra.mxu1 %v2253_v48  ;;  %2057 = vmatprep.subr.bf16.mxu0 %v2254_v49  ;;  %v303_v48 = vld [vmem:[%s2443_s26 + $0x28] sm:$0xff]  ;;  %v1867_v49 = vcombine.low %v302_v47, %v302_v47 }
  0x40   : > { %2079 = vmatprep.subr.bf16.mxu1 %v2255_v50  ;;  %v1868_v50 = vcombine.high %v302_v47, %v302_v47 }
  0x42   : > { %2058 = vmatpush3.bf16.msra.mxu0 %v2256_v51  ;;  %v1869_v51 = vcombine.low %v303_v48, %v303_v48 }
  0x43   : > { %2080 = vmatpush3.bf16.msra.mxu1 %v2257_v52  ;;  %2059 = vmatprep.subr.bf16.mxu0 %v2258_v53  ;;  %v1870_v52 = vcombine.high %v303_v48, %v303_v48  ;;  %v2318_v53 = vld [vmem:[%s2448_s30 + $0x378] sm:$0xff]  }
  0x44   : > { %2081 = vmatprep.subr.bf16.mxu1 %v2259_v54  ;;  %v2319_v54 = vld [vmem:[%s2448_s30 + $0x3f8] sm:$0xff]  }
  0x46   : > { %2060 = vmatpush3.bf16.msra.mxu0 %v2260_v55  ;;  %v2320_v55 = vld [vmem:[%s2448_s30 + $0x338] sm:$0xff]  }
  0x47   : > { %2082 = vmatpush3.bf16.msra.mxu1 %v2261_v56  ;;  %2061 = vmatprep.subr.bf16.mxu0 %v2262_v57  ;;  %v2321_v56 = vld [vmem:[%s2448_s30 + $0x3b8] sm:$0xff]   ;;  %v2322_v57 = vld [vmem:[%s2448_s30 + $0x370] sm:$0xff]  }
  0x48   : > { %2083 = vmatprep.subr.bf16.mxu1 %v2263_v58  ;;  %v2323_v58 = vld [vmem:[%s2448_s30 + $0x3f0] sm:$0xff]  }
  0x4a   : > { %2062 = vmatpush3.bf16.msra.mxu0 %v2264_v59  ;;  %v2324_v59 = vld [vmem:[%s2448_s30 + $0x330] sm:$0xff]  }
  0x4b   : > { %2084 = vmatpush3.bf16.msra.mxu1 %v2265_v60  ;;  %2063 = vmatprep.subr.bf16.mxu0 %v2266_v61  ;;  %v2325_v60 = vld [vmem:[%s2448_s30 + $0x3b0] sm:$0xff]   ;;  %v2326_v61 = vld [vmem:[%s2448_s30 + $0x368] sm:$0xff]  }
  0x4c   : > { %2085 = vmatprep.subr.bf16.mxu1 %v2267_v62  ;;  %v2327_v62 = vld [vmem:[%s2448_s30 + $0x3e8] sm:$0xff]  }
  0x4e   : > { %2064 = vmatpush3.bf16.msra.mxu0 %v2268_v63  ;;  %v2328_v63 = vld [vmem:[%s2448_s30 + $0x328] sm:$0xff]  }
  0x4f   : > { %2086 = vmatpush3.bf16.msra.mxu1 %v2269_v0  ;;  %2065 = vmatprep.subr.bf16.mxu0 %v2270_v1  ;;  %v2329_v0 = vld [vmem:[%s2448_s30 + $0x3a8] sm:$0xff]   ;;  %v2330_v1 = vld [vmem:[%s2448_s30 + $0x360] sm:$0xff]  }
  0x50   : > { %2087 = vmatprep.subr.bf16.mxu1 %v2271_v2  ;;  %v2331_v2 = vld [vmem:[%s2448_s30 + $0x3e0] sm:$0xff]  }
  0x52   : > { %2066 = vmatpush3.bf16.msra.mxu0 %v2272_v3  ;;  %v2332_v3 = vld [vmem:[%s2448_s30 + $0x320] sm:$0xff]  }
  0x53   : > { %2088 = vmatpush3.bf16.msra.mxu1 %v2273_v4  ;;  %2067 = vmatprep.subr.bf16.mxu0 %v2274_v5  ;;  %v2333_v4 = vld [vmem:[%s2448_s30 + $0x3a0] sm:$0xff]   ;;  %v2334_v5 = vld [vmem:[%s2448_s30 + $0x358] sm:$0xff]  }
  0x54   : > { %2089 = vmatprep.subr.bf16.mxu1 %v2275_v6  ;;  %v2335_v6 = vld [vmem:[%s2448_s30 + $0x3d8] sm:$0xff]  }
  0x56   : > { %2068 = vmatpush3.bf16.msra.mxu0 %v2276_v7  ;;  %v2336_v7 = vld [vmem:[%s2448_s30 + $0x318] sm:$0xff]  }
  0x57   : > { %2090 = vmatpush3.bf16.msra.mxu1 %v2277_v8  ;;  %2097 = vmatprep.subr.bf16.mxu0 %v2282_v15  ;;  %v2337_v8 = vld [vmem:[%s2448_s30 + $0x398] sm:$0xff]   ;;  %v2344_v15 = vld [vmem:[%s2448_s30 + $0x308] sm:$0xff]  }
  0x58   : > { %2119 = vmatprep.subr.bf16.mxu1 %v2283_v16  ;;  %v2345_v16 = vld [vmem:[%s2448_s30 + $0x388] sm:$0xff]  }
  0x59   : > { %1499 = vmatmul.mubr.bf16.vlgmr.msra.gmra.mxu0 %v1863_v10  ;;  %v2339_v10 = vld [vmem:[%s2448_s30 + $0x3d0] sm:$0xff]  }
  0x5a   : > { %1539 = vmatmul.mubr.bf16.vlgmr.msra.gmra.mxu1 %v1865_v13  ;;  %2098 = vmatpush3.bf16.msra.mxu0 %v2284_v17  ;;  %v2342_v13 = vld [vmem:[%s2448_s30 + $0x348] sm:$0xff]   ;;  %v2346_v17 = vld [vmem:[%s2448_s30 + $0x340] sm:$0xff]  }
  0x5b   : > { %2120 = vmatpush3.bf16.msra.mxu1 %v2285_v18  ;;  %2099 = vmatprep.subr.bf16.mxu0 %v2286_v19  ;;  %v2347_v18 = vld [vmem:[%s2448_s30 + $0x3c0] sm:$0xff]  }
  0x5c   : > { %2121 = vmatprep.subr.bf16.mxu1 %v2287_v20  ;;  %1578 = vmatprep.mubr.bf16.mxu0 %v1868_v50  ;;  %v2348_v19 = vld [vmem:[%s2448_s30 + $0x300] sm:$0xff]  }
  0x5d   : > { %1618 = vmatprep.mubr.bf16.mxu1 %v1870_v52  ;;  %v2349_v20 = vld [vmem:[%s2448_s30 + $0x380] sm:$0xff]  }
  0x5e   : > { %2100 = vmatpush3.bf16.msra.mxu0 %v2288_v21  ;;  %v304_v21 = vld [vmem:[%s2443_s26 + $0x30] sm:$0xff] }
  0x5f   : > { %2122 = vmatpush3.bf16.msra.mxu1 %v2289_v22  ;;  %2101 = vmatprep.subr.bf16.mxu0 %v2290_v23  ;;  %v305_v22 = vld [vmem:[%s2443_s26 + $0x38] sm:$0xff]  ;;  %v1871_v23 = vcombine.low %v304_v21, %v304_v21 }
  0x60   : > { %2123 = vmatprep.subr.bf16.mxu1 %v2291_v24  ;;  %v1872_v24 = vcombine.high %v304_v21, %v304_v21 }
  0x62   : > { %2102 = vmatpush3.bf16.msra.mxu0 %v2292_v25  ;;  %v1873_v25 = vcombine.low %v305_v22, %v305_v22 }
  0x63   : > { %2124 = vmatpush3.bf16.msra.mxu1 %v2293_v26  ;;  %2103 = vmatprep.subr.bf16.mxu0 %v2294_v27  ;;  %v1874_v26 = vcombine.high %v305_v22, %v305_v22 }
  0x64   : > { %2125 = vmatprep.subr.bf16.mxu1 %v2295_v28 }
  0x66   : > { %2104 = vmatpush3.bf16.msra.mxu0 %v2296_v29 }
  0x67   : > { %2126 = vmatpush3.bf16.msra.mxu1 %v2297_v30  ;;  %2105 = vmatprep.subr.bf16.mxu0 %v2298_v31 }
  0x68   : > { %2127 = vmatprep.subr.bf16.mxu1 %v2299_v32 }
  0x6a   : > { %2106 = vmatpush3.bf16.msra.mxu0 %v2300_v33 }
  0x6b   : > { %2128 = vmatpush3.bf16.msra.mxu1 %v2301_v34  ;;  %2107 = vmatprep.subr.bf16.mxu0 %v2302_v35 }
  0x6c   : > { %2129 = vmatprep.subr.bf16.mxu1 %v2303_v36 }
  0x6e   : > { %2108 = vmatpush3.bf16.msra.mxu0 %v2304_v37 }
  0x6f   : > { %2130 = vmatpush3.bf16.msra.mxu1 %v2305_v38  ;;  %2109 = vmatprep.subr.bf16.mxu0 %v2306_v39 }
  0x70   : > { %2131 = vmatprep.subr.bf16.mxu1 %v2307_v40 }
  0x72   : > { %2110 = vmatpush3.bf16.msra.mxu0 %v2308_v41 }
  0x73   : > { %2132 = vmatpush3.bf16.msra.mxu1 %v2309_v42  ;;  %2111 = vmatprep.subr.bf16.mxu0 %v2310_v43 }
  0x74   : > { %2133 = vmatprep.subr.bf16.mxu1 %v2311_v44 }
  0x76   : > { %2112 = vmatpush3.bf16.msra.mxu0 %v2312_v45 }
  0x77   : > { %2134 = vmatpush3.bf16.msra.mxu1 %v2313_v46  ;;  %2141 = vmatprep.subr.bf16.mxu0 %v2318_v53 }
  0x78   : > { %2163 = vmatprep.subr.bf16.mxu1 %v2319_v54 }
  0x79   : > { %1579 = vmatmul.mubr.bf16.vlgmr.msra.gmra.mxu0 %v1867_v49 }
  0x7a   : > { %1619 = vmatmul.mubr.bf16.vlgmr.msra.gmra.mxu1 %v1869_v51  ;;  %2142 = vmatpush3.bf16.msra.mxu0 %v2320_v55 }
  0x7b   : > { %2164 = vmatpush3.bf16.msra.mxu1 %v2321_v56  ;;  %2143 = vmatprep.subr.bf16.mxu0 %v2322_v57 }
  0x7c   : > { %2165 = vmatprep.subr.bf16.mxu1 %v2323_v58  ;;  %1658 = vmatprep.mubr.bf16.mxu0 %v1872_v24 }
  0x7d   : > { %1698 = vmatprep.mubr.bf16.mxu1 %v1874_v26 }
  0x7e   : > { %2144 = vmatpush3.bf16.msra.mxu0 %v2324_v59 }
  0x7f   : > { %2166 = vmatpush3.bf16.msra.mxu1 %v2325_v60  ;;  %2145 = vmatprep.subr.bf16.mxu0 %v2326_v61 }
  0x80   : > { %2167 = vmatprep.subr.bf16.mxu1 %v2327_v62 }
  0x82   : > { %2146 = vmatpush3.bf16.msra.mxu0 %v2328_v63 }
  0x83   : > { %2168 = vmatpush3.bf16.msra.mxu1 %v2329_v0  ;;  %2147 = vmatprep.subr.bf16.mxu0 %v2330_v1 }
  0x84   : > { %2169 = vmatprep.subr.bf16.mxu1 %v2331_v2 }
  0x86   : > { %2148 = vmatpush3.bf16.msra.mxu0 %v2332_v3 }
  0x87   : > { %2170 = vmatpush3.bf16.msra.mxu1 %v2333_v4  ;;  %2149 = vmatprep.subr.bf16.mxu0 %v2334_v5 }
  0x88   : > { %2171 = vmatprep.subr.bf16.mxu1 %v2335_v6 }
  0x8a   : > { %2150 = vmatpush3.bf16.msra.mxu0 %v2336_v7  ;;  %v297_v7 = vld [vmem:[#allocation2] sm:$0xff] }
  0x8b   : > { %2172 = vmatpush3.bf16.msra.mxu1 %v2337_v8  ;;  %2151 = vmatprep.subr.bf16.mxu0 %v2338_v9 }
  0x8c   : > { %2173 = vmatprep.subr.bf16.mxu1 %v2339_v10 }
  0x8e   : > { %2152 = vmatpush3.bf16.msra.mxu0 %v2340_v11 }
  0x8f   : > { %2174 = vmatpush3.bf16.msra.mxu1 %v2341_v12  ;;  %2153 = vmatprep.subr.bf16.mxu0 %v2342_v13 }
  0x90   : > { %2175 = vmatprep.subr.bf16.mxu1 %v2343_v14 }
  0x92   : > { %2154 = vmatpush3.bf16.msra.mxu0 %v2344_v15 }
  0x93   : > { %2176 = vmatpush3.bf16.msra.mxu1 %v2345_v16  ;;  %2155 = vmatprep.subr.bf16.mxu0 %v2346_v17 }
  0x94   : > { %2177 = vmatprep.subr.bf16.mxu1 %v2347_v18 }
  0x96   : > { %2156 = vmatpush3.bf16.msra.mxu0 %v2348_v19 }
  0x97   : > { %2178 = vmatpush3.bf16.msra.mxu1 %v2349_v20 }
  0x99   : > { %1659 = vmatmul.mubr.bf16.vlgmr.msra.gmra.mxu0 %v1871_v23 }
  0x9a   : > { %1699 = vmatmul.mubr.bf16.vlgmr.msra.gmra.mxu1 %v1873_v25 }
  0xf9   : > { %v2025_v27 = vpop.f32.mrf.mxu0 }
  0xfa   : > { %v2047_v28 = vpop.f32.mrf.mxu1 }
  0xfb   : > { %v2026_v29 = vpop.f32.mrf.mxu0 }
  0xfc   : > { %v2048_v30 = vpop.f32.mrf.mxu1  ;;  %v2027_v31 = vadd.f32 %v2026_v29, %v2025_v27 }
  0xfd   : > { %v2049_v32 = vadd.f32 %v2048_v30, %v2047_v28  ;;  %v2028_v33 = vpop.f32.mrf.mxu0 }
  0xfe   : > { %v2050_v34 = vpop.f32.mrf.mxu1 }
  0xff   : > { %v1461_v35 = vadd.f32 %v2049_v32, %v2027_v31  ;;  %v2029_v36 = vpop.f32.mrf.mxu0 }
 0x100   : > { %v2051_v37 = vpop.f32.mrf.mxu1 }
 0x119   : > { %v2069_v38 = vpop.f32.mrf.mxu0 }
 0x11a   : > { %v2091_v39 = vpop.f32.mrf.mxu1 }
 0x11b   : > { %v2070_v40 = vpop.f32.mrf.mxu0 }
 0x11c   : > { %v2092_v41 = vpop.f32.mrf.mxu1  ;;  %v2071_v54 = vadd.f32 %v2070_v40, %v2069_v38 }
 0x11d   : > { %v2072_v42 = vpop.f32.mrf.mxu0  ;;  %v2093_v56 = vadd.f32 %v2092_v41, %v2091_v39 }
 0x11e   : > { %v2094_v43 = vpop.f32.mrf.mxu1  ;;  %v1501_v55 = vadd.f32 %v2071_v54, %v1461_v35 }
 0x11f   : > { %v2073_v44 = vpop.f32.mrf.mxu0 }
 0x120   : > { %v2095_v45 = vpop.f32.mrf.mxu1  ;;  %v1541_v58 = vadd.f32 %v2093_v56, %v1501_v55 }
 0x139   : > { %v2113_v46 = vpop.f32.mrf.mxu0 }
 0x13a   : > { %v2135_v47 = vpop.f32.mrf.mxu1 }
 0x13b   : > { %v2114_v48 = vpop.f32.mrf.mxu0 }
 0x13c   : > { %v2136_v49 = vpop.f32.mrf.mxu1  ;;  %v2115_v57 = vadd.f32 %v2114_v48, %v2113_v46 }
 0x13d   : > { %v2116_v50 = vpop.f32.mrf.mxu0  ;;  %v2137_v60 = vadd.f32 %v2136_v49, %v2135_v47 }
 0x13e   : > { %v2138_v51 = vpop.f32.mrf.mxu1  ;;  %v1581_v59 = vadd.f32 %v2115_v57, %v1541_v58 }
 0x13f   : > { %v2117_v52 = vpop.f32.mrf.mxu0 }
 0x140   : > { %v2139_v53 = vpop.f32.mrf.mxu1  ;;  %v1621_v0 = vadd.f32 %v2137_v60, %v1581_v59 }
 0x159   : > { %v2157_v61 = vpop.f32.mrf.mxu0 }
 0x15a   : > { %v2179_v62 = vpop.f32.mrf.mxu1 }
 0x15b   : > { %v2158_v63 = vpop.f32.mrf.mxu0 }
 0x15c   : > { %v2159_v1 = vadd.f32 %v2158_v63, %v2157_v61  ;;  %v2180_v2 = vpop.f32.mrf.mxu1 }
 0x15d   : > { %v2160_v3 = vpop.f32.mrf.mxu0  ;;  %v2181_v5 = vadd.f32 %v2180_v2, %v2179_v62 }
 0x15e   : > { %v1661_v4 = vadd.f32 %v2159_v1, %v1621_v0  ;;  %v2182_v6 = vpop.f32.mrf.mxu1 }
 0x15f   : > { %v2161_v8 = vpop.f32.mrf.mxu0 }
 0x160   : > { %v1701_v9 = vadd.f32 %v2181_v5, %v1661_v4  ;;  %v2183_v10 = vpop.f32.mrf.mxu1  ;;  %1712 = sbr.rel (%p2003_p7) target bundleno = 404 (0x194), region = 44 }
 0x162   : > { %v1706_v11 = vadd.f32 %v1701_v9, %v297_v7 }
 0x164   : > { %1708 = vst.msk [vmem:[#allocation2] sm:$0xff] %vm1707_vm1, %v1706_v11 }
 0x165   : > { %v2004_v13 = vld [vmem:[#allocation4] ss:$0 sm:$0xff]  ;;  %v2005_v14 = vld [vmem:[#allocation3] ss:$0 sm:$0xff] }
 0x16b   : > { %v1713_v12 = vld [vmem:[#allocation2] sm:$0xff] }
 0x16c   : > { %v1721_v15 = vmul.f32 %v2004_v13, %v1713_v12 }
 0x16e   : > { %v1729_v16 = vadd.f32 %v2005_v14, %v1721_v15 }
 0x170   : > { %v1730_v17 = vsub.f32 0.0, %v1729_v16  ;;  %v1736_v18 = vmul.f32 1.442695, %v1729_v16  ;;  %vm1738_vm2 = vcmp.ge.f32.partialorder %v1729_v16, 0.0 }
 0x172   : > { %v1731_v19 = vmul.f32 1.442695, %v1730_v17  ;;  %2354 = vpow2.f32 %v1736_v18 }
 0x174   : > { %2356 = vpow2.f32 %v1731_v19 }
 0x17f   : > { %v2355_v20 = vpop.eup %2354 }
 0x180   : > { %v1739_v21 = vadd.f32 1.0, %v2355_v20 }
 0x181   : > { %v2357_v22 = vpop.eup %2356 }
 0x182   : > { %v1733_v23 = vadd.f32 1.0, %v2357_v22  ;;  %2358 = vrcp.f32 %v1739_v21 }
 0x184   : > { %2360 = vrcp.f32 %v1733_v23 }
 0x18f   : > { %v2359_v24 = vpop.eup %2358 }
 0x190   : > { %v1741_v25 = vmul.f32 %v2359_v24, %v2355_v20 }
 0x191   : > { %v2361_v26 = vpop.eup %2360 }
 0x192   : > { %v1742_v27 = vsel %vm1738_vm2, %v2361_v26, %v1741_v25 }
 0x193   : > { %1743 = vst.msk [vmem:[%s2605_s4] sm:$0xff] %vm1707_vm1, %v1742_v27 }
 0x194 PF: > { %s18_s21 = sadd.s32 1, %s2384_s21   ;;  %s2607_s19 = smov %s2380_s20 }
 0x195   : > { %p15_p8 = scmp.ge.s32.totalorder %s18_s21, 10   ;;  %s2608_s20 = smov %s2610_s2 }
 0x197   :  { %17 = sbr.rel (!%p15_p8) target bundleno = 3 (0x3), region = 80 }

</bundles_post_ra>
